<compile_context>
chip_gen: v6e
topology: v6e:2x2x1
jax: 0.10.0
libtpu: 0.0.40
codegen_flags: <defaults>
</compile_context>

<pallas_src>
import functools

import jax
import jax.numpy as jnp
from jax.experimental import pallas as pl
from jax.experimental.pallas import tpu as pltpu


# ---------------------------- fused Pallas kernel ----------------------------

def fused_block_kernel(mask_ref, x_ref, w1_ref, b1_ref, w2_ref, b2_ref,
                       cw1_ref, cb1_ref, cw2_ref, cb2_ref,
                       sw1_ref, sb1_ref, sw3_ref, sb3_ref,
                       o_ref, ypad_ref, *, H, W, dilation, pool_stride):
    """Whole MyBasicBlock forward for one image (grid over batch)."""
    f32 = jnp.float32
    Wp = W + 2                      # padded row pitch
    Lp = (H + 2) * Wp               # flattened padded image length
    S = (H - 1) * Wp + W            # contiguous span covering every interior pixel
    C = x_ref.shape[1]              # in channels
    P = w1_ref.shape[0]             # planes (out channels)
    cr = sw1_ref.shape[0]           # reduced channels
    ps, dil = pool_stride, dilation
    h, w = H // ps, W // ps

    mask = mask_ref[...]            # (1, S): 1.0 on real image columns, 0.0 on gutter
    maskb = mask > 0.5

    # Re-zero only the scratch halo ring (2 x 19 lanes); interior columns are fully
    # overwritten each step and gutter columns are masked before the store.
    zhalo = jnp.zeros((P, Wp + 1), jnp.bfloat16)
    ypad_ref[:, pl.ds(0, Wp + 1)] = zhalo
    ypad_ref[:, pl.ds(Lp - (Wp + 1), Wp + 1)] = zhalo

    # ---- conv1 + bn1 + relu : one K=9*C dot, lane-dense (P, S) f32 accumulator ----
    taps1 = jnp.concatenate(
        [x_ref[0, :, pl.ds(dy * Wp + dx, S)] for dy in range(3) for dx in range(3)],
        axis=0)                                                       # (9*C, S) bf16
    y1 = jnp.dot(w1_ref[...], taps1, preferred_element_type=f32) + b1_ref[...]
    y1 = jnp.maximum(y1, 0.0) * mask          # zeroed gutter == conv2's zero padding
    ypad_ref[:, pl.ds(Wp + 1, S)] = y1.astype(jnp.bfloat16)

    # ---- conv2 + bn2 ----
    taps2 = jnp.concatenate(
        [ypad_ref[:, pl.ds(dy * Wp + dx, S)] for dy in range(3) for dx in range(3)],
        axis=0)                                                       # (9*P, S) bf16
    y2 = jnp.dot(w2_ref[...], taps2, preferred_element_type=f32) + b2_ref[...]  # (P, S)

    # ---- channel attention: GAP/GMP over valid pixels + shared 2-layer MLP ----
    gap = jnp.sum(y2 * mask, axis=1, keepdims=True) * (1.0 / (H * W))  # (P, 1)
    gmp = jnp.max(jnp.where(maskb, y2, -1e30), axis=1, keepdims=True)  # (P, 1)
    feats = jnp.concatenate([gap, gmp], axis=1)                        # (P, 2)
    hid = jnp.maximum(
        jnp.dot(cw1_ref[...], feats, preferred_element_type=f32) + cb1_ref[...], 0.0)
    o2 = jnp.dot(cw2_ref[...], hid, preferred_element_type=f32) + cb2_ref[...]   # (P, 2)
    ca = o2[:, 0:1] + o2[:, 1:2]                                       # (P, 1)

    # ---- spatial attention stage 1: 2x2 max-pool + 1x1 conv + ReLU ----
    v = jnp.maximum(y2[:, :S - Wp], y2[:, Wp:])        # vertical pair max (P, S-Wp)
    R = jnp.concatenate([v[:, ps * i * Wp: ps * i * Wp + W] for i in range(h)],
                        axis=1)                                        # (P, h*W)
    pooled = jnp.max(R.reshape(P, h * w, ps), axis=2)                  # (P, h*w)
    s1 = jnp.maximum(
        jnp.dot(sw1_ref[...], pooled, preferred_element_type=f32) + sb1_ref[...], 0.0)

    # ---- spatial attention stage 2: dilated 3x3 conv as one merged K=9*cr dot ----
    wp2 = w + 2 * dil
    span2 = (h - 1) * wp2 + w
    zc = jnp.zeros((cr, dil), f32)
    zr = jnp.zeros((cr, dil * wp2), f32)
    srows = [jnp.concatenate([zc, s1[:, i * w:(i + 1) * w], zc], axis=1)
             for i in range(h)]
    spad = jnp.concatenate([zr] + srows + [zr], axis=1)                # (cr, (h+2d)*wp2)
    taps3 = jnp.concatenate(
        [spad[:, ty * dil * wp2 + tx * dil: ty * dil * wp2 + tx * dil + span2]
         for ty in range(3) for tx in range(3)], axis=0)               # (9*cr, span2)
    s2 = jnp.dot(sw3_ref[...], taps3, preferred_element_type=f32) + sb3_ref[...]

    # ---- PixelShuffle(ps) of s2 into the flat (1, S) row layout ----
    zgap = jnp.zeros((1, Wp - W), f32)
    sa_rows = []
    for y in range(H):
        i, a = y // ps, y % ps
        chunks = [s2[a * ps + b: a * ps + b + 1, i * wp2: i * wp2 + w]
                  for b in range(ps)]                                  # ps x (1, w)
        row = jnp.stack(chunks, axis=2).reshape(1, W)                  # interleave
        sa_rows.append(row)
        if y < H - 1:
            sa_rows.append(zgap)
    sa = jnp.concatenate(sa_rows, axis=1)                              # (1, S)

    # ---- out = relu(y2 * sigmoid(ca + sa) + identity) ----
    att = jax.nn.sigmoid(ca + sa)                                      # (P, S)
    idn = x_ref[0, :, pl.ds(Wp + 1, S)].astype(f32)                    # identity
    o_ref[0, :, pl.ds(Wp + 1, S)] = jnp.maximum(y2 * att + idn, 0.0)


# ---------------------------- wrapper ----------------------------

def my_basic_block_forward(x_nchw, params, *, dilation_value=2, pool_stride=2):
    N, C, H, W = x_nchw.shape
    P = params['conv1_w'].shape[0]
    assert C == P, "identity path assumes inplanes == planes (no downsample branch)"
    assert H % pool_stride == 0 and W % pool_stride == 0
    cr = params['ca_w1'].shape[0]
    Wp, Hp = W + 2, H + 2
    Lp = Hp * Wp
    S = (H - 1) * Wp + W

    # pad + flatten + cast once at the DMA boundary (halves input HBM traffic)
    xpad = jnp.pad(x_nchw, ((0, 0), (0, 0), (1, 1), (1, 1)))
    xflat = xpad.reshape(N, C, Lp).astype(jnp.bfloat16)

    # column-validity mask over the contiguous interior span
    col = jnp.arange(S, dtype=jnp.int32) % Wp
    mask = (col < W).astype(jnp.float32).reshape(1, S)

    kernel = functools.partial(fused_block_kernel, H=H, W=W,
                               dilation=dilation_value, pool_stride=pool_stride)
    bcast2 = lambda n: (0, 0)

    out_flat = pl.pallas_call(
        kernel,
        out_shape=jax.ShapeDtypeStruct((N, P, Lp), jnp.float32),
        grid=(N,),
        in_specs=[
            pl.BlockSpec((1, S), bcast2),                        # mask
            pl.BlockSpec((1, C, Lp), lambda n: (n, 0, 0)),       # x (padded, flat, bf16)
            pl.BlockSpec((P, 9 * C), bcast2),                    # conv1 w (BN folded)
            pl.BlockSpec((P, 1), bcast2),                        # conv1 b
            pl.BlockSpec((P, 9 * P), bcast2),                    # conv2 w
            pl.BlockSpec((P, 1), bcast2),                        # conv2 b
            pl.BlockSpec((cr, P), bcast2),                       # CA linear1 w
            pl.BlockSpec((cr, 1), bcast2),                       # CA linear1 b
            pl.BlockSpec((P, cr), bcast2),                       # CA linear2 w
            pl.BlockSpec((P, 1), bcast2),                        # CA linear2 b
            pl.BlockSpec((cr, P), bcast2),                       # SA 1x1 conv w
            pl.BlockSpec((cr, 1), bcast2),                       # SA 1x1 conv b
            pl.BlockSpec((pool_stride ** 2, 9 * cr), bcast2),    # SA dilated 3x3 w
            pl.BlockSpec((pool_stride ** 2, 1), bcast2),         # SA dilated 3x3 b
        ],
        out_specs=pl.BlockSpec((1, P, Lp), lambda n: (n, 0, 0)),
        scratch_shapes=[pltpu.VMEM((P, Lp), jnp.bfloat16)],      # padded conv1 output
        compiler_params=pltpu.CompilerParams(
            dimension_semantics=("parallel",),
            vmem_limit_bytes=32 * 1024 * 1024),
    )(mask, xflat,
      params['conv1_w'], params['conv1_b'], params['conv2_w'], params['conv2_b'],
      params['ca_w1'], params['ca_b1'], params['ca_w2'], params['ca_b2'],
      params['sa_w1x1'], params['sa_b1x1'], params['sa_w3x3'], params['sa_b3x3'])

    # drop the pad gutter (interior slice), back to NCHW
    return out_flat.reshape(N, P, Hp, Wp)[:, :, 1:H + 1, 1:W + 1]


# ---------------------------- parameter init ----------------------------

def init_params(key, inplanes, planes, reduction=16, pool_stride=2):
    """Random params in kernel layout.  Conv weights: [p, (ty*3+tx)*Cin + c]."""
    eps = 1e-5
    ks = jax.random.split(key, 18)

    def nrm(k, shape, scale=0.1):
        return scale * jax.random.normal(k, shape, jnp.float32)

    cr = max(planes // reduction, 1)

    # conv1 (3x3, bias=False) + BN1 folded (eval-mode); bf16 weights for the MXU
    w1 = nrm(ks[0], (planes, 3, 3, inplanes))
    g1 = 1.0 + nrm(ks[1], (planes,)); be1 = nrm(ks[2], (planes,))
    m1 = nrm(ks[3], (planes,));        v1 = 1.0 + jnp.abs(nrm(ks[4], (planes,)))
    s1 = g1 / jnp.sqrt(v1 + eps)
    conv1_w = (w1 * s1[:, None, None, None]).reshape(planes, 9 * inplanes).astype(jnp.bfloat16)
    conv1_b = (be1 - m1 * s1).reshape(planes, 1)

    # conv2 (3x3, bias=False) + BN2 folded
    w2 = nrm(ks[5], (planes, 3, 3, planes))
    g2 = 1.0 + nrm(ks[6], (planes,)); be2 = nrm(ks[7], (planes,))
    m2 = nrm(ks[8], (planes,));        v2 = 1.0 + jnp.abs(nrm(ks[9], (planes,)))
    s2 = g2 / jnp.sqrt(v2 + eps)
    conv2_w = (w2 * s2[:, None, None, None]).reshape(planes, 9 * planes).astype(jnp.bfloat16)
    conv2_b = (be2 - m2 * s2).reshape(planes, 1)

    return dict(
        conv1_w=conv1_w, conv1_b=conv1_b,
        conv2_w=conv2_w, conv2_b=conv2_b,
        # channel attention MLP (PyTorch Linear layout: (out, in))
        ca_w1=nrm(ks[10], (cr, planes)),  ca_b1=nrm(ks[11], (cr, 1)),
        ca_w2=nrm(ks[12], (planes, cr)),  ca_b2=nrm(ks[13], (planes, 1)),
        # spatial attention convs (bias=True); 3x3 laid out as [oc, (ty*3+tx)*cr + ic]
        sa_w1x1=nrm(ks[14], (cr, planes)),             sa_b1x1=nrm(ks[15], (cr, 1)),
        sa_w3x3=nrm(ks[16], (pool_stride ** 2, 9 * cr)),
        sa_b3x3=nrm(ks[17], (pool_stride ** 2, 1)),
    )


if __name__ == "__main__":
    key = jax.random.PRNGKey(0)
    kx, kp = jax.random.split(key)
    # inplanes == planes == 32 (reduction 16 -> reduced channels 2); stride=1, no downsample.
    N, C, H, W = 2, 32, 16, 16
    x_nchw = jax.random.normal(kx, (N, C, H, W), jnp.float32)   # PyTorch-style NCHW input
    params = init_params(kp, C, C)

    fwd = jax.jit(my_basic_block_forward)
    out = jax.block_until_ready(fwd(x_nchw, params))
    assert out.shape == (N, C, H, W)
    assert bool(jnp.all(jnp.isfinite(out)))
    print("KERNEL_OK")
</pallas_src>

<mosaic_0001>
module attributes {stable_mosaic.version = 11 : i64} {
  func.func @fused_block_kernel(%arg0: i32, %arg1: memref<1x286xf32, #tpu.memory_space<vmem>>, %arg2: memref<1x32x324xbf16, #tpu.memory_space<vmem>>, %arg3: memref<32x288xbf16, #tpu.memory_space<vmem>>, %arg4: memref<32x1xf32, #tpu.memory_space<vmem>>, %arg5: memref<32x288xbf16, #tpu.memory_space<vmem>>, %arg6: memref<32x1xf32, #tpu.memory_space<vmem>>, %arg7: memref<2x32xf32, #tpu.memory_space<vmem>>, %arg8: memref<2x1xf32, #tpu.memory_space<vmem>>, %arg9: memref<32x2xf32, #tpu.memory_space<vmem>>, %arg10: memref<32x1xf32, #tpu.memory_space<vmem>>, %arg11: memref<2x32xf32, #tpu.memory_space<vmem>>, %arg12: memref<2x1xf32, #tpu.memory_space<vmem>>, %arg13: memref<4x18xf32, #tpu.memory_space<vmem>>, %arg14: memref<4x1xf32, #tpu.memory_space<vmem>>, %arg15: memref<1x32x324xf32, #tpu.memory_space<vmem>>, %arg16: memref<32x324xbf16, #tpu.memory_space<vmem>>) attributes {dimension_semantics = [#tpu.dimension_semantics<parallel>], iteration_bounds = array<i64: 2>, scalar_prefetch = 0 : i64, scratch_operands = 1 : i64, tpu.core_type = #tpu.core_type<tc>, window_params = [{pipeline_mode = #tpu.pipeline_mode<synchronous>, transform_indices = @transform_0, window_bounds = array<i64: 1, 286>}, {transform_indices = @transform_1, window_bounds = array<i64: 1, 32, 324>}, {pipeline_mode = #tpu.pipeline_mode<synchronous>, transform_indices = @transform_2, window_bounds = array<i64: 32, 288>}, {pipeline_mode = #tpu.pipeline_mode<synchronous>, transform_indices = @transform_3, window_bounds = array<i64: 32, 1>}, {pipeline_mode = #tpu.pipeline_mode<synchronous>, transform_indices = @transform_4, window_bounds = array<i64: 32, 288>}, {pipeline_mode = #tpu.pipeline_mode<synchronous>, transform_indices = @transform_5, window_bounds = array<i64: 32, 1>}, {pipeline_mode = #tpu.pipeline_mode<synchronous>, transform_indices = @transform_6, window_bounds = array<i64: 2, 32>}, {pipeline_mode = #tpu.pipeline_mode<synchronous>, transform_indices = @transform_7, window_bounds = array<i64: 2, 1>}, {pipeline_mode = #tpu.pipeline_mode<synchronous>, transform_indices = @transform_8, window_bounds = array<i64: 32, 2>}, {pipeline_mode = #tpu.pipeline_mode<synchronous>, transform_indices = @transform_9, window_bounds = array<i64: 32, 1>}, {pipeline_mode = #tpu.pipeline_mode<synchronous>, transform_indices = @transform_10, window_bounds = array<i64: 2, 32>}, {pipeline_mode = #tpu.pipeline_mode<synchronous>, transform_indices = @transform_11, window_bounds = array<i64: 2, 1>}, {pipeline_mode = #tpu.pipeline_mode<synchronous>, transform_indices = @transform_12, window_bounds = array<i64: 4, 18>}, {pipeline_mode = #tpu.pipeline_mode<synchronous>, transform_indices = @transform_13, window_bounds = array<i64: 4, 1>}, {transform_indices = @transform_14, window_bounds = array<i64: 1, 32, 324>}]} {
    %c0 = arith.constant 0 : index
    %c0_0 = arith.constant 0 : index
    %0 = vector.load %arg1[%c0, %c0_0] : memref<1x286xf32, #tpu.memory_space<vmem>>, vector<1x286xf32>
    %cst = arith.constant 5.000000e-01 : f32
    %1 = vector.broadcast %cst : f32 to vector<1x286xf32>
    %2 = arith.cmpf ogt, %0, %1 : vector<1x286xf32>
    %cst_1 = arith.constant 0.000000e+00 : bf16
    %3 = vector.broadcast %cst_1 : bf16 to vector<32x19xbf16>
    %c0_2 = arith.constant 0 : index
    %c0_3 = arith.constant 0 : index
    %4 = vector.load %arg16[%c0_2, %c0_3] : memref<32x324xbf16, #tpu.memory_space<vmem>>, vector<32x19xbf16>
    tpu.vector_store %arg16[%c0_2, %c0_3], %3 {strides = array<i32>} : memref<32x324xbf16, #tpu.memory_space<vmem>>, vector<32x19xbf16>,
    %c0_4 = arith.constant 0 : index
    %c305 = arith.constant 305 : index
    %5 = vector.load %arg16[%c0_4, %c305] : memref<32x324xbf16, #tpu.memory_space<vmem>>, vector<32x19xbf16>
    tpu.vector_store %arg16[%c0_4, %c305], %3 {strides = array<i32>} : memref<32x324xbf16, #tpu.memory_space<vmem>>, vector<32x19xbf16>,
    %c0_5 = arith.constant 0 : index
    %c0_6 = arith.constant 0 : index
    %c0_7 = arith.constant 0 : index
    %6 = vector.load %arg2[%c0_5, %c0_6, %c0_7] : memref<1x32x324xbf16, #tpu.memory_space<vmem>>, vector<1x32x286xbf16>
    %7 = vector.shape_cast %6 : vector<1x32x286xbf16> to vector<32x286xbf16>
    %c0_8 = arith.constant 0 : index
    %c0_9 = arith.constant 0 : index
    %c1 = arith.constant 1 : index
    %8 = vector.load %arg2[%c0_8, %c0_9, %c1] : memref<1x32x324xbf16, #tpu.memory_space<vmem>>, vector<1x32x286xbf16>
    %9 = vector.shape_cast %8 : vector<1x32x286xbf16> to vector<32x286xbf16>
    %c0_10 = arith.constant 0 : index
    %c0_11 = arith.constant 0 : index
    %c2 = arith.constant 2 : index
    %10 = vector.load %arg2[%c0_10, %c0_11, %c2] : memref<1x32x324xbf16, #tpu.memory_space<vmem>>, vector<1x32x286xbf16>
    %11 = vector.shape_cast %10 : vector<1x32x286xbf16> to vector<32x286xbf16>
    %c0_12 = arith.constant 0 : index
    %c0_13 = arith.constant 0 : index
    %c18 = arith.constant 18 : index
    %12 = vector.load %arg2[%c0_12, %c0_13, %c18] : memref<1x32x324xbf16, #tpu.memory_space<vmem>>, vector<1x32x286xbf16>
    %13 = vector.shape_cast %12 : vector<1x32x286xbf16> to vector<32x286xbf16>
    %c0_14 = arith.constant 0 : index
    %c0_15 = arith.constant 0 : index
    %c19 = arith.constant 19 : index
    %14 = vector.load %arg2[%c0_14, %c0_15, %c19] : memref<1x32x324xbf16, #tpu.memory_space<vmem>>, vector<1x32x286xbf16>
    %15 = vector.shape_cast %14 : vector<1x32x286xbf16> to vector<32x286xbf16>
    %c0_16 = arith.constant 0 : index
    %c0_17 = arith.constant 0 : index
    %c20 = arith.constant 20 : index
    %16 = vector.load %arg2[%c0_16, %c0_17, %c20] : memref<1x32x324xbf16, #tpu.memory_space<vmem>>, vector<1x32x286xbf16>
    %17 = vector.shape_cast %16 : vector<1x32x286xbf16> to vector<32x286xbf16>
    %c0_18 = arith.constant 0 : index
    %c0_19 = arith.constant 0 : index
    %c36 = arith.constant 36 : index
    %18 = vector.load %arg2[%c0_18, %c0_19, %c36] : memref<1x32x324xbf16, #tpu.memory_space<vmem>>, vector<1x32x286xbf16>
    %19 = vector.shape_cast %18 : vector<1x32x286xbf16> to vector<32x286xbf16>
    %c0_20 = arith.constant 0 : index
    %c0_21 = arith.constant 0 : index
    %c37 = arith.constant 37 : index
    %20 = vector.load %arg2[%c0_20, %c0_21, %c37] : memref<1x32x324xbf16, #tpu.memory_space<vmem>>, vector<1x32x286xbf16>
    %21 = vector.shape_cast %20 : vector<1x32x286xbf16> to vector<32x286xbf16>
    %c0_22 = arith.constant 0 : index
    %c0_23 = arith.constant 0 : index
    %c38 = arith.constant 38 : index
    %22 = vector.load %arg2[%c0_22, %c0_23, %c38] : memref<1x32x324xbf16, #tpu.memory_space<vmem>>, vector<1x32x286xbf16>
    %23 = vector.shape_cast %22 : vector<1x32x286xbf16> to vector<32x286xbf16>
    %24 = tpu.concatenate %7, %9, %11, %13, %15, %17, %19, %21, %23 in 0 : vector<32x286xbf16>, vector<32x286xbf16>, vector<32x286xbf16>, vector<32x286xbf16>, vector<32x286xbf16>, vector<32x286xbf16>, vector<32x286xbf16>, vector<32x286xbf16>, vector<32x286xbf16> -> vector<288x286xbf16>
    %c0_24 = arith.constant 0 : index
    %c0_25 = arith.constant 0 : index
    %25 = vector.load %arg3[%c0_24, %c0_25] : memref<32x288xbf16, #tpu.memory_space<vmem>>, vector<32x288xbf16>
    %cst_26 = arith.constant dense<0.000000e+00> : vector<32x286xf32>
    %26 = tpu.matmul %25, %24, %cst_26 {dimension_numbers = #tpu.dot_dimension_numbers<[1], [0], [0], [1], [0, 0, 1, 1], [], []>} : vector<32x288xbf16>, vector<288x286xbf16>, vector<32x286xf32> -> vector<32x286xf32>
    %c0_27 = arith.constant 0 : index
    %c0_28 = arith.constant 0 : index
    %27 = vector.load %arg4[%c0_27, %c0_28] : memref<32x1xf32, #tpu.memory_space<vmem>>, vector<32x1xf32>
    %28 = vector.broadcast %27 : vector<32x1xf32> to vector<32x286xf32>
    %29 = arith.addf %26, %28 : vector<32x286xf32>
    %cst_29 = arith.constant 0.000000e+00 : f32
    %30 = vector.broadcast %cst_29 : f32 to vector<32x286xf32>
    %31 = arith.maximumf %29, %30 : vector<32x286xf32>
    %32 = vector.broadcast %0 : vector<1x286xf32> to vector<32x286xf32>
    %33 = arith.mulf %31, %32 : vector<32x286xf32>
    %34 = arith.truncf %33 : vector<32x286xf32> to vector<32x286xbf16>
    %c0_30 = arith.constant 0 : index
    %c19_31 = arith.constant 19 : index
    %35 = vector.load %arg16[%c0_30, %c19_31] : memref<32x324xbf16, #tpu.memory_space<vmem>>, vector<32x286xbf16>
    tpu.vector_store %arg16[%c0_30, %c19_31], %34 {strides = array<i32>} : memref<32x324xbf16, #tpu.memory_space<vmem>>, vector<32x286xbf16>,
    %c0_32 = arith.constant 0 : index
    %c0_33 = arith.constant 0 : index
    %36 = vector.load %arg16[%c0_32, %c0_33] : memref<32x324xbf16, #tpu.memory_space<vmem>>, vector<32x286xbf16>
    %c0_34 = arith.constant 0 : index
    %c1_35 = arith.constant 1 : index
    %37 = vector.load %arg16[%c0_34, %c1_35] : memref<32x324xbf16, #tpu.memory_space<vmem>>, vector<32x286xbf16>
    %c0_36 = arith.constant 0 : index
    %c2_37 = arith.constant 2 : index
    %38 = vector.load %arg16[%c0_36, %c2_37] : memref<32x324xbf16, #tpu.memory_space<vmem>>, vector<32x286xbf16>
    %c0_38 = arith.constant 0 : index
    %c18_39 = arith.constant 18 : index
    %39 = vector.load %arg16[%c0_38, %c18_39] : memref<32x324xbf16, #tpu.memory_space<vmem>>, vector<32x286xbf16>
    %c0_40 = arith.constant 0 : index
    %c19_41 = arith.constant 19 : index
    %40 = vector.load %arg16[%c0_40, %c19_41] : memref<32x324xbf16, #tpu.memory_space<vmem>>, vector<32x286xbf16>
    %c0_42 = arith.constant 0 : index
    %c20_43 = arith.constant 20 : index
    %41 = vector.load %arg16[%c0_42, %c20_43] : memref<32x324xbf16, #tpu.memory_space<vmem>>, vector<32x286xbf16>
    %c0_44 = arith.constant 0 : index
    %c36_45 = arith.constant 36 : index
    %42 = vector.load %arg16[%c0_44, %c36_45] : memref<32x324xbf16, #tpu.memory_space<vmem>>, vector<32x286xbf16>
    %c0_46 = arith.constant 0 : index
    %c37_47 = arith.constant 37 : index
    %43 = vector.load %arg16[%c0_46, %c37_47] : memref<32x324xbf16, #tpu.memory_space<vmem>>, vector<32x286xbf16>
    %c0_48 = arith.constant 0 : index
    %c38_49 = arith.constant 38 : index
    %44 = vector.load %arg16[%c0_48, %c38_49] : memref<32x324xbf16, #tpu.memory_space<vmem>>, vector<32x286xbf16>
    %45 = tpu.concatenate %36, %37, %38, %39, %40, %41, %42, %43, %44 in 0 : vector<32x286xbf16>, vector<32x286xbf16>, vector<32x286xbf16>, vector<32x286xbf16>, vector<32x286xbf16>, vector<32x286xbf16>, vector<32x286xbf16>, vector<32x286xbf16>, vector<32x286xbf16> -> vector<288x286xbf16>
    %c0_50 = arith.constant 0 : index
    %c0_51 = arith.constant 0 : index
    %46 = vector.load %arg5[%c0_50, %c0_51] : memref<32x288xbf16, #tpu.memory_space<vmem>>, vector<32x288xbf16>
    %cst_52 = arith.constant dense<0.000000e+00> : vector<32x286xf32>
    %47 = tpu.matmul %46, %45, %cst_52 {dimension_numbers = #tpu.dot_dimension_numbers<[1], [0], [0], [1], [0, 0, 1, 1], [], []>} : vector<32x288xbf16>, vector<288x286xbf16>, vector<32x286xf32> -> vector<32x286xf32>
    %c0_53 = arith.constant 0 : index
    %c0_54 = arith.constant 0 : index
    %48 = vector.load %arg6[%c0_53, %c0_54] : memref<32x1xf32, #tpu.memory_space<vmem>>, vector<32x1xf32>
    %49 = vector.broadcast %48 : vector<32x1xf32> to vector<32x286xf32>
    %50 = arith.addf %47, %49 : vector<32x286xf32>
    %51 = vector.broadcast %0 : vector<1x286xf32> to vector<32x286xf32>
    %52 = arith.mulf %50, %51 : vector<32x286xf32>
    %cst_55 = arith.constant dense<0.000000e+00> : vector<32xf32>
    %53 = vector.multi_reduction <add>, %52, %cst_55 [1] : vector<32x286xf32> to vector<32xf32>
    %54 = vector.shape_cast %53 : vector<32xf32> to vector<32x1xf32>
    %cst_56 = arith.constant 3.906250e-03 : f32
    %55 = vector.broadcast %cst_56 : f32 to vector<32x1xf32>
    %56 = arith.mulf %54, %55 : vector<32x1xf32>
    %cst_57 = arith.constant -1.000000e+30 : f32
    %57 = vector.shape_cast %2 : vector<1x286xi1> to vector<1x286xi1>
    %58 = vector.broadcast %57 : vector<1x286xi1> to vector<32x286xi1>
    %59 = vector.broadcast %cst_57 : f32 to vector<32x286xf32>
    %60 = arith.select %58, %50, %59 : vector<32x286xi1>, vector<32x286xf32>
    %cst_58 = arith.constant dense<0xFF800000> : vector<32xf32>
    %61 = vector.multi_reduction <maximumf>, %60, %cst_58 [1] : vector<32x286xf32> to vector<32xf32>
    %62 = vector.shape_cast %61 : vector<32xf32> to vector<32x1xf32>
    %63 = tpu.concatenate %56, %62 in 1 : vector<32x1xf32>, vector<32x1xf32> -> vector<32x2xf32>
    %c0_59 = arith.constant 0 : index
    %c0_60 = arith.constant 0 : index
    %64 = vector.load %arg7[%c0_59, %c0_60] : memref<2x32xf32, #tpu.memory_space<vmem>>, vector<2x32xf32>
    %cst_61 = arith.constant dense<0.000000e+00> : vector<2x2xf32>
    %65 = tpu.matmul %64, %63, %cst_61 {dimension_numbers = #tpu.dot_dimension_numbers<[1], [0], [0], [1], [0, 0, 1, 1], [], []>} : vector<2x32xf32>, vector<32x2xf32>, vector<2x2xf32> -> vector<2x2xf32>
    %c0_62 = arith.constant 0 : index
    %c0_63 = arith.constant 0 : index
    %66 = vector.load %arg8[%c0_62, %c0_63] : memref<2x1xf32, #tpu.memory_space<vmem>>, vector<2x1xf32>
    %67 = vector.broadcast %66 : vector<2x1xf32> to vector<2x2xf32>
    %68 = arith.addf %65, %67 : vector<2x2xf32>
    %cst_64 = arith.constant 0.000000e+00 : f32
    %69 = vector.broadcast %cst_64 : f32 to vector<2x2xf32>
    %70 = arith.maximumf %68, %69 : vector<2x2xf32>
    %c0_65 = arith.constant 0 : index
    %c0_66 = arith.constant 0 : index
    %71 = vector.load %arg9[%c0_65, %c0_66] : memref<32x2xf32, #tpu.memory_space<vmem>>, vector<32x2xf32>
    %cst_67 = arith.constant dense<0.000000e+00> : vector<32x2xf32>
    %72 = tpu.matmul %71, %70, %cst_67 {dimension_numbers = #tpu.dot_dimension_numbers<[1], [0], [0], [1], [0, 0, 1, 1], [], []>} : vector<32x2xf32>, vector<2x2xf32>, vector<32x2xf32> -> vector<32x2xf32>
    %c0_68 = arith.constant 0 : index
    %c0_69 = arith.constant 0 : index
    %73 = vector.load %arg10[%c0_68, %c0_69] : memref<32x1xf32, #tpu.memory_space<vmem>>, vector<32x1xf32>
    %74 = vector.broadcast %73 : vector<32x1xf32> to vector<32x2xf32>
    %75 = arith.addf %72, %74 : vector<32x2xf32>
    %76 = vector.extract_strided_slice %75 {offsets = [0, 0], sizes = [32, 1], strides = [1, 1]} : vector<32x2xf32> to vector<32x1xf32>
    %77 = vector.extract_strided_slice %75 {offsets = [0, 1], sizes = [32, 1], strides = [1, 1]} : vector<32x2xf32> to vector<32x1xf32>
    %78 = arith.addf %76, %77 : vector<32x1xf32>
    %79 = vector.extract_strided_slice %50 {offsets = [0, 0], sizes = [32, 268], strides = [1, 1]} : vector<32x286xf32> to vector<32x268xf32>
    %80 = vector.extract_strided_slice %50 {offsets = [0, 18], sizes = [32, 268], strides = [1, 1]} : vector<32x286xf32> to vector<32x268xf32>
    %81 = arith.maximumf %79, %80 : vector<32x268xf32>
    %82 = vector.extract_strided_slice %81 {offsets = [0, 0], sizes = [32, 16], strides = [1, 1]} : vector<32x268xf32> to vector<32x16xf32>
    %83 = vector.extract_strided_slice %81 {offsets = [0, 36], sizes = [32, 16], strides = [1, 1]} : vector<32x268xf32> to vector<32x16xf32>
    %84 = vector.extract_strided_slice %81 {offsets = [0, 72], sizes = [32, 16], strides = [1, 1]} : vector<32x268xf32> to vector<32x16xf32>
    %85 = vector.extract_strided_slice %81 {offsets = [0, 108], sizes = [32, 16], strides = [1, 1]} : vector<32x268xf32> to vector<32x16xf32>
    %86 = vector.extract_strided_slice %81 {offsets = [0, 144], sizes = [32, 16], strides = [1, 1]} : vector<32x268xf32> to vector<32x16xf32>
    %87 = vector.extract_strided_slice %81 {offsets = [0, 180], sizes = [32, 16], strides = [1, 1]} : vector<32x268xf32> to vector<32x16xf32>
    %88 = vector.extract_strided_slice %81 {offsets = [0, 216], sizes = [32, 16], strides = [1, 1]} : vector<32x268xf32> to vector<32x16xf32>
    %89 = vector.extract_strided_slice %81 {offsets = [0, 252], sizes = [32, 16], strides = [1, 1]} : vector<32x268xf32> to vector<32x16xf32>
    %90 = tpu.concatenate %82, %83, %84, %85, %86, %87, %88, %89 in 1 : vector<32x16xf32>, vector<32x16xf32>, vector<32x16xf32>, vector<32x16xf32>, vector<32x16xf32>, vector<32x16xf32>, vector<32x16xf32>, vector<32x16xf32> -> vector<32x128xf32>
    %91 = vector.shape_cast %90 : vector<32x128xf32> to vector<32x64x2xf32>
    %cst_70 = arith.constant dense<0xFF800000> : vector<32x64xf32>
    %92 = vector.multi_reduction <maximumf>, %91, %cst_70 [2] : vector<32x64x2xf32> to vector<32x64xf32>
    %c0_71 = arith.constant 0 : index
    %c0_72 = arith.constant 0 : index
    %93 = vector.load %arg11[%c0_71, %c0_72] : memref<2x32xf32, #tpu.memory_space<vmem>>, vector<2x32xf32>
    %cst_73 = arith.constant dense<0.000000e+00> : vector<2x64xf32>
    %94 = tpu.matmul %93, %92, %cst_73 {dimension_numbers = #tpu.dot_dimension_numbers<[1], [0], [0], [1], [0, 0, 1, 1], [], []>} : vector<2x32xf32>, vector<32x64xf32>, vector<2x64xf32> -> vector<2x64xf32>
    %c0_74 = arith.constant 0 : index
    %c0_75 = arith.constant 0 : index
    %95 = vector.load %arg12[%c0_74, %c0_75] : memref<2x1xf32, #tpu.memory_space<vmem>>, vector<2x1xf32>
    %96 = vector.broadcast %95 : vector<2x1xf32> to vector<2x64xf32>
    %97 = arith.addf %94, %96 : vector<2x64xf32>
    %cst_76 = arith.constant 0.000000e+00 : f32
    %98 = vector.broadcast %cst_76 : f32 to vector<2x64xf32>
    %99 = arith.maximumf %97, %98 : vector<2x64xf32>
    %cst_77 = arith.constant 0.000000e+00 : f32
    %100 = vector.broadcast %cst_77 : f32 to vector<2x2xf32>
    %cst_78 = arith.constant 0.000000e+00 : f32
    %101 = vector.broadcast %cst_78 : f32 to vector<2x24xf32>
    %102 = vector.extract_strided_slice %99 {offsets = [0, 0], sizes = [2, 8], strides = [1, 1]} : vector<2x64xf32> to vector<2x8xf32>
    %103 = tpu.concatenate %100, %102, %100 in 1 : vector<2x2xf32>, vector<2x8xf32>, vector<2x2xf32> -> vector<2x12xf32>
    %104 = vector.extract_strided_slice %99 {offsets = [0, 8], sizes = [2, 8], strides = [1, 1]} : vector<2x64xf32> to vector<2x8xf32>
    %105 = tpu.concatenate %100, %104, %100 in 1 : vector<2x2xf32>, vector<2x8xf32>, vector<2x2xf32> -> vector<2x12xf32>
    %106 = vector.extract_strided_slice %99 {offsets = [0, 16], sizes = [2, 8], strides = [1, 1]} : vector<2x64xf32> to vector<2x8xf32>
    %107 = tpu.concatenate %100, %106, %100 in 1 : vector<2x2xf32>, vector<2x8xf32>, vector<2x2xf32> -> vector<2x12xf32>
    %108 = vector.extract_strided_slice %99 {offsets = [0, 24], sizes = [2, 8], strides = [1, 1]} : vector<2x64xf32> to vector<2x8xf32>
    %109 = tpu.concatenate %100, %108, %100 in 1 : vector<2x2xf32>, vector<2x8xf32>, vector<2x2xf32> -> vector<2x12xf32>
    %110 = vector.extract_strided_slice %99 {offsets = [0, 32], sizes = [2, 8], strides = [1, 1]} : vector<2x64xf32> to vector<2x8xf32>
    %111 = tpu.concatenate %100, %110, %100 in 1 : vector<2x2xf32>, vector<2x8xf32>, vector<2x2xf32> -> vector<2x12xf32>
    %112 = vector.extract_strided_slice %99 {offsets = [0, 40], sizes = [2, 8], strides = [1, 1]} : vector<2x64xf32> to vector<2x8xf32>
    %113 = tpu.concatenate %100, %112, %100 in 1 : vector<2x2xf32>, vector<2x8xf32>, vector<2x2xf32> -> vector<2x12xf32>
    %114 = vector.extract_strided_slice %99 {offsets = [0, 48], sizes = [2, 8], strides = [1, 1]} : vector<2x64xf32> to vector<2x8xf32>
    %115 = tpu.concatenate %100, %114, %100 in 1 : vector<2x2xf32>, vector<2x8xf32>, vector<2x2xf32> -> vector<2x12xf32>
    %116 = vector.extract_strided_slice %99 {offsets = [0, 56], sizes = [2, 8], strides = [1, 1]} : vector<2x64xf32> to vector<2x8xf32>
    %117 = tpu.concatenate %100, %116, %100 in 1 : vector<2x2xf32>, vector<2x8xf32>, vector<2x2xf32> -> vector<2x12xf32>
    %118 = tpu.concatenate %101, %103, %105, %107, %109, %111, %113, %115, %117, %101 in 1 : vector<2x24xf32>, vector<2x12xf32>, vector<2x12xf32>, vector<2x12xf32>, vector<2x12xf32>, vector<2x12xf32>, vector<2x12xf32>, vector<2x12xf32>, vector<2x12xf32>, vector<2x24xf32> -> vector<2x144xf32>
    %119 = vector.extract_strided_slice %118 {offsets = [0, 0], sizes = [2, 92], strides = [1, 1]} : vector<2x144xf32> to vector<2x92xf32>
    %120 = vector.extract_strided_slice %118 {offsets = [0, 2], sizes = [2, 92], strides = [1, 1]} : vector<2x144xf32> to vector<2x92xf32>
    %121 = vector.extract_strided_slice %118 {offsets = [0, 4], sizes = [2, 92], strides = [1, 1]} : vector<2x144xf32> to vector<2x92xf32>
    %122 = vector.extract_strided_slice %118 {offsets = [0, 24], sizes = [2, 92], strides = [1, 1]} : vector<2x144xf32> to vector<2x92xf32>
    %123 = vector.extract_strided_slice %118 {offsets = [0, 26], sizes = [2, 92], strides = [1, 1]} : vector<2x144xf32> to vector<2x92xf32>
    %124 = vector.extract_strided_slice %118 {offsets = [0, 28], sizes = [2, 92], strides = [1, 1]} : vector<2x144xf32> to vector<2x92xf32>
    %125 = vector.extract_strided_slice %118 {offsets = [0, 48], sizes = [2, 92], strides = [1, 1]} : vector<2x144xf32> to vector<2x92xf32>
    %126 = vector.extract_strided_slice %118 {offsets = [0, 50], sizes = [2, 92], strides = [1, 1]} : vector<2x144xf32> to vector<2x92xf32>
    %127 = vector.extract_strided_slice %118 {offsets = [0, 52], sizes = [2, 92], strides = [1, 1]} : vector<2x144xf32> to vector<2x92xf32>
    %128 = tpu.concatenate %119, %120, %121, %122, %123, %124, %125, %126, %127 in 0 : vector<2x92xf32>, vector<2x92xf32>, vector<2x92xf32>, vector<2x92xf32>, vector<2x92xf32>, vector<2x92xf32>, vector<2x92xf32>, vector<2x92xf32>, vector<2x92xf32> -> vector<18x92xf32>
    %c0_79 = arith.constant 0 : index
    %c0_80 = arith.constant 0 : index
    %129 = vector.load %arg13[%c0_79, %c0_80] : memref<4x18xf32, #tpu.memory_space<vmem>>, vector<4x18xf32>
    %cst_81 = arith.constant dense<0.000000e+00> : vector<4x92xf32>
    %130 = tpu.matmul %129, %128, %cst_81 {dimension_numbers = #tpu.dot_dimension_numbers<[1], [0], [0], [1], [0, 0, 1, 1], [], []>} : vector<4x18xf32>, vector<18x92xf32>, vector<4x92xf32> -> vector<4x92xf32>
    %c0_82 = arith.constant 0 : index
    %c0_83 = arith.constant 0 : index
    %131 = vector.load %arg14[%c0_82, %c0_83] : memref<4x1xf32, #tpu.memory_space<vmem>>, vector<4x1xf32>
    %132 = vector.broadcast %131 : vector<4x1xf32> to vector<4x92xf32>
    %133 = arith.addf %130, %132 : vector<4x92xf32>
    %cst_84 = arith.constant 0.000000e+00 : f32
    %134 = vector.broadcast %cst_84 : f32 to vector<1x2xf32>
    %135 = vector.extract_strided_slice %133 {offsets = [0, 0], sizes = [1, 8], strides = [1, 1]} : vector<4x92xf32> to vector<1x8xf32>
    %136 = vector.extract_strided_slice %133 {offsets = [1, 0], sizes = [1, 8], strides = [1, 1]} : vector<4x92xf32> to vector<1x8xf32>
    %137 = vector.shape_cast %135 : vector<1x8xf32> to vector<1x8x1xf32>
    %138 = vector.shape_cast %136 : vector<1x8xf32> to vector<1x8x1xf32>
    %139 = tpu.concatenate %137, %138 in 2 : vector<1x8x1xf32>, vector<1x8x1xf32> -> vector<1x8x2xf32>
    %140 = vector.shape_cast %139 : vector<1x8x2xf32> to vector<1x16xf32>
    %141 = vector.extract_strided_slice %133 {offsets = [2, 0], sizes = [1, 8], strides = [1, 1]} : vector<4x92xf32> to vector<1x8xf32>
    %142 = vector.extract_strided_slice %133 {offsets = [3, 0], sizes = [1, 8], strides = [1, 1]} : vector<4x92xf32> to vector<1x8xf32>
    %143 = vector.shape_cast %141 : vector<1x8xf32> to vector<1x8x1xf32>
    %144 = vector.shape_cast %142 : vector<1x8xf32> to vector<1x8x1xf32>
    %145 = tpu.concatenate %143, %144 in 2 : vector<1x8x1xf32>, vector<1x8x1xf32> -> vector<1x8x2xf32>
    %146 = vector.shape_cast %145 : vector<1x8x2xf32> to vector<1x16xf32>
    %147 = vector.extract_strided_slice %133 {offsets = [0, 12], sizes = [1, 8], strides = [1, 1]} : vector<4x92xf32> to vector<1x8xf32>
    %148 = vector.extract_strided_slice %133 {offsets = [1, 12], sizes = [1, 8], strides = [1, 1]} : vector<4x92xf32> to vector<1x8xf32>
    %149 = vector.shape_cast %147 : vector<1x8xf32> to vector<1x8x1xf32>
    %150 = vector.shape_cast %148 : vector<1x8xf32> to vector<1x8x1xf32>
    %151 = tpu.concatenate %149, %150 in 2 : vector<1x8x1xf32>, vector<1x8x1xf32> -> vector<1x8x2xf32>
    %152 = vector.shape_cast %151 : vector<1x8x2xf32> to vector<1x16xf32>
    %153 = vector.extract_strided_slice %133 {offsets = [2, 12], sizes = [1, 8], strides = [1, 1]} : vector<4x92xf32> to vector<1x8xf32>
    %154 = vector.extract_strided_slice %133 {offsets = [3, 12], sizes = [1, 8], strides = [1, 1]} : vector<4x92xf32> to vector<1x8xf32>
    %155 = vector.shape_cast %153 : vector<1x8xf32> to vector<1x8x1xf32>
    %156 = vector.shape_cast %154 : vector<1x8xf32> to vector<1x8x1xf32>
    %157 = tpu.concatenate %155, %156 in 2 : vector<1x8x1xf32>, vector<1x8x1xf32> -> vector<1x8x2xf32>
    %158 = vector.shape_cast %157 : vector<1x8x2xf32> to vector<1x16xf32>
    %159 = vector.extract_strided_slice %133 {offsets = [0, 24], sizes = [1, 8], strides = [1, 1]} : vector<4x92xf32> to vector<1x8xf32>
    %160 = vector.extract_strided_slice %133 {offsets = [1, 24], sizes = [1, 8], strides = [1, 1]} : vector<4x92xf32> to vector<1x8xf32>
    %161 = vector.shape_cast %159 : vector<1x8xf32> to vector<1x8x1xf32>
    %162 = vector.shape_cast %160 : vector<1x8xf32> to vector<1x8x1xf32>
    %163 = tpu.concatenate %161, %162 in 2 : vector<1x8x1xf32>, vector<1x8x1xf32> -> vector<1x8x2xf32>
    %164 = vector.shape_cast %163 : vector<1x8x2xf32> to vector<1x16xf32>
    %165 = vector.extract_strided_slice %133 {offsets = [2, 24], sizes = [1, 8], strides = [1, 1]} : vector<4x92xf32> to vector<1x8xf32>
    %166 = vector.extract_strided_slice %133 {offsets = [3, 24], sizes = [1, 8], strides = [1, 1]} : vector<4x92xf32> to vector<1x8xf32>
    %167 = vector.shape_cast %165 : vector<1x8xf32> to vector<1x8x1xf32>
    %168 = vector.shape_cast %166 : vector<1x8xf32> to vector<1x8x1xf32>
    %169 = tpu.concatenate %167, %168 in 2 : vector<1x8x1xf32>, vector<1x8x1xf32> -> vector<1x8x2xf32>
    %170 = vector.shape_cast %169 : vector<1x8x2xf32> to vector<1x16xf32>
    %171 = vector.extract_strided_slice %133 {offsets = [0, 36], sizes = [1, 8], strides = [1, 1]} : vector<4x92xf32> to vector<1x8xf32>
    %172 = vector.extract_strided_slice %133 {offsets = [1, 36], sizes = [1, 8], strides = [1, 1]} : vector<4x92xf32> to vector<1x8xf32>
    %173 = vector.shape_cast %171 : vector<1x8xf32> to vector<1x8x1xf32>
    %174 = vector.shape_cast %172 : vector<1x8xf32> to vector<1x8x1xf32>
    %175 = tpu.concatenate %173, %174 in 2 : vector<1x8x1xf32>, vector<1x8x1xf32> -> vector<1x8x2xf32>
    %176 = vector.shape_cast %175 : vector<1x8x2xf32> to vector<1x16xf32>
    %177 = vector.extract_strided_slice %133 {offsets = [2, 36], sizes = [1, 8], strides = [1, 1]} : vector<4x92xf32> to vector<1x8xf32>
    %178 = vector.extract_strided_slice %133 {offsets = [3, 36], sizes = [1, 8], strides = [1, 1]} : vector<4x92xf32> to vector<1x8xf32>
    %179 = vector.shape_cast %177 : vector<1x8xf32> to vector<1x8x1xf32>
    %180 = vector.shape_cast %178 : vector<1x8xf32> to vector<1x8x1xf32>
    %181 = tpu.concatenate %179, %180 in 2 : vector<1x8x1xf32>, vector<1x8x1xf32> -> vector<1x8x2xf32>
    %182 = vector.shape_cast %181 : vector<1x8x2xf32> to vector<1x16xf32>
    %183 = vector.extract_strided_slice %133 {offsets = [0, 48], sizes = [1, 8], strides = [1, 1]} : vector<4x92xf32> to vector<1x8xf32>
    %184 = vector.extract_strided_slice %133 {offsets = [1, 48], sizes = [1, 8], strides = [1, 1]} : vector<4x92xf32> to vector<1x8xf32>
    %185 = vector.shape_cast %183 : vector<1x8xf32> to vector<1x8x1xf32>
    %186 = vector.shape_cast %184 : vector<1x8xf32> to vector<1x8x1xf32>
    %187 = tpu.concatenate %185, %186 in 2 : vector<1x8x1xf32>, vector<1x8x1xf32> -> vector<1x8x2xf32>
    %188 = vector.shape_cast %187 : vector<1x8x2xf32> to vector<1x16xf32>
    %189 = vector.extract_strided_slice %133 {offsets = [2, 48], sizes = [1, 8], strides = [1, 1]} : vector<4x92xf32> to vector<1x8xf32>
    %190 = vector.extract_strided_slice %133 {offsets = [3, 48], sizes = [1, 8], strides = [1, 1]} : vector<4x92xf32> to vector<1x8xf32>
    %191 = vector.shape_cast %189 : vector<1x8xf32> to vector<1x8x1xf32>
    %192 = vector.shape_cast %190 : vector<1x8xf32> to vector<1x8x1xf32>
    %193 = tpu.concatenate %191, %192 in 2 : vector<1x8x1xf32>, vector<1x8x1xf32> -> vector<1x8x2xf32>
    %194 = vector.shape_cast %193 : vector<1x8x2xf32> to vector<1x16xf32>
    %195 = vector.extract_strided_slice %133 {offsets = [0, 60], sizes = [1, 8], strides = [1, 1]} : vector<4x92xf32> to vector<1x8xf32>
    %196 = vector.extract_strided_slice %133 {offsets = [1, 60], sizes = [1, 8], strides = [1, 1]} : vector<4x92xf32> to vector<1x8xf32>
    %197 = vector.shape_cast %195 : vector<1x8xf32> to vector<1x8x1xf32>
    %198 = vector.shape_cast %196 : vector<1x8xf32> to vector<1x8x1xf32>
    %199 = tpu.concatenate %197, %198 in 2 : vector<1x8x1xf32>, vector<1x8x1xf32> -> vector<1x8x2xf32>
    %200 = vector.shape_cast %199 : vector<1x8x2xf32> to vector<1x16xf32>
    %201 = vector.extract_strided_slice %133 {offsets = [2, 60], sizes = [1, 8], strides = [1, 1]} : vector<4x92xf32> to vector<1x8xf32>
    %202 = vector.extract_strided_slice %133 {offsets = [3, 60], sizes = [1, 8], strides = [1, 1]} : vector<4x92xf32> to vector<1x8xf32>
    %203 = vector.shape_cast %201 : vector<1x8xf32> to vector<1x8x1xf32>
    %204 = vector.shape_cast %202 : vector<1x8xf32> to vector<1x8x1xf32>
    %205 = tpu.concatenate %203, %204 in 2 : vector<1x8x1xf32>, vector<1x8x1xf32> -> vector<1x8x2xf32>
    %206 = vector.shape_cast %205 : vector<1x8x2xf32> to vector<1x16xf32>
    %207 = vector.extract_strided_slice %133 {offsets = [0, 72], sizes = [1, 8], strides = [1, 1]} : vector<4x92xf32> to vector<1x8xf32>
    %208 = vector.extract_strided_slice %133 {offsets = [1, 72], sizes = [1, 8], strides = [1, 1]} : vector<4x92xf32> to vector<1x8xf32>
    %209 = vector.shape_cast %207 : vector<1x8xf32> to vector<1x8x1xf32>
    %210 = vector.shape_cast %208 : vector<1x8xf32> to vector<1x8x1xf32>
    %211 = tpu.concatenate %209, %210 in 2 : vector<1x8x1xf32>, vector<1x8x1xf32> -> vector<1x8x2xf32>
    %212 = vector.shape_cast %211 : vector<1x8x2xf32> to vector<1x16xf32>
    %213 = vector.extract_strided_slice %133 {offsets = [2, 72], sizes = [1, 8], strides = [1, 1]} : vector<4x92xf32> to vector<1x8xf32>
    %214 = vector.extract_strided_slice %133 {offsets = [3, 72], sizes = [1, 8], strides = [1, 1]} : vector<4x92xf32> to vector<1x8xf32>
    %215 = vector.shape_cast %213 : vector<1x8xf32> to vector<1x8x1xf32>
    %216 = vector.shape_cast %214 : vector<1x8xf32> to vector<1x8x1xf32>
    %217 = tpu.concatenate %215, %216 in 2 : vector<1x8x1xf32>, vector<1x8x1xf32> -> vector<1x8x2xf32>
    %218 = vector.shape_cast %217 : vector<1x8x2xf32> to vector<1x16xf32>
    %219 = vector.extract_strided_slice %133 {offsets = [0, 84], sizes = [1, 8], strides = [1, 1]} : vector<4x92xf32> to vector<1x8xf32>
    %220 = vector.extract_strided_slice %133 {offsets = [1, 84], sizes = [1, 8], strides = [1, 1]} : vector<4x92xf32> to vector<1x8xf32>
    %221 = vector.shape_cast %219 : vector<1x8xf32> to vector<1x8x1xf32>
    %222 = vector.shape_cast %220 : vector<1x8xf32> to vector<1x8x1xf32>
    %223 = tpu.concatenate %221, %222 in 2 : vector<1x8x1xf32>, vector<1x8x1xf32> -> vector<1x8x2xf32>
    %224 = vector.shape_cast %223 : vector<1x8x2xf32> to vector<1x16xf32>
    %225 = vector.extract_strided_slice %133 {offsets = [2, 84], sizes = [1, 8], strides = [1, 1]} : vector<4x92xf32> to vector<1x8xf32>
    %226 = vector.extract_strided_slice %133 {offsets = [3, 84], sizes = [1, 8], strides = [1, 1]} : vector<4x92xf32> to vector<1x8xf32>
    %227 = vector.shape_cast %225 : vector<1x8xf32> to vector<1x8x1xf32>
    %228 = vector.shape_cast %226 : vector<1x8xf32> to vector<1x8x1xf32>
    %229 = tpu.concatenate %227, %228 in 2 : vector<1x8x1xf32>, vector<1x8x1xf32> -> vector<1x8x2xf32>
    %230 = vector.shape_cast %229 : vector<1x8x2xf32> to vector<1x16xf32>
    %231 = tpu.concatenate %140, %134, %146, %134, %152, %134, %158, %134, %164, %134, %170, %134, %176, %134, %182, %134 in 1 : vector<1x16xf32>, vector<1x2xf32>, vector<1x16xf32>, vector<1x2xf32>, vector<1x16xf32>, vector<1x2xf32>, vector<1x16xf32>, vector<1x2xf32>, vector<1x16xf32>, vector<1x2xf32>, vector<1x16xf32>, vector<1x2xf32>, vector<1x16xf32>, vector<1x2xf32>, vector<1x16xf32>, vector<1x2xf32> -> vector<1x144xf32>
    %232 = tpu.concatenate %188, %134, %194, %134, %200, %134, %206, %134, %212, %134, %218, %134, %224, %134, %230 in 1 : vector<1x16xf32>, vector<1x2xf32>, vector<1x16xf32>, vector<1x2xf32>, vector<1x16xf32>, vector<1x2xf32>, vector<1x16xf32>, vector<1x2xf32>, vector<1x16xf32>, vector<1x2xf32>, vector<1x16xf32>, vector<1x2xf32>, vector<1x16xf32>, vector<1x2xf32>, vector<1x16xf32> -> vector<1x142xf32>
    %233 = tpu.concatenate %231, %232 in 1 : vector<1x144xf32>, vector<1x142xf32> -> vector<1x286xf32>
    %234 = vector.broadcast %78 : vector<32x1xf32> to vector<32x286xf32>
    %235 = vector.broadcast %233 : vector<1x286xf32> to vector<32x286xf32>
    %236 = arith.addf %234, %235 : vector<32x286xf32>
    %237 = arith.negf %236 : vector<32x286xf32>
    %238 = math.exp %237 : vector<32x286xf32>
    %cst_85 = arith.constant 1.000000e+00 : f32
    %239 = vector.broadcast %cst_85 : f32 to vector<32x286xf32>
    %240 = arith.addf %239, %238 : vector<32x286xf32>
    %241 = arith.divf %239, %240 : vector<32x286xf32>
    %c0_86 = arith.constant 0 : index
    %c0_87 = arith.constant 0 : index
    %c19_88 = arith.constant 19 : index
    %242 = vector.load %arg2[%c0_86, %c0_87, %c19_88] : memref<1x32x324xbf16, #tpu.memory_space<vmem>>, vector<1x32x286xbf16>
    %243 = vector.shape_cast %242 : vector<1x32x286xbf16> to vector<32x286xbf16>
    %244 = arith.extf %243 : vector<32x286xbf16> to vector<32x286xf32>
    %245 = arith.mulf %50, %241 : vector<32x286xf32>
    %246 = arith.addf %245, %244 : vector<32x286xf32>
    %cst_89 = arith.constant 0.000000e+00 : f32
    %247 = vector.broadcast %cst_89 : f32 to vector<32x286xf32>
    %248 = arith.maximumf %246, %247 : vector<32x286xf32>
    %c0_90 = arith.constant 0 : index
    %c0_91 = arith.constant 0 : index
    %c19_92 = arith.constant 19 : index
    %249 = vector.load %arg15[%c0_90, %c0_91, %c19_92] : memref<1x32x324xf32, #tpu.memory_space<vmem>>, vector<1x32x286xf32>
    %250 = vector.shape_cast %249 : vector<1x32x286xf32> to vector<32x286xf32>
    %251 = vector.shape_cast %248 : vector<32x286xf32> to vector<1x32x286xf32>
    tpu.vector_store %arg15[%c0_90, %c0_91, %c19_92], %251 {strides = array<i32>} : memref<1x32x324xf32, #tpu.memory_space<vmem>>, vector<1x32x286xf32>,
    return
  }
  func.func @transform_0(%arg0: i32) -> (i32, i32) {
    %c0_i32 = arith.constant 0 : i32
    %c0_i32_0 = arith.constant 0 : i32
    %c0_i32_1 = arith.constant 0 : i32
    return %c0_i32, %c0_i32_0 : i32, i32
  }
  func.func @transform_1(%arg0: i32) -> (i32, i32, i32) {
    %c0_i32 = arith.constant 0 : i32
    %c0_i32_0 = arith.constant 0 : i32
    %c0_i32_1 = arith.constant 0 : i32
    return %arg0, %c0_i32, %c0_i32_0 : i32, i32, i32
  }
  func.func @transform_2(%arg0: i32) -> (i32, i32) {
    %c0_i32 = arith.constant 0 : i32
    %c0_i32_0 = arith.constant 0 : i32
    %c0_i32_1 = arith.constant 0 : i32
    return %c0_i32, %c0_i32_0 : i32, i32
  }
  func.func @transform_3(%arg0: i32) -> (i32, i32) {
    %c0_i32 = arith.constant 0 : i32
    %c0_i32_0 = arith.constant 0 : i32
    %c0_i32_1 = arith.constant 0 : i32
    return %c0_i32, %c0_i32_0 : i32, i32
  }
  func.func @transform_4(%arg0: i32) -> (i32, i32) {
    %c0_i32 = arith.constant 0 : i32
    %c0_i32_0 = arith.constant 0 : i32
    %c0_i32_1 = arith.constant 0 : i32
    return %c0_i32, %c0_i32_0 : i32, i32
  }
  func.func @transform_5(%arg0: i32) -> (i32, i32) {
    %c0_i32 = arith.constant 0 : i32
    %c0_i32_0 = arith.constant 0 : i32
    %c0_i32_1 = arith.constant 0 : i32
    return %c0_i32, %c0_i32_0 : i32, i32
  }
  func.func @transform_6(%arg0: i32) -> (i32, i32) {
    %c0_i32 = arith.constant 0 : i32
    %c0_i32_0 = arith.constant 0 : i32
    %c0_i32_1 = arith.constant 0 : i32
    return %c0_i32, %c0_i32_0 : i32, i32
  }
  func.func @transform_7(%arg0: i32) -> (i32, i32) {
    %c0_i32 = arith.constant 0 : i32
    %c0_i32_0 = arith.constant 0 : i32
    %c0_i32_1 = arith.constant 0 : i32
    return %c0_i32, %c0_i32_0 : i32, i32
  }
  func.func @transform_8(%arg0: i32) -> (i32, i32) {
    %c0_i32 = arith.constant 0 : i32
    %c0_i32_0 = arith.constant 0 : i32
    %c0_i32_1 = arith.constant 0 : i32
    return %c0_i32, %c0_i32_0 : i32, i32
  }
  func.func @transform_9(%arg0: i32) -> (i32, i32) {
    %c0_i32 = arith.constant 0 : i32
    %c0_i32_0 = arith.constant 0 : i32
    %c0_i32_1 = arith.constant 0 : i32
    return %c0_i32, %c0_i32_0 : i32, i32
  }
  func.func @transform_10(%arg0: i32) -> (i32, i32) {
    %c0_i32 = arith.constant 0 : i32
    %c0_i32_0 = arith.constant 0 : i32
    %c0_i32_1 = arith.constant 0 : i32
    return %c0_i32, %c0_i32_0 : i32, i32
  }
  func.func @transform_11(%arg0: i32) -> (i32, i32) {
    %c0_i32 = arith.constant 0 : i32
    %c0_i32_0 = arith.constant 0 : i32
    %c0_i32_1 = arith.constant 0 : i32
    return %c0_i32, %c0_i32_0 : i32, i32
  }
  func.func @transform_12(%arg0: i32) -> (i32, i32) {
    %c0_i32 = arith.constant 0 : i32
    %c0_i32_0 = arith.constant 0 : i32
    %c0_i32_1 = arith.constant 0 : i32
    return %c0_i32, %c0_i32_0 : i32, i32
  }
  func.func @transform_13(%arg0: i32) -> (i32, i32) {
    %c0_i32 = arith.constant 0 : i32
    %c0_i32_0 = arith.constant 0 : i32
    %c0_i32_1 = arith.constant 0 : i32
    return %c0_i32, %c0_i32_0 : i32, i32
  }
  func.func @transform_14(%arg0: i32) -> (i32, i32, i32) {
    %c0_i32 = arith.constant 0 : i32
    %c0_i32_0 = arith.constant 0 : i32
    %c0_i32_1 = arith.constant 0 : i32
    return %arg0, %c0_i32, %c0_i32_0 : i32, i32, i32
  }
}

</mosaic_0001>

<bundles_post_ra>
// kernel: my_basic_block_forward.1
= control target key start
LH: loop header
LB: loop body
LE: loop exit
PB: predicated region body
PF: predicated region fallthrough
CT: control target
= control target key end

     0   :  { %s12383_s29 = smov 0   ;;  %s19628_s0 = inlined_call_operand.vmem [shape: f32[1,286], index: 0, kind: input, shape index: {}]   ;;  %s19629_s1 = inlined_call_operand.vmem [shape: bf16[2,32,324], index: 1, kind: input, shape index: {}]   ;;  %s19630_s2 = inlined_call_operand.vmem [shape: bf16[32,288], index: 2, kind: input, shape index: {}]   ;;  %s19631_s3 = inlined_call_operand.vmem [shape: f32[32,1], index: 3, kind: input, shape index: {}]   ;;  %s19632_s4 = inlined_call_operand.vmem [shape: bf16[32,288], index: 4, kind: input, shape index: {}]   ;;  %s19633_s5 = inlined_call_operand.vmem [shape: f32[32,1], index: 5, kind: input, shape index: {}]   ;;  %s19634_s6 = inlined_call_operand.vmem [shape: f32[2,32], index: 6, kind: input, shape index: {}]   ;;  %s19635_s7 = inlined_call_operand.vmem [shape: f32[2,1], index: 7, kind: input, shape index: {}]   ;;  %s19636_s8 = inlined_call_operand.vmem [shape: f32[32,2], index: 8, kind: input, shape index: {}]   ;;  %s19637_s9 = inlined_call_operand.vmem [shape: f32[32,1], index: 9, kind: input, shape index: {}]   ;;  %s19638_s10 = inlined_call_operand.vmem [shape: f32[2,32], index: 10, kind: input, shape index: {}]   ;;  %s19639_s11 = inlined_call_operand.vmem [shape: f32[2,1], index: 11, kind: input, shape index: {}]   ;;  %s19640_s12 = inlined_call_operand.vmem [shape: f32[4,18], index: 12, kind: input, shape index: {}]   ;;  %s19641_s13 = inlined_call_operand.vmem [shape: f32[4,1], index: 13, kind: input, shape index: {}]   ;;  %s19642_s14 = inlined_call_operand.vmem [shape: f32[2,32,324], index: 14, kind: output, shape index: {}]  }
   0x1   :  { %20217 = sst [smem:[#allocation270_spill]] %s19628_s0 }
   0x2   :  { %20218 = sst [smem:[#allocation271_spill]] %s19629_s1 }
   0x3   :  { %20219 = sst [smem:[#allocation272_spill]] %s19630_s2 }
   0x4   :  { %20220 = sst [smem:[#allocation273_spill]] %s19631_s3 }
   0x5   :  { %20221 = sst [smem:[#allocation274_spill]] %s19632_s4 }
   0x6   :  { %20222 = sst [smem:[#allocation275_spill]] %s19633_s5 }
   0x7   :  { %20223 = sst [smem:[#allocation276_spill]] %s19634_s6 }
   0x8   :  { %20224 = sst [smem:[#allocation277_spill]] %s19635_s7 }
   0x9   :  { %20225 = sst [smem:[#allocation278_spill]] %s19636_s8 }
   0xa   :  { %20226 = sst [smem:[#allocation279_spill]] %s19637_s9 }
   0xb   :  { %20227 = sst [smem:[#allocation280_spill]] %s19638_s10 }
   0xc   :  { %20228 = sst [smem:[#allocation281_spill]] %s19639_s11 }
   0xd   :  { %20229 = sst [smem:[#allocation282_spill]] %s19640_s12 }
   0xe   :  { %20230 = sst [smem:[#allocation283_spill]] %s19641_s13 }
   0xf   :  { %20231 = sst [smem:[#allocation284_spill]] %s19642_s14 }
  0x10 LB: > { %20232 = sst [smem:[#allocation3_spill]] %s12234_s29  ;;  %s11825_s30 = sadd.s32 4294967295, %s12234_s29   ;;  %s12234_s29 = sphi %s12383_s29, %s24_s29  }
  0x11   : > { %p11829_p0 = scmp.ge.s32.totalorder %s12234_s29, 1  ;;  %p412_p1 = scmp.lt.s32.totalorder %s12234_s29, 3 }
  0x13   : > { %p413_p2 = pnand %p11829_p0, %p412_p1 }
  0x15   : > { %416 = sbr.rel (%p413_p2) target bundleno = 4204 (0x106c), region = 76 }
  0x1a   : > { %p458_p3 = scmp.lt.s32.totalorder %s11825_s30, 1  ;;  %s20234_s1 = sld [smem:[#allocation271_spill]]  ;;  %v19654_v6 = vmov 0   ;;  %vm579_vm0 = vcmask 900096   ;;  %vm20172_vm1 = vcmask 1031168   ;;  %vm533_vm2 = vcmask 1039360  }
  0x1b   : > { %s19696_s19 = smov 110   ;;  %s19694_s20 = smov 126   ;;  %859 = vmatprep.mubr.bf16.mxu1 %v19654_v6  ;;  %12124 = vset.pattern.permute.xlu1 %v19654_v6  ;;  %vm20174_vm3 = vcmask 736256   ;;  %vm671_vm4 = vcmask 744448   ;;  %vm767_vm5 = vcmask 261120   ;;  %vm648_vm6 = vcmask 752640  }
  0x1c   : > { %s21343_s30 = smov (!%p458_p3, %s11825_s30), 1  ;;  %s19664_s21 = smov 127   ;;  %12123 = vset.pattern.permute.xlu0 %v19654_v6  ;;  %vm20187_vm7 = vcmask 883712   ;;  %vm20169_vm8 = vcmask 891904   ;;  %vm471_vm9 = vcmask 150528   ;;  %vm476_vm10 = vcmask 552328  }
  0x1d   : > { %20233 = sst [smem:[#allocation4_spill]] %s21343_s30  ;;  %s12041_s15 = smul.u32 48, %s21343_s30  ;;  %472 = vst.msk [vmem:[#allocation2] sm:$0xf] %vm471_vm9, %v19654_v6  ;;  %473 = vst.msk [vmem:[#allocation2 + $0xc] sm:$0xf] %vm471_vm9, %v19654_v6 }
  0x1e   : > { %s19643_s22 = smov 90   ;;  %s19645_s23 = smov 91   ;;  %474 = vst.msk [vmem:[#allocation2 + $0x18] sm:$0xf] %vm471_vm9, %v19654_v6  ;;  %475 = vst.msk [vmem:[#allocation2 + $0x24] sm:$0xf] %vm471_vm9, %v19654_v6 }
  0x1f   : > { %s19647_s24 = smov 92   ;;  %s19649_s25 = smov 108   ;;  %477 = vst.msk [vmem:[#allocation2 + $0x8] sm:$0xf] %vm476_vm10, %v19654_v6  ;;  %479 = vst.msk [vmem:[#allocation2 + $0x20] sm:$0xf] %vm476_vm10, %v19654_v6 }
  0x20   : > { %s12397_s18 = scalar_lea.vmem %s20234_s1, %s12041_s15  ;;  %s20236_s2 = sld [smem:[#allocation272_spill]]  ;;  %478 = vst.msk [vmem:[#allocation2 + $0x14] sm:$0xf] %vm476_vm10, %v19654_v6  ;;  %480 = vst.msk [vmem:[#allocation2 + $0x2c] sm:$0xf] %vm476_vm10, %v19654_v6  ;;  %vm1087_vm11 = vcmask 1043608  }
  0x21   : > { %20235 = sst [smem:[#allocation5_spill]] %s12397_s18  ;;  %v12400_v0 = vld [vmem:[%s12397_s18 + $0x1c] ss:$12 sps:$4 sm:$0xff]   ;;  %v12403_v1 = vld [vmem:[%s12397_s18 + $0x18] ss:$12 sps:$4 sm:$0xff]   ;;  %s19651_s28 = smov 109  }
  0x22   : > { %575 = vrot.lane.b32.xlu0 %v12400_v0, %s19696_s19  ;;  %v12408_v2 = vld [vmem:[%s12397_s18 + $0x20] ss:$12 sps:$4 sm:$0xff]   ;;  %573 = vrot.lane.b32.xlu1 %v12403_v1, %s19696_s19  ;;  %v12413_v3 = vld [vmem:[%s12397_s18 + $0x4] ss:$12 sps:$4 sm:$0xff]   ;;  %s20237_s3 = sld [smem:[#allocation273_spill]]  ;;  %vm1088_vm12 = vcmask 1047556  }
  0x23   : > { %v12418_v4 = vld [vmem:[%s12397_s18 + $0x8] ss:$12 sps:$4 sm:$0xff]   ;;  %v12423_v5 = vld [vmem:[%s12397_s18] ss:$12 sps:$4 sm:$0xff]   ;;  %s20238_s5 = sld [smem:[#allocation275_spill]]  ;;  %vm20168_vm13 = vcmask 154624   ;;  %vm12722_vm14 = vmor %vm1088_vm12, %vm1087_vm11 }
  0x24   : > { %s20242_s0 = sld [smem:[#allocation270_spill]]  ;;  %vm1091_vm15 = vcmask 396288   ;;  %s20249_s15 = smov 108   ;;  %vm1600_vm9 = vcmask 244736   ;;  %vm20177_vm11 = vcmask 130048   ;;  %vm20201_vm12 = vcmask 392192  }
  0x25   : > { %s20250_s16 = smov 92   ;;  %s20251_s17 = smov 91  }
  0x26   : > { %577 = vrot.lane.b32.xlu0 %v12408_v2, %s19696_s19  ;;  %569 = vrot.lane.b32.xlu1 %v12413_v3, %s19696_s19  ;;  %v12503_v7 = vld [vmem:[%s20236_s2 + $0x4] ss:$12 sps:$4 sm:$0xff]   ;;  %v12593_v56 = vld [vmem:[%s20236_s2 + $0x8] ss:$12 sps:$4 sm:$0xff]   ;;  %s20252_s26 = smov 90   ;;  %s20253_s4 = sld [smem:[#allocation274_spill]] }
  0x27   : > { %806 = vmatprep.mubr.bf16.mxu0 %v12503_v7  ;;  %v12604_v63 = vld [vmem:[%s20236_s2 + $0x20] ss:$12 sps:$4 sm:$0xff]   ;;  %s19668_s27 = smov 28   ;;  %s19726_s1 = smov 82  }
  0x28   : > { %v714_v8 = vld [vmem:[%s20237_s3 + $0x8] sm:$0xff]  ;;  %v713_v9 = vld [vmem:[%s20237_s3] sm:$0xff]  ;;  %v715_v10 = vld [vmem:[%s20237_s3 + $0x10] sm:$0xff]  ;;  %s19744_s29 = smov 64   ;;  %s20292_s14 = smov 78  }
  0x29   : > { %v716_v11 = vld [vmem:[%s20237_s3 + $0x18] sm:$0xff]  ;;  %v1323_v12 = vld [vmem:[%s20238_s5] sm:$0xff]  ;;  %v1324_v13 = vld [vmem:[%s20238_s5 + $0x8] sm:$0xff]  ;;  %s20284_s3 = smov 86   ;;  %s19747_s30 = smov 62  }
  0x2a   : > { %571 = vrot.lane.b32.xlu0 %v12418_v4, %s19696_s19  ;;  %567 = vrot.lane.b32.xlu1 %v12423_v5, %s19696_s19  ;;  %v1325_v14 = vld [vmem:[%s20238_s5 + $0x10] sm:$0xff]  ;;  %v1326_v15 = vld [vmem:[%s20238_s5 + $0x18] sm:$0xff]  ;;  %s19742_s5 = smov 66   ;;  %s20298_s18 = smov 72  }
  0x2b   : > { %s19765_s12 = smov 52   ;;  %s20308_s13 = smov 66  }
  0x2c   : > { %s20312_s10 = smov 64   ;;  %s20315_s11 = smov 62  }
  0x2d   : > { %s20317_s8 = smov 60   ;;  %s19779_s7 = smov 44  }
  0x2e   : > { %552 = vrot.lane.b32.xlu0 %v12400_v0, %s19694_s20  ;;  %554 = vrot.lane.b32.xlu1 %v12408_v2, %s19694_s20  ;;  %s20319_s9 = smov 58   ;;  %s19787_s6 = smov 42  }
  0x32   : > { %550 = vrot.lane.b32.xlu0 %v12403_v1, %s19694_s20  ;;  %546 = vrot.lane.b32.xlu1 %v12413_v3, %s19694_s20 }
  0x36   : > { %548 = vrot.lane.b32.xlu0 %v12418_v4, %s19694_s20  ;;  %544 = vrot.lane.b32.xlu1 %v12423_v5, %s19694_s20 }
  0x3a   : > { %529 = vrot.lane.b32.xlu0 %v12400_v0, %s19664_s21  ;;  %531 = vrot.lane.b32.xlu1 %v12408_v2, %s19664_s21 }
  0x3e   : > { %527 = vrot.lane.b32.xlu0 %v12403_v1, %s19664_s21  ;;  %523 = vrot.lane.b32.xlu1 %v12413_v3, %s19664_s21 }
  0x42   : > { %525 = vrot.lane.b32.xlu0 %v12418_v4, %s19664_s21  ;;  %521 = vrot.lane.b32.xlu1 %v12423_v5, %s19664_s21 }
  0x46   : > { %690 = vrot.lane.b32.xlu0 %v12400_v0, %s19643_s22  ;;  %692 = vrot.lane.b32.xlu1 %v12408_v2, %s19643_s22 }
  0x4a   : > { %688 = vrot.lane.b32.xlu0 %v12403_v1, %s19643_s22  ;;  %684 = vrot.lane.b32.xlu1 %v12413_v3, %s19643_s22 }
  0x4e   : > { %686 = vrot.lane.b32.xlu0 %v12418_v4, %s19643_s22  ;;  %682 = vrot.lane.b32.xlu1 %v12423_v5, %s19643_s22  ;;  %s19670_s22 = smov 48  }
  0x52   : > { %669 = vrot.lane.b32.xlu0 %v12408_v2, %s19645_s23  ;;  %667 = vrot.lane.b32.xlu1 %v12400_v0, %s19645_s23 }
  0x56   : > { %665 = vrot.lane.b32.xlu0 %v12403_v1, %s19645_s23  ;;  %663 = vrot.lane.b32.xlu1 %v12418_v4, %s19645_s23 }
  0x5a   : > { %661 = vrot.lane.b32.xlu0 %v12413_v3, %s19645_s23  ;;  %659 = vrot.lane.b32.xlu1 %v12423_v5, %s19645_s23  ;;  %s19676_s23 = smov 88  }
  0x5e   : > { %646 = vrot.lane.b32.xlu0 %v12408_v2, %s19647_s24  ;;  %644 = vrot.lane.b32.xlu1 %v12400_v0, %s19647_s24 }
  0x62   : > { %642 = vrot.lane.b32.xlu0 %v12403_v1, %s19647_s24  ;;  %640 = vrot.lane.b32.xlu1 %v12418_v4, %s19647_s24 }
  0x66   : > { %638 = vrot.lane.b32.xlu0 %v12413_v3, %s19647_s24  ;;  %636 = vrot.lane.b32.xlu1 %v12423_v5, %s19647_s24  ;;  %s19708_s24 = smov 116  }
  0x6a   : > { %623 = vrot.lane.b32.xlu0 %v12408_v2, %s19649_s25  ;;  %621 = vrot.lane.b32.xlu1 %v12400_v0, %s19649_s25 }
  0x6e   : > { %619 = vrot.lane.b32.xlu0 %v12403_v1, %s19649_s25  ;;  %617 = vrot.lane.b32.xlu1 %v12418_v4, %s19649_s25 }
  0x72   : > { %615 = vrot.lane.b32.xlu0 %v12413_v3, %s19649_s25  ;;  %613 = vrot.lane.b32.xlu1 %v12423_v5, %s19649_s25  ;;  %s19662_s25 = smov 19  }
  0x76   : > { %600 = vrot.lane.b32.xlu0 %v12408_v2, %s19651_s28  ;;  %598 = vrot.lane.b32.xlu1 %v12400_v0, %s19651_s28 }
  0x7a   : > { %596 = vrot.lane.b32.xlu0 %v12403_v1, %s19651_s28  ;;  %594 = vrot.lane.b32.xlu1 %v12418_v4, %s19651_s28 }
  0x7e   : > { %592 = vrot.lane.b32.xlu0 %v12413_v3, %s19651_s28  ;;  %590 = vrot.lane.b32.xlu1 %v12423_v5, %s19651_s28  ;;  %s20248_s28 = smov 109  }
  0x82   : > { %724 = vperm.xlu1 %12124, %v714_v8   ;;  %719 = vperm.xlu0 %12123, %v713_v9  }
  0x86   : > { %729 = vperm.xlu1 %12124, %v715_v10   ;;  %734 = vperm.xlu0 %12123, %v716_v11  }
  0x8a   : > { %1329 = vperm.xlu1 %12124, %v1323_v12   ;;  %1334 = vperm.xlu0 %12123, %v1324_v13  }
  0x8e   : > { %1339 = vperm.xlu1 %12124, %v1325_v14   ;;  %1344 = vperm.xlu0 %12123, %v1326_v15  }
  0x94   : > { %v576_v16 = vpop.permute.xlu0 %575  ;;  %v574_v17 = vpop.permute.xlu1 %573 }
  0x95   : > { %v582_v21 = vsel %vm579_vm0, %v574_v17, %v576_v16 }
  0x98   : > { %v12546_v18 = vpop.permute.xlu0 %577  ;;  %v570_v19 = vpop.permute.xlu1 %569 }
  0x99   : > { %v583_v20 = vsel %vm579_vm0, %v576_v16, %v12546_v18 }
  0x9a   : > { %774 = vmatprep.subr.bf16.mxu0 %v583_v20 }
  0x9b   : > { %775 = vmatpush1.bf16.msra.mxu0 %v582_v21 }
  0x9c   : > { %v12551_v22 = vpop.permute.xlu0 %571  ;;  %v568_v23 = vpop.permute.xlu1 %567 }
  0x9d   : > { %v581_v24 = vsel %vm579_vm0, %v570_v19, %v12551_v22  ;;  %v580_v25 = vsel %vm579_vm0, %v568_v23, %v570_v19 }
  0x9e   : > { %776 = vmatprep.subr.bf16.mxu0 %v581_v24 }
  0x9f   : > { %777 = vmatpush1.bf16.msra.mxu0 %v580_v25 }
  0xa0   : > { %v553_v26 = vpop.permute.xlu0 %552  ;;  %v12556_v27 = vpop.permute.xlu1 %554 }
  0xa1   : > { %v560_v28 = vsel %vm20172_vm1, %v553_v26, %v12556_v27 }
  0xa2   : > { %778 = vmatprep.subr.bf16.mxu0 %v560_v28 }
  0xa4   : > { %v551_v29 = vpop.permute.xlu0 %550  ;;  %v547_v30 = vpop.permute.xlu1 %546 }
  0xa5   : > { %v559_v31 = vsel %vm20172_vm1, %v551_v29, %v553_v26 }
  0xa6   : > { %779 = vmatpush1.bf16.msra.mxu0 %v559_v31 }
  0xa8   : > { %v12561_v32 = vpop.permute.xlu0 %548  ;;  %v545_v33 = vpop.permute.xlu1 %544 }
  0xa9   : > { %v558_v34 = vsel %vm20172_vm1, %v547_v30, %v12561_v32  ;;  %v557_v35 = vsel %vm20172_vm1, %v545_v33, %v547_v30  ;;  %v12165_v33 = vld [vmem:[%s20236_s2] ss:$12 sps:$4 sm:$0xff]  }
  0xaa   : > { %780 = vmatprep.subr.bf16.mxu0 %v558_v34 }
  0xab   : > { %781 = vmatpush1.bf16.msra.mxu0 %v557_v35 }
  0xac   : > { %v530_v36 = vpop.permute.xlu0 %529  ;;  %v12566_v37 = vpop.permute.xlu1 %531 }
  0xad   : > { %v537_v38 = vsel %vm533_vm2, %v530_v36, %v12566_v37 }
  0xae   : > { %782 = vmatprep.subr.bf16.mxu0 %v537_v38 }
  0xb0   : > { %v528_v39 = vpop.permute.xlu0 %527  ;;  %v524_v40 = vpop.permute.xlu1 %523 }
  0xb1   : > { %v536_v41 = vsel %vm533_vm2, %v528_v39, %v530_v36 }
  0xb2   : > { %783 = vmatpush1.bf16.msra.mxu0 %v536_v41 }
  0xb4   : > { %v12571_v42 = vpop.permute.xlu0 %525  ;;  %v522_v43 = vpop.permute.xlu1 %521 }
  0xb5   : > { %v535_v44 = vsel %vm533_vm2, %v524_v40, %v12571_v42  ;;  %v534_v45 = vsel %vm533_vm2, %v522_v43, %v524_v40 }
  0xb6   : > { %784 = vmatprep.subr.bf16.mxu0 %v535_v44 }
  0xb7   : > { %785 = vmatpush1.bf16.msra.mxu0 %v534_v45 }
  0xb8   : > { %v691_v46 = vpop.permute.xlu0 %690  ;;  %786 = vmatprep.subr.bf16.mxu0 %v12400_v0  ;;  %v12577_v47 = vpop.permute.xlu1 %692 }
  0xb9   : > { %v698_v48 = vsel %vm20174_vm3, %v691_v46, %v12577_v47 }
  0xba   : > { %839 = vmatprep.subr.bf16.mxu1 %v698_v48 }
  0xbb   : > { %787 = vmatpush1.bf16.msra.mxu0 %v12403_v1 }
  0xbc   : > { %v689_v49 = vpop.permute.xlu0 %688  ;;  %788 = vmatprep.subr.bf16.mxu0 %v12413_v3  ;;  %v685_v50 = vpop.permute.xlu1 %684 }
  0xbd   : > { %v697_v51 = vsel %vm20174_vm3, %v689_v49, %v691_v46  ;;  %v19653_v46 = vlaneseq }
  0xbe   : > { %840 = vmatpush1.bf16.msra.mxu1 %v697_v51 }
  0xbf   : > { %789 = vmatpush1.bf16.msra.mxu0 %v12423_v5 }
  0xc0   : > { %v12585_v52 = vpop.permute.xlu0 %686  ;;  %v683_v53 = vpop.permute.xlu1 %682 }
  0xc1   : > { %v696_v54 = vsel %vm20174_vm3, %v685_v50, %v12585_v52  ;;  %v695_v55 = vsel %vm20174_vm3, %v683_v53, %v685_v50  ;;  %v12657_v50 = vshrl.u32 %v19653_v46, 7 }
  0xc2   : > { %841 = vmatprep.subr.bf16.mxu1 %v696_v54 }
  0xc3   : > { %842 = vmatpush1.bf16.msra.mxu1 %v695_v55  ;;  %20239 = vst [vmem:[#allocation6_spill] sm:$0xff] %v12657_v50  ;;  %v12662_v55 = vsub.s32 1, %v12657_v50 }
  0xc4   : > { %v670_v57 = vpop.permute.xlu0 %669  ;;  %v668_v58 = vpop.permute.xlu1 %667 }
  0xc5   : > { %11903 = vmatprep.subr.bf16.mxu1 %v670_v57  ;;  %v675_v59 = vsel %vm671_vm4, %v668_v58, %v670_v57  ;;  %20240 = vst [vmem:[#allocation7_spill] sm:$0xff] %v12662_v55 }
  0xc6   : > { %11844 = vmatmul.mubr.msk.bf16.vlgmr.msra.gmra.mxu1 %vm767_vm5, %v12593_v56  ;;  %790 = vmatprep.subr.bf16.mxu0 %v675_v59  ;;  %v12670_v59 = vld [vmem:[%s20242_s0] sm:$0x7]  ;;  %s20281_s0 = smov 98  }
  0xc7   : > { %11904 = vmatpush3.bf16.msra.mxu1 %v12546_v18  ;;  %869 = vmatprep.mubr.bf16.mxu1 %v19654_v6 }
  0xc8   : > { %v666_v60 = vpop.permute.xlu0 %665  ;;  %v664_v61 = vpop.permute.xlu1 %663 }
  0xc9   : > { %v674_v62 = vsel %vm671_vm4, %v666_v60, %v668_v58  ;;  %11905 = vmatprep.subr.bf16.mxu1 %v664_v61 }
  0xca   : > { %791 = vmatpush2.bf16.msra.mxu0 %v674_v62 }
  0xcb   : > { %11906 = vmatpush3.bf16.msra.mxu1 %v12551_v22 }
  0xcc   : > { %v662_v0 = vpop.permute.xlu0 %661  ;;  %v660_v1 = vpop.permute.xlu1 %659 }
  0xcd   : > { %v673_v3 = vsel %vm671_vm4, %v662_v0, %v664_v61  ;;  %v672_v5 = vsel %vm671_vm4, %v660_v1, %v662_v0  ;;  %v12674_v1 = vrot.slane %v12670_v59, %v12662_v55 }
  0xce   : > { %792 = vmatprep.subr.bf16.mxu0 %v673_v3  ;;  %11845 = vmatmul.mubr.msk.bf16.gmra.mxu1 %vm767_vm5, %v12604_v63 }
  0xcf   : > { %793 = vmatpush2.bf16.msra.mxu0 %v672_v5  ;;  %912 = vmatprep.mubr.bf16.mxu1 %v12503_v7  ;;  %20243 = vst [vmem:[#allocation9_spill] sm:$0xff] %v12674_v1 }
  0xd0   : > { %v647_v8 = vpop.permute.xlu0 %646  ;;  %v645_v9 = vpop.permute.xlu1 %644 }
  0xd1   : > { %11907 = vmatprep.subr.bf16.mxu1 %v647_v8  ;;  %v652_v10 = vsel %vm648_vm6, %v645_v9, %v647_v8 }
  0xd2   : > { %11908 = vmatpush3.bf16.msra.mxu1 %v12556_v27  ;;  %794 = vmatprep.subr.bf16.mxu0 %v652_v10 }
  0xd4   : > { %v643_v11 = vpop.permute.xlu0 %642  ;;  %v641_v12 = vpop.permute.xlu1 %640 }
  0xd5   : > { %v651_v13 = vsel %vm648_vm6, %v643_v11, %v645_v9  ;;  %11909 = vmatprep.subr.bf16.mxu1 %v641_v12 }
  0xd6   : > { %795 = vmatpush2.bf16.msra.mxu0 %v651_v13  ;;  %11910 = vmatpush3.bf16.msra.mxu1 %v12561_v32 }
  0xd8   : > { %v639_v14 = vpop.permute.xlu0 %638  ;;  %v637_v15 = vpop.permute.xlu1 %636 }
  0xd9   : > { %v650_v7 = vsel %vm648_vm6, %v639_v14, %v641_v12  ;;  %v649_v16 = vsel %vm648_vm6, %v637_v15, %v639_v14 }
  0xda   : > { %796 = vmatprep.subr.bf16.mxu0 %v650_v7 }
  0xdb   : > { %797 = vmatpush2.bf16.msra.mxu0 %v649_v16 }
  0xdc   : > { %v624_v17 = vpop.permute.xlu0 %623  ;;  %v622_v18 = vpop.permute.xlu1 %621 }
  0xdd   : > { %11911 = vmatprep.subr.bf16.mxu1 %v624_v17  ;;  %v629_v19 = vsel %vm20187_vm7, %v622_v18, %v624_v17  ;;  %v12683_v17 = vsub.s32 2, %v12657_v50 }
  0xde   : > { %11912 = vmatpush3.bf16.msra.mxu1 %v12566_v37  ;;  %798 = vmatprep.subr.bf16.mxu0 %v629_v19 }
  0xdf   : > { %20245 = vst [vmem:[#allocation11_spill] sm:$0xff] %v12683_v17 }
  0xe0   : > { %v620_v20 = vpop.permute.xlu0 %619  ;;  %v618_v21 = vpop.permute.xlu1 %617 }
  0xe1   : > { %v628_v22 = vsel %vm20187_vm7, %v620_v20, %v622_v18  ;;  %11913 = vmatprep.subr.bf16.mxu1 %v618_v21 }
  0xe2   : > { %799 = vmatpush2.bf16.msra.mxu0 %v628_v22  ;;  %11914 = vmatpush3.bf16.msra.mxu1 %v12571_v42 }
  0xe4   : > { %v616_v23 = vpop.permute.xlu0 %615  ;;  %v614_v24 = vpop.permute.xlu1 %613 }
  0xe5   : > { %v627_v25 = vsel %vm20187_vm7, %v616_v23, %v618_v21  ;;  %v626_v26 = vsel %vm20187_vm7, %v614_v24, %v616_v23 }
  0xe6   : > { %800 = vmatprep.subr.bf16.mxu0 %v627_v25 }
  0xe7   : > { %801 = vmatpush2.bf16.msra.mxu0 %v626_v26 }
  0xe8   : > { %v601_v27 = vpop.permute.xlu0 %600  ;;  %v599_v28 = vpop.permute.xlu1 %598 }
  0xe9   : > { %11915 = vmatprep.subr.bf16.mxu1 %v601_v27  ;;  %v606_v29 = vsel %vm20169_vm8, %v599_v28, %v601_v27 }
  0xea   : > { %11916 = vmatpush3.bf16.msra.mxu1 %v12408_v2  ;;  %802 = vmatprep.subr.bf16.mxu0 %v606_v29  ;;  %v12168_v2 = vld [vmem:[%s20236_s2 + $0x1c] ss:$12 sps:$4 sm:$0xff]  }
  0xec   : > { %v597_v30 = vpop.permute.xlu0 %596  ;;  %v595_v31 = vpop.permute.xlu1 %594 }
  0xed   : > { %v605_v32 = vsel %vm20169_vm8, %v597_v30, %v599_v28  ;;  %11917 = vmatprep.subr.bf16.mxu1 %v595_v31 }
  0xee   : > { %803 = vmatpush2.bf16.msra.mxu0 %v605_v32  ;;  %11918 = vmatpush3.bf16.msra.mxu1 %v12418_v4  ;;  %v12170_v4 = vld [vmem:[%s20236_s2 + $0x18] ss:$12 sps:$4 sm:$0xff]   ;;  %s20282_s2 = smov 96  }
  0xef   : > { %11986 = vmatprep.subr.bf16.mxu1 %v12577_v47 }
  0xf0   : > { %v593_v34 = vpop.permute.xlu0 %592  ;;  %v591_v35 = vpop.permute.xlu1 %590 }
  0xf1   : > { %v604_v36 = vsel %vm20169_vm8, %v593_v34, %v595_v31  ;;  %913 = vmatmul.mubr.bf16.vlgmr.msra.gmra.mxu1 %v12165_v33  ;;  %v603_v37 = vsel %vm20169_vm8, %v591_v35, %v593_v34 }
  0xf2   : > { %804 = vmatprep.subr.bf16.mxu0 %v604_v36  ;;  %11987 = vmatpush3.bf16.msra.mxu1 %v12577_v47 }
  0xf3   : > { %805 = vmatpush2.bf16.msra.mxu0 %v603_v37  ;;  %11988 = vmatprep.subr.bf16.mxu1 %v12585_v52 }
  0xf4   : > { %920 = vmatprep.mubr.bf16.mxu1 %v12168_v2 }
  0xf6   : > { %807 = vmatmul.mubr.bf16.vlgmr.msra.gmra.mxu0 %v12165_v33  ;;  %11989 = vmatpush3.bf16.msra.mxu1 %v12585_v52  ;;  %v12689_v33 = vrot.slane %v12670_v59, %v12683_v17 }
  0xf7   : > { %816 = vmatprep.mubr.bf16.mxu0 %v12168_v2 }
  0xf9   : > { %921 = vmatmul.mubr.bf16.gmra.mxu1 %v12170_v4 }
  0xfa   : > { %11990 = vmatprep.mubr.msk.bf16.mxu1 %vm767_vm5, %v12593_v56  ;;  %v12665_v56 = vsub.s32 0, %v12657_v50 }
  0xfc   : > { %20241 = vst [vmem:[#allocation8_spill] sm:$0xff] %v12665_v56  ;;  %v12679_v8 = vrot.slane %v12670_v59, %v12665_v56 }
  0xfd   : > { %v720_v49 = vpop.permute.xlu0 %719  ;;  %v12659_v53 = vpop.permute.xlu1 %724 }
  0xfe   : > { %817 = vmatmul.mubr.bf16.gmra.mxu0 %v12170_v4  ;;  %20244 = vst [vmem:[#allocation10_spill] sm:$0xff] %v12679_v8 }
  0xff   : > { %1468 = vmatprep.mubr.bf16.mxu0 %v19654_v6 }
 0x101   : > { %11991 = vmatmul.mubr.msk.bf16.vlgmr.msra.gmra.mxu1 %vm767_vm5, %v12604_v63  ;;  %v730_v11 = vpop.permute.xlu1 %729  ;;  %v735_v26 = vpop.permute.xlu0 %734 }
 0x186   : > { %v861_v38 = vpop.f32.mrf.mxu1 }
 0x188   : > { %v863_v39 = vpop.f32.mrf.mxu1 }
 0x18a   : > { %v865_v40 = vpop.f32.mrf.mxu1 }
 0x18c   : > { %v867_v41 = vpop.f32.mrf.mxu1 }
 0x18e   : > { %v871_v42 = vpop.f32.mrf.mxu1 }
 0x190   : > { %v873_v43 = vpop.f32.mrf.mxu1 }
 0x192   : > { %v12652_v44 = vpop.f32.mrf.mxu1 }
 0x194   : > { %v12654_v45 = vpop.f32.mrf.mxu1 }
 0x1b1   : > { %v11919_v47 = vpop.f32.mrf.mxu1 }
 0x1b3   : > { %v11920_v48 = vpop.f32.mrf.mxu1 }
 0x1b4   : > { %v11921_v20 = vadd.f32 %v11920_v48, %v11919_v47 }
 0x1b5   : > { %v11922_v51 = vpop.f32.mrf.mxu1 }
 0x1b6   : > { %v808_v52 = vpop.f32.mrf.mxu0 }
 0x1b7   : > { %v809_v54 = vadd.f32 %v808_v52, %v720_v49  ;;  %v11923_v57 = vpop.f32.mrf.mxu1 }
 0x1b8   : > { %v810_v58 = vpop.f32.mrf.mxu0  ;;  %v11924_v35 = vadd.f32 %v11923_v57, %v11922_v51 }
 0x1b9   : > { %v862_v60 = vadd.f32 %v861_v38, %v809_v54  ;;  %v811_v61 = vadd.f32 %v810_v58, %v720_v49  ;;  %v11925_v62 = vpop.f32.mrf.mxu1 }
 0x1ba   : > { %v812_v63 = vpop.f32.mrf.mxu0 }
 0x1bb   : > { %v864_v0 = vadd.f32 %v863_v39, %v811_v61  ;;  %v813_v3 = vadd.f32 %v812_v63, %v12659_v53  ;;  %v978_v5 = vmax.f32 %v862_v60, 0.0  ;;  %v11926_v9 = vpop.f32.mrf.mxu1 }
 0x1bc   : > { %v814_v10 = vpop.f32.mrf.mxu0  ;;  %v11927_v14 = vadd.f32 %v11926_v9, %v11925_v62 }
 0x1bd   : > { %v979_v12 = vmax.f32 %v864_v0, 0.0  ;;  %v866_v13 = vadd.f32 %v865_v40, %v813_v3  ;;  %v815_v15 = vadd.f32 %v814_v10, %v12659_v53  ;;  %v11928_v7 = vpop.f32.mrf.mxu1  ;;  %v1006_v21 = vmul.f32 %v12679_v8, %v978_v5 }
 0x1be   : > { %v818_v16 = vpop.f32.mrf.mxu0  ;;  %v923_v30 = vadd.f32 %v11927_v14, %v730_v11 }
 0x1bf   : > { %v1007_v18 = vmul.f32 %v12674_v1, %v979_v12  ;;  %v819_v19 = vadd.f32 %v818_v16, %v730_v11  ;;  %v981_v22 = vmax.f32 %v866_v13, 0.0  ;;  %v868_v23 = vadd.f32 %v867_v41, %v815_v15  ;;  %v11929_v24 = vpop.f32.mrf.mxu1 }
 0x1c0   : > { %v820_v25 = vpop.f32.mrf.mxu0  ;;  %v11930_v28 = vadd.f32 %v11929_v24, %v11928_v7  ;;  %v915_v41 = vadd.f32 %v11921_v20, %v720_v49  ;;  %v918_v49 = vadd.f32 %v11924_v35, %v12659_v53 }
 0x1c1   : > { %v872_v27 = vadd.f32 %v871_v42, %v819_v19  ;;  %v821_v29 = vadd.f32 %v820_v25, %v730_v11  ;;  %v982_v31 = vmax.f32 %v868_v23, 0.0  ;;  %v11992_v32 = vpop.f32.mrf.mxu1  ;;  %v11895_v2 = vpack.c.bf16 %v1007_v18, %v1006_v21  ;;  %v12716_v23 = vpop.permute.xlu1 %1329 }
 0x1c2   : > { %v822_v34 = vpop.f32.mrf.mxu0  ;;  %v972_v37 = vadd.f32 %v11992_v32, %v923_v30  ;;  %v1009_v38 = vmul.f32 %v12679_v8, %v981_v22  ;;  %v926_v52 = vadd.f32 %v11930_v28, %v735_v26  ;;  %v12720_v25 = vpop.permute.xlu0 %1334 }
 0x1c3   : > { %v874_v36 = vadd.f32 %v873_v43, %v821_v29  ;;  %v823_v4 = vadd.f32 %v822_v34, %v735_v26  ;;  %v1010_v39 = vmul.f32 %v12674_v1, %v982_v31  ;;  %v984_v40 = vmax.f32 %v872_v27, 0.0  ;;  %v963_v42 = vpop.f32.mrf.mxu1  ;;  %1050 = vrot.lane.b32.xlu1 %v11895_v2, %s19662_s25 }
 0x1c4   : > { %v824_v43 = vpop.f32.mrf.mxu0  ;;  %v986_v48 = vmax.f32 %v972_v37, 0.0  ;;  %v964_v54 = vadd.f32 %v963_v42, %v915_v41 }
 0x1c5   : > { %v985_v47 = vmax.f32 %v874_v36, 0.0  ;;  %v876_v51 = vadd.f32 %v12652_v44, %v823_v4  ;;  %v825_v57 = vadd.f32 %v824_v43, %v735_v26  ;;  %v11993_v58 = vpop.f32.mrf.mxu1  ;;  %v11897_v60 = vpack.c.bf16 %v1010_v39, %v1009_v38  ;;  %v12718_v24 = vpop.permute.xlu1 %1339 }
 0x1c6   : > { %v1014_v62 = vmul.f32 %v12689_v33, %v986_v48  ;;  %v975_v63 = vadd.f32 %v11993_v58, %v926_v52  ;;  %v1012_v0 = vmul.f32 %v12679_v8, %v984_v40  ;;  %v980_v5 = vmax.f32 %v964_v54, 0.0  ;;  %v12726_v29 = vpop.permute.xlu0 %1344 }
 0x1c7   : > { %v1013_v61 = vmul.f32 %v12674_v1, %v985_v47  ;;  %v987_v3 = vmax.f32 %v876_v51, 0.0  ;;  %v878_v9 = vadd.f32 %v12654_v45, %v825_v57  ;;  %v966_v10 = vpop.f32.mrf.mxu1  ;;  %1054 = vrot.lane.b32.xlu1 %v11897_v60, %s19662_s25 }
 0x1c8   : > { %v11900_v44 = vpack.c.bf16 %v1014_v62, %v1014_v62  ;;  %v989_v11 = vmax.f32 %v975_v63, 0.0  ;;  %v967_v12 = vadd.f32 %v966_v10, %v918_v49  ;;  %v1008_v13 = vmul.f32 %v12689_v33, %v980_v5 }
 0x1c9   : > { %v988_v14 = vmax.f32 %v878_v9, 0.0  ;;  %v11899_v15 = vpack.c.bf16 %v1013_v61, %v1012_v0  ;;  %v1015_v53 = vmul.f32 %v12679_v8, %v987_v3 }
 0x1ca   : > { %1060 = vrot.lane.b32.xlu0 %v11900_v44, %s19662_s25  ;;  %v11896_v16 = vpack.c.bf16 %v1008_v13, %v1008_v13  ;;  %v1017_v45 = vmul.f32 %v12689_v33, %v989_v11  ;;  %v983_v18 = vmax.f32 %v967_v12, 0.0 }
 0x1cb   : > { %v1016_v7 = vmul.f32 %v12674_v1, %v988_v14  ;;  %1058 = vrot.lane.b32.xlu1 %v11899_v15, %s19662_s25  ;;  %v12867_v14 = vld [vmem:[%s20253_s4 + $0x4] ss:$12 sps:$4 sm:$0xff]  }
 0x1cc   : > { %v11902_v20 = vpack.c.bf16 %v1017_v45, %v1017_v45  ;;  %v1011_v21 = vmul.f32 %v12689_v33, %v983_v18  ;;  %1415 = vmatprep.mubr.bf16.mxu1 %v12867_v14 }
 0x1cd   : > { %v11901_v19 = vpack.c.bf16 %v1016_v7, %v1015_v53 }
 0x1ce   : > { %1052 = vrot.lane.b32.xlu0 %v11896_v16, %s19662_s25  ;;  %v11898_v22 = vpack.c.bf16 %v1011_v21, %v1011_v21 }
 0x1cf   : > { %1062 = vrot.lane.b32.xlu1 %v11901_v19, %s19662_s25 }
 0x1d2   : > { %1064 = vrot.lane.b32.xlu0 %v11902_v20, %s19662_s25 }
 0x1d6   : > { %1056 = vrot.lane.b32.xlu0 %v11898_v22, %s19662_s25  ;;  %s19666_s25 = smov 8  }
 0x235   : > { %v1051_v26 = vpop.permute.xlu1 %1050 }
 0x236   : > { %v1066_v28 = vrot.slane %v1051_v26, 4 }
 0x238   : > { %v1071_v30 = vsel %vm20168_vm13, %v1066_v28, %v1051_v26 }
 0x239   : > { %1090 = vst.msk [vmem:[#allocation2] sm:$0xff] %vm12722_vm14, %v1071_v30  ;;  %v1055_v31 = vpop.permute.xlu1 %1054 }
 0x23a   : > { %v1067_v32 = vrot.slane %v1055_v31, 4 }
 0x23c   : > { %v1073_v34 = vsel %vm20168_vm13, %v1067_v32, %v1055_v31  ;;  %v1061_v2 = vpop.permute.xlu0 %1060 }
 0x23d   : > { %1093 = vst.msk [vmem:[#allocation2 + $0xc] sm:$0xff] %vm12722_vm14, %v1073_v34  ;;  %v1059_v35 = vpop.permute.xlu1 %1058 }
 0x23e   : > { %v1068_v36 = vrot.slane %v1059_v35, 4 }
 0x240   : > { %v1075_v37 = vsel %vm20168_vm13, %v1068_v36, %v1059_v35  ;;  %v1076_v4 = vsel %vm20168_vm13, %v1068_v36, %v1061_v2  ;;  %v1053_v38 = vpop.permute.xlu0 %1052  ;;  %v1099_v42 = vld [vmem:[#allocation2] sm:$0xff] }
 0x241   : > { %1095 = vst.msk [vmem:[#allocation2 + $0x18] sm:$0xff] %vm12722_vm14, %v1075_v37  ;;  %v1072_v39 = vsel %vm20168_vm13, %v1066_v28, %v1053_v38  ;;  %v1063_v40 = vpop.permute.xlu1 %1062 }
 0x242   : > { %1096 = vst.msk [vmem:[#allocation2 + $0x20] sm:$0xf] %vm1091_vm15, %v1076_v4  ;;  %1092 = vst.msk [vmem:[#allocation2 + $0x8] sm:$0xf] %vm1091_vm15, %v1072_v39  ;;  %v1069_v41 = vrot.slane %v1063_v40, 4 }
 0x244   : > { %v1101_v43 = vld [vmem:[#allocation2 + $0xc] sm:$0xff]  ;;  %v1077_v47 = vsel %vm20168_vm13, %v1069_v41, %v1063_v40  ;;  %v1065_v48 = vpop.permute.xlu0 %1064 }
 0x245   : > { %v12742_v51 = vcombine.low %v1099_v42, %v1101_v43  ;;  %v12744_v52 = vcombine.high %v1099_v42, %v1101_v43  ;;  %1097 = vst.msk [vmem:[#allocation2 + $0x24] sm:$0xff] %vm12722_vm14, %v1077_v47  ;;  %v1078_v54 = vsel %vm20168_vm13, %v1069_v41, %v1065_v48  ;;  %vm2100_vm14 = vcmask 523264  }
 0x246   : > { %1098 = vst.msk [vmem:[#allocation2 + $0x2c] sm:$0xf] %vm1091_vm15, %v1078_v54 }
 0x247   : > { %1141 = vrot.lane.b32.xlu0 %v12744_v52, %s19664_s21  ;;  %1139 = vrot.lane.b32.xlu1 %v12742_v51, %s19664_s21 }
 0x248   : > { %v1057_v57 = vpop.permute.xlu0 %1056  ;;  %v1103_v49 = vld [vmem:[#allocation2 + $0x18] sm:$0xff] }
 0x249   : > { %v1074_v58 = vsel %vm20168_vm13, %v1067_v32, %v1057_v57  ;;  %v1100_v60 = vld [vmem:[#allocation2 + $0x8] sm:$0xf]  ;;  %vm8302_vm13 = vcmask 392512  }
 0x24a   : > { %1094 = vst.msk [vmem:[#allocation2 + $0x14] sm:$0xf] %vm1091_vm15, %v1074_v58  ;;  %vm20186_vm15 = vcmask 654336  }
 0x24b   : > { %1163 = vrot.lane.b32.xlu0 %v12744_v52, %s19694_s20 }
 0x24c   : > { %v1105_v63 = vld [vmem:[#allocation2 + $0x24] sm:$0xff] }
 0x24d   : > { %v12782_v0 = vcombine.low %v1103_v49, %v1105_v63  ;;  %v12788_v3 = vld [vmem:[#allocation2 + $0x20] ss:$12 sps:$4 sm:$0xff]   ;;  %v12826_v5 = vcombine.high %v1103_v49, %v1105_v63 }
 0x24f   : > { %1185 = vrot.lane.b32.xlu0 %v12744_v52, %s19696_s19 }
 0x251   : > { %v1102_v61 = vld [vmem:[#allocation2 + $0x14] sm:$0xf] }
 0x252   : > { %v12760_v62 = vcombine.low %v1100_v60, %v1102_v61 }
 0x253   : > { %1207 = vrot.lane.b32.xlu0 %v12744_v52, %s20248_s28 }
 0x254   : > { %1143 = vrot.lane.b32.xlu1 %v12760_v62, %s19664_s21 }
 0x257   : > { %1229 = vrot.lane.b32.xlu0 %v12744_v52, %s20249_s15 }
 0x258   : > { %1161 = vrot.lane.b32.xlu1 %v12742_v51, %s19694_s20 }
 0x25b   : > { %1251 = vrot.lane.b32.xlu0 %v12744_v52, %s20250_s16 }
 0x25c   : > { %1165 = vrot.lane.b32.xlu1 %v12760_v62, %s19694_s20 }
 0x25f   : > { %1273 = vrot.lane.b32.xlu0 %v12744_v52, %s20251_s17 }
 0x260   : > { %1183 = vrot.lane.b32.xlu1 %v12742_v51, %s19696_s19 }
 0x263   : > { %1295 = vrot.lane.b32.xlu0 %v12744_v52, %s20252_s26 }
 0x264   : > { %1187 = vrot.lane.b32.xlu1 %v12760_v62, %s19696_s19 }
 0x267   : > { %1145 = vrot.lane.b32.xlu0 %v12782_v0, %s19664_s21 }
 0x268   : > { %1205 = vrot.lane.b32.xlu1 %v12742_v51, %s20248_s28 }
 0x26b   : > { %1149 = vrot.lane.b32.xlu0 %v12788_v3, %s19664_s21 }
 0x26c   : > { %1209 = vrot.lane.b32.xlu1 %v12760_v62, %s20248_s28 }
 0x26f   : > { %1167 = vrot.lane.b32.xlu0 %v12782_v0, %s19694_s20 }
 0x270   : > { %1227 = vrot.lane.b32.xlu1 %v12742_v51, %s20249_s15 }
 0x273   : > { %1171 = vrot.lane.b32.xlu0 %v12788_v3, %s19694_s20 }
 0x274   : > { %1231 = vrot.lane.b32.xlu1 %v12760_v62, %s20249_s15 }
 0x277   : > { %1189 = vrot.lane.b32.xlu0 %v12782_v0, %s19696_s19 }
 0x278   : > { %1249 = vrot.lane.b32.xlu1 %v12742_v51, %s20250_s16 }
 0x27b   : > { %1193 = vrot.lane.b32.xlu0 %v12788_v3, %s19696_s19 }
 0x27c   : > { %1253 = vrot.lane.b32.xlu1 %v12760_v62, %s20250_s16 }
 0x27f   : > { %1211 = vrot.lane.b32.xlu0 %v12782_v0, %s20248_s28 }
 0x280   : > { %1271 = vrot.lane.b32.xlu1 %v12742_v51, %s20251_s17 }
 0x283   : > { %1215 = vrot.lane.b32.xlu0 %v12788_v3, %s20248_s28 }
 0x284   : > { %1275 = vrot.lane.b32.xlu1 %v12760_v62, %s20251_s17 }
 0x287   : > { %1233 = vrot.lane.b32.xlu0 %v12782_v0, %s20249_s15 }
 0x288   : > { %1293 = vrot.lane.b32.xlu1 %v12742_v51, %s20252_s26 }
 0x28b   : > { %1237 = vrot.lane.b32.xlu0 %v12788_v3, %s20249_s15 }
 0x28c   : > { %1297 = vrot.lane.b32.xlu1 %v12760_v62, %s20252_s26 }
 0x28f   : > { %1255 = vrot.lane.b32.xlu0 %v12782_v0, %s20250_s16 }
 0x290   : > { %1147 = vrot.lane.b32.xlu1 %v12826_v5, %s19664_s21  ;;  %s19674_s21 = smov 26  }
 0x293   : > { %1259 = vrot.lane.b32.xlu0 %v12788_v3, %s20250_s16 }
 0x294   : > { %1169 = vrot.lane.b32.xlu1 %v12826_v5, %s19694_s20 }
 0x297   : > { %1277 = vrot.lane.b32.xlu0 %v12782_v0, %s20251_s17 }
 0x298   : > { %1191 = vrot.lane.b32.xlu1 %v12826_v5, %s19696_s19 }
 0x29b   : > { %1281 = vrot.lane.b32.xlu0 %v12788_v3, %s20251_s17 }
 0x29c   : > { %1213 = vrot.lane.b32.xlu1 %v12826_v5, %s20248_s28  ;;  %s20296_s28 = smov 74  }
 0x29f   : > { %1299 = vrot.lane.b32.xlu0 %v12782_v0, %s20252_s26 }
 0x2a0   : > { %1235 = vrot.lane.b32.xlu1 %v12826_v5, %s20249_s15 }
 0x2a3   : > { %1303 = vrot.lane.b32.xlu0 %v12788_v3, %s20252_s26 }
 0x2a4   : > { %1257 = vrot.lane.b32.xlu1 %v12826_v5, %s20250_s16 }
 0x2a8   : > { %1279 = vrot.lane.b32.xlu1 %v12826_v5, %s20251_s17  ;;  %s19672_s17 = smov 68  }
 0x2ac   : > { %1301 = vrot.lane.b32.xlu1 %v12826_v5, %s20252_s26 }
 0x2b9   : > { %v12856_v9 = vpop.permute.xlu0 %1141  ;;  %v12858_v11 = vpop.permute.xlu1 %1139 }
 0x2bd   : > { %v1164_v10 = vpop.permute.xlu0 %1163 }
 0x2c1   : > { %v1186_v44 = vpop.permute.xlu0 %1185 }
 0x2c5   : > { %v12860_v12 = vpop.permute.xlu0 %1207 }
 0x2c6   : > { %v12862_v13 = vpop.permute.xlu1 %1143 }
 0x2c9   : > { %v12870_v15 = vpop.permute.xlu0 %1229 }
 0x2ca   : > { %v1162_v53 = vpop.permute.xlu1 %1161 }
 0x2cd   : > { %v12872_v7 = vpop.permute.xlu0 %1251 }
 0x2ce   : > { %v12874_v16 = vpop.permute.xlu1 %1165 }
 0x2d1   : > { %v12876_v45 = vpop.permute.xlu0 %1273 }
 0x2d2   : > { %v1184_v18 = vpop.permute.xlu1 %1183 }
 0x2d3   : > { %v1195_v6 = vsel %vm579_vm0, %v1184_v18, %v1186_v44  ;;  %v1152_v18 = vsel %vm533_vm2, %v12856_v9, %v12862_v13 }
 0x2d5   : > { %v12878_v19 = vpop.permute.xlu0 %1295 }
 0x2d6   : > { %v12880_v20 = vpop.permute.xlu1 %1187 }
 0x2d7   : > { %v1196_v49 = vsel %vm579_vm0, %v1186_v44, %v12880_v20 }
 0x2d9   : > { %v1146_v21 = vpop.permute.xlu0 %1145 }
 0x2da   : > { %v12882_v22 = vpop.permute.xlu1 %1205 }
 0x2dd   : > { %v12884_v26 = vpop.permute.xlu0 %1149 }
 0x2de   : > { %v12886_v27 = vpop.permute.xlu1 %1209 }
 0x2e1   : > { %v1168_v28 = vpop.permute.xlu0 %1167 }
 0x2e2   : > { %v12888_v30 = vpop.permute.xlu1 %1227 }
 0x2e5   : > { %v12890_v31 = vpop.permute.xlu0 %1171 }
 0x2e6   : > { %v12892_v32 = vpop.permute.xlu1 %1231 }
 0x2e9   : > { %v1190_v34 = vpop.permute.xlu0 %1189 }
 0x2ea   : > { %v12894_v2 = vpop.permute.xlu1 %1249 }
 0x2ed   : > { %v1194_v35 = vpop.permute.xlu0 %1193 }
 0x2ee   : > { %v12896_v36 = vpop.permute.xlu1 %1253 }
 0x2f1   : > { %v12898_v37 = vpop.permute.xlu0 %1211 }
 0x2f2   : > { %v12900_v4 = vpop.permute.xlu1 %1271 }
 0x2f5   : > { %v12902_v38 = vpop.permute.xlu0 %1215 }
 0x2f6   : > { %v12904_v39 = vpop.permute.xlu1 %1275 }
 0x2f9   : > { %v12906_v40 = vpop.permute.xlu0 %1233 }
 0x2fa   : > { %v1294_v41 = vpop.permute.xlu1 %1293 }
 0x2fd   : > { %v12908_v42 = vpop.permute.xlu0 %1237 }
 0x2fe   : > { %v12910_v43 = vpop.permute.xlu1 %1297 }
 0x301   : > { %v12912_v47 = vpop.permute.xlu0 %1255 }
 0x302   : > { %v1148_v48 = vpop.permute.xlu1 %1147 }
 0x305   : > { %v12914_v54 = vpop.permute.xlu0 %1259 }
 0x306   : > { %v1170_v57 = vpop.permute.xlu1 %1169 }
 0x307   : > { %v1176_v50 = vsel %vm20172_vm1, %v1170_v57, %v12890_v31 }
 0x309   : > { %v1278_v63 = vpop.permute.xlu0 %1277 }
 0x30a   : > { %v1192_v58 = vpop.permute.xlu1 %1191 }
 0x30b   : > { %v1198_v60 = vsel %vm579_vm0, %v1192_v58, %v1194_v35  ;;  %v1197_v61 = vsel %vm579_vm0, %v1190_v34, %v1192_v58  ;;  %v1175_v34 = vsel %vm20172_vm1, %v1168_v28, %v1170_v57  ;;  %v1174_v58 = vsel %vm20172_vm1, %v1164_v10, %v12874_v16 }
 0x30c   : > { %1383 = vmatprep.subr.bf16.mxu1 %v1198_v60 }
 0x30d   : > { %1384 = vmatpush1.bf16.msra.mxu1 %v1197_v61  ;;  %v1282_v8 = vpop.permute.xlu0 %1281  ;;  %v1173_v61 = vsel %vm20172_vm1, %v1162_v53, %v1164_v10  ;;  %vm8316_vm1 = vcmask 523712  }
 0x30e   : > { %1385 = vmatprep.subr.bf16.mxu1 %v1196_v49  ;;  %v12920_v46 = vpop.permute.xlu1 %1213 }
 0x311   : > { %1386 = vmatpush1.bf16.msra.mxu1 %v1195_v6  ;;  %v1300_v49 = vpop.permute.xlu0 %1299  ;;  %v1154_v6 = vsel %vm533_vm2, %v1148_v48, %v12884_v26 }
 0x312   : > { %1387 = vmatprep.subr.bf16.mxu1 %v1176_v50  ;;  %v12925_v1 = vpop.permute.xlu1 %1235  ;;  %v1153_v50 = vsel %vm533_vm2, %v1146_v21, %v1148_v48  ;;  %v1306_v21 = vsel %vm20174_vm3, %v12878_v19, %v12910_v43  ;;  %v1305_v48 = vsel %vm20174_vm3, %v1294_v41, %v12878_v19 }
 0x315   : > { %1388 = vmatpush1.bf16.msra.mxu1 %v1175_v34  ;;  %v12937_v28 = vpop.permute.xlu0 %1303  ;;  %v1151_v34 = vsel %vm533_vm2, %v12858_v11, %v12856_v9  ;;  %v20254_v9 = vmov 0   ;;  %vm470_vm2 = vcmp.gt.f32.partialorder %v12670_v59, 0.5 }
 0x316   : > { %1389 = vmatprep.subr.bf16.mxu1 %v1174_v58  ;;  %v1258_v60 = vpop.permute.xlu1 %1257  ;;  %v12954_v58 = vld [vmem:[%s20253_s4 + $0x8] ss:$12 sps:$4 sm:$0xff]  }
 0x317   : > { %v1263_v19 = vsel %vm648_vm6, %v12912_v47, %v1258_v60  ;;  %v1624_v47 = vsel %vm470_vm2, 1, %v20254_v9  ;;  %vm20200_vm2 = vcmask 785408  }
 0x318   : > { %v1632_v59 = vrot.slane %v1624_v47, %v12662_v55 }
 0x319   : > { %1390 = vmatpush1.bf16.msra.mxu1 %v1173_v61 }
 0x31a   : > { %1391 = vmatprep.subr.bf16.mxu1 %v1154_v6  ;;  %v1280_v44 = vpop.permute.xlu1 %1279  ;;  %v1628_v6 = vrot.slane %v1624_v47, %v12665_v56  ;;  %vm13073_vm10 = vcmp.eq.s32.totalorder %v1632_v59, 1 }
 0x31b   : > { %v1285_v11 = vsel %vm671_vm4, %v1278_v63, %v1280_v44 }
 0x31d   : > { %1392 = vmatpush1.bf16.msra.mxu1 %v1153_v50  ;;  %v1636_v50 = vrot.slane %v1624_v47, %v12683_v17 }
 0x31e   : > { %1393 = vmatprep.subr.bf16.mxu1 %v1152_v18  ;;  %v1302_v57 = vpop.permute.xlu1 %1301 }
 0x31f   : > { %v1308_v10 = vsel %vm20174_vm3, %v1302_v57, %v12937_v28  ;;  %v1307_v53 = vsel %vm20174_vm3, %v1300_v49, %v1302_v57  ;;  %vm9527_vm3 = vcmask 1041409  }
 0x320   : > { %1448 = vmatprep.subr.bf16.mxu0 %v1308_v10 }
 0x321   : > { %1394 = vmatpush1.bf16.msra.mxu1 %v1151_v34  ;;  %1449 = vmatpush1.bf16.msra.mxu0 %v1307_v53 }
 0x322   : > { %1395 = vmatprep.subr.bf16.mxu1 %v12826_v5  ;;  %1450 = vmatprep.subr.bf16.mxu0 %v1306_v21  ;;  %v1286_v5 = vsel %vm671_vm4, %v1280_v44, %v1282_v8 }
 0x325   : > { %1396 = vmatpush1.bf16.msra.mxu1 %v12782_v0  ;;  %1451 = vmatpush1.bf16.msra.mxu0 %v1305_v48  ;;  %v1264_v0 = vsel %vm648_vm6, %v1258_v60, %v12914_v54 }
 0x326   : > { %1397 = vmatprep.subr.bf16.mxu1 %v12744_v52  ;;  %11935 = vmatprep.subr.bf16.mxu0 %v1282_v8  ;;  %v12173_v52 = vld [vmem:[%s20253_s4 + $0x20] ss:$12 sps:$4 sm:$0xff]   ;;  %v1283_v8 = vsel %vm671_vm4, %v12900_v4, %v12876_v45 }
 0x328   : > { %11868 = vmatmul.mubr.msk.bf16.vlgmr.msra.gmra.mxu0 %vm767_vm5, %v12954_v58 }
 0x329   : > { %1398 = vmatpush1.bf16.msra.mxu1 %v12742_v51  ;;  %11936 = vmatpush3.bf16.msra.mxu0 %v1194_v35  ;;  %v1284_v51 = vsel %vm671_vm4, %v12876_v45, %v12904_v39  ;;  %v1262_v45 = vsel %vm648_vm6, %v12872_v7, %v12896_v36  ;;  %vm13059_vm4 = vcmp.eq.s32.totalorder %v1628_v6, 1  ;;  %v20273_v6 = vld [vmem:[#allocation9_spill] sm:$0xff] }
 0x32a   : > { %1399 = vmatprep.subr.bf16.mxu1 %v1286_v5  ;;  %11937 = vmatprep.subr.bf16.mxu0 %v12904_v39 }
 0x32b   : > { %1478 = vmatprep.mubr.bf16.mxu0 %v20254_v9 }
 0x32d   : > { %1400 = vmatpush2.bf16.msra.mxu1 %v1285_v11  ;;  %11938 = vmatpush3.bf16.msra.mxu0 %v12880_v20  ;;  %v1261_v20 = vsel %vm648_vm6, %v12894_v2, %v12872_v7  ;;  %v1240_v7 = vsel %vm20187_vm7, %v12870_v15, %v12892_v32  ;;  %vm13068_vm6 = vcmp.eq.s32.totalorder %v1636_v50, 1  ;;  %v20274_v50 = vld [vmem:[#allocation10_spill] sm:$0xff] }
 0x32e   : > { %1401 = vmatprep.subr.bf16.mxu1 %v1284_v51  ;;  %11939 = vmatprep.subr.bf16.mxu0 %v12914_v54 }
 0x330   : > { %11869 = vmatmul.mubr.msk.bf16.gmra.mxu0 %vm767_vm5, %v12173_v52 }
 0x331   : > { %1402 = vmatpush2.bf16.msra.mxu1 %v1283_v8  ;;  %11940 = vmatpush3.bf16.msra.mxu0 %v12890_v31  ;;  %v12174_v31 = vld [vmem:[%s20253_s4] ss:$12 sps:$4 sm:$0xff]  }
 0x332   : > { %1403 = vmatprep.subr.bf16.mxu1 %v1264_v0  ;;  %11941 = vmatprep.subr.bf16.mxu0 %v12896_v36 }
 0x333   : > { %1521 = vmatprep.mubr.bf16.mxu0 %v12867_v14  ;;  %v1242_v14 = vsel %vm20187_vm7, %v12925_v1, %v12908_v42 }
 0x335   : > { %1404 = vmatpush2.bf16.msra.mxu1 %v1263_v19  ;;  %11942 = vmatpush3.bf16.msra.mxu0 %v12874_v16  ;;  %v1241_v16 = vsel %vm20187_vm7, %v12906_v40, %v12925_v1  ;;  %v1220_v1 = vsel %vm20169_vm8, %v12920_v46, %v12902_v38 }
 0x336   : > { %1405 = vmatprep.subr.bf16.mxu1 %v1262_v45  ;;  %11943 = vmatprep.subr.bf16.mxu0 %v12908_v42 }
 0x339   : > { %1406 = vmatpush2.bf16.msra.mxu1 %v1261_v20  ;;  %11944 = vmatpush3.bf16.msra.mxu0 %v12884_v26  ;;  %v1239_v26 = vsel %vm20187_vm7, %v12888_v30, %v12870_v15  ;;  %v12177_v15 = vld [vmem:[%s20253_s4 + $0x1c] ss:$12 sps:$4 sm:$0xff]   ;;  %vm9533_vm7 = vcmask 1044484  }
 0x33a   : > { %1407 = vmatprep.subr.bf16.mxu1 %v1242_v14  ;;  %11945 = vmatprep.subr.bf16.mxu0 %v12892_v32 }
 0x33d   : > { %1408 = vmatpush2.bf16.msra.mxu1 %v1241_v16  ;;  %11946 = vmatpush3.bf16.msra.mxu0 %v12862_v13  ;;  %v1219_v13 = vsel %vm20169_vm8, %v12898_v37, %v12920_v46  ;;  %v1217_v46 = vsel %vm20169_vm8, %v12882_v22, %v12860_v12 }
 0x33e   : > { %1409 = vmatprep.subr.bf16.mxu1 %v1240_v7  ;;  %11947 = vmatprep.subr.bf16.mxu0 %v12902_v38 }
 0x341   : > { %1410 = vmatpush2.bf16.msra.mxu1 %v1239_v26  ;;  %11948 = vmatpush3.bf16.msra.mxu0 %v12788_v3  ;;  %v1218_v3 = vsel %vm20169_vm8, %v12860_v12, %v12886_v27  ;;  %vm8309_vm8 = vcmask 458112  }
 0x342   : > { %1411 = vmatprep.subr.bf16.mxu1 %v1220_v1  ;;  %11949 = vmatprep.subr.bf16.mxu0 %v12886_v27 }
 0x345   : > { %1412 = vmatpush2.bf16.msra.mxu1 %v1219_v13  ;;  %11950 = vmatpush3.bf16.msra.mxu0 %v12760_v62  ;;  %v12179_v62 = vld [vmem:[%s20253_s4 + $0x18] ss:$12 sps:$4 sm:$0xff]   ;;  %s20285_s4 = smov 84  }
 0x346   : > { %1413 = vmatprep.subr.bf16.mxu1 %v1218_v3  ;;  %11994 = vmatprep.subr.bf16.mxu0 %v12937_v28 }
 0x348   : > { %1522 = vmatmul.mubr.bf16.vlgmr.msra.gmra.mxu0 %v12174_v31 }
 0x349   : > { %1414 = vmatpush2.bf16.msra.mxu1 %v1217_v46  ;;  %11995 = vmatpush3.bf16.msra.mxu0 %v12937_v28 }
 0x34a   : > { %11996 = vmatprep.subr.bf16.mxu0 %v12910_v43  ;;  %1529 = vmatprep.mubr.bf16.mxu0 %v12177_v15 }
 0x34c   : > { %1416 = vmatmul.mubr.bf16.vlgmr.msra.gmra.mxu1 %v12174_v31 }
 0x34d   : > { %11997 = vmatpush3.bf16.msra.mxu0 %v12910_v43  ;;  %1425 = vmatprep.mubr.bf16.mxu1 %v12177_v15 }
 0x350   : > { %1530 = vmatmul.mubr.bf16.gmra.mxu0 %v12179_v62 }
 0x351   : > { %11998 = vmatprep.mubr.msk.bf16.mxu0 %vm767_vm5, %v12954_v58 }
 0x354   : > { %1426 = vmatmul.mubr.bf16.gmra.mxu1 %v12179_v62 }
 0x358   : > { %11999 = vmatmul.mubr.msk.bf16.vlgmr.msra.gmra.mxu0 %vm767_vm5, %v12173_v52 }
 0x3e8   : > { %v13039_v12 = vpop.f32.mrf.mxu0 }
 0x3ea   : > { %v13041_v22 = vpop.f32.mrf.mxu0 }
 0x3ec   : > { %v13043_v27 = vpop.f32.mrf.mxu0 }
 0x3ee   : > { %v13045_v30 = vpop.f32.mrf.mxu0 }
 0x3f0   : > { %v1480_v32 = vpop.f32.mrf.mxu0 }
 0x3f2   : > { %v1482_v2 = vpop.f32.mrf.mxu0 }
 0x3f4   : > { %v1484_v35 = vpop.f32.mrf.mxu0 }
 0x3f6   : > { %v1486_v36 = vpop.f32.mrf.mxu0 }
 0x408   : > { %v11951_v37 = vpop.f32.mrf.mxu0 }
 0x40a   : > { %v11952_v4 = vpop.f32.mrf.mxu0 }
 0x40b   : > { %v11953_v18 = vadd.f32 %v11952_v4, %v11951_v37 }
 0x40c   : > { %v1417_v38 = vpop.f32.mrf.mxu1  ;;  %v11954_v39 = vpop.f32.mrf.mxu0 }
 0x40d   : > { %v1418_v26 = vadd.f32 %v1417_v38, %v12716_v23 }
 0x40e   : > { %v1419_v40 = vpop.f32.mrf.mxu1  ;;  %v11955_v41 = vpop.f32.mrf.mxu0 }
 0x40f   : > { %v11956_v8 = vadd.f32 %v11955_v41, %v11954_v39  ;;  %v1420_v37 = vadd.f32 %v1419_v40, %v12716_v23 }
 0x410   : > { %v13048_v42 = vpop.f32.mrf.mxu1  ;;  %v11957_v43 = vpop.f32.mrf.mxu0 }
 0x411   : > { %v13130_v40 = vadd.f32 %v13041_v22, %v1420_v37 }
 0x412   : > { %v1423_v54 = vpop.f32.mrf.mxu1  ;;  %v11958_v63 = vpop.f32.mrf.mxu0 }
 0x413   : > { %v11959_v60 = vadd.f32 %v11958_v63, %v11957_v43  ;;  %v1424_v39 = vadd.f32 %v1423_v54, %v12720_v25  ;;  %20270 = vst [vmem:[#allocation21_spill] sm:$0xff] %v13130_v40  ;;  %v1422_v54 = vadd.f32 %v13048_v42, %v12720_v25 }
 0x414   : > { %v1427_v61 = vpop.f32.mrf.mxu1  ;;  %v11960_v49 = vpop.f32.mrf.mxu0 }
 0x415   : > { %v1428_v44 = vadd.f32 %v1427_v61, %v12718_v24  ;;  %v1532_v21 = vadd.f32 %v11959_v60, %v12718_v24  ;;  %v13135_v63 = vadd.f32 %v13045_v30, %v1424_v39  ;;  %v13142_v60 = vadd.f32 %v13043_v27, %v1422_v54 }
 0x416   : > { %v1429_v28 = vpop.f32.mrf.mxu1  ;;  %v11961_v57 = vpop.f32.mrf.mxu0 }
 0x417   : > { %v13055_v10 = vadd.f32 %v1480_v32, %v1428_v44  ;;  %v1430_v53 = vadd.f32 %v1429_v28, %v12718_v24  ;;  %v11962_v34 = vadd.f32 %v11961_v57, %v11960_v49  ;;  %v1524_v24 = vadd.f32 %v11953_v18, %v12716_v23  ;;  %20271 = vst [vmem:[#allocation22_spill] sm:$0xff] %v13135_v63 }
 0x418   : > { %v1431_v48 = vpop.f32.mrf.mxu1  ;;  %v12000_v58 = vpop.f32.mrf.mxu0  ;;  %20272 = vst [vmem:[#allocation23_spill] sm:$0xff] %v13142_v60  ;;  %v1588_v44 = vmul.f32 %v13130_v40, %v20273_v6 }
 0x419   : > { %20255 = vst [vmem:[#allocation12_spill] sm:$0xff] %v13055_v10  ;;  %v13063_v9 = vadd.f32 %v1482_v2, %v1430_v53  ;;  %v1432_v11 = vadd.f32 %v1431_v48, %v12726_v29  ;;  %v13066_v52 = vadd.f32 %v12000_v58, %v1532_v21  ;;  %v1535_v14 = vadd.f32 %v11962_v34, %v12726_v29 }
 0x41a   : > { %v1433_v0 = vpop.f32.mrf.mxu1  ;;  %v1572_v19 = vpop.f32.mrf.mxu0  ;;  %v1646_v16 = vsel %vm13059_vm4, %v13055_v10, -1e+30  ;;  %v1527_v2 = vadd.f32 %v11956_v8, %v12720_v25  ;;  %v1641_v25 = vsel %vm13073_vm10, %v13130_v40, -1e+30  ;;  %v1591_v34 = vmul.f32 %v13135_v63, %v20273_v6 }
 0x41b   : > { %20258 = vst [vmem:[#allocation13_spill] sm:$0xff] %v13063_v9  ;;  %20259 = vst [vmem:[#allocation14_spill] sm:$0xff] %v13066_v52  ;;  %v1434_v20 = vadd.f32 %v1433_v0, %v12726_v29  ;;  %1936 = vrot.lane.b32.xlu0 %v13066_v52, %s19696_s19  ;;  %v1647_v7 = vsel %vm13073_vm10, %v13063_v9, -1e+30  ;;  %v13088_v1 = vadd.f32 %v1484_v35, %v1432_v11  ;;  %v1648_v31 = vsel %vm13068_vm6, %v13066_v52, -1e+30 }
 0x41c   : > { %v12001_v13 = vpop.f32.mrf.mxu0  ;;  %v13093_v3 = vmax.f32 %v1646_v16, %v1647_v7  ;;  %v13097_v15 = vadd.f32 %v1572_v19, %v1524_v24  ;;  %v1663_v32 = vsel %vm1600_vm9, %v1648_v31, -inf  ;;  %v1590_v21 = vmul.f32 %v13142_v60, %v20274_v50 }
 0x41d   : > { %20264 = vst [vmem:[#allocation15_spill] sm:$0xff] %v13088_v1  ;;  %v13095_v29 = vadd.f32 %v1486_v36, %v1434_v20  ;;  %v13099_v46 = vadd.f32 %v12001_v13, %v1535_v14  ;;  %v13109_v36 = vadd.f32 %v13039_v12, %v1418_v26  ;;  %v1649_v4 = vsel %vm13059_vm4, %v13088_v1, -1e+30 }
 0x41e   : > { %20266 = vst [vmem:[#allocation17_spill] sm:$0xff] %v13097_v15  ;;  %v1575_v62 = vpop.f32.mrf.mxu0  ;;  %v1664_v35 = vmax.f32 %v13093_v3, %v1663_v32  ;;  %v1642_v22 = vsel %vm13068_vm6, %v13097_v15, -1e+30  ;;  %v1589_v49 = vmul.f32 %v13097_v15, %v12689_v33  ;;  %v1605_v58 = vadd.f32 %v1591_v34, %v1590_v21 }
 0x41f   : > { %20265 = vst [vmem:[#allocation16_spill] sm:$0xff] %v13095_v29  ;;  %20267 = vst [vmem:[#allocation18_spill] sm:$0xff] %v13099_v46  ;;  %1942 = vrot.lane.b32.xlu1 %v13099_v46, %s19696_s19  ;;  %1924 = vrot.lane.b32.xlu0 %v13097_v15, %s19696_s19  ;;  %v1650_v38 = vsel %vm13073_vm10, %v13095_v29, -1e+30  ;;  %v13119_v41 = vadd.f32 %v1575_v62, %v1527_v2  ;;  %v1651_v43 = vsel %vm13068_vm6, %v13099_v46, -1e+30 }
 0x420   : > { %20268 = vst [vmem:[#allocation19_spill] sm:$0xff] %v13109_v36  ;;  %v1667_v12 = vmax.f32 %v1649_v4, %v1650_v38  ;;  %v1668_v47 = vsel %vm1600_vm9, %v1651_v43, -inf  ;;  %v1640_v30 = vsel %vm13059_vm4, %v13109_v36, -1e+30  ;;  %v1653_v42 = vsel %vm1600_vm9, %v1642_v22, -inf }
 0x421   : > { %20269 = vst [vmem:[#allocation20_spill] sm:$0xff] %v13119_v41  ;;  %v1652_v61 = vmax.f32 %v1640_v30, %v1641_v25  ;;  %v1587_v18 = vmul.f32 %v13109_v36, %v20274_v50  ;;  %v1601_v28 = vsel %vm1600_vm9, %v1589_v49, 0.0  ;;  %v1592_v53 = vmul.f32 %v13119_v41, %v12689_v33 }
 0x422   : > { %v1669_v23 = vmax.f32 %v1667_v12, %v1668_v47  ;;  %v1645_v8 = vsel %vm13068_vm6, %v13119_v41, -1e+30  ;;  %v1644_v0 = vsel %vm13073_vm10, %v13135_v63, -1e+30  ;;  %v1643_v24 = vsel %vm13059_vm4, %v13142_v60, -1e+30 }
 0x423   : > { %1930 = vrot.lane.b32.xlu1 %v13119_v41, %s19696_s19  ;;  %1920 = vrot.lane.b32.xlu0 %v13109_v36, %s19696_s19  ;;  %v1654_v27 = vmax.f32 %v1652_v61, %v1653_v42  ;;  %v1599_v57 = vadd.f32 %v1588_v44, %v1587_v18  ;;  %v1606_v48 = vsel %vm1600_vm9, %v1592_v53, 0.0  ;;  %v1658_v19 = vsel %vm1600_vm9, %v1645_v8, -inf }
 0x424   : > { %v1607_v11 = vadd.f32 %v1606_v48, %v1605_v58  ;;  %v1657_v20 = vmax.f32 %v1643_v24, %v1644_v0  ;;  %v1594_v51 = vmul.f32 %v13063_v9, %v20273_v6  ;;  %v1595_v45 = vmul.f32 %v13066_v52, %v12689_v33 }
 0x425   : > { %v1602_v59 = vadd.f32 %v1601_v28, %v1599_v57  ;;  %v1593_v5 = vmul.f32 %v13055_v10, %v20274_v50  ;;  %v1597_v13 = vmul.f32 %v13095_v29, %v20273_v6  ;;  %v1598_v31 = vmul.f32 %v13099_v46, %v12689_v33 }
 0x426   : > { %v1659_v14 = vmax.f32 %v1657_v20, %v1658_v19  ;;  %v1611_v7 = vsel %vm1600_vm9, %v1595_v45, 0.0  ;;  %v1596_v3 = vmul.f32 %v13088_v1, %v20274_v50  ;;  %v19755_v47 = vmov 0.0  }
 0x427   : > { %1922 = vrot.lane.b32.xlu1 %v13130_v40, %s19696_s19  ;;  %1928 = vrot.lane.b32.xlu0 %v13135_v63, %s19696_s19  ;;  %v1610_v16 = vadd.f32 %v1594_v51, %v1593_v5  ;;  %v1616_v37 = vsel %vm1600_vm9, %v1598_v31, 0.0  ;;  %vm2077_vm4 = vcmask 949248   ;;  %vm2115_vm6 = vcmask 916480  }
 0x428   : > { %v1615_v32 = vadd.f32 %v1597_v13, %v1596_v3  ;;  %12002 = vmatprep.subr.mxu0 %v19755_v47  ;;  %vm1786_vm9 = vcmask 15360   ;;  %vm8274_vm10 = vcmask 130112  }
 0x429   : > { %v1612_v26 = vadd.f32 %v1611_v7, %v1610_v16 }
 0x42a   : > { %v1617_v4 = vadd.f32 %v1616_v37, %v1615_v32 }
 0x42b   : > { %1926 = vrot.lane.b32.xlu1 %v13142_v60, %s19696_s19 }
 0x446   : > { %1655 = vmax.xlane.f32.xlu0 %v1654_v27 }
 0x44f   : > { %1603 = vadd.xlane.f32.xlu1 %v1602_v59 }
 0x45c   : > { %1932 = vrot.lane.b32.xlu0 %v13055_v10, %s19696_s19 }
 0x460   : > { %1934 = vrot.lane.b32.xlu1 %v13063_v9, %s19696_s19 }
 0x47b   : > { %1608 = vadd.xlane.f32.xlu0 %v1607_v11 }
 0x484   : > { %1660 = vmax.xlane.f32.xlu1 %v1659_v14 }
 0x48d   : > { %v1937_v2 = vpop.permute.xlu0 %1936 }
 0x48e   : > { %v1973_v54 = vmax.f32 %v13066_v52, %v1937_v2 }
 0x491   : > { %1940 = vrot.lane.b32.xlu0 %v13095_v29, %s19696_s19  ;;  %v13201_v62 = vpop.permute.xlu1 %1942  ;;  %v1925_v38 = vpop.permute.xlu0 %1924 }
 0x492   : > { %v1976_v25 = vmax.f32 %v13099_v46, %v13201_v62 }
 0x495   : > { %1938 = vrot.lane.b32.xlu1 %v13088_v1, %s19696_s19  ;;  %v1921_v43 = vpop.permute.xlu0 %1920 }
 0x499   : > { %v1929_v27 = vpop.permute.xlu0 %1928 }
 0x4b0   : > { %1665 = vmax.xlane.f32.xlu0 %v1664_v35  ;;  %v1931_v35 = vpop.permute.xlu1 %1930 }
 0x4b1   : > { %v1970_v61 = vmax.f32 %v13119_v41, %v1931_v35  ;;  %v1948_v18 = vsel %vm579_vm0, %v1929_v27, %v1931_v35 }
 0x4b2   : > { %v1969_v57 = vmax.f32 %v13135_v63, %v1948_v18 }
 0x4b4   : > { %1613 = vadd.xlane.f32.xlu0 %v1612_v26  ;;  %v1923_v39 = vpop.permute.xlu1 %1922 }
 0x4b5   : > { %v1945_v12 = vsel %vm579_vm0, %v1921_v43, %v1923_v39  ;;  %v1946_v22 = vsel %vm579_vm0, %v1923_v39, %v1925_v38 }
 0x4b6   : > { %v13206_v33 = vmax.f32 %v13109_v36, %v1945_v12  ;;  %v1966_v30 = vmax.f32 %v13130_v40, %v1946_v22 }
 0x4b8   : > { %v1927_v42 = vpop.permute.xlu1 %1926 }
 0x4b9   : > { %1670 = vmax.xlane.f32.xlu1 %v1669_v23  ;;  %v1967_v23 = vmax.f32 %v13097_v15, %v1925_v38  ;;  %v1947_v49 = vsel %vm579_vm0, %v1927_v42, %v1929_v27 }
 0x4ba   : > { %v13230_v6 = vmax.f32 %v13142_v60, %v1947_v49 }
 0x4bd   : > { %1618 = vadd.xlane.f32.xlu1 %v1617_v4 }
 0x4ca   : > { %1981 = vrot.lane.b32.xlu0 %v13206_v33, %s20249_s15 }
 0x4ce   : > { %1993 = vrot.lane.b32.xlu0 %v13206_v33, %s19676_s23  ;;  %2071 = vrot.lane.b32.xlu1 %v1973_v54, %s19708_s24 }
 0x4cf   : > { %v13232_v50 = vpop.xlane.xlu0 %1655 }
 0x4d2   : > { %2005 = vrot.lane.b32.xlu0 %v13206_v33, %s19672_s17  ;;  %2063 = vrot.lane.b32.xlu1 %v1967_v23, %s19708_s24 }
 0x4d3   : > { %v1933_v59 = vpop.permute.xlu0 %1932 }
 0x4d6   : > { %2021 = vrot.lane.b32.xlu0 %v1966_v30, %s19670_s22  ;;  %2075 = vrot.lane.b32.xlu1 %v1976_v25, %s19708_s24 }
 0x4d8   : > { %v1604_v44 = vpop.xlane.xlu1 %1603 }
 0x4da   : > { %2033 = vrot.lane.b32.xlu0 %v1966_v30, %s19668_s27  ;;  %2067 = vrot.lane.b32.xlu1 %v1970_v61, %s19708_s24 }
 0x4dc   : > { %v1935_v28 = vpop.permute.xlu1 %1934 }
 0x4dd   : > { %v1949_v53 = vsel %vm579_vm0, %v1933_v59, %v1935_v28  ;;  %v1950_v21 = vsel %vm579_vm0, %v1935_v28, %v1937_v2  ;;  %v1620_v2 = vmul.f32 0.00390625, %v1604_v44 }
 0x4de   : > { %2045 = vrot.lane.b32.xlu0 %v1966_v30, %s19666_s25  ;;  %1983 = vrot.lane.b32.xlu1 %v13230_v6, %s20249_s15  ;;  %v13247_v34 = vmax.f32 %v13055_v10, %v1949_v53  ;;  %v1972_v48 = vmax.f32 %v13063_v9, %v1950_v21 }
 0x4e2   : > { %2061 = vrot.lane.b32.xlu0 %v1966_v30, %s19708_s24  ;;  %1995 = vrot.lane.b32.xlu1 %v13230_v6, %s19676_s23 }
 0x4e6   : > { %2065 = vrot.lane.b32.xlu0 %v1969_v57, %s19708_s24  ;;  %2007 = vrot.lane.b32.xlu1 %v13230_v6, %s19672_s17 }
 0x4ea   : > { %2023 = vrot.lane.b32.xlu1 %v1969_v57, %s19670_s22  ;;  %1985 = vrot.lane.b32.xlu0 %v13247_v34, %s20249_s15 }
 0x4ee   : > { %2035 = vrot.lane.b32.xlu1 %v1969_v57, %s19668_s27  ;;  %1997 = vrot.lane.b32.xlu0 %v13247_v34, %s19676_s23 }
 0x4f2   : > { %2047 = vrot.lane.b32.xlu1 %v1969_v57, %s19666_s25  ;;  %2009 = vrot.lane.b32.xlu0 %v13247_v34, %s19672_s17 }
 0x4f6   : > { %2025 = vrot.lane.b32.xlu0 %v1972_v48, %s19670_s22 }
 0x4fa   : > { %2037 = vrot.lane.b32.xlu0 %v1972_v48, %s19668_s27 }
 0x4fe   : > { %2049 = vrot.lane.b32.xlu0 %v1972_v48, %s19666_s25 }
 0x502   : > { %2069 = vrot.lane.b32.xlu0 %v1972_v48, %s19708_s24 }
 0x504   : > { %v1609_v58 = vpop.xlane.xlu0 %1608 }
 0x505   : > { %v1621_v37 = vmul.f32 0.00390625, %v1609_v58 }
 0x508   : > { %v1941_v11 = vpop.permute.xlu0 %1940 }
 0x509   : > { %v1952_v8 = vsel %vm579_vm0, %v1941_v11, %v13201_v62 }
 0x50a   : > { %v1975_v0 = vmax.f32 %v13095_v29, %v1952_v8 }
 0x50c   : > { %2073 = vrot.lane.b32.xlu0 %v1975_v0, %s19708_s24 }
 0x50d   : > { %v1661_v24 = vpop.xlane.xlu1 %1660 }
 0x511   : > { %v1939_v19 = vpop.permute.xlu1 %1938 }
 0x512   : > { %v1951_v20 = vsel %vm579_vm0, %v1939_v19, %v1941_v11  ;;  %vm20185_vm0 = vcmask 7168  }
 0x513   : > { %v13270_v14 = vmax.f32 %v13088_v1, %v1951_v20  ;;  %v1674_v35 = vsel %vm20185_vm0, %v1621_v37, %v1661_v24  ;;  %v1673_v43 = vsel %vm20185_vm0, %v1620_v2, %v13232_v50 }
 0x515   : > { %1987 = vrot.lane.b32.xlu1 %v13270_v14, %s20249_s15 }
 0x519   : > { %1999 = vrot.lane.b32.xlu1 %v13270_v14, %s19676_s23  ;;  %s19702_s23 = smov 120  }
 0x51d   : > { %2011 = vrot.lane.b32.xlu1 %v13270_v14, %s19672_s17  ;;  %s19698_s17 = smov 122  }
 0x521   : > { %2027 = vrot.lane.b32.xlu1 %v1975_v0, %s19670_s22  ;;  %s19682_s22 = smov 18  }
 0x525   : > { %2039 = vrot.lane.b32.xlu1 %v1975_v0, %s19668_s27  ;;  %s19680_s27 = smov 124  }
 0x529   : > { %2051 = vrot.lane.b32.xlu1 %v1975_v0, %s19666_s25  ;;  %s19678_s25 = smov 22  }
 0x539   : > { %v1666_v51 = vpop.xlane.xlu0 %1665 }
 0x53d   : > { %v1614_v45 = vpop.xlane.xlu0 %1613 }
 0x53e   : > { %v1622_v13 = vmul.f32 0.00390625, %v1614_v45 }
 0x540   : > { %v1675_v4 = vsel %vm20185_vm0, %v1622_v13, %v1666_v51 }
 0x541   : > { %v1982_v5 = vpop.permute.xlu0 %1981 }
 0x542   : > { %v1671_v16 = vpop.xlane.xlu1 %1670  ;;  %v2087_v23 = vsel %vm20177_vm11, %v13206_v33, %v1982_v5 }
 0x545   : > { %v1994_v7 = vpop.permute.xlu0 %1993 }
 0x546   : > { %v1619_v26 = vpop.xlane.xlu1 %1618  ;;  %v2091_v25 = vsel %vm767_vm5, %v2087_v23, %v1994_v7 }
 0x547   : > { %v1623_v31 = vmul.f32 0.00390625, %v1619_v26 }
 0x549   : > { %v2006_v3 = vpop.permute.xlu0 %2005  ;;  %v1676_v62 = vsel %vm20185_vm0, %v1623_v31, %v1671_v16  ;;  %vm12307_vm0 = vmmov 0  }
 0x54a   : > { %12003 = vmatpush3.msra.mxu0 %v1676_v62  ;;  %v13282_v32 = vpop.permute.xlu1 %2071  ;;  %v2096_v42 = vsel %vm20201_vm12, %v2091_v25, %v2006_v3 }
 0x54b   : > { %12004 = vmatprep.subr.mxu0 %v19755_v47 }
 0x54c   : > { %12005 = vmatpush3.msra.mxu0 %v1675_v4 }
 0x54d   : > { %v2022_v38 = vpop.permute.xlu0 %2021  ;;  %12006 = vmatprep.subr.mxu0 %v19755_v47 }
 0x54e   : > { %12007 = vmatpush3.msra.mxu0 %v1674_v35  ;;  %v2064_v39 = vpop.permute.xlu1 %2063  ;;  %v2101_v61 = vsel %vm2100_vm14, %v2096_v42, %v2022_v38 }
 0x54f   : > { %12008 = vmatprep.subr.mxu0 %v19755_v47 }
 0x550   : > { %12009 = vmatpush3.msra.mxu0 %v1673_v43 }
 0x551   : > { %v2034_v12 = vpop.permute.xlu0 %2033  ;;  %12021 = vmatprep.subr.mxu0 %v19755_v47 }
 0x552   : > { %v13292_v54 = vpop.permute.xlu1 %2075  ;;  %v2106_v27 = vsel %vm20186_vm15, %v2101_v61, %v2034_v12 }
 0x555   : > { %v2046_v22 = vpop.permute.xlu0 %2045 }
 0x556   : > { %v2068_v30 = vpop.permute.xlu1 %2067  ;;  %v2111_v44 = vsel %vm20200_vm2, %v2106_v27, %v2046_v22  ;;  %v12285_v27 = vmov 1983009808  }
 0x559   : > { %v2062_v49 = vpop.permute.xlu0 %2061 }
 0x55a   : > { %v2078_v33 = vsel %vm2077_vm4, %v2062_v49, %v2064_v39  ;;  %v1984_v50 = vpop.permute.xlu1 %1983  ;;  %v2883_v49 = vunpack.c.l.s4 %v12285_v27 }
 0x55b   : > { %v13303_v18 = vsel %vm2115_vm6, %v2111_v44, %v2078_v33  ;;  %v2088_v21 = vsel %vm20177_vm11, %v13230_v6, %v1984_v50 }
 0x55c   : > { %2724 = vrot.lane.b32.xlu1 %v13303_v18, %s19674_s21  ;;  %2124 = vrot.lane.b32.xlu0 %v13303_v18, %s19694_s20  ;;  %s19686_s21 = smov 14   ;;  %v2884_v50 = vunpack.c.0.s8 %v2883_v49 }
 0x55d   : > { %v2066_v0 = vpop.permute.xlu0 %2065 }
 0x55e   : > { %v1996_v28 = vpop.permute.xlu1 %1995  ;;  %v2079_v6 = vsel %vm2077_vm4, %v2066_v0, %v2068_v30 }
 0x55f   : > { %v2092_v48 = vsel %vm767_vm5, %v2088_v21, %v1996_v28  ;;  %v12288_v28 = vmov 1934713408  }
 0x560   : > { %2748 = vrot.lane.b32.xlu1 %v13303_v18, %s19678_s25  ;;  %2136 = vrot.lane.b32.xlu0 %v13303_v18, %s19680_s27  ;;  %s19684_s25 = smov 10   ;;  %s19704_s27 = smov 118  }
 0x561   : > { %v13384_v51 = vpop.permute.xlu0 %1985 }
 0x562   : > { %v2008_v57 = vpop.permute.xlu1 %2007 }
 0x563   : > { %v2097_v58 = vsel %vm20201_vm12, %v2092_v48, %v2008_v57  ;;  %v2947_v57 = vunpack.c.l.s4 %v12288_v28 }
 0x564   : > { %2772 = vrot.lane.b32.xlu1 %v13303_v18, %s19682_s22  ;;  %2148 = vrot.lane.b32.xlu0 %v13303_v18, %s19698_s17  ;;  %s19688_s22 = smov 6  }
 0x565   : > { %v13394_v45 = vpop.permute.xlu0 %1997 }
 0x566   : > { %v2024_v59 = vpop.permute.xlu1 %2023 }
 0x567   : > { %v2102_v8 = vsel %vm2100_vm14, %v2097_v58, %v2024_v59  ;;  %v20300_v58 = vld [vmem:[#allocation6_spill] sm:$0xff] }
 0x568   : > { %2796 = vrot.lane.b32.xlu1 %v13303_v18, %s19686_s21  ;;  %2160 = vrot.lane.b32.xlu0 %v13303_v18, %s19702_s23  ;;  %s19692_s21 = smov 114  }
 0x569   : > { %v13400_v5 = vpop.permute.xlu0 %2009 }
 0x56a   : > { %v2036_v53 = vpop.permute.xlu1 %2035 }
 0x56b   : > { %v2107_v24 = vsel %vm20186_vm15, %v2102_v8, %v2036_v53 }
 0x56c   : > { %2820 = vrot.lane.b32.xlu1 %v13303_v18, %s19684_s25  ;;  %2172 = vrot.lane.b32.xlu0 %v13303_v18, %s19704_s27  ;;  %s19690_s25 = smov 2  }
 0x56d   : > { %v13412_v7 = vpop.permute.xlu0 %2025 }
 0x56e   : > { %v2048_v11 = vpop.permute.xlu1 %2047 }
 0x56f   : > { %v2112_v19 = vsel %vm20200_vm2, %v2107_v24, %v2048_v11  ;;  %v13517_v11 = vsub.s32 %v2884_v50, %v20300_v58 }
 0x570   : > { %2844 = vrot.lane.b32.xlu1 %v13303_v18, %s19688_s22  ;;  %2184 = vrot.lane.b32.xlu0 %v13303_v18, %s19708_s24  ;;  %v13342_v20 = vsel %vm2115_vm6, %v2112_v19, %v2079_v6  ;;  %s19710_s22 = smov 112   ;;  %v2948_v19 = vunpack.c.0.s8 %v2947_v57 }
 0x571   : > { %v13420_v13 = vpop.permute.xlu0 %2037 }
 0x572   : > { %v13550_v57 = vsub.s32 %v2948_v19, %v20300_v58 }
 0x574   : > { %2868 = vrot.lane.b32.xlu1 %v13303_v18, %s19690_s25  ;;  %2196 = vrot.lane.b32.xlu0 %v13303_v18, %s19692_s21  ;;  %s20275_s25 = smov 124   ;;  %s19700_s21 = smov 106  }
 0x575   : > { %v13432_v3 = vpop.permute.xlu0 %2049 }
 0x578   : > { %2208 = vrot.lane.b32.xlu0 %v13303_v18, %s19710_s22  ;;  %2126 = vrot.lane.b32.xlu1 %v13342_v20, %s19694_s20  ;;  %s19718_s20 = smov 104  }
 0x579   : > { %v13440_v2 = vpop.permute.xlu0 %2069 }
 0x57c   : > { %2220 = vrot.lane.b32.xlu0 %v13303_v18, %s19696_s19  ;;  %2138 = vrot.lane.b32.xlu1 %v13342_v20, %s20275_s25  ;;  %s19706_s19 = smov 102  }
 0x57e   : > { %v13452_v4 = vpop.permute.xlu0 %2073 }
 0x580   : > { %2232 = vrot.lane.b32.xlu0 %v13303_v18, %s20249_s15  ;;  %2150 = vrot.lane.b32.xlu1 %v13342_v20, %s19698_s17  ;;  %s19720_s17 = smov 100  }
 0x584   : > { %2244 = vrot.lane.b32.xlu0 %v13303_v18, %s19700_s21  ;;  %2162 = vrot.lane.b32.xlu1 %v13342_v20, %s19702_s23  ;;  %s20276_s21 = smov 114   ;;  %s19716_s23 = smov 98  }
 0x587   : > { %v13402_v16 = vpop.permute.xlu1 %1987 }
 0x588   : > { %2256 = vrot.lane.b32.xlu0 %v13303_v18, %s19718_s20  ;;  %2174 = vrot.lane.b32.xlu1 %v13342_v20, %s19704_s27  ;;  %s19714_s27 = smov 96  }
 0x58b   : > { %v13414_v26 = vpop.permute.xlu1 %1999 }
 0x58c   : > { %2268 = vrot.lane.b32.xlu0 %v13303_v18, %s19706_s19  ;;  %2186 = vrot.lane.b32.xlu1 %v13342_v20, %s19708_s24  ;;  %s20277_s19 = smov 110   ;;  %s19712_s24 = smov 94  }
 0x58f   : > { %v13422_v31 = vpop.permute.xlu1 %2011 }
 0x590   : > { %2280 = vrot.lane.b32.xlu0 %v13303_v18, %s19720_s17  ;;  %2198 = vrot.lane.b32.xlu1 %v13342_v20, %s20276_s21 }
 0x593   : > { %v13434_v62 = vpop.permute.xlu1 %2027 }
 0x594   : > { %2292 = vrot.lane.b32.xlu0 %v13303_v18, %s19716_s23  ;;  %2210 = vrot.lane.b32.xlu1 %v13342_v20, %s19710_s22  ;;  %s20278_s22 = smov 106   ;;  %s19724_s23 = smov 86  }
 0x597   : > { %v13442_v37 = vpop.permute.xlu1 %2039 }
 0x598   : > { %2304 = vrot.lane.b32.xlu0 %v13303_v18, %s19714_s27  ;;  %2222 = vrot.lane.b32.xlu1 %v13342_v20, %s20277_s19  ;;  %s20280_s27 = smov 102  }
 0x59b   : > { %v13454_v35 = vpop.permute.xlu1 %2051 }
 0x59c   : > { %2316 = vrot.lane.b32.xlu0 %v13303_v18, %s19712_s24  ;;  %2234 = vrot.lane.b32.xlu1 %v13342_v20, %s20249_s15  ;;  %s20279_s24 = smov 88  }
 0x5a0   : > { %2328 = vrot.lane.b32.xlu0 %v13303_v18, %s20250_s16  ;;  %2246 = vrot.lane.b32.xlu1 %v13342_v20, %s20278_s22 }
 0x5a4   : > { %2340 = vrot.lane.b32.xlu0 %v13303_v18, %s20252_s26  ;;  %2258 = vrot.lane.b32.xlu1 %v13342_v20, %s19718_s20  ;;  %s19722_s20 = smov 84  }
 0x5a8   : > { %2352 = vrot.lane.b32.xlu0 %v13303_v18, %s20279_s24  ;;  %2270 = vrot.lane.b32.xlu1 %v13342_v20, %s20280_s27 }
 0x5ac   : > { %2364 = vrot.lane.b32.xlu0 %v13303_v18, %s19724_s23  ;;  %2282 = vrot.lane.b32.xlu1 %v13342_v20, %s19720_s17  ;;  %s19728_s17 = smov 80   ;;  %s19730_s23 = smov 78  }
 0x5b0   : > { %2376 = vrot.lane.b32.xlu0 %v13303_v18, %s19722_s20  ;;  %2294 = vrot.lane.b32.xlu1 %v13342_v20, %s20281_s0  ;;  %s20283_s20 = smov 94  }
 0x5b4   : > { %2388 = vrot.lane.b32.xlu0 %v13303_v18, %s19726_s1  ;;  %2306 = vrot.lane.b32.xlu1 %v13342_v20, %s20282_s2  ;;  %s19732_s1 = smov 76  }
 0x5b8   : > { %2400 = vrot.lane.b32.xlu0 %v13303_v18, %s19728_s17  ;;  %2318 = vrot.lane.b32.xlu1 %v13342_v20, %s20283_s20  ;;  %s19734_s17 = smov 74  }
 0x5bc   : > { %2412 = vrot.lane.b32.xlu0 %v13303_v18, %s19730_s23  ;;  %2330 = vrot.lane.b32.xlu1 %v13342_v20, %s20250_s16  ;;  %s19736_s23 = smov 72  }
 0x5c0   : > { %2424 = vrot.lane.b32.xlu0 %v13303_v18, %s19732_s1  ;;  %2342 = vrot.lane.b32.xlu1 %v13342_v20, %s20252_s26  ;;  %s19738_s1 = smov 70  }
 0x5c4   : > { %2436 = vrot.lane.b32.xlu0 %v13303_v18, %s19734_s17  ;;  %2354 = vrot.lane.b32.xlu1 %v13342_v20, %s20279_s24  ;;  %s20287_s17 = smov 68  }
 0x5c8   : > { %2448 = vrot.lane.b32.xlu0 %v13303_v18, %s19736_s23  ;;  %2366 = vrot.lane.b32.xlu1 %v13342_v20, %s20284_s3  ;;  %s20288_s23 = smov 82  }
 0x5cc   : > { %2460 = vrot.lane.b32.xlu0 %v13303_v18, %s19738_s1  ;;  %2378 = vrot.lane.b32.xlu1 %v13342_v20, %s20285_s4  ;;  %s20290_s1 = smov 80  }
 0x5ce   : > { %v13460_v38 = vpop.permute.xlu0 %2124  ;;  %v13462_v39 = vpop.permute.xlu1 %2724 }
 0x5cf   : > { %20286 = vst [vmem:[#allocation9_spill] sm:$0xff] %v13462_v39 }
 0x5d0   : > { %2472 = vrot.lane.b32.xlu0 %v13303_v18, %s20287_s17  ;;  %2390 = vrot.lane.b32.xlu1 %v13342_v20, %s20288_s23 }
 0x5d2   : > { %v13468_v43 = vpop.permute.xlu0 %2136  ;;  %v13470_v12 = vpop.permute.xlu1 %2748 }
 0x5d3   : > { %20289 = vst [vmem:[#allocation10_spill] sm:$0xff] %v13470_v12  ;;  %v2881_v0 = vcombine.high %v13303_v18, %v13468_v43 }
 0x5d4   : > { %2484 = vrot.lane.b32.xlu0 %v13303_v18, %s19742_s5  ;;  %2402 = vrot.lane.b32.xlu1 %v13342_v20, %s20290_s1  ;;  %s20294_s5 = smov 76  }
 0x5d5   : > { %v13541_v28 = vrot.slane %v2881_v0, %v13517_v11 }
 0x5d6   : > { %v13476_v23 = vpop.permute.xlu0 %2148  ;;  %v13478_v22 = vpop.permute.xlu1 %2772 }
 0x5d7   : > { %20291 = vst [vmem:[#allocation24_spill] sm:$0xff] %v13478_v22  ;;  %v2897_v59 = vcombine.high %v13460_v38, %v13476_v23  ;;  %20306 = vst [vmem:[#allocation33_spill] sm:$0xff] %v13541_v28 }
 0x5d8   : > { %2496 = vrot.lane.b32.xlu0 %v13303_v18, %s19744_s29  ;;  %2414 = vrot.lane.b32.xlu1 %v13342_v20, %s20292_s14  ;;  %s19753_s29 = smov 60  }
 0x5d9   : > { %v13531_v6 = vrot.slane %v2897_v59, %v13517_v11 }
 0x5da   : > { %v13484_v25 = vpop.permute.xlu0 %2160  ;;  %v13486_v30 = vpop.permute.xlu1 %2796 }
 0x5db   : > { %20293 = vst [vmem:[#allocation25_spill] sm:$0xff] %v13486_v30  ;;  %20303 = vst [vmem:[#allocation30_spill] sm:$0xff] %v13531_v6  ;;  %v2961_v59 = vcombine.high %v13541_v28, %v13531_v6 }
 0x5dc   : > { %2508 = vrot.lane.b32.xlu0 %v13303_v18, %s19747_s30  ;;  %2426 = vrot.lane.b32.xlu1 %v13342_v20, %s20294_s5  ;;  %s19751_s30 = smov 58  }
 0x5dd   : > { %v13570_v29 = vrot.slane %v2961_v59, %v13550_v57 }
 0x5de   : > { %v13492_v42 = vpop.permute.xlu0 %2172  ;;  %v13494_v61 = vpop.permute.xlu1 %2820 }
 0x5df   : > { %20295 = vst [vmem:[#allocation26_spill] sm:$0xff] %v13494_v61  ;;  %20311 = vst [vmem:[#allocation37_spill] sm:$0xff] %v13570_v29 }
 0x5e0   : > { %2520 = vrot.lane.b32.xlu0 %v13303_v18, %s19753_s29  ;;  %2438 = vrot.lane.b32.xlu1 %v13342_v20, %s20296_s28  ;;  %s20301_s29 = smov 70  }
 0x5e2   : > { %v13500_v44 = vpop.permute.xlu0 %2184  ;;  %v13502_v33 = vpop.permute.xlu1 %2844 }
 0x5e3   : > { %20297 = vst [vmem:[#allocation27_spill] sm:$0xff] %v13502_v33  ;;  %v2913_v53 = vcombine.high %v13484_v25, %v13500_v44 }
 0x5e4   : > { %2532 = vrot.lane.b32.xlu0 %v13303_v18, %s19751_s30  ;;  %2450 = vrot.lane.b32.xlu1 %v13342_v20, %s20298_s18  ;;  %s19757_s30 = smov 56  }
 0x5e5   : > { %v13534_v27 = vrot.slane %v2913_v53, %v13517_v11 }
 0x5e6   : > { %v13512_v21 = vpop.permute.xlu0 %2196  ;;  %v13514_v48 = vpop.permute.xlu1 %2868 }
 0x5e7   : > { %20299 = vst [vmem:[#allocation28_spill] sm:$0xff] %v13514_v48  ;;  %v2929_v8 = vcombine.high %v13492_v42, %v13512_v21  ;;  %20304 = vst [vmem:[#allocation31_spill] sm:$0xff] %v13534_v27 }
 0x5e8   : > { %2544 = vrot.lane.b32.xlu0 %v13303_v18, %s19757_s30  ;;  %2462 = vrot.lane.b32.xlu1 %v13342_v20, %s20301_s29  ;;  %s19761_s30 = smov 54  }
 0x5e9   : > { %v13528_v24 = vrot.slane %v2929_v8, %v13517_v11 }
 0x5ea   : > { %v13536_v49 = vpop.permute.xlu0 %2208  ;;  %v13538_v50 = vpop.permute.xlu1 %2126 }
 0x5eb   : > { %20302 = vst [vmem:[#allocation29_spill] sm:$0xff] %v13528_v24  ;;  %20305 = vst [vmem:[#allocation32_spill] sm:$0xff] %v13538_v50  ;;  %v2993_v47 = vcombine.high %v13534_v27, %v13528_v24 }
 0x5ec   : > { %2556 = vrot.lane.b32.xlu0 %v13303_v18, %s19761_s30  ;;  %2474 = vrot.lane.b32.xlu1 %v13342_v20, %s20287_s17  ;;  %s19768_s30 = smov 50  }
 0x5ed   : > { %v13563_v0 = vrot.slane %v2993_v47, %v13550_v57 }
 0x5ee   : > { %v13554_v53 = vpop.permute.xlu0 %2220  ;;  %v13556_v8 = vpop.permute.xlu1 %2138 }
 0x5ef   : > { %20307 = vst [vmem:[#allocation34_spill] sm:$0xff] %v13556_v8  ;;  %20309 = vst [vmem:[#allocation35_spill] sm:$0xff] %v13563_v0 }
 0x5f0   : > { %2568 = vrot.lane.b32.xlu0 %v13303_v18, %s19765_s12  ;;  %2486 = vrot.lane.b32.xlu1 %v13342_v20, %s20308_s13  ;;  %s20314_s12 = smov 48   ;;  %s20402_s13 = smov 122  }
 0x5f2   : > { %v13565_v46 = vpop.permute.xlu0 %2232  ;;  %v13567_v19 = vpop.permute.xlu1 %2150 }
 0x5f3   : > { %20310 = vst [vmem:[#allocation36_spill] sm:$0xff] %v13567_v19  ;;  %v3017_v33 = vcombine.high %v13536_v49, %v13565_v46 }
 0x5f4   : > { %2580 = vrot.lane.b32.xlu0 %v13303_v18, %s19768_s30  ;;  %2498 = vrot.lane.b32.xlu1 %v13342_v20, %s20312_s10  ;;  %s19775_s30 = smov 46   ;;  %s20382_s10 = smov 10  }
 0x5f6   : > { %v13578_v52 = vpop.permute.xlu0 %2244  ;;  %v13580_v47 = vpop.permute.xlu1 %2162 }
 0x5f7   : > { %20313 = vst [vmem:[#allocation38_spill] sm:$0xff] %v13580_v47  ;;  %v3033_v55 = vcombine.high %v13554_v53, %v13578_v52 }
 0x5f8   : > { %2592 = vrot.lane.b32.xlu0 %v13303_v18, %s20314_s12  ;;  %2510 = vrot.lane.b32.xlu1 %v13342_v20, %s20315_s11  ;;  %s20378_s11 = smov 14  }
 0x5f9   : > { %v13642_v58 = vrot.slane %v3033_v55, %v13517_v11 }
 0x5fa   : > { %v13586_v59 = vpop.permute.xlu0 %2256  ;;  %v13588_v41 = vpop.permute.xlu1 %2174 }
 0x5fb   : > { %20316 = vst [vmem:[#allocation39_spill] sm:$0xff] %v13588_v41  ;;  %20328 = vst [vmem:[#allocation46_spill] sm:$0xff] %v13642_v58 }
 0x5fc   : > { %2604 = vrot.lane.b32.xlu0 %v13303_v18, %s19775_s30  ;;  %2522 = vrot.lane.b32.xlu1 %v13342_v20, %s20317_s8  ;;  %s20321_s30 = smov 56   ;;  %s19789_s8 = smov 40  }
 0x5fe   : > { %v13594_v9 = vpop.permute.xlu0 %2268  ;;  %v13596_v63 = vpop.permute.xlu1 %2186 }
 0x5ff   : > { %20318 = vst [vmem:[#allocation40_spill] sm:$0xff] %v13596_v63 }
 0x600   : > { %2616 = vrot.lane.b32.xlu0 %v13303_v18, %s19779_s7  ;;  %2534 = vrot.lane.b32.xlu1 %v13342_v20, %s20319_s9  ;;  %s20323_s7 = smov 54   ;;  %s20358_s9 = smov 8  }
 0x602   : > { %v13602_v15 = vpop.permute.xlu0 %2280  ;;  %v13604_v40 = vpop.permute.xlu1 %2198 }
 0x603   : > { %20320 = vst [vmem:[#allocation41_spill] sm:$0xff] %v13604_v40  ;;  %v3049_v56 = vcombine.high %v13586_v59, %v13602_v15 }
 0x604   : > { %2628 = vrot.lane.b32.xlu0 %v13303_v18, %s19787_s6  ;;  %2546 = vrot.lane.b32.xlu1 %v13342_v20, %s20321_s30  ;;  %s19798_s6 = smov 38   ;;  %s19833_s30 = smov 24  }
 0x605   : > { %v13645_v29 = vrot.slane %v3049_v56, %v13517_v11 }
 0x606   : > { %v13610_v1 = vpop.permute.xlu0 %2292  ;;  %v13612_v10 = vpop.permute.xlu1 %2210 }
 0x607   : > { %20322 = vst [vmem:[#allocation42_spill] sm:$0xff] %v13612_v10  ;;  %v3065_v60 = vcombine.high %v13594_v9, %v13610_v1  ;;  %20329 = vst [vmem:[#allocation47_spill] sm:$0xff] %v13645_v29 }
 0x608   : > { %2640 = vrot.lane.b32.xlu0 %v13303_v18, %s19789_s8  ;;  %2558 = vrot.lane.b32.xlu1 %v13342_v20, %s20323_s7  ;;  %s20325_s8 = smov 52   ;;  %s19810_s7 = smov 34  }
 0x609   : > { %v13635_v48 = vrot.slane %v3065_v60, %v13517_v11  ;;  %v13652_v60 = vrot.slane %v3017_v33, %v13517_v11 }
 0x60a   : > { %v13620_v36 = vpop.permute.xlu0 %2304  ;;  %v13622_v17 = vpop.permute.xlu1 %2222 }
 0x60b   : > { %20324 = vst [vmem:[#allocation43_spill] sm:$0xff] %v13622_v17  ;;  %20326 = vst [vmem:[#allocation44_spill] sm:$0xff] %v13635_v48  ;;  %v3129_v0 = vcombine.high %v13645_v29, %v13635_v48  ;;  %v3097_v56 = vcombine.high %v13652_v60, %v13642_v58 }
 0x60c   : > { %2652 = vrot.lane.b32.xlu0 %v13303_v18, %s19798_s6  ;;  %2570 = vrot.lane.b32.xlu1 %v13342_v20, %s20325_s8  ;;  %s19807_s6 = smov 36   ;;  %s20330_s8 = smov 50   ;;  %20331 = vst [vmem:[#allocation48_spill] sm:$0xff] %v13652_v60 }
 0x60d   : > { %v13673_v8 = vrot.slane %v3129_v0, %v13550_v57  ;;  %v13680_v47 = vrot.slane %v3097_v56, %v13550_v57 }
 0x60e   : > { %v13637_v30 = vpop.permute.xlu0 %2316  ;;  %v13639_v61 = vpop.permute.xlu1 %2234 }
 0x60f   : > { %20327 = vst [vmem:[#allocation45_spill] sm:$0xff] %v13639_v61  ;;  %20334 = vst [vmem:[#allocation51_spill] sm:$0xff] %v13673_v8 }
 0x610   : > { %2664 = vrot.lane.b32.xlu0 %v13303_v18, %s19807_s6  ;;  %2582 = vrot.lane.b32.xlu1 %v13342_v20, %s20330_s8  ;;  %s19816_s6 = smov 32   ;;  %20335 = vst [vmem:[#allocation52_spill] sm:$0xff] %v13680_v47  ;;  %s20343_s8 = smov 42  }
 0x612   : > { %v13656_v10 = vpop.permute.xlu0 %2328  ;;  %v13658_v55 = vpop.permute.xlu1 %2246 }
 0x613   : > { %20332 = vst [vmem:[#allocation49_spill] sm:$0xff] %v13658_v55  ;;  %v3153_v33 = vcombine.high %v13620_v36, %v13656_v10 }
 0x614   : > { %2676 = vrot.lane.b32.xlu0 %v13303_v18, %s19810_s7  ;;  %2594 = vrot.lane.b32.xlu1 %v13342_v20, %s20314_s12  ;;  %s20336_s7 = smov 46   ;;  %s20342_s12 = smov 28  }
 0x615   : > { %v13685_v63 = vrot.slane %v3153_v33, %v13517_v11 }
 0x616   : > { %v13668_v61 = vpop.permute.xlu0 %2340  ;;  %v13670_v17 = vpop.permute.xlu1 %2258 }
 0x617   : > { %20333 = vst [vmem:[#allocation50_spill] sm:$0xff] %v13670_v17  ;;  %v3169_v55 = vcombine.high %v13637_v30, %v13668_v61  ;;  %20337 = vst [vmem:[#allocation53_spill] sm:$0xff] %v13685_v63 }
 0x618   : > { %2688 = vrot.lane.b32.xlu0 %v13303_v18, %s19816_s6  ;;  %2606 = vrot.lane.b32.xlu1 %v13342_v20, %s20336_s7  ;;  %s19820_s6 = smov 30   ;;  %s20340_s7 = smov 44  }
 0x619   : > { %v13688_v17 = vrot.slane %v3169_v55, %v13517_v11 }
 0x61a   : > { %v13690_v0 = vpop.permute.xlu0 %2352  ;;  %v13692_v41 = vpop.permute.xlu1 %2270 }
 0x61b   : > { %20338 = vst [vmem:[#allocation54_spill] sm:$0xff] %v13688_v17  ;;  %20339 = vst [vmem:[#allocation55_spill] sm:$0xff] %v13692_v41  ;;  %v3233_v56 = vcombine.high %v13685_v63, %v13688_v17 }
 0x61c   : > { %2700 = vrot.lane.b32.xlu0 %v13303_v18, %s19820_s6  ;;  %2618 = vrot.lane.b32.xlu1 %v13342_v20, %s20340_s7  ;;  %s20345_s6 = smov 40   ;;  %s20347_s7 = smov 38  }
 0x61d   : > { %v13769_v6 = vrot.slane %v3233_v56, %v13550_v57 }
 0x61e   : > { %v13702_v33 = vpop.permute.xlu0 %2364  ;;  %v13704_v55 = vpop.permute.xlu1 %2282 }
 0x61f   : > { %20341 = vst [vmem:[#allocation56_spill] sm:$0xff] %v13704_v55  ;;  %20362 = vst [vmem:[#allocation69_spill] sm:$0xff] %v13769_v6 }
 0x620   : > { %2712 = vrot.lane.b32.xlu0 %v13303_v18, %s20342_s12  ;;  %2630 = vrot.lane.b32.xlu1 %v13342_v20, %s20343_s8  ;;  %s19835_s8 = smov 20  }
 0x622   : > { %v13710_v40 = vpop.permute.xlu0 %2376  ;;  %v13712_v41 = vpop.permute.xlu1 %2294 }
 0x623   : > { %20344 = vst [vmem:[#allocation57_spill] sm:$0xff] %v13712_v41  ;;  %v3185_v55 = vcombine.high %v13690_v0, %v13710_v40 }
 0x624   : > { %2736 = vrot.lane.b32.xlu0 %v13303_v18, %s19833_s30  ;;  %2642 = vrot.lane.b32.xlu1 %v13342_v20, %s20345_s6  ;;  %s19839_s30 = smov 16   ;;  %s20355_s6 = smov 34  }
 0x625   : > { %v13731_v41 = vrot.slane %v3185_v55, %v13517_v11 }
 0x626   : > { %v13720_v47 = vpop.permute.xlu0 %2388  ;;  %v13722_v8 = vpop.permute.xlu1 %2306 }
 0x627   : > { %20346 = vst [vmem:[#allocation58_spill] sm:$0xff] %v13722_v8  ;;  %v3201_v63 = vcombine.high %v13702_v33, %v13720_v47  ;;  %20348 = vst [vmem:[#allocation59_spill] sm:$0xff] %v13731_v41 }
 0x628   : > { %2760 = vrot.lane.b32.xlu0 %v13303_v18, %s19835_s8  ;;  %2654 = vrot.lane.b32.xlu1 %v13342_v20, %s20347_s7  ;;  %s20352_s8 = smov 36   ;;  %s19847_s7 = smov 12  }
 0x629   : > { %v13734_v17 = vrot.slane %v3201_v63, %v13517_v11 }
 0x62a   : > { %v13736_v50 = vpop.permute.xlu0 %2400  ;;  %v13738_v19 = vpop.permute.xlu1 %2318 }
 0x62b   : > { %20349 = vst [vmem:[#allocation60_spill] sm:$0xff] %v13734_v17  ;;  %20350 = vst [vmem:[#allocation61_spill] sm:$0xff] %v13736_v50  ;;  %v3265_v8 = vcombine.high %v13731_v41, %v13734_v17 }
 0x62c   : > { %20351 = vst [vmem:[#allocation62_spill] sm:$0xff] %v13738_v19  ;;  %2784 = vrot.lane.b32.xlu0 %v13303_v18, %s19839_s30  ;;  %2666 = vrot.lane.b32.xlu1 %v13342_v20, %s20352_s8  ;;  %s20359_s30 = smov 32   ;;  %s20374_s8 = smov 20  }
 0x62d   : > { %v13772_v27 = vrot.slane %v3265_v8, %v13550_v57 }
 0x62e   : > { %v13746_v28 = vpop.permute.xlu0 %2412  ;;  %v13748_v55 = vpop.permute.xlu1 %2330 }
 0x62f   : > { %20353 = vst [vmem:[#allocation63_spill] sm:$0xff] %v13746_v28  ;;  %20354 = vst [vmem:[#allocation64_spill] sm:$0xff] %v13748_v55 }
 0x630   : > { %2808 = vrot.lane.b32.xlu0 %v13303_v18, %s19847_s7  ;;  %2678 = vrot.lane.b32.xlu1 %v13342_v20, %s20355_s6  ;;  %20363 = vst [vmem:[#allocation70_spill] sm:$0xff] %v13772_v27  ;;  %s19854_s7 = smov 4   ;;  %s20371_s6 = smov 22  }
 0x632   : > { %v13754_v63 = vpop.permute.xlu0 %2424  ;;  %v13756_v19 = vpop.permute.xlu1 %2342 }
 0x633   : > { %20356 = vst [vmem:[#allocation65_spill] sm:$0xff] %v13754_v63  ;;  %20357 = vst [vmem:[#allocation66_spill] sm:$0xff] %v13756_v19  ;;  %v3289_v55 = vcombine.high %v13736_v50, %v13754_v63 }
 0x634   : > { %2832 = vrot.lane.b32.xlu0 %v13303_v18, %s20358_s9  ;;  %2690 = vrot.lane.b32.xlu1 %v13342_v20, %s20359_s30  ;;  %s20364_s30 = smov 30  }
 0x636   : > { %v13764_v41 = vpop.permute.xlu0 %2436  ;;  %v13766_v17 = vpop.permute.xlu1 %2354 }
 0x637   : > { %20360 = vst [vmem:[#allocation67_spill] sm:$0xff] %v13764_v41  ;;  %20361 = vst [vmem:[#allocation68_spill] sm:$0xff] %v13766_v17  ;;  %v3305_v19 = vcombine.high %v13746_v28, %v13764_v41  ;;  %v3303_v17 = vrot.slane %v3289_v55, %v13517_v11 }
 0x638   : > { %2856 = vrot.lane.b32.xlu0 %v13303_v18, %s19854_s7  ;;  %2702 = vrot.lane.b32.xlu1 %v13342_v20, %s20364_s30  ;;  %s20367_s7 = smov 26   ;;  %s20370_s30 = smov 24  }
 0x639   : > { %v3319_v56 = vrot.slane %v3305_v19, %v13517_v11 }
 0x63a   : > { %v13784_v60 = vpop.permute.xlu0 %2448  ;;  %v13786_v8 = vpop.permute.xlu1 %2366 }
 0x63b   : > { %20365 = vst [vmem:[#allocation71_spill] sm:$0xff] %v13784_v60  ;;  %20366 = vst [vmem:[#allocation72_spill] sm:$0xff] %v13786_v8  ;;  %v3369_v29 = vcombine.high %v3303_v17, %v3319_v56 }
 0x63c   : > { %2714 = vrot.lane.b32.xlu0 %v13342_v20, %s20342_s12  ;;  %2726 = vrot.lane.b32.xlu1 %v13342_v20, %s20367_s7  ;;  %s20375_s12 = smov 18  }
 0x63e   : > { %v13794_v24 = vpop.permute.xlu0 %2460  ;;  %v13796_v48 = vpop.permute.xlu1 %2378 }
 0x63f   : > { %20368 = vst [vmem:[#allocation73_spill] sm:$0xff] %v13794_v24  ;;  %20369 = vst [vmem:[#allocation74_spill] sm:$0xff] %v13796_v48 }
 0x640   : > { %2738 = vrot.lane.b32.xlu0 %v13342_v20, %s20370_s30  ;;  %2750 = vrot.lane.b32.xlu1 %v13342_v20, %s20371_s6  ;;  %s20377_s30 = smov 16  }
 0x642   : > { %v13802_v19 = vpop.permute.xlu0 %2472  ;;  %v13804_v55 = vpop.permute.xlu1 %2390 }
 0x643   : > { %20372 = vst [vmem:[#allocation75_spill] sm:$0xff] %v13802_v19  ;;  %20373 = vst [vmem:[#allocation76_spill] sm:$0xff] %v13804_v55  ;;  %v3321_v58 = vcombine.high %v13784_v60, %v13802_v19 }
 0x644   : > { %2762 = vrot.lane.b32.xlu0 %v13342_v20, %s20374_s8  ;;  %2774 = vrot.lane.b32.xlu1 %v13342_v20, %s20375_s12  ;;  %s20381_s8 = smov 12  }
 0x645   : > { %v3335_v8 = vrot.slane %v3321_v58, %v13517_v11 }
 0x646   : > { %v13812_v27 = vpop.permute.xlu0 %2484  ;;  %v13814_v6 = vpop.permute.xlu1 %2402 }
 0x647   : > { %20376 = vst [vmem:[#allocation77_spill] sm:$0xff] %v13814_v6  ;;  %v3337_v48 = vcombine.high %v13794_v24, %v13812_v27  ;;  %v3368_v24 = vcombine.low %v3303_v17, %v3319_v56 }
 0x648   : > { %2786 = vrot.lane.b32.xlu0 %v13342_v20, %s20377_s30  ;;  %2798 = vrot.lane.b32.xlu1 %v13342_v20, %s20378_s11  ;;  %s20385_s30 = smov 6  }
 0x649   : > { %v3351_v55 = vrot.slane %v3337_v48, %v13517_v11  ;;  %v2089_v48 = vsel %vm20177_vm11, %v13247_v34, %v13384_v51  ;;  %v2080_v34 = vsel %vm2077_vm4, %v13440_v2, %v13282_v32  ;;  %v13862_v51 = vrot.slane %v3368_v24, %v13550_v57 }
 0x64a   : > { %v13824_v50 = vpop.permute.xlu0 %2496  ;;  %v13826_v63 = vpop.permute.xlu1 %2414  ;;  %v2093_v58 = vsel %vm767_vm5, %v2089_v48, %v13394_v45  ;;  %v13877_v2 = vrot.slane %v3369_v29, %v13550_v57 }
 0x64b   : > { %20379 = vst [vmem:[#allocation78_spill] sm:$0xff] %v13824_v50  ;;  %20380 = vst [vmem:[#allocation79_spill] sm:$0xff] %v13826_v63  ;;  %v3401_v60 = vcombine.high %v3335_v8, %v3351_v55  ;;  %v3400_v19 = vcombine.low %v3335_v8, %v3351_v55  ;;  %v2098_v17 = vsel %vm20201_vm12, %v2093_v58, %v13400_v5 }
 0x64c   : > { %2810 = vrot.lane.b32.xlu0 %v13342_v20, %s20381_s8  ;;  %2822 = vrot.lane.b32.xlu1 %v13342_v20, %s20382_s10  ;;  %v2103_v56 = vsel %vm2100_vm14, %v2098_v17, %v13412_v7  ;;  %20390 = vst [vmem:[#allocation85_spill] sm:$0xff] %v13862_v51  ;;  %s20391_s8 = smov 2   ;;  %20394 = vst [vmem:[#allocation88_spill] sm:$0xff] %v13877_v2 }
 0x64d   : > { %v13850_v55 = vrot.slane %v3400_v19, %v13550_v57  ;;  %v2108_v45 = vsel %vm20186_vm15, %v2103_v56, %v13420_v13  ;;  %v13880_v24 = vrot.slane %v3401_v60, %v13550_v57 }
 0x64e   : > { %v13832_v28 = vpop.permute.xlu0 %2508  ;;  %v13834_v41 = vpop.permute.xlu1 %2426  ;;  %v2113_v5 = vsel %vm20200_vm2, %v2108_v45, %v13432_v3 }
 0x64f   : > { %20383 = vst [vmem:[#allocation80_spill] sm:$0xff] %v13832_v28  ;;  %20384 = vst [vmem:[#allocation81_spill] sm:$0xff] %v13834_v41  ;;  %v13883_v13 = vsel %vm2115_vm6, %v2113_v5, %v2080_v34  ;;  %v4377_v29 = vcombine.high %v13814_v6, %v13834_v41 }
 0x650   : > { %2834 = vrot.lane.b32.xlu0 %v13342_v20, %s20358_s9  ;;  %2846 = vrot.lane.b32.xlu1 %v13342_v20, %s20385_s30  ;;  %20388 = vst [vmem:[#allocation84_spill] sm:$0xff] %v13850_v55  ;;  %s20389_s9 = smov 4   ;;  %20395 = vst [vmem:[#allocation89_spill] sm:$0xff] %v13880_v24 }
 0x651   : > { %20396 = vst [vmem:[#allocation90_spill] sm:$0xff] %v13883_v13  ;;  %v13939_v6 = vrot.slane %v4377_v29, %v13517_v11  ;;  %v2090_v29 = vsel %vm20177_vm11, %v13270_v14, %v13402_v16  ;;  %vm9529_vm11 = vcmask 1042434  }
 0x652   : > { %v13845_v50 = vpop.permute.xlu0 %2520  ;;  %v13847_v8 = vpop.permute.xlu1 %2438 }
 0x653   : > { %20386 = vst [vmem:[#allocation82_spill] sm:$0xff] %v13845_v50  ;;  %20387 = vst [vmem:[#allocation83_spill] sm:$0xff] %v13847_v8  ;;  %v4393_v56 = vcombine.high %v13826_v63, %v13847_v8  ;;  %v2912_v8 = vcombine.low %v13484_v25, %v13500_v44  ;;  %v3048_v25 = vcombine.low %v13586_v59, %v13602_v15 }
 0x654   : > { %2858 = vrot.lane.b32.xlu0 %v13342_v20, %s20389_s9  ;;  %2870 = vrot.lane.b32.xlu1 %v13342_v20, %s20391_s8  ;;  %s20397_s9 = smov 126   ;;  %20411 = vst [vmem:[#allocation102_spill] sm:$0xff] %v13939_v6  ;;  %v3200_v44 = vcombine.low %v13702_v33, %v13720_v47  ;;  %v3184_v15 = vcombine.low %v13690_v0, %v13710_v40 }
 0x655   : > { %v13924_v32 = vrot.slane %v4393_v56, %v13517_v11 }
 0x656   : > { %v13870_v7 = vpop.permute.xlu0 %2532  ;;  %v13872_v19 = vpop.permute.xlu1 %2450 }
 0x657   : > { %20392 = vst [vmem:[#allocation86_spill] sm:$0xff] %v13870_v7  ;;  %20393 = vst [vmem:[#allocation87_spill] sm:$0xff] %v13872_v19 }
 0x658   : > { %2128 = vrot.lane.b32.xlu0 %v13883_v13, %s20397_s9  ;;  %2728 = vrot.lane.b32.xlu1 %v13883_v13, %s20367_s7  ;;  %20406 = vst [vmem:[#allocation97_spill] sm:$0xff] %v13924_v32 }
 0x65a   : > { %v13891_v48 = vpop.permute.xlu0 %2544  ;;  %v13893_v58 = vpop.permute.xlu1 %2462 }
 0x65b   : > { %20398 = vst [vmem:[#allocation91_spill] sm:$0xff] %v13891_v48  ;;  %20399 = vst [vmem:[#allocation92_spill] sm:$0xff] %v13893_v58 }
 0x65c   : > { %2140 = vrot.lane.b32.xlu0 %v13883_v13, %s20275_s25  ;;  %2752 = vrot.lane.b32.xlu1 %v13883_v13, %s20371_s6  ;;  %s20405_s6 = smov 120  }
 0x65e   : > { %v13901_v60 = vpop.permute.xlu0 %2556  ;;  %v13903_v17 = vpop.permute.xlu1 %2474 }
 0x65f   : > { %20400 = vst [vmem:[#allocation93_spill] sm:$0xff] %v13901_v60  ;;  %20401 = vst [vmem:[#allocation94_spill] sm:$0xff] %v13903_v17  ;;  %v4409_v34 = vcombine.high %v13872_v19, %v13903_v17 }
 0x660   : > { %2152 = vrot.lane.b32.xlu0 %v13883_v13, %s20402_s13  ;;  %2776 = vrot.lane.b32.xlu1 %v13883_v13, %s20375_s12  ;;  %s20412_s12 = smov 118  }
 0x661   : > { %v13927_v24 = vrot.slane %v4409_v34, %v13517_v11 }
 0x662   : > { %v13913_v45 = vpop.permute.xlu0 %2568  ;;  %v13915_v5 = vpop.permute.xlu1 %2486 }
 0x663   : > { %20403 = vst [vmem:[#allocation95_spill] sm:$0xff] %v13913_v45  ;;  %20404 = vst [vmem:[#allocation96_spill] sm:$0xff] %v13915_v5  ;;  %v4425_v3 = vcombine.high %v13893_v58, %v13915_v5  ;;  %v20607_v5 = vld [vmem:[#allocation65_spill] sm:$0xff] }
 0x664   : > { %2164 = vrot.lane.b32.xlu0 %v13883_v13, %s20405_s6  ;;  %20407 = vst [vmem:[#allocation98_spill] sm:$0xff] %v13927_v24  ;;  %2800 = vrot.lane.b32.xlu1 %v13883_v13, %s20378_s11  ;;  %s20416_s11 = smov 116  }
 0x665   : > { %v13930_v2 = vrot.slane %v4425_v3, %v13517_v11  ;;  %v4457_v3 = vcombine.high %v13939_v6, %v13924_v32  ;;  %v2094_v6 = vsel %vm767_vm5, %v2090_v29, %v13414_v26 }
 0x666   : > { %v13934_v51 = vpop.permute.xlu0 %2580  ;;  %v13936_v55 = vpop.permute.xlu1 %2498 }
 0x667   : > { %20408 = vst [vmem:[#allocation99_spill] sm:$0xff] %v13930_v2  ;;  %20409 = vst [vmem:[#allocation100_spill] sm:$0xff] %v13934_v51  ;;  %v4489_v56 = vcombine.high %v13927_v24, %v13930_v2  ;;  %v13966_v32 = vrot.slane %v4457_v3, %v13550_v57 }
 0x668   : > { %20410 = vst [vmem:[#allocation101_spill] sm:$0xff] %v13936_v55  ;;  %2176 = vrot.lane.b32.xlu0 %v13883_v13, %s20412_s12  ;;  %2824 = vrot.lane.b32.xlu1 %v13883_v13, %s20382_s10 }
 0x669   : > { %v13954_v19 = vrot.slane %v4489_v56, %v13550_v57  ;;  %20417 = vst [vmem:[#allocation106_spill] sm:$0xff] %v13966_v32  ;;  %v2099_v56 = vsel %vm20201_vm12, %v2094_v6, %v13422_v31  ;;  %v2081_v6 = vsel %vm2077_vm4, %v13452_v4, %v13292_v54  ;;  %vm8288_vm4 = vcmask 261312  }
 0x66a   : > { %v13949_v34 = vpop.permute.xlu0 %2592  ;;  %v13951_v41 = vpop.permute.xlu1 %2510  ;;  %v2104_v14 = vsel %vm2100_vm14, %v2099_v56, %v13434_v62  ;;  %vm8281_vm14 = vcmask 195712   ;;  %vm9539_vm12 = vcmask 1047559  }
 0x66b   : > { %20413 = vst [vmem:[#allocation103_spill] sm:$0xff] %v13949_v34  ;;  %20414 = vst [vmem:[#allocation104_spill] sm:$0xff] %v13951_v41  ;;  %v2109_v26 = vsel %vm20186_vm15, %v2104_v14, %v13442_v37  ;;  %vm9531_vm15 = vcmask 1043459  }
 0x66c   : > { %20415 = vst [vmem:[#allocation105_spill] sm:$0xff] %v13954_v19  ;;  %2188 = vrot.lane.b32.xlu0 %v13883_v13, %s20416_s11  ;;  %2848 = vrot.lane.b32.xlu1 %v13883_v13, %s20385_s30  ;;  %v2114_v3 = vsel %vm20200_vm2, %v2109_v26, %v13454_v35  ;;  %s20423_s30 = smov 112   ;;  %vm9537_vm2 = vcmask 1046534  }
 0x66d   : > { %v13996_v37 = vsel %vm2115_vm6, %v2114_v3, %v2081_v6  ;;  %vm8295_vm6 = vcmask 326912  }
 0x66e   : > { %v13970_v24 = vpop.permute.xlu0 %2604  ;;  %v13974_v16 = vpop.permute.xlu1 %2522  ;;  %20422 = vst [vmem:[#allocation111_spill] sm:$0xff] %v13996_v37 }
 0x66f   : > { %20418 = vst [vmem:[#allocation107_spill] sm:$0xff] %v13970_v24  ;;  %20419 = vst [vmem:[#allocation108_spill] sm:$0xff] %v13974_v16  ;;  %v4513_v31 = vcombine.high %v13936_v55, %v13974_v16 }
 0x670   : > { %2200 = vrot.lane.b32.xlu0 %v13883_v13, %s20276_s21  ;;  %2872 = vrot.lane.b32.xlu1 %v13883_v13, %s20391_s8 }
 0x671   : > { %v14005_v56 = vrot.slane %v4513_v31, %v13517_v11 }
 0x672   : > { %v13988_v62 = vpop.permute.xlu0 %2616  ;;  %v13993_v29 = vpop.permute.xlu1 %2534 }
 0x673   : > { %20420 = vst [vmem:[#allocation109_spill] sm:$0xff] %v13988_v62  ;;  %20421 = vst [vmem:[#allocation110_spill] sm:$0xff] %v13993_v29  ;;  %v4529_v35 = vcombine.high %v13951_v41, %v13993_v29  ;;  %v3560_v41 = vcombine.low %v13949_v34, %v13988_v62 }
 0x674   : > { %2212 = vrot.lane.b32.xlu0 %v13883_v13, %s20423_s30  ;;  %2130 = vrot.lane.b32.xlu1 %v13996_v37, %s20397_s9  ;;  %20424 = vst [vmem:[#allocation112_spill] sm:$0xff] %v14005_v56  ;;  %s20434_s9 = smov 104  }
 0x675   : > { %v14008_v14 = vrot.slane %v4529_v35, %v13517_v11  ;;  %v14084_v62 = vrot.slane %v3560_v41, %v13517_v11 }
 0x676   : > { %v14010_v54 = vpop.permute.xlu0 %2628  ;;  %v14012_v4 = vpop.permute.xlu1 %2546 }
 0x677   : > { %20425 = vst [vmem:[#allocation113_spill] sm:$0xff] %v14008_v14  ;;  %20426 = vst [vmem:[#allocation114_spill] sm:$0xff] %v14010_v54  ;;  %v4593_v26 = vcombine.high %v14005_v56, %v14008_v14  ;;  %v3576_v14 = vcombine.low %v13970_v24, %v14010_v54 }
 0x678   : > { %20427 = vst [vmem:[#allocation115_spill] sm:$0xff] %v14012_v4  ;;  %2224 = vrot.lane.b32.xlu0 %v13883_v13, %s20277_s19  ;;  %2142 = vrot.lane.b32.xlu1 %v13996_v37, %s20275_s25  ;;  %s20549_s25 = smov 28  }
 0x67a   : > { %v14020_v3 = vpop.permute.xlu0 %2640  ;;  %v14022_v31 = vpop.permute.xlu1 %2558 }
 0x67b   : > { %20428 = vst [vmem:[#allocation116_spill] sm:$0xff] %v14020_v3  ;;  %20429 = vst [vmem:[#allocation117_spill] sm:$0xff] %v14022_v31 }
 0x67c   : > { %2236 = vrot.lane.b32.xlu0 %v13883_v13, %s20249_s15  ;;  %2154 = vrot.lane.b32.xlu1 %v13996_v37, %s20402_s13 }
 0x67e   : > { %v14028_v6 = vpop.permute.xlu0 %2652  ;;  %v14030_v35 = vpop.permute.xlu1 %2570 }
 0x67f   : > { %20430 = vst [vmem:[#allocation118_spill] sm:$0xff] %v14028_v6  ;;  %20431 = vst [vmem:[#allocation119_spill] sm:$0xff] %v14030_v35  ;;  %v4545_v2 = vcombine.high %v14012_v4, %v14030_v35 }
 0x680   : > { %2248 = vrot.lane.b32.xlu0 %v13883_v13, %s20278_s22  ;;  %2166 = vrot.lane.b32.xlu1 %v13996_v37, %s20405_s6  ;;  %s20441_s6 = smov 100  }
 0x681   : > { %v14053_v16 = vrot.slane %v4545_v2, %v13517_v11  ;;  %v14071_v2 = vrot.slane %v3576_v14, %v13517_v11 }
 0x682   : > { %v14038_v32 = vpop.permute.xlu0 %2664  ;;  %v14040_v19 = vpop.permute.xlu1 %2582 }
 0x683   : > { %20432 = vst [vmem:[#allocation120_spill] sm:$0xff] %v14038_v32  ;;  %20433 = vst [vmem:[#allocation121_spill] sm:$0xff] %v14040_v19  ;;  %v4561_v56 = vcombine.high %v14022_v31, %v14040_v19  ;;  %v3592_v55 = vcombine.low %v14020_v3, %v14038_v32  ;;  %v14116_v31 = vrot.slane %v4593_v26, %v13550_v57 }
 0x684   : > { %2260 = vrot.lane.b32.xlu0 %v13883_v13, %s20434_s9  ;;  %2178 = vrot.lane.b32.xlu1 %v13996_v37, %s20412_s12  ;;  %20435 = vst [vmem:[#allocation122_spill] sm:$0xff] %v14053_v16  ;;  %s20498_s12 = smov 62  }
 0x685   : > { %v14056_v4 = vrot.slane %v4561_v56, %v13517_v11  ;;  %v14074_v56 = vrot.slane %v3592_v55, %v13517_v11  ;;  %v3625_v55 = vcombine.high %v14084_v62, %v14071_v2  ;;  %20447 = vst [vmem:[#allocation133_spill] sm:$0xff] %v14116_v31 }
 0x686   : > { %v14058_v35 = vpop.permute.xlu0 %2676  ;;  %v14064_v54 = vpop.permute.xlu1 %2594 }
 0x687   : > { %20436 = vst [vmem:[#allocation123_spill] sm:$0xff] %v14056_v4  ;;  %20437 = vst [vmem:[#allocation124_spill] sm:$0xff] %v14058_v35  ;;  %v3608_v24 = vcombine.low %v14028_v6, %v14058_v35  ;;  %v4625_v3 = vcombine.high %v14053_v16, %v14056_v4  ;;  %v14113_v29 = vrot.slane %v3625_v55, %v13550_v57 }
 0x688   : > { %20438 = vst [vmem:[#allocation125_spill] sm:$0xff] %v14064_v54  ;;  %2272 = vrot.lane.b32.xlu0 %v13883_v13, %s20280_s27  ;;  %2190 = vrot.lane.b32.xlu1 %v13996_v37, %s20416_s11  ;;  %s20495_s11 = smov 64  }
 0x689   : > { %v14077_v32 = vrot.slane %v3608_v24, %v13517_v11  ;;  %v14104_v16 = vrot.slane %v4625_v3, %v13550_v57  ;;  %20446 = vst [vmem:[#allocation132_spill] sm:$0xff] %v14113_v29 }
 0x68a   : > { %v14081_v34 = vpop.permute.xlu0 %2688  ;;  %v14088_v35 = vpop.permute.xlu1 %2606 }
 0x68b   : > { %20439 = vst [vmem:[#allocation126_spill] sm:$0xff] %v14081_v34  ;;  %v3657_v6 = vcombine.high %v14074_v56, %v14077_v32  ;;  %20440 = vst [vmem:[#allocation127_spill] sm:$0xff] %v14088_v35 }
 0x68c   : > { %2284 = vrot.lane.b32.xlu0 %v13883_v13, %s20441_s6  ;;  %2202 = vrot.lane.b32.xlu1 %v13996_v37, %s20276_s21  ;;  %20445 = vst [vmem:[#allocation131_spill] sm:$0xff] %v14104_v16 }
 0x68d   : > { %v14101_v41 = vrot.slane %v3657_v6, %v13550_v57 }
 0x68e   : > { %v14096_v24 = vpop.permute.xlu0 %2700  ;;  %v14098_v14 = vpop.permute.xlu1 %2618 }
 0x68f   : > { %20442 = vst [vmem:[#allocation128_spill] sm:$0xff] %v14096_v24  ;;  %20443 = vst [vmem:[#allocation129_spill] sm:$0xff] %v14098_v14  ;;  %v3712_v4 = vcombine.low %v14096_v24, %v13462_v39  ;;  %v4649_v6 = vcombine.high %v14064_v54, %v14098_v14 }
 0x690   : > { %20444 = vst [vmem:[#allocation130_spill] sm:$0xff] %v14101_v41  ;;  %2296 = vrot.lane.b32.xlu0 %v13883_v13, %s20281_s0  ;;  %2214 = vrot.lane.b32.xlu1 %v13996_v37, %s20423_s30  ;;  %s20501_s30 = smov 60  }
 0x691   : > { %v14137_v54 = vrot.slane %v3712_v4, %v13517_v11  ;;  %v4663_v55 = vrot.slane %v4649_v6, %v13517_v11 }
 0x692   : > { %v14120_v3 = vpop.permute.xlu0 %2712  ;;  %v14124_v17 = vpop.permute.xlu1 %2630 }
 0x693   : > { %20448 = vst [vmem:[#allocation134_spill] sm:$0xff] %v14120_v3  ;;  %v3696_v19 = vcombine.low %v14081_v34, %v14120_v3  ;;  %20449 = vst [vmem:[#allocation135_spill] sm:$0xff] %v14124_v17  ;;  %v4665_v26 = vcombine.high %v14088_v35, %v14124_v17 }
 0x694   : > { %2308 = vrot.lane.b32.xlu0 %v13883_v13, %s20282_s2  ;;  %2226 = vrot.lane.b32.xlu1 %v13996_v37, %s20277_s19  ;;  %s20504_s19 = smov 58  }
 0x695   : > { %v14140_v34 = vrot.slane %v3696_v19, %v13517_v11  ;;  %v4679_v24 = vrot.slane %v4665_v26, %v13517_v11  ;;  %v3744_v19 = vcombine.low %v13470_v12, %v13478_v22 }
 0x696   : > { %v14146_v3 = vpop.permute.xlu0 %2736  ;;  %v14150_v35 = vpop.permute.xlu1 %2642 }
 0x697   : > { %20450 = vst [vmem:[#allocation136_spill] sm:$0xff] %v14146_v3  ;;  %v3761_v14 = vcombine.high %v14140_v34, %v14137_v54  ;;  %20451 = vst [vmem:[#allocation137_spill] sm:$0xff] %v14150_v35  ;;  %v4729_v39 = vcombine.high %v4663_v55, %v4679_v24  ;;  %v14167_v16 = vrot.slane %v3744_v19, %v13517_v11 }
 0x698   : > { %2320 = vrot.lane.b32.xlu0 %v13883_v13, %s20283_s20  ;;  %2238 = vrot.lane.b32.xlu1 %v13996_v37, %s20249_s15 }
 0x69a   : > { %v14158_v4 = vpop.permute.xlu0 %2760  ;;  %v14162_v26 = vpop.permute.xlu1 %2654 }
 0x69b   : > { %20452 = vst [vmem:[#allocation138_spill] sm:$0xff] %v14158_v4  ;;  %v3728_v6 = vcombine.low %v14146_v3, %v14158_v4  ;;  %20453 = vst [vmem:[#allocation139_spill] sm:$0xff] %v14162_v26 }
 0x69c   : > { %2332 = vrot.lane.b32.xlu0 %v13883_v13, %s20250_s16  ;;  %2250 = vrot.lane.b32.xlu1 %v13996_v37, %s20278_s22 }
 0x69d   : > { %v14170_v31 = vrot.slane %v3728_v6, %v13517_v11 }
 0x69e   : > { %v14174_v12 = vpop.permute.xlu0 %2784  ;;  %v14178_v3 = vpop.permute.xlu1 %2666 }
 0x69f   : > { %20454 = vst [vmem:[#allocation140_spill] sm:$0xff] %v14174_v12  ;;  %v3793_v22 = vcombine.high %v14170_v31, %v14167_v16  ;;  %20455 = vst [vmem:[#allocation141_spill] sm:$0xff] %v14178_v3  ;;  %v4681_v6 = vcombine.high %v14150_v35, %v14178_v3  ;;  %v14192_v12 = vrot.slane %v3761_v14, %v13550_v57 }
 0x6a0   : > { %2344 = vrot.lane.b32.xlu0 %v13883_v13, %s20252_s26  ;;  %2262 = vrot.lane.b32.xlu1 %v13996_v37, %s20434_s9  ;;  %v4728_v3 = vcombine.low %v4663_v55, %v4679_v24  ;;  %s20531_s9 = smov 40  }
 0x6a1   : > { %v14185_v19 = vrot.slane %v3793_v22, %v13550_v57  ;;  %20458 = vst [vmem:[#allocation144_spill] sm:$0xff] %v14192_v12  ;;  %v4695_v14 = vrot.slane %v4681_v6, %v13517_v11 }
 0x6a2   : > { %v14189_v4 = vpop.permute.xlu0 %2808  ;;  %v14194_v17 = vpop.permute.xlu1 %2678 }
 0x6a3   : > { %20456 = vst [vmem:[#allocation142_spill] sm:$0xff] %v14185_v19  ;;  %20457 = vst [vmem:[#allocation143_spill] sm:$0xff] %v14189_v4  ;;  %v4697_v29 = vcombine.high %v14162_v26, %v14194_v17 }
 0x6a4   : > { %20459 = vst [vmem:[#allocation145_spill] sm:$0xff] %v14194_v17  ;;  %2356 = vrot.lane.b32.xlu0 %v13883_v13, %s20279_s24  ;;  %2274 = vrot.lane.b32.xlu1 %v13996_v37, %s20280_s27 }
 0x6a5   : > { %v4711_v4 = vrot.slane %v4697_v29, %v13517_v11  ;;  %v14224_v29 = vrot.slane %v4728_v3, %v13550_v57  ;;  %v14244_v3 = vrot.slane %v4729_v39, %v13550_v57 }
 0x6a6   : > { %v14208_v35 = vpop.permute.xlu0 %2832  ;;  %v14210_v26 = vpop.permute.xlu1 %2690 }
 0x6a7   : > { %20460 = vst [vmem:[#allocation146_spill] sm:$0xff] %v14208_v35  ;;  %20461 = vst [vmem:[#allocation147_spill] sm:$0xff] %v14210_v26  ;;  %v4760_v17 = vcombine.low %v4695_v14, %v4711_v4  ;;  %v4761_v63 = vcombine.high %v4695_v14, %v4711_v4 }
 0x6a8   : > { %2368 = vrot.lane.b32.xlu0 %v13883_v13, %s20284_s3  ;;  %2286 = vrot.lane.b32.xlu1 %v13996_v37, %s20441_s6  ;;  %20465 = vst [vmem:[#allocation151_spill] sm:$0xff] %v14224_v29  ;;  %20469 = vst [vmem:[#allocation155_spill] sm:$0xff] %v14244_v3  ;;  %s20567_s6 = smov 4  }
 0x6a9   : > { %v14219_v22 = vrot.slane %v4760_v17, %v13550_v57  ;;  %v14237_v17 = vrot.slane %v4761_v63, %v13550_v57 }
 0x6aa   : > { %v14216_v41 = vpop.permute.xlu0 %2856  ;;  %v14221_v6 = vpop.permute.xlu1 %2702 }
 0x6ab   : > { %20462 = vst [vmem:[#allocation148_spill] sm:$0xff] %v14216_v41  ;;  %20463 = vst [vmem:[#allocation149_spill] sm:$0xff] %v14219_v22 }
 0x6ac   : > { %20464 = vst [vmem:[#allocation150_spill] sm:$0xff] %v14221_v6  ;;  %2380 = vrot.lane.b32.xlu0 %v13883_v13, %s20285_s4  ;;  %2298 = vrot.lane.b32.xlu1 %v13996_v37, %s20281_s0  ;;  %20468 = vst [vmem:[#allocation154_spill] sm:$0xff] %v14237_v17 }
 0x6ae   : > { %v14232_v55 = vpop.permute.xlu0 %2714  ;;  %v14234_v4 = vpop.permute.xlu1 %2726 }
 0x6af   : > { %20466 = vst [vmem:[#allocation152_spill] sm:$0xff] %v14232_v55  ;;  %20467 = vst [vmem:[#allocation153_spill] sm:$0xff] %v14234_v4 }
 0x6b0   : > { %2392 = vrot.lane.b32.xlu0 %v13883_v13, %s20288_s23  ;;  %2310 = vrot.lane.b32.xlu1 %v13996_v37, %s20282_s2 }
 0x6b2   : > { %v14246_v14 = vpop.permute.xlu0 %2738  ;;  %v14248_v19 = vpop.permute.xlu1 %2750 }
 0x6b3   : > { %20470 = vst [vmem:[#allocation156_spill] sm:$0xff] %v14246_v14  ;;  %20471 = vst [vmem:[#allocation157_spill] sm:$0xff] %v14248_v19  ;;  %v2928_v14 = vcombine.low %v13492_v42, %v13512_v21  ;;  %v14631_v21 = vrot.slane %v2912_v8, %v13517_v11 }
 0x6b4   : > { %2404 = vrot.lane.b32.xlu0 %v13883_v13, %s20290_s1  ;;  %2322 = vrot.lane.b32.xlu1 %v13996_v37, %s20283_s20  ;;  %s20507_s20 = smov 56  }
 0x6b6   : > { %v14256_v63 = vpop.permute.xlu0 %2762  ;;  %v14258_v12 = vpop.permute.xlu1 %2774 }
 0x6b7   : > { %20472 = vst [vmem:[#allocation158_spill] sm:$0xff] %v14256_v63  ;;  %20473 = vst [vmem:[#allocation159_spill] sm:$0xff] %v14258_v12 }
 0x6b8   : > { %2416 = vrot.lane.b32.xlu0 %v13883_v13, %s20292_s14  ;;  %2334 = vrot.lane.b32.xlu1 %v13996_v37, %s20250_s16  ;;  %s20510_s16 = smov 54  }
 0x6ba   : > { %v14266_v24 = vpop.permute.xlu0 %2786  ;;  %v14268_v35 = vpop.permute.xlu1 %2798 }
 0x6bb   : > { %20474 = vst [vmem:[#allocation160_spill] sm:$0xff] %v14266_v24  ;;  %20475 = vst [vmem:[#allocation161_spill] sm:$0xff] %v14268_v35 }
 0x6bc   : > { %2428 = vrot.lane.b32.xlu0 %v13883_v13, %s20294_s5  ;;  %2346 = vrot.lane.b32.xlu1 %v13996_v37, %s20252_s26 }
 0x6be   : > { %v14274_v41 = vpop.permute.xlu0 %2810  ;;  %v14276_v29 = vpop.permute.xlu1 %2822 }
 0x6bf   : > { %20476 = vst [vmem:[#allocation162_spill] sm:$0xff] %v14274_v41  ;;  %20477 = vst [vmem:[#allocation163_spill] sm:$0xff] %v14276_v29  ;;  %v4920_v39 = vcombine.low %v14266_v24, %v14274_v41  ;;  %v4936_v17 = vcombine.low %v14268_v35, %v14276_v29 }
 0x6c0   : > { %2440 = vrot.lane.b32.xlu0 %v13883_v13, %s20296_s28  ;;  %2358 = vrot.lane.b32.xlu1 %v13996_v37, %s20279_s24  ;;  %s20513_s24 = smov 52  }
 0x6c1   : > { %v14295_v6 = vrot.slane %v4920_v39, %v13517_v11  ;;  %v14298_v4 = vrot.slane %v4936_v17, %v13517_v11 }
 0x6c2   : > { %v14286_v3 = vpop.permute.xlu0 %2834  ;;  %v14288_v22 = vpop.permute.xlu1 %2846 }
 0x6c3   : > { %20478 = vst [vmem:[#allocation164_spill] sm:$0xff] %v14286_v3  ;;  %20479 = vst [vmem:[#allocation165_spill] sm:$0xff] %v14288_v22  ;;  %v4985_v17 = vcombine.high %v14295_v6, %v14298_v4 }
 0x6c4   : > { %2452 = vrot.lane.b32.xlu0 %v13883_v13, %s20298_s18  ;;  %2370 = vrot.lane.b32.xlu1 %v13996_v37, %s20284_s3  ;;  %20480 = vst [vmem:[#allocation166_spill] sm:$0xff] %v14295_v6  ;;  %20481 = vst [vmem:[#allocation167_spill] sm:$0xff] %v14298_v4  ;;  %s20492_s3 = smov 66  }
 0x6c6   : > { %v14300_v24 = vpop.permute.xlu0 %2858  ;;  %v14304_v29 = vpop.permute.xlu1 %2870 }
 0x6c7   : > { %20482 = vst [vmem:[#allocation168_spill] sm:$0xff] %v14300_v24  ;;  %v4952_v35 = vcombine.low %v14286_v3, %v14300_v24  ;;  %20483 = vst [vmem:[#allocation169_spill] sm:$0xff] %v14304_v29  ;;  %v4968_v41 = vcombine.low %v14288_v22, %v14304_v29  ;;  %v14333_v29 = vrot.slane %v4985_v17, %v13550_v57 }
 0x6c8   : > { %2464 = vrot.lane.b32.xlu0 %v13883_v13, %s20301_s29  ;;  %2382 = vrot.lane.b32.xlu1 %v13996_v37, %s20285_s4 }
 0x6c9   : > { %v14311_v26 = vrot.slane %v4952_v35, %v13517_v11  ;;  %v14318_v39 = vrot.slane %v4968_v41, %v13517_v11  ;;  %20489 = vst [vmem:[#allocation175_spill] sm:$0xff] %v14333_v29 }
 0x6ca   : > { %v14320_v3 = vpop.permute.xlu0 %2128  ;;  %v14322_v24 = vpop.permute.xlu1 %2728 }
 0x6cb   : > { %20484 = vst [vmem:[#allocation170_spill] sm:$0xff] %v14311_v26  ;;  %20485 = vst [vmem:[#allocation171_spill] sm:$0xff] %v14318_v39  ;;  %v5017_v22 = vcombine.high %v14311_v26, %v14318_v39 }
 0x6cc   : > { %20486 = vst [vmem:[#allocation172_spill] sm:$0xff] %v14320_v3  ;;  %20487 = vst [vmem:[#allocation173_spill] sm:$0xff] %v14322_v24  ;;  %2476 = vrot.lane.b32.xlu0 %v13883_v13, %s20287_s17  ;;  %2394 = vrot.lane.b32.xlu1 %v13996_v37, %s20288_s23 }
 0x6cd   : > { %v14336_v41 = vrot.slane %v5017_v22, %v13550_v57 }
 0x6ce   : > { %v14330_v35 = vpop.permute.xlu0 %2140  ;;  %v14338_v3 = vpop.permute.xlu1 %2752 }
 0x6cf   : > { %20488 = vst [vmem:[#allocation174_spill] sm:$0xff] %v14330_v35  ;;  %20490 = vst [vmem:[#allocation176_spill] sm:$0xff] %v14336_v41 }
 0x6d0   : > { %20491 = vst [vmem:[#allocation177_spill] sm:$0xff] %v14338_v3  ;;  %2488 = vrot.lane.b32.xlu0 %v13883_v13, %s20492_s3  ;;  %2406 = vrot.lane.b32.xlu1 %v13996_v37, %s20290_s1 }
 0x6d2   : > { %v14346_v4 = vpop.permute.xlu0 %2152  ;;  %v14348_v35 = vpop.permute.xlu1 %2776 }
 0x6d3   : > { %20493 = vst [vmem:[#allocation178_spill] sm:$0xff] %v14346_v4  ;;  %20494 = vst [vmem:[#allocation179_spill] sm:$0xff] %v14348_v35 }
 0x6d4   : > { %2500 = vrot.lane.b32.xlu0 %v13883_v13, %s20495_s11  ;;  %2418 = vrot.lane.b32.xlu1 %v13996_v37, %s20292_s14 }
 0x6d6   : > { %v14354_v22 = vpop.permute.xlu0 %2164  ;;  %v14356_v17 = vpop.permute.xlu1 %2800 }
 0x6d7   : > { %20496 = vst [vmem:[#allocation180_spill] sm:$0xff] %v14354_v22  ;;  %20497 = vst [vmem:[#allocation181_spill] sm:$0xff] %v14356_v17 }
 0x6d8   : > { %2512 = vrot.lane.b32.xlu0 %v13883_v13, %s20498_s12  ;;  %2430 = vrot.lane.b32.xlu1 %v13996_v37, %s20294_s5 }
 0x6da   : > { %v14362_v6 = vpop.permute.xlu0 %2176  ;;  %v14364_v29 = vpop.permute.xlu1 %2824 }
 0x6db   : > { %20499 = vst [vmem:[#allocation182_spill] sm:$0xff] %v14362_v6  ;;  %20500 = vst [vmem:[#allocation183_spill] sm:$0xff] %v14364_v29 }
 0x6dc   : > { %2524 = vrot.lane.b32.xlu0 %v13883_v13, %s20501_s30  ;;  %2442 = vrot.lane.b32.xlu1 %v13996_v37, %s20296_s28 }
 0x6de   : > { %v14370_v41 = vpop.permute.xlu0 %2188  ;;  %v14372_v22 = vpop.permute.xlu1 %2848 }
 0x6df   : > { %20502 = vst [vmem:[#allocation184_spill] sm:$0xff] %v14370_v41  ;;  %20503 = vst [vmem:[#allocation185_spill] sm:$0xff] %v14372_v22 }
 0x6e0   : > { %2536 = vrot.lane.b32.xlu0 %v13883_v13, %s20504_s19  ;;  %2454 = vrot.lane.b32.xlu1 %v13996_v37, %s20298_s18 }
 0x6e2   : > { %v14378_v4 = vpop.permute.xlu0 %2200  ;;  %v14380_v6 = vpop.permute.xlu1 %2872 }
 0x6e3   : > { %20505 = vst [vmem:[#allocation186_spill] sm:$0xff] %v14378_v4  ;;  %20506 = vst [vmem:[#allocation187_spill] sm:$0xff] %v14380_v6 }
 0x6e4   : > { %2548 = vrot.lane.b32.xlu0 %v13883_v13, %s20507_s20  ;;  %2466 = vrot.lane.b32.xlu1 %v13996_v37, %s20301_s29  ;;  %s20516_s29 = smov 50  }
 0x6e6   : > { %v14386_v26 = vpop.permute.xlu0 %2212  ;;  %v14388_v41 = vpop.permute.xlu1 %2130 }
 0x6e7   : > { %20508 = vst [vmem:[#allocation188_spill] sm:$0xff] %v14386_v26  ;;  %20509 = vst [vmem:[#allocation189_spill] sm:$0xff] %v14388_v41 }
 0x6e8   : > { %2560 = vrot.lane.b32.xlu0 %v13883_v13, %s20510_s16  ;;  %2478 = vrot.lane.b32.xlu1 %v13996_v37, %s20287_s17  ;;  %s20519_s17 = smov 48  }
 0x6ea   : > { %v14394_v39 = vpop.permute.xlu0 %2224  ;;  %v14396_v4 = vpop.permute.xlu1 %2142 }
 0x6eb   : > { %20511 = vst [vmem:[#allocation190_spill] sm:$0xff] %v14394_v39  ;;  %20512 = vst [vmem:[#allocation191_spill] sm:$0xff] %v14396_v4 }
 0x6ec   : > { %2572 = vrot.lane.b32.xlu0 %v13883_v13, %s20513_s24  ;;  %2490 = vrot.lane.b32.xlu1 %v13996_v37, %s20492_s3  ;;  %s20522_s3 = smov 46  }
 0x6ee   : > { %v14402_v55 = vpop.permute.xlu0 %2236  ;;  %v14404_v26 = vpop.permute.xlu1 %2154 }
 0x6ef   : > { %20514 = vst [vmem:[#allocation192_spill] sm:$0xff] %v14402_v55  ;;  %20515 = vst [vmem:[#allocation193_spill] sm:$0xff] %v14404_v26 }
 0x6f0   : > { %2584 = vrot.lane.b32.xlu0 %v13883_v13, %s20516_s29  ;;  %2502 = vrot.lane.b32.xlu1 %v13996_v37, %s20495_s11  ;;  %s20525_s11 = smov 44  }
 0x6f2   : > { %v14410_v41 = vpop.permute.xlu0 %2248  ;;  %v14412_v39 = vpop.permute.xlu1 %2166 }
 0x6f3   : > { %20517 = vst [vmem:[#allocation194_spill] sm:$0xff] %v14410_v41  ;;  %20518 = vst [vmem:[#allocation195_spill] sm:$0xff] %v14412_v39 }
 0x6f4   : > { %2596 = vrot.lane.b32.xlu0 %v13883_v13, %s20519_s17  ;;  %2514 = vrot.lane.b32.xlu1 %v13996_v37, %s20498_s12  ;;  %s20528_s12 = smov 42  }
 0x6f6   : > { %v14418_v4 = vpop.permute.xlu0 %2260  ;;  %v14420_v55 = vpop.permute.xlu1 %2178 }
 0x6f7   : > { %20520 = vst [vmem:[#allocation196_spill] sm:$0xff] %v14418_v4  ;;  %20521 = vst [vmem:[#allocation197_spill] sm:$0xff] %v14420_v55 }
 0x6f8   : > { %2608 = vrot.lane.b32.xlu0 %v13883_v13, %s20522_s3  ;;  %2526 = vrot.lane.b32.xlu1 %v13996_v37, %s20501_s30 }
 0x6fa   : > { %v14426_v26 = vpop.permute.xlu0 %2272  ;;  %v14428_v41 = vpop.permute.xlu1 %2190 }
 0x6fb   : > { %20523 = vst [vmem:[#allocation198_spill] sm:$0xff] %v14426_v26  ;;  %20524 = vst [vmem:[#allocation199_spill] sm:$0xff] %v14428_v41 }
 0x6fc   : > { %2620 = vrot.lane.b32.xlu0 %v13883_v13, %s20525_s11  ;;  %2538 = vrot.lane.b32.xlu1 %v13996_v37, %s20504_s19  ;;  %s20534_s19 = smov 38  }
 0x6fe   : > { %v14434_v39 = vpop.permute.xlu0 %2284  ;;  %v14436_v4 = vpop.permute.xlu1 %2202 }
 0x6ff   : > { %20526 = vst [vmem:[#allocation200_spill] sm:$0xff] %v14434_v39  ;;  %20527 = vst [vmem:[#allocation201_spill] sm:$0xff] %v14436_v4 }
 0x700   : > { %2632 = vrot.lane.b32.xlu0 %v13883_v13, %s20528_s12  ;;  %2550 = vrot.lane.b32.xlu1 %v13996_v37, %s20507_s20  ;;  %s20537_s20 = smov 36  }
 0x702   : > { %v14442_v55 = vpop.permute.xlu0 %2296  ;;  %v14444_v26 = vpop.permute.xlu1 %2214 }
 0x703   : > { %20529 = vst [vmem:[#allocation202_spill] sm:$0xff] %v14442_v55  ;;  %20530 = vst [vmem:[#allocation203_spill] sm:$0xff] %v14444_v26 }
 0x704   : > { %2644 = vrot.lane.b32.xlu0 %v13883_v13, %s20531_s9  ;;  %2562 = vrot.lane.b32.xlu1 %v13996_v37, %s20510_s16  ;;  %s20540_s16 = smov 34  }
 0x706   : > { %v14450_v41 = vpop.permute.xlu0 %2308  ;;  %v14452_v39 = vpop.permute.xlu1 %2226 }
 0x707   : > { %20532 = vst [vmem:[#allocation204_spill] sm:$0xff] %v14450_v41  ;;  %20533 = vst [vmem:[#allocation205_spill] sm:$0xff] %v14452_v39 }
 0x708   : > { %2656 = vrot.lane.b32.xlu0 %v13883_v13, %s20534_s19  ;;  %2574 = vrot.lane.b32.xlu1 %v13996_v37, %s20513_s24  ;;  %s20543_s24 = smov 32  }
 0x70a   : > { %v14458_v4 = vpop.permute.xlu0 %2320  ;;  %v14460_v55 = vpop.permute.xlu1 %2238 }
 0x70b   : > { %20535 = vst [vmem:[#allocation206_spill] sm:$0xff] %v14458_v4  ;;  %20536 = vst [vmem:[#allocation207_spill] sm:$0xff] %v14460_v55 }
 0x70c   : > { %2668 = vrot.lane.b32.xlu0 %v13883_v13, %s20537_s20  ;;  %2586 = vrot.lane.b32.xlu1 %v13996_v37, %s20516_s29  ;;  %s20546_s29 = smov 30  }
 0x70e   : > { %v14466_v26 = vpop.permute.xlu0 %2332  ;;  %v14468_v41 = vpop.permute.xlu1 %2250 }
 0x70f   : > { %20538 = vst [vmem:[#allocation208_spill] sm:$0xff] %v14466_v26  ;;  %20539 = vst [vmem:[#allocation209_spill] sm:$0xff] %v14468_v41 }
 0x710   : > { %2680 = vrot.lane.b32.xlu0 %v13883_v13, %s20540_s16  ;;  %2598 = vrot.lane.b32.xlu1 %v13996_v37, %s20519_s17 }
 0x712   : > { %v14474_v39 = vpop.permute.xlu0 %2344  ;;  %v14476_v4 = vpop.permute.xlu1 %2262 }
 0x713   : > { %20541 = vst [vmem:[#allocation210_spill] sm:$0xff] %v14474_v39  ;;  %20542 = vst [vmem:[#allocation211_spill] sm:$0xff] %v14476_v4 }
 0x714   : > { %2692 = vrot.lane.b32.xlu0 %v13883_v13, %s20543_s24  ;;  %2610 = vrot.lane.b32.xlu1 %v13996_v37, %s20522_s3  ;;  %s20552_s3 = smov 24  }
 0x716   : > { %v14482_v55 = vpop.permute.xlu0 %2356  ;;  %v14484_v26 = vpop.permute.xlu1 %2274 }
 0x717   : > { %20544 = vst [vmem:[#allocation212_spill] sm:$0xff] %v14482_v55  ;;  %20545 = vst [vmem:[#allocation213_spill] sm:$0xff] %v14484_v26 }
 0x718   : > { %2704 = vrot.lane.b32.xlu0 %v13883_v13, %s20546_s29  ;;  %2622 = vrot.lane.b32.xlu1 %v13996_v37, %s20525_s11  ;;  %s20555_s11 = smov 20  }
 0x71a   : > { %v14490_v41 = vpop.permute.xlu0 %2368  ;;  %v14492_v39 = vpop.permute.xlu1 %2286 }
 0x71b   : > { %20547 = vst [vmem:[#allocation214_spill] sm:$0xff] %v14490_v41  ;;  %20548 = vst [vmem:[#allocation215_spill] sm:$0xff] %v14492_v39 }
 0x71c   : > { %2716 = vrot.lane.b32.xlu0 %v13883_v13, %s20549_s25  ;;  %2634 = vrot.lane.b32.xlu1 %v13996_v37, %s20528_s12  ;;  %s20558_s12 = smov 16  }
 0x71e   : > { %v14498_v4 = vpop.permute.xlu0 %2380  ;;  %v14500_v55 = vpop.permute.xlu1 %2298 }
 0x71f   : > { %20550 = vst [vmem:[#allocation216_spill] sm:$0xff] %v14498_v4  ;;  %20551 = vst [vmem:[#allocation217_spill] sm:$0xff] %v14500_v55 }
 0x720   : > { %2740 = vrot.lane.b32.xlu0 %v13883_v13, %s20552_s3  ;;  %2646 = vrot.lane.b32.xlu1 %v13996_v37, %s20531_s9  ;;  %s20561_s9 = smov 12  }
 0x722   : > { %v14506_v26 = vpop.permute.xlu0 %2392  ;;  %v14508_v41 = vpop.permute.xlu1 %2310 }
 0x723   : > { %20553 = vst [vmem:[#allocation218_spill] sm:$0xff] %v14506_v26  ;;  %20554 = vst [vmem:[#allocation219_spill] sm:$0xff] %v14508_v41 }
 0x724   : > { %2764 = vrot.lane.b32.xlu0 %v13883_v13, %s20555_s11  ;;  %2658 = vrot.lane.b32.xlu1 %v13996_v37, %s20534_s19  ;;  %s20564_s19 = smov 8  }
 0x726   : > { %v14514_v39 = vpop.permute.xlu0 %2404  ;;  %v14516_v4 = vpop.permute.xlu1 %2322 }
 0x727   : > { %20556 = vst [vmem:[#allocation220_spill] sm:$0xff] %v14514_v39  ;;  %20557 = vst [vmem:[#allocation221_spill] sm:$0xff] %v14516_v4 }
 0x728   : > { %2788 = vrot.lane.b32.xlu0 %v13883_v13, %s20558_s12  ;;  %2670 = vrot.lane.b32.xlu1 %v13996_v37, %s20537_s20 }
 0x72a   : > { %v14522_v55 = vpop.permute.xlu0 %2416  ;;  %v14524_v26 = vpop.permute.xlu1 %2334 }
 0x72b   : > { %20559 = vst [vmem:[#allocation222_spill] sm:$0xff] %v14522_v55  ;;  %20560 = vst [vmem:[#allocation223_spill] sm:$0xff] %v14524_v26 }
 0x72c   : > { %2812 = vrot.lane.b32.xlu0 %v13883_v13, %s20561_s9  ;;  %2682 = vrot.lane.b32.xlu1 %v13996_v37, %s20540_s16  ;;  %s20572_s16 = smov 22  }
 0x72e   : > { %v14530_v41 = vpop.permute.xlu0 %2428  ;;  %v14532_v39 = vpop.permute.xlu1 %2346 }
 0x72f   : > { %20562 = vst [vmem:[#allocation224_spill] sm:$0xff] %v14530_v41  ;;  %20563 = vst [vmem:[#allocation225_spill] sm:$0xff] %v14532_v39 }
 0x730   : > { %2836 = vrot.lane.b32.xlu0 %v13883_v13, %s20564_s19  ;;  %2694 = vrot.lane.b32.xlu1 %v13996_v37, %s20543_s24  ;;  %s20583_s24 = smov 6  }
 0x732   : > { %v14538_v4 = vpop.permute.xlu0 %2440  ;;  %v14540_v55 = vpop.permute.xlu1 %2358 }
 0x733   : > { %20565 = vst [vmem:[#allocation226_spill] sm:$0xff] %v14538_v4  ;;  %20566 = vst [vmem:[#allocation227_spill] sm:$0xff] %v14540_v55 }
 0x734   : > { %2860 = vrot.lane.b32.xlu0 %v13883_v13, %s20567_s6  ;;  %2706 = vrot.lane.b32.xlu1 %v13996_v37, %s20546_s29 }
 0x736   : > { %v14546_v26 = vpop.permute.xlu0 %2452  ;;  %v14548_v41 = vpop.permute.xlu1 %2370 }
 0x737   : > { %20568 = vst [vmem:[#allocation228_spill] sm:$0xff] %v14546_v26  ;;  %20569 = vst [vmem:[#allocation229_spill] sm:$0xff] %v14548_v41 }
 0x738   : > { %2718 = vrot.lane.b32.xlu0 %v13996_v37, %s20549_s25  ;;  %2730 = vrot.lane.b32.xlu1 %v13996_v37, %s20367_s7  ;;  %s20575_s25 = smov 18   ;;  %s20578_s7 = smov 14  }
 0x73a   : > { %v14554_v39 = vpop.permute.xlu0 %2464  ;;  %v14556_v4 = vpop.permute.xlu1 %2382 }
 0x73b   : > { %20570 = vst [vmem:[#allocation230_spill] sm:$0xff] %v14554_v39  ;;  %20571 = vst [vmem:[#allocation231_spill] sm:$0xff] %v14556_v4 }
 0x73c   : > { %2742 = vrot.lane.b32.xlu0 %v13996_v37, %s20552_s3  ;;  %2754 = vrot.lane.b32.xlu1 %v13996_v37, %s20572_s16  ;;  %s21000_s16 = sld [smem:[#allocation276_spill]] }
 0x73e   : > { %v14562_v55 = vpop.permute.xlu0 %2476  ;;  %v14564_v26 = vpop.permute.xlu1 %2394 }
 0x73f   : > { %20573 = vst [vmem:[#allocation232_spill] sm:$0xff] %v14562_v55  ;;  %20574 = vst [vmem:[#allocation233_spill] sm:$0xff] %v14564_v26 }
 0x740   : > { %2766 = vrot.lane.b32.xlu0 %v13996_v37, %s20555_s11  ;;  %2778 = vrot.lane.b32.xlu1 %v13996_v37, %s20575_s25  ;;  %s21153_s11 = sld [smem:[#allocation278_spill]] }
 0x742   : > { %v14570_v41 = vpop.permute.xlu0 %2488  ;;  %v14572_v39 = vpop.permute.xlu1 %2406 }
 0x743   : > { %20576 = vst [vmem:[#allocation234_spill] sm:$0xff] %v14570_v41  ;;  %20577 = vst [vmem:[#allocation235_spill] sm:$0xff] %v14572_v39 }
 0x744   : > { %2790 = vrot.lane.b32.xlu0 %v13996_v37, %s20558_s12  ;;  %2802 = vrot.lane.b32.xlu1 %v13996_v37, %s20578_s7  ;;  %s21152_s7 = sld [smem:[#allocation277_spill]] }
 0x746   : > { %v14578_v4 = vpop.permute.xlu0 %2500  ;;  %v14580_v55 = vpop.permute.xlu1 %2418 }
 0x747   : > { %20579 = vst [vmem:[#allocation236_spill] sm:$0xff] %v14578_v4  ;;  %20580 = vst [vmem:[#allocation237_spill] sm:$0xff] %v14580_v55 }
 0x748   : > { %2814 = vrot.lane.b32.xlu0 %v13996_v37, %s20561_s9  ;;  %2826 = vrot.lane.b32.xlu1 %v13996_v37, %s20382_s10  ;;  %s21154_s9 = sld [smem:[#allocation281_spill]] }
 0x74a   : > { %v14586_v26 = vpop.permute.xlu0 %2512  ;;  %v14588_v41 = vpop.permute.xlu1 %2430 }
 0x74b   : > { %20581 = vst [vmem:[#allocation238_spill] sm:$0xff] %v14586_v26  ;;  %20582 = vst [vmem:[#allocation239_spill] sm:$0xff] %v14588_v41 }
 0x74c   : > { %2838 = vrot.lane.b32.xlu0 %v13996_v37, %s20564_s19  ;;  %2850 = vrot.lane.b32.xlu1 %v13996_v37, %s20583_s24  ;;  %s21174_s24 = sld [smem:[#allocation280_spill]] }
 0x74e   : > { %v14594_v39 = vpop.permute.xlu0 %2524  ;;  %v14596_v13 = vpop.permute.xlu1 %2442 }
 0x74f   : > { %20584 = vst [vmem:[#allocation240_spill] sm:$0xff] %v14594_v39  ;;  %20585 = vst [vmem:[#allocation241_spill] sm:$0xff] %v14596_v13  ;;  %v2896_v13 = vcombine.low %v13460_v38, %v13476_v23  ;;  %v3064_v38 = vcombine.low %v13594_v9, %v13610_v1  ;;  %v5601_v0 = vcombine.high %v14578_v4, %v14594_v39  ;;  %v20603_v39 = vld [vmem:[#allocation67_spill] sm:$0xff] }
 0x750   : > { %2862 = vrot.lane.b32.xlu0 %v13996_v37, %s20567_s6  ;;  %2874 = vrot.lane.b32.xlu1 %v13996_v37, %s20391_s8  ;;  %v2880_v37 = vcombine.low %v13303_v18, %v13468_v43  ;;  %v3032_v43 = vcombine.low %v13554_v53, %v13578_v52  ;;  %v3168_v52 = vcombine.low %v13637_v30, %v13668_v61 }
 0x751   : > { %v14628_v42 = vrot.slane %v2896_v13, %v13517_v11  ;;  %v3016_v13 = vcombine.low %v13536_v49, %v13565_v46  ;;  %v3056_v49 = vrot.slane %v3048_v25, %v13517_v11  ;;  %v3152_v30 = vcombine.low %v13620_v36, %v13656_v10 }
 0x752   : > { %v14602_v55 = vpop.permute.xlu0 %2536  ;;  %v14604_v19 = vpop.permute.xlu1 %2454  ;;  %v14636_v23 = vrot.slane %v2880_v37, %v13517_v11  ;;  %v3072_v37 = vrot.slane %v3064_v38, %v13517_v11  ;;  %v3040_v46 = vrot.slane %v3032_v43, %v13517_v11  ;;  %v14671_v61 = vrot.slane %v3200_v44, %v13517_v11 }
 0x753   : > { %20586 = vst [vmem:[#allocation242_spill] sm:$0xff] %v14602_v55  ;;  %20587 = vst [vmem:[#allocation243_spill] sm:$0xff] %v14604_v19  ;;  %v14621_v19 = vrot.slane %v2928_v14, %v13517_v11  ;;  %v5617_v47 = vcombine.high %v14586_v26, %v14602_v55  ;;  %v14683_v25 = vrot.slane %v3168_v52, %v13517_v11  ;;  %v20599_v52 = vld [vmem:[#allocation73_spill] sm:$0xff]  ;;  %v20605_v26 = vld [vmem:[#allocation75_spill] sm:$0xff] }
 0x754   : > { %v2944_v9 = vcombine.low %v14636_v23, %v14628_v42  ;;  %v3112_v43 = vcombine.low %v3056_v49, %v3072_v37  ;;  %v14686_v10 = vrot.slane %v3184_v15, %v13517_v11  ;;  %v20606_v55 = vld [vmem:[#allocation71_spill] sm:$0xff] }
 0x755   : > { %v2976_v18 = vcombine.low %v14631_v21, %v14621_v19  ;;  %v14689_v36 = vrot.slane %v5617_v47, %v13517_v11  ;;  %v14706_v47 = vrot.slane %v5601_v0, %v13517_v11 }
 0x756   : > { %v14606_v41 = vpop.permute.xlu0 %2548  ;;  %v14608_v12 = vpop.permute.xlu1 %2466  ;;  %v2952_v38 = vrot.slane %v2944_v9, %v13550_v57  ;;  %v14695_v9 = vrot.slane %v3152_v30, %v13517_v11 }
 0x757   : > { %20588 = vst [vmem:[#allocation244_spill] sm:$0xff] %v14606_v41  ;;  %20589 = vst [vmem:[#allocation245_spill] sm:$0xff] %v14608_v12  ;;  %v2984_v33 = vrot.slane %v2976_v18, %v13550_v57  ;;  %v3024_v18 = vrot.slane %v3016_v13, %v13517_v11  ;;  %v3248_v13 = vcombine.low %v14686_v10, %v14671_v61 }
 0x758   : > { %20597 = vst [vmem:[#allocation253_spill] sm:$0xff] %v14689_v36  ;;  %20602 = vst [vmem:[#allocation256_spill] sm:$0xff] %v14706_v47  ;;  %v3216_v30 = vcombine.low %v14695_v9, %v14683_v25 }
 0x75a   : > { %v14612_v63 = vpop.permute.xlu0 %2560  ;;  %v14623_v58 = vpop.permute.xlu1 %2478 }
 0x75b   : > { %20590 = vst [vmem:[#allocation246_spill] sm:$0xff] %v14612_v63  ;;  %20591 = vst [vmem:[#allocation247_spill] sm:$0xff] %v14623_v58  ;;  %v3080_v58 = vcombine.low %v3024_v18, %v3040_v46 }
 0x75e   : > { %v14625_v12 = vpop.permute.xlu0 %2572  ;;  %v14659_v53 = vpop.permute.xlu1 %2490 }
 0x75f   : > { %20592 = vst [vmem:[#allocation248_spill] sm:$0xff] %v14625_v12  ;;  %20594 = vst [vmem:[#allocation250_spill] sm:$0xff] %v14659_v53  ;;  %v5633_v59 = vcombine.high %v14606_v41, %v14625_v12  ;;  %v3336_v53 = vcombine.low %v20599_v52, %v13812_v27  ;;  %v20604_v41 = vld [vmem:[#allocation63_spill] sm:$0xff]  ;;  %v3120_v27 = vrot.slane %v3112_v43, %v13550_v57 }
 0x760   : > { %v3304_v12 = vcombine.low %v20604_v41, %v20603_v39  ;;  %v3113_v52 = vcombine.high %v3056_v49, %v3072_v37  ;;  %v3088_v39 = vrot.slane %v3080_v58, %v13550_v57  ;;  %v3224_v49 = vrot.slane %v3216_v30, %v13550_v57 }
 0x761   : > { %v14692_v44 = vrot.slane %v5633_v59, %v13517_v11  ;;  %v14723_v22 = vrot.slane %v3336_v53, %v13517_v11  ;;  %v3456_v30 = vcombine.low %v13891_v48, %v13913_v45 }
 0x762   : > { %v14646_v8 = vpop.permute.xlu0 %2584  ;;  %v14701_v15 = vpop.permute.xlu1 %2502  ;;  %v14733_v37 = vrot.slane %v3304_v12, %v13517_v11  ;;  %v3144_v53 = vcombine.low %v3088_v39, %v3120_v27 }
 0x763   : > { %20593 = vst [vmem:[#allocation249_spill] sm:$0xff] %v14646_v8  ;;  %v5649_v1 = vcombine.high %v14612_v63, %v14646_v8  ;;  %20598 = vst [vmem:[#allocation254_spill] sm:$0xff] %v14692_v44  ;;  %v3320_v63 = vcombine.low %v20606_v55, %v20605_v26  ;;  %v3009_v8 = vcombine.high %v2952_v38, %v2984_v33 }
 0x764   : > { %20600 = vst [vmem:[#allocation73_spill] sm:$0xff] %v14701_v15  ;;  %v5681_v15 = vcombine.high %v14706_v47, %v14689_v36  ;;  %v3256_v26 = vrot.slane %v3248_v13, %v13550_v57  ;;  %v3081_v55 = vcombine.high %v3024_v18, %v3040_v46  ;;  %v20673_v47 = vld [vmem:[#allocation185_spill] sm:$0xff] }
 0x765   : > { %v14678_v14 = vrot.slane %v5649_v1, %v13517_v11  ;;  %v3008_v1 = vcombine.low %v2952_v38, %v2984_v33  ;;  %v14736_v33 = vrot.slane %v3320_v63, %v13517_v11  ;;  %v7256_v58 = vsel %vm1786_vm9, %v3009_v8, -inf }
 0x766   : > { %v14673_v40 = vpop.permute.xlu0 %2596  ;;  %v14743_v38 = vrot.slane %v3113_v52, %v13550_v57  ;;  %v14746_v46 = vrot.slane %v5681_v15, %v13550_v57  ;;  %v3472_v63 = vcombine.low %v13901_v60, %v13934_v51  ;;  %v2977_v8 = vcombine.high %v14631_v21, %v14621_v19  ;;  %v20647_v51 = vld [vmem:[#allocation41_spill] sm:$0xff] }
 0x767   : > { %20595 = vst [vmem:[#allocation251_spill] sm:$0xff] %v14673_v40  ;;  %20596 = vst [vmem:[#allocation252_spill] sm:$0xff] %v14678_v14  ;;  %v5713_v59 = vcombine.high %v14692_v44, %v14678_v14  ;;  %v7232_v0 = vsel %vm1786_vm9, %v3008_v1, -inf  ;;  %v20608_v44 = vld [vmem:[#allocation61_spill] sm:$0xff]  ;;  %v3384_v12 = vcombine.low %v14736_v33, %v14723_v22  ;;  %v3145_v1 = vcombine.high %v3088_v39, %v3120_v27  ;;  %v20614_v27 = vld [vmem:[#allocation78_spill] sm:$0xff] }
 0x768   : > { %v3288_v14 = vcombine.low %v20608_v44, %v20607_v5  ;;  %v14738_v5 = vpop.permute.xlu1 %2514  ;;  %20612 = vst [vmem:[#allocation71_spill] sm:$0xff] %v14746_v46  ;;  %v3281_v44 = vcombine.high %v3224_v49, %v3256_v26  ;;  %v14760_v13 = vrot.slane %v3081_v55, %v13550_v57  ;;  %v7235_v52 = vsel %vm1786_vm9, %v3144_v53, -inf }
 0x769   : > { %v14730_v41 = vrot.slane %v5713_v59, %v13550_v57  ;;  %20611 = vst [vmem:[#allocation75_spill] sm:$0xff] %v14738_v5  ;;  %v3440_v59 = vcombine.low %v13832_v28, %v13870_v7  ;;  %v2945_v19 = vcombine.high %v14636_v23, %v14628_v42  ;;  %v14778_v39 = vrot.slane %v3472_v63, %v13517_v11  ;;  %v20621_v28 = vld [vmem:[#allocation47_spill] sm:$0xff]  ;;  %v20653_v5 = vld [vmem:[#allocation38_spill] sm:$0xff] }
 0x76a   : > { %v14703_v4 = vpop.permute.xlu0 %2608  ;;  %v14749_v18 = vrot.slane %v3288_v14, %v13517_v11  ;;  %v3146_v21 = vcombine.low %v14760_v13, %v14743_v38  ;;  %v7262_v14 = vsel %vm1786_vm9, %v3281_v44, -inf  ;;  %v3392_v53 = vrot.slane %v3384_v12, %v13550_v57 }
 0x76b   : > { %20601 = vst [vmem:[#allocation255_spill] sm:$0xff] %v14703_v4  ;;  %20610 = vst [vmem:[#allocation63_spill] sm:$0xff] %v14730_v41  ;;  %v7259_v42 = vsel %vm1786_vm9, %v3145_v1, -inf  ;;  %v2991_v23 = vrot.slane %v2977_v8, %v13550_v57  ;;  %v3280_v63 = vcombine.low %v3224_v49, %v3256_v26  ;;  %v2959_v48 = vrot.slane %v2945_v19, %v13550_v57 }
 0x76c   : > { %v3352_v15 = vcombine.low %v14749_v18, %v14733_v37  ;;  %v14780_v55 = vpop.permute.xlu1 %2526  ;;  %v7283_v8 = vsel %vm1786_vm9, %v3146_v21, -inf  ;;  %v3249_v26 = vcombine.high %v14686_v10, %v14671_v61  ;;  %v3217_v19 = vcombine.high %v14695_v9, %v14683_v25 }
 0x76d   : > { %20615 = vst [vmem:[#allocation61_spill] sm:$0xff] %v14780_v55 }
 0x76e   : > { %v14725_v6 = vpop.permute.xlu0 %2620 }
 0x76f   : > { %20609 = vst [vmem:[#allocation67_spill] sm:$0xff] %v14725_v6  ;;  %7233 = vmax.xlane.f32.xlu0 %v7232_v0  ;;  %v3424_v0 = vcombine.low %v20614_v27, %v13845_v50  ;;  %v14792_v27 = vrot.slane %v3456_v30, %v13517_v11  ;;  %v3360_v50 = vrot.slane %v3352_v15, %v13550_v57 }
 0x770   : > { %v14808_v15 = vpop.permute.xlu1 %2538  ;;  %v3010_v30 = vcombine.low %v2959_v48, %v2991_v23 }
 0x771   : > { %v14797_v44 = vrot.slane %v3424_v0, %v13517_v11  ;;  %v3520_v12 = vcombine.low %v14792_v27, %v14778_v39  ;;  %20618 = vst [vmem:[#allocation259_spill] sm:$0xff] %v14808_v15  ;;  %v3416_v10 = vcombine.low %v3360_v50, %v3392_v53 }
 0x772   : > { %v14755_v43 = vpop.permute.xlu0 %2632  ;;  %v7280_v61 = vsel %vm1786_vm9, %v3010_v30, -inf  ;;  %v20625_v30 = vld [vmem:[#allocation48_spill] sm:$0xff] }
 0x773   : > { %20613 = vst [vmem:[#allocation65_spill] sm:$0xff] %v14755_v43  ;;  %7257 = vmax.xlane.f32.xlu0 %v7256_v58 }
 0x774   : > { %7236 = vmax.xlane.f32.xlu1 %v7235_v52  ;;  %v14789_v52 = vrot.slane %v3440_v59, %v13517_v11  ;;  %v7238_v59 = vsel %vm1786_vm9, %v3280_v63, -inf  ;;  %v3263_v63 = vrot.slane %v3249_v26, %v13550_v57  ;;  %v14822_v25 = vpop.permute.xlu1 %2550 }
 0x776   : > { %v14782_v58 = vpop.permute.xlu0 %2644  ;;  %v3488_v49 = vcombine.low %v14797_v44, %v14789_v52 }
 0x777   : > { %20616 = vst [vmem:[#allocation257_spill] sm:$0xff] %v14782_v58  ;;  %7263 = vmax.xlane.f32.xlu0 %v7262_v14  ;;  %v3417_v14 = vcombine.high %v3360_v50, %v3392_v53  ;;  %v7241_v53 = vsel %vm1786_vm9, %v3416_v10, -inf  ;;  %v3385_v10 = vcombine.high %v14736_v33, %v14723_v22  ;;  %v3353_v22 = vcombine.high %v14749_v18, %v14733_v37 }
 0x778   : > { %7260 = vmax.xlane.f32.xlu1 %v7259_v42  ;;  %v3011_v42 = vcombine.high %v2959_v48, %v2991_v23  ;;  %v3496_v45 = vrot.slane %v3488_v49, %v13550_v57 }
 0x779   : > { %v7265_v21 = vsel %vm1786_vm9, %v3417_v14, -inf  ;;  %v20624_v14 = vld [vmem:[#allocation46_spill] sm:$0xff] }
 0x77a   : > { %v14801_v1 = vpop.permute.xlu0 %2656  ;;  %v7304_v48 = vsel %vm1786_vm9, %v3011_v42, -inf  ;;  %v3096_v50 = vcombine.low %v20625_v30, %v20624_v14 }
 0x77b   : > { %20617 = vst [vmem:[#allocation258_spill] sm:$0xff] %v14801_v1  ;;  %7284 = vmax.xlane.f32.xlu0 %v7283_v8  ;;  %v3528_v8 = vrot.slane %v3520_v12, %v13550_v57  ;;  %v3231_v12 = vrot.slane %v3217_v19, %v13550_v57  ;;  %v20627_v19 = vld [vmem:[#allocation29_spill] sm:$0xff] }
 0x77c   : > { %7239 = vmax.xlane.f32.xlu1 %v7238_v59  ;;  %v20620_v59 = vld [vmem:[#allocation44_spill] sm:$0xff] }
 0x77d   : > { %v3128_v7 = vcombine.low %v20621_v28, %v20620_v59  ;;  %20622 = vst [vmem:[#allocation44_spill] sm:$0xff] %v14822_v25  ;;  %v3553_v23 = vcombine.high %v3496_v45, %v3528_v8  ;;  %v3282_v26 = vcombine.low %v3231_v12, %v3263_v63  ;;  %v3656_v28 = vcombine.low %v14074_v56, %v14077_v32  ;;  %v20628_v59 = vld [vmem:[#allocation31_spill] sm:$0xff]  ;;  %v14848_v56 = vpop.permute.xlu1 %2562 }
 0x77e   : > { %v14813_v0 = vpop.permute.xlu0 %2668  ;;  %v2992_v60 = vcombine.low %v20628_v59, %v20627_v19  ;;  %v3624_v32 = vcombine.low %v14084_v62, %v14071_v2  ;;  %20629 = vst [vmem:[#allocation48_spill] sm:$0xff] %v14848_v56  ;;  %v3552_v18 = vcombine.low %v3496_v45, %v3528_v8 }
 0x77f   : > { %20619 = vst [vmem:[#allocation260_spill] sm:$0xff] %v14813_v0  ;;  %7266 = vmax.xlane.f32.xlu0 %v7265_v21  ;;  %v7268_v21 = vsel %vm1786_vm9, %v3553_v23, -inf  ;;  %v14837_v42 = vrot.slane %v3128_v7, %v13550_v57  ;;  %v3147_v7 = vcombine.high %v14760_v13, %v14743_v38  ;;  %v20630_v23 = vld [vmem:[#allocation30_spill] sm:$0xff]  ;;  %v5753_v38 = vcombine.high %v14703_v4, %v14755_v43 }
 0x780   : > { %7281 = vmax.xlane.f32.xlu1 %v7280_v61  ;;  %v3283_v61 = vcombine.high %v3231_v12, %v3263_v63  ;;  %v7286_v63 = vsel %vm1786_vm9, %v3282_v26, -inf  ;;  %v20631_v12 = vld [vmem:[#allocation33_spill] sm:$0xff]  ;;  %v5769_v13 = vcombine.high %v14782_v58, %v14813_v0  ;;  %v14876_v26 = vrot.slane %v3624_v32, %v13550_v57  ;;  %v20688_v58 = vld [vmem:[#allocation83_spill] sm:$0xff] }
 0x781   : > { %v2960_v14 = vcombine.low %v20631_v12, %v20630_v23  ;;  %v7307_v37 = vsel %vm1786_vm9, %v3147_v7, -inf  ;;  %v7244_v12 = vsel %vm1786_vm9, %v3552_v18, -inf  ;;  %v20691_v0 = vld [vmem:[#allocation87_spill] sm:$0xff] }
 0x782   : > { %v14824_v9 = vpop.permute.xlu0 %2680  ;;  %v7310_v62 = vsel %vm1786_vm9, %v3283_v61, -inf  ;;  %v14899_v7 = vrot.slane %v5769_v13, %v13517_v11  ;;  %v3792_v13 = vcombine.low %v14170_v31, %v14167_v16  ;;  %v5921_v31 = vcombine.high %v14338_v3, %v14348_v35  ;;  %v20679_v3 = vld [vmem:[#allocation55_spill] sm:$0xff] }
 0x783   : > { %20623 = vst [vmem:[#allocation47_spill] sm:$0xff] %v14824_v9  ;;  %7305 = vmax.xlane.f32.xlu0 %v7304_v48  ;;  %v14842_v48 = vrot.slane %v3096_v50, %v13550_v57  ;;  %v5785_v30 = vcombine.high %v14801_v1, %v14824_v9  ;;  %v14865_v50 = vrot.slane %v3656_v28, %v13550_v57  ;;  %v20693_v1 = vld [vmem:[#allocation130_spill] sm:$0xff] }
 0x784   : > { %7242 = vmax.xlane.f32.xlu1 %v7241_v53  ;;  %v14872_v53 = vrot.slane %v2992_v60, %v13550_v57  ;;  %v5737_v28 = vcombine.high %v14673_v40, %v14725_v6  ;;  %v14886_v60 = vpop.permute.xlu1 %2574  ;;  %v2968_v32 = vrot.slane %v2960_v14, %v13550_v57  ;;  %20637 = vst [vmem:[#allocation262_spill] sm:$0xff] %v14899_v7  ;;  %v20687_v40 = vld [vmem:[#allocation42_spill] sm:$0xff] }
 0x785   : > { %v3148_v2 = vcombine.low %v14842_v48, %v14837_v42  ;;  %v14882_v61 = vrot.slane %v5785_v30, %v13517_v11  ;;  %20634 = vst [vmem:[#allocation30_spill] sm:$0xff] %v14886_v60  ;;  %v3689_v8 = vcombine.high %v14876_v26, %v14865_v50  ;;  %v20652_v60 = vld [vmem:[#allocation40_spill] sm:$0xff]  ;;  %v14967_v56 = vrot.slane %v5921_v31, %v13517_v11 }
 0x786   : > { %v14833_v49 = vpop.permute.xlu0 %2692  ;;  %v4000_v15 = vcombine.low %v20653_v5, %v20652_v60 }
 0x787   : > { %20626 = vst [vmem:[#allocation46_spill] sm:$0xff] %v14833_v49  ;;  %7269 = vmax.xlane.f32.xlu0 %v7268_v21  ;;  %v3399_v21 = vrot.slane %v3385_v10, %v13550_v57  ;;  %20633 = vst [vmem:[#allocation31_spill] sm:$0xff] %v14882_v61  ;;  %v7331_v45 = vsel %vm1786_vm9, %v3148_v2, -inf  ;;  %v3367_v10 = vrot.slane %v3353_v22, %v13550_v57  ;;  %v7271_v18 = vsel %vm1786_vm9, %v3689_v8, -inf }
 0x788   : > { %7287 = vmax.xlane.f32.xlu1 %v7286_v63  ;;  %v14896_v63 = vrot.slane %v5753_v38, %v13517_v11  ;;  %v14906_v2 = vrot.slane %v5737_v28, %v13517_v11  ;;  %v5849_v14 = vcombine.high %v14899_v7, %v14882_v61  ;;  %v20667_v7 = vld [vmem:[#allocation62_spill] sm:$0xff] }
 0x789   : > { %v3418_v30 = vcombine.low %v3367_v10, %v3399_v21 }
 0x78a   : > { %v14859_v33 = vpop.permute.xlu0 %2704  ;;  %20636 = vst [vmem:[#allocation261_spill] sm:$0xff] %v14896_v63  ;;  %20638 = vst [vmem:[#allocation263_spill] sm:$0xff] %v14906_v2  ;;  %v5817_v28 = vcombine.high %v14906_v2, %v14896_v63  ;;  %v14936_v8 = vrot.slane %v5849_v14, %v13550_v57 }
 0x78b   : > { %20632 = vst [vmem:[#allocation29_spill] sm:$0xff] %v14859_v33  ;;  %7311 = vmax.xlane.f32.xlu0 %v7310_v62  ;;  %v5889_v19 = vcombine.high %v14859_v33, %v14322_v24  ;;  %v3012_v62 = vcombine.low %v2968_v32, %v14872_v53  ;;  %v7289_v16 = vsel %vm1786_vm9, %v3418_v30, -inf  ;;  %v20645_v30 = vld [vmem:[#allocation36_spill] sm:$0xff] }
 0x78c   : > { %7308 = vmax.xlane.f32.xlu1 %v7307_v37  ;;  %20643 = vst [vmem:[#allocation268_spill] sm:$0xff] %v14936_v8 }
 0x78d   : > { %v14911_v22 = vrot.slane %v5889_v19, %v13517_v11  ;;  %v3521_v19 = vcombine.high %v14792_v27, %v14778_v39  ;;  %v14945_v39 = vrot.slane %v3792_v13, %v13550_v57 }
 0x78e   : > { %v14888_v59 = vpop.permute.xlu0 %2716 }
 0x78f   : > { %20635 = vst [vmem:[#allocation33_spill] sm:$0xff] %v14888_v59  ;;  %v5873_v23 = vcombine.high %v14833_v49, %v14888_v59  ;;  %7332 = vmax.xlane.f32.xlu0 %v7331_v45  ;;  %20639 = vst [vmem:[#allocation264_spill] sm:$0xff] %v14911_v22  ;;  %v3419_v45 = vcombine.high %v3367_v10, %v3399_v21  ;;  %v7328_v21 = vsel %vm1786_vm9, %v3012_v62, -inf  ;;  %v20648_v62 = vld [vmem:[#allocation39_spill] sm:$0xff]  ;;  %v20678_v59 = vld [vmem:[#allocation57_spill] sm:$0xff] }
 0x790   : > { %7245 = vmax.xlane.f32.xlu1 %v7244_v12  ;;  %v14929_v12 = vpop.permute.xlu1 %2586  ;;  %v3489_v10 = vcombine.high %v14797_v44, %v14789_v52  ;;  %v4016_v55 = vcombine.low %v20648_v62, %v20647_v51  ;;  %v14954_v52 = vrot.slane %v5817_v28, %v13550_v57  ;;  %v20650_v44 = vld [vmem:[#allocation60_spill] sm:$0xff]  ;;  %v3535_v13 = vrot.slane %v3521_v19, %v13550_v57 }
 0x791   : > { %v14914_v38 = vrot.slane %v5873_v23, %v13517_v11  ;;  %v3760_v23 = vcombine.low %v14140_v34, %v14137_v54  ;;  %20642 = vst [vmem:[#allocation267_spill] sm:$0xff] %v14929_v12  ;;  %v7313_v34 = vsel %vm1786_vm9, %v3419_v45, -inf  ;;  %v3013_v54 = vcombine.high %v2968_v32, %v14872_v53  ;;  %v20651_v45 = vld [vmem:[#allocation59_spill] sm:$0xff] }
 0x792   : > { %v14918_v37 = vpop.permute.xlu0 %2740  ;;  %20649 = vst [vmem:[#allocation36_spill] sm:$0xff] %v14954_v52  ;;  %v3264_v25 = vcombine.low %v20651_v45, %v20650_v44  ;;  %v3688_v53 = vcombine.low %v14876_v26, %v14865_v50  ;;  %v20656_v44 = vld [vmem:[#allocation54_spill] sm:$0xff]  ;;  %v20657_v50 = vld [vmem:[#allocation53_spill] sm:$0xff]  ;;  %v3503_v12 = vrot.slane %v3489_v10, %v13550_v57  ;;  %v14987_v46 = vrot.slane %v4016_v55, %v13517_v11 }
 0x793   : > { %20640 = vst [vmem:[#allocation265_spill] sm:$0xff] %v14914_v38  ;;  %20641 = vst [vmem:[#allocation266_spill] sm:$0xff] %v14918_v37  ;;  %7272 = vmax.xlane.f32.xlu0 %v7271_v18  ;;  %v20646_v18 = vld [vmem:[#allocation32_spill] sm:$0xff]  ;;  %v14961_v32 = vrot.slane %v3760_v23, %v13550_v57  ;;  %v3232_v26 = vcombine.low %v20657_v50, %v20656_v44  ;;  %v7352_v19 = vsel %vm1786_vm9, %v3013_v54, -inf }
 0x794   : > { %7290 = vmax.xlane.f32.xlu1 %v7289_v16  ;;  %v3984_v16 = vcombine.low %v20646_v18, %v20645_v30  ;;  %20654 = vst [vmem:[#allocation32_spill] sm:$0xff] %v14967_v56  ;;  %v14976_v23 = vpop.permute.xlu1 %2598  ;;  %v7247_v50 = vsel %vm1786_vm9, %v3688_v53, -inf  ;;  %v3272_v54 = vrot.slane %v3264_v25, %v13550_v57  ;;  %v4008_v10 = vrot.slane %v4000_v15, %v13517_v11 }
 0x795   : > { %20658 = vst [vmem:[#allocation39_spill] sm:$0xff] %v14976_v23  ;;  %v3825_v31 = vcombine.high %v14961_v32, %v14945_v39  ;;  %v6025_v52 = vcombine.high %v14356_v17, %v14364_v29  ;;  %v3555_v44 = vcombine.high %v3503_v12, %v3535_v13  ;;  %v20672_v29 = vld [vmem:[#allocation187_spill] sm:$0xff] }
 0x796   : > { %v14940_v27 = vpop.permute.xlu0 %2764  ;;  %v14994_v23 = vrot.slane %v3984_v16, %v13517_v11  ;;  %v4064_v25 = vcombine.low %v4008_v10, %v14987_v46  ;;  %v4065_v33 = vcombine.high %v4008_v10, %v14987_v46  ;;  %v20680_v10 = vld [vmem:[#allocation49_spill] sm:$0xff] }
 0x797   : > { %20644 = vst [vmem:[#allocation269_spill] sm:$0xff] %v14940_v27  ;;  %v5905_v14 = vcombine.high %v14918_v37, %v14940_v27  ;;  %7314 = vmax.xlane.f32.xlu0 %v7313_v34  ;;  %v3554_v34 = vcombine.low %v3503_v12, %v3535_v13  ;;  %v7274_v8 = vsel %vm1786_vm9, %v3825_v31, -inf  ;;  %v15015_v12 = vrot.slane %v6025_v52, %v13517_v11 }
 0x798   : > { %7329 = vmax.xlane.f32.xlu1 %v7328_v21  ;;  %v15009_v15 = vpop.permute.xlu1 %2610  ;;  %v15030_v52 = vrot.slane %v4064_v25, %v13550_v57 }
 0x799   : > { %v14970_v28 = vrot.slane %v5905_v14, %v13517_v11  ;;  %v20660_v14 = vld [vmem:[#allocation34_spill] sm:$0xff]  ;;  %20662 = vst [vmem:[#allocation40_spill] sm:$0xff] %v15009_v15 }
 0x79a   : > { %v14978_v45 = vpop.permute.xlu0 %2788  ;;  %v3968_v21 = vcombine.low %v13342_v20, %v20660_v14 }
 0x79b   : > { %20655 = vst [vmem:[#allocation41_spill] sm:$0xff] %v14970_v28  ;;  %20659 = vst [vmem:[#allocation60_spill] sm:$0xff] %v14978_v45  ;;  %7353 = vmax.xlane.f32.xlu0 %v7352_v19  ;;  %v3240_v19 = vrot.slane %v3232_v26, %v13550_v57  ;;  %v20663_v26 = vld [vmem:[#allocation76_spill] sm:$0xff] }
 0x79c   : > { %7248 = vmax.xlane.f32.xlu1 %v7247_v50  ;;  %v15004_v53 = vrot.slane %v3968_v21, %v13517_v11  ;;  %v7292_v50 = vsel %vm1786_vm9, %v3554_v34, -inf  ;;  %v20664_v21 = vld [vmem:[#allocation72_spill] sm:$0xff]  ;;  %v20666_v34 = vld [vmem:[#allocation66_spill] sm:$0xff] }
 0x79d   : > { %v3284_v41 = vcombine.low %v3240_v19, %v3272_v54  ;;  %v4288_v2 = vcombine.low %v20664_v21, %v20663_v26  ;;  %v3285_v15 = vcombine.high %v3240_v19, %v3272_v54  ;;  %v4256_v61 = vcombine.low %v20667_v7, %v20666_v34  ;;  %v20670_v54 = vld [vmem:[#allocation64_spill] sm:$0xff]  ;;  %v20671_v19 = vld [vmem:[#allocation58_spill] sm:$0xff] }
 0x79e   : > { %v14999_v55 = vpop.permute.xlu0 %2812  ;;  %v4032_v31 = vcombine.low %v15004_v53, %v14994_v23  ;;  %v4240_v17 = vcombine.low %v20671_v19, %v20670_v54 }
 0x79f   : > { %20661 = vst [vmem:[#allocation59_spill] sm:$0xff] %v14999_v55  ;;  %v6009_v16 = vcombine.high %v14978_v45, %v14999_v55  ;;  %7275 = vmax.xlane.f32.xlu0 %v7274_v8  ;;  %v7316_v8 = vsel %vm1786_vm9, %v3555_v44, -inf  ;;  %v7334_v45 = vsel %vm1786_vm9, %v3284_v41, -inf  ;;  %v3149_v55 = vcombine.high %v14842_v48, %v14837_v42  ;;  %v15048_v41 = vpop.permute.xlu1 %2622 }
 0x7a0   : > { %7293 = vmax.xlane.f32.xlu1 %v7292_v50  ;;  %v20669_v50 = vld [vmem:[#allocation68_spill] sm:$0xff]  ;;  %v4033_v44 = vcombine.high %v15004_v53, %v14994_v23  ;;  %v4040_v25 = vrot.slane %v4032_v31, %v13550_v57  ;;  %v15046_v24 = vrot.slane %v4288_v2, %v13517_v11  ;;  %20674 = vst [vmem:[#allocation54_spill] sm:$0xff] %v15048_v41  ;;  %v7358_v48 = vsel %vm1786_vm9, %v3285_v15, -inf  ;;  %v20676_v23 = vld [vmem:[#allocation51_spill] sm:$0xff] }
 0x7a1   : > { %v15018_v13 = vrot.slane %v6009_v16, %v13517_v11  ;;  %v20668_v16 = vld [vmem:[#allocation74_spill] sm:$0xff]  ;;  %v20677_v53 = vld [vmem:[#allocation52_spill] sm:$0xff]  ;;  %v20681_v31 = vld [vmem:[#allocation43_spill] sm:$0xff]  ;;  %v15074_v37 = vrot.slane %v4240_v17, %v13517_v11 }
 0x7a2   : > { %v15022_v63 = vpop.permute.xlu0 %2836  ;;  %v4272_v36 = vcombine.low %v20669_v50, %v20668_v16  ;;  %v3150_v49 = vcombine.low %v20677_v53, %v20676_v23  ;;  %v4096_v2 = vcombine.low %v4040_v25, %v15030_v52  ;;  %v4120_v41 = vcombine.low %v20681_v31, %v20680_v10  ;;  %v20686_v17 = vld [vmem:[#allocation45_spill] sm:$0xff] }
 0x7a3   : > { %20665 = vst [vmem:[#allocation38_spill] sm:$0xff] %v15022_v63  ;;  %7317 = vmax.xlane.f32.xlu0 %v7316_v8  ;;  %v6057_v8 = vcombine.high %v20673_v47, %v20672_v29  ;;  %v4152_v47 = vcombine.low %v20679_v3, %v20678_v59  ;;  %v7355_v23 = vsel %vm1786_vm9, %v3149_v55, -inf  ;;  %v3824_v53 = vcombine.low %v14961_v32, %v14945_v39  ;;  %v20682_v29 = vld [vmem:[#allocation56_spill] sm:$0xff]  ;;  %v15103_v4 = vpop.permute.xlu1 %2634 }
 0x7a4   : > { %7335 = vmax.xlane.f32.xlu1 %v7334_v45  ;;  %v15058_v45 = vrot.slane %v4256_v61, %v13517_v11  ;;  %v15066_v15 = vrot.slane %v4272_v36, %v13517_v11  ;;  %v20683_v61 = vld [vmem:[#allocation50_spill] sm:$0xff]  ;;  %v20684_v55 = vld [vmem:[#allocation96_spill] sm:$0xff]  ;;  %v7379_v39 = vsel %vm1786_vm9, %v3150_v49, -inf  ;;  %v15088_v32 = vrot.slane %v4065_v33, %v13550_v57  ;;  %20692 = vst [vmem:[#allocation34_spill] sm:$0xff] %v15103_v4 }
 0x7a5   : > { %v4136_v35 = vcombine.low %v20683_v61, %v20682_v29  ;;  %v4104_v6 = vcombine.low %v20687_v40, %v20686_v17  ;;  %v20690_v49 = vld [vmem:[#allocation94_spill] sm:$0xff]  ;;  %v7250_v43 = vsel %vm1786_vm9, %v3824_v53, -inf  ;;  %v15109_v19 = vrot.slane %v4120_v41, %v13517_v11 }
 0x7a6   : > { %v15050_v42 = vpop.permute.xlu0 %2860  ;;  %v4336_v36 = vcombine.low %v15066_v15, %v15046_v24  ;;  %v4408_v33 = vcombine.low %v20691_v0, %v20690_v49  ;;  %v20696_v0 = vld [vmem:[#allocation77_spill] sm:$0xff]  ;;  %v20707_v4 = vcombine.high %v14970_v28, %v14967_v56 }
 0x7a7   : > { %20675 = vst [vmem:[#allocation53_spill] sm:$0xff] %v15050_v42  ;;  %v6041_v46 = vcombine.high %v15022_v63, %v15050_v42  ;;  %7359 = vmax.xlane.f32.xlu0 %v7358_v48  ;;  %v15077_v48 = vrot.slane %v6057_v8, %v13517_v11  ;;  %v20685_v42 = vld [vmem:[#allocation92_spill] sm:$0xff]  ;;  %v15093_v8 = vrot.slane %v4152_v47, %v13517_v11  ;;  %v20712_v28 = vld [vmem:[#allocation121_spill] sm:$0xff] }
 0x7a8   : > { %7356 = vmax.xlane.f32.xlu1 %v7355_v23  ;;  %v4424_v27 = vcombine.low %v20685_v42, %v20684_v55  ;;  %v4304_v23 = vcombine.low %v15074_v37, %v15058_v45  ;;  %v20689_v42 = vld [vmem:[#allocation79_spill] sm:$0xff]  ;;  %v20694_v47 = vld [vmem:[#allocation132_spill] sm:$0xff]  ;;  %v15112_v54 = vrot.slane %v4136_v35, %v13517_v11  ;;  %v15124_v41 = vrot.slane %v4336_v36, %v13550_v57  ;;  %v20713_v56 = vld [vmem:[#allocation117_spill] sm:$0xff] }
 0x7a9   : > { %v15080_v63 = vrot.slane %v6041_v46, %v13517_v11  ;;  %v4392_v55 = vcombine.low %v20689_v42, %v20688_v58  ;;  %v3690_v9 = vcombine.low %v20694_v47, %v20693_v1  ;;  %v4097_v58 = vcombine.high %v4040_v25, %v15030_v52  ;;  %v20695_v42 = vld [vmem:[#allocation81_spill] sm:$0xff]  ;;  %v20697_v52 = vld [vmem:[#allocation84_spill] sm:$0xff] }
 0x7aa   : > { %v4376_v49 = vcombine.low %v20696_v0, %v20695_v42  ;;  %v15119_v46 = vrot.slane %v4424_v27, %v13517_v11  ;;  %v15127_v35 = vrot.slane %v4104_v6, %v13517_v11  ;;  %v20698_v25 = vld [vmem:[#allocation85_spill] sm:$0xff]  ;;  %v15134_v42 = vrot.slane %v4304_v23, %v13550_v57 }
 0x7ab   : > { %7380 = vmax.xlane.f32.xlu0 %v7379_v39  ;;  %v7424_v39 = vsel %vm1786_vm9, %v4096_v2, -inf  ;;  %v6120_v53 = vcombine.low %v15080_v63, %v15077_v48  ;;  %v3420_v2 = vcombine.low %v20698_v25, %v20697_v52  ;;  %v15137_v27 = vrot.slane %v4392_v55, %v13517_v11  ;;  %v15156_v25 = vpop.permute.xlu1 %2646 }
 0x7ac   : > { %7251 = vmax.xlane.f32.xlu1 %v7250_v43  ;;  %v4200_v43 = vcombine.low %v15112_v54, %v15093_v8  ;;  %v15140_v0 = vrot.slane %v4408_v33, %v13517_v11  ;;  %v6088_v6 = vcombine.low %v15018_v13, %v15015_v12  ;;  %v7295_v36 = vsel %vm1786_vm9, %v3690_v9, -inf  ;;  %20703 = vst [vmem:[#allocation74_spill] sm:$0xff] %v15156_v25 }
 0x7ad   : > { %20699 = vst [vmem:[#allocation76_spill] sm:$0xff] %v15137_v27  ;;  %v7448_v52 = vsel %vm1786_vm9, %v4097_v58, -inf  ;;  %v15149_v23 = vrot.slane %v4033_v44, %v13550_v57  ;;  %v15152_v55 = vrot.slane %v4376_v49, %v13517_v11  ;;  %v4368_v9 = vcombine.low %v15134_v42, %v15124_v41  ;;  %v20706_v58 = vld [vmem:[#allocation37_spill] sm:$0xff] }
 0x7ae   : > { %20700 = vst [vmem:[#allocation72_spill] sm:$0xff] %v15140_v0  ;;  %v4472_v33 = vcombine.low %v15140_v0, %v15119_v46  ;;  %v15161_v1 = vrot.slane %v6120_v53, %v13550_v57  ;;  %v4208_v49 = vrot.slane %v4200_v43, %v13550_v57  ;;  %v15172_v25 = vrot.slane %v20707_v4, %v13550_v57 }
 0x7af   : > { %7425 = vmax.xlane.f32.xlu0 %v7424_v39  ;;  %v4168_v39 = vcombine.low %v15127_v35, %v15109_v19  ;;  %20701 = vst [vmem:[#allocation66_spill] sm:$0xff] %v15149_v23  ;;  %20702 = vst [vmem:[#allocation62_spill] sm:$0xff] %v15152_v55  ;;  %v4098_v44 = vcombine.low %v15149_v23, %v15088_v32  ;;  %v4440_v0 = vcombine.low %v15152_v55, %v15137_v27  ;;  %v15207_v23 = vpop.permute.xlu1 %2658 }
 0x7b0   : > { %7296 = vmax.xlane.f32.xlu1 %v7295_v36  ;;  %20704 = vst [vmem:[#allocation68_spill] sm:$0xff] %v15161_v1  ;;  %v20705_v36 = vld [vmem:[#allocation35_spill] sm:$0xff]  ;;  %20708 = vst [vmem:[#allocation57_spill] sm:$0xff] %v15172_v25  ;;  %v7337_v53 = vsel %vm1786_vm9, %v3420_v2, -inf  ;;  %v4560_v55 = vcombine.low %v20713_v56, %v20712_v28  ;;  %v7430_v2 = vsel %vm1786_vm9, %v4368_v9, -inf  ;;  %v4305_v56 = vcombine.high %v15074_v37, %v15058_v45  ;;  %v20714_v28 = vld [vmem:[#allocation110_spill] sm:$0xff] }
 0x7b1   : > { %v3014_v47 = vcombine.low %v20706_v58, %v20705_v36  ;;  %v4337_v36 = vcombine.high %v15066_v15, %v15046_v24  ;;  %v4176_v43 = vrot.slane %v4168_v39, %v13550_v57  ;;  %v20710_v58 = vcombine.high %v14914_v38, %v14911_v22  ;;  %v20715_v9 = vld [vmem:[#allocation104_spill] sm:$0xff]  ;;  %v20717_v22 = vld [vmem:[#allocation115_spill] sm:$0xff]  ;;  %20718 = vst [vmem:[#allocation43_spill] sm:$0xff] %v15207_v23 }
 0x7b2   : > { %v7472_v39 = vsel %vm1786_vm9, %v4098_v44, -inf  ;;  %v4528_v38 = vcombine.low %v20715_v9, %v20714_v28  ;;  %v20719_v44 = vcombine.high %v15018_v13, %v15015_v12  ;;  %v20721_v45 = vcombine.high %v15080_v63, %v15077_v48  ;;  %v20723_v28 = vld [vmem:[#allocation108_spill] sm:$0xff]  ;;  %v20724_v9 = vld [vmem:[#allocation101_spill] sm:$0xff] }
 0x7b3   : > { %7449 = vmax.xlane.f32.xlu0 %v7448_v52  ;;  %v15178_v52 = vrot.slane %v6088_v6, %v13550_v57  ;;  %v15187_v4 = vrot.slane %v20710_v58, %v13550_v57  ;;  %v15193_v6 = vrot.slane %v4472_v33, %v13550_v57  ;;  %v7376_v15 = vsel %vm1786_vm9, %v3014_v47, -inf  ;;  %v20716_v33 = vld [vmem:[#allocation119_spill] sm:$0xff] }
 0x7b4   : > { %7338 = vmax.xlane.f32.xlu1 %v7337_v53  ;;  %v4232_v53 = vcombine.low %v4176_v43, %v4208_v49  ;;  %v4544_v27 = vcombine.low %v20717_v22, %v20716_v33  ;;  %v4201_v47 = vcombine.high %v15112_v54, %v15093_v8  ;;  %v15218_v37 = vrot.slane %v20719_v44, %v13550_v57 }
 0x7b5   : > { %20709 = vst [vmem:[#allocation55_spill] sm:$0xff] %v15178_v52  ;;  %20711 = vst [vmem:[#allocation49_spill] sm:$0xff] %v15187_v4  ;;  %v15224_v22 = vrot.slane %v20721_v45, %v13550_v57  ;;  %v4512_v33 = vcombine.low %v20724_v9, %v20723_v28  ;;  %v15231_v54 = vrot.slane %v4560_v55, %v13517_v11 }
 0x7b6   : > { %20720 = vst [vmem:[#allocation56_spill] sm:$0xff] %v15218_v37  ;;  %v15236_v13 = vrot.slane %v4337_v36, %v13550_v57  ;;  %v4169_v63 = vcombine.high %v15127_v35, %v15109_v19  ;;  %v4233_v48 = vcombine.high %v4176_v43, %v4208_v49  ;;  %v15246_v55 = vrot.slane %v4544_v27, %v13517_v11  ;;  %v15260_v49 = vpop.permute.xlu1 %2670 }
 0x7b7   : > { %7431 = vmax.xlane.f32.xlu0 %v7430_v2  ;;  %v15210_v2 = vrot.slane %v4440_v0, %v13550_v57  ;;  %20722 = vst [vmem:[#allocation50_spill] sm:$0xff] %v15224_v22  ;;  %v7427_v44 = vsel %vm1786_vm9, %v4232_v53, -inf  ;;  %v15250_v45 = vrot.slane %v4305_v56, %v13550_v57  ;;  %v4153_v36 = vcombine.high %v20679_v3, %v20678_v59 }
 0x7b8   : > { %7377 = vmax.xlane.f32.xlu1 %v7376_v15  ;;  %v15243_v15 = vrot.slane %v4528_v38, %v13517_v11  ;;  %v4215_v19 = vrot.slane %v4201_v47, %v13550_v57  ;;  %v15256_v35 = vrot.slane %v4512_v33, %v13517_v11  ;;  %v4608_v38 = vcombine.low %v15246_v55, %v15231_v54 }
 0x7b9   : > { %v4504_v12 = vcombine.low %v15210_v2, %v15193_v6  ;;  %20725 = vst [vmem:[#allocation96_spill] sm:$0xff] %v15260_v49  ;;  %v4370_v43 = vcombine.low %v15250_v45, %v15236_v13  ;;  %v4137_v3 = vcombine.high %v20683_v61, %v20682_v29  ;;  %v4369_v59 = vcombine.high %v15134_v42, %v15124_v41  ;;  %v20726_v29 = vld [vmem:[#allocation145_spill] sm:$0xff]  ;;  %v20727_v61 = vld [vmem:[#allocation139_spill] sm:$0xff]  ;;  %v20813_v49 = vld [vmem:[#allocation204_spill] sm:$0xff] }
 0x7ba   : > { %v4576_v53 = vcombine.low %v15256_v35, %v15243_v15  ;;  %v7451_v56 = vsel %vm1786_vm9, %v4233_v48, -inf  ;;  %v4183_v47 = vrot.slane %v4169_v63, %v13550_v57  ;;  %v3969_v28 = vcombine.high %v13342_v20, %v20660_v14  ;;  %v20729_v63 = vld [vmem:[#allocation127_spill] sm:$0xff] }
 0x7bb   : > { %7473 = vmax.xlane.f32.xlu0 %v7472_v39  ;;  %v7433_v27 = vsel %vm1786_vm9, %v4504_v12, -inf  ;;  %v4121_v39 = vcombine.high %v20681_v31, %v20680_v10  ;;  %v4105_v10 = vcombine.high %v20687_v40, %v20686_v17  ;;  %v15280_v31 = vrot.slane %v4153_v36, %v13517_v11  ;;  %v20728_v17 = vld [vmem:[#allocation135_spill] sm:$0xff]  ;;  %v20731_v36 = vld [vmem:[#allocation137_spill] sm:$0xff] }
 0x7bc   : > { %7428 = vmax.xlane.f32.xlu1 %v7427_v44  ;;  %v4696_v41 = vcombine.low %v20727_v61, %v20726_v29  ;;  %v7478_v42 = vsel %vm1786_vm9, %v4370_v43, -inf  ;;  %v4235_v9 = vcombine.high %v4183_v47, %v4215_v19  ;;  %v15286_v33 = vrot.slane %v4608_v38, %v13550_v57  ;;  %v20730_v44 = vld [vmem:[#allocation141_spill] sm:$0xff]  ;;  %v15299_v43 = vpop.permute.xlu1 %2682 }
 0x7bd   : > { %v15289_v12 = vrot.slane %v4121_v39, %v13517_v11  ;;  %v15292_v20 = vrot.slane %v4137_v3, %v13517_v11  ;;  %v7454_v40 = vsel %vm1786_vm9, %v4369_v59, -inf  ;;  %v4234_v14 = vcombine.low %v4183_v47, %v4215_v19  ;;  %20732 = vst [vmem:[#allocation92_spill] sm:$0xff] %v15299_v43  ;;  %v20733_v47 = vld [vmem:[#allocation129_spill] sm:$0xff] }
 0x7be   : > { %v4664_v48 = vcombine.low %v20729_v63, %v20728_v17  ;;  %v15302_v38 = vrot.slane %v4576_v53, %v13550_v57  ;;  %v3985_v3 = vcombine.high %v20646_v18, %v20645_v30  ;;  %v4017_v19 = vcombine.high %v20648_v62, %v20647_v51  ;;  %v20734_v29 = vld [vmem:[#allocation125_spill] sm:$0xff] }
 0x7bf   : > { %7434 = vmax.xlane.f32.xlu0 %v7433_v27  ;;  %v4680_v27 = vcombine.low %v20731_v36, %v20730_v44  ;;  %v15311_v59 = vrot.slane %v4105_v10, %v13517_v11  ;;  %v4648_v53 = vcombine.low %v20734_v29, %v20733_v47  ;;  %v15318_v61 = vrot.slane %v4696_v41, %v13517_v11  ;;  %v20736_v44 = vld [vmem:[#allocation72_spill] sm:$0xff]  ;;  %v20741_v47 = vld [vmem:[#allocation62_spill] sm:$0xff] }
 0x7c0   : > { %7452 = vmax.xlane.f32.xlu1 %v7451_v56  ;;  %v4216_v56 = vcombine.low %v15292_v20, %v15280_v31  ;;  %v4641_v30 = vcombine.high %v15302_v38, %v15286_v33  ;;  %v15324_v51 = vrot.slane %v3969_v28, %v13517_v11  ;;  %v4001_v18 = vcombine.high %v20653_v5, %v20652_v60 }
 0x7c1   : > { %v4184_v62 = vcombine.low %v15311_v59, %v15289_v12  ;;  %v15331_v10 = vrot.slane %v4664_v48, %v13517_v11  ;;  %v15334_v41 = vrot.slane %v4680_v27, %v13517_v11  ;;  %v15340_v28 = vrot.slane %v3985_v3, %v13517_v11 }
 0x7c2   : > { %v15343_v5 = vrot.slane %v4017_v19, %v13517_v11  ;;  %v4289_v60 = vcombine.high %v20664_v21, %v20663_v26  ;;  %v15348_v17 = vrot.slane %v4216_v56, %v13550_v57  ;;  %v15351_v63 = vrot.slane %v4648_v53, %v13517_v11  ;;  %v20740_v56 = vld [vmem:[#allocation76_spill] sm:$0xff] }
 0x7c3   : > { %7479 = vmax.xlane.f32.xlu0 %v7478_v42  ;;  %v7499_v42 = vsel %vm1786_vm9, %v4235_v9, -inf  ;;  %v7475_v9 = vsel %vm1786_vm9, %v4234_v14, -inf  ;;  %v4744_v14 = vcombine.low %v15334_v41, %v15318_v61  ;;  %v4371_v48 = vcombine.high %v15250_v45, %v15236_v13  ;;  %v20738_v45 = vld [vmem:[#allocation64_spill] sm:$0xff] }
 0x7c4   : > { %7455 = vmax.xlane.f32.xlu1 %v7454_v40  ;;  %v4505_v40 = vcombine.high %v15210_v2, %v15193_v6  ;;  %v15355_v6 = vpop.permute.xlu1 %2694  ;;  %v7460_v2 = vsel %vm1786_vm9, %v4641_v30, -inf  ;;  %v4257_v26 = vcombine.high %v20667_v7, %v20666_v34  ;;  %v4273_v21 = vcombine.high %v20669_v50, %v20668_v16  ;;  %v20737_v7 = vld [vmem:[#allocation66_spill] sm:$0xff] }
 0x7c5   : > { %20735 = vst [vmem:[#allocation45_spill] sm:$0xff] %v15355_v6  ;;  %v4473_v36 = vcombine.high %v20736_v44, %v15119_v46  ;;  %v15367_v27 = vrot.slane %v4184_v62, %v13550_v57  ;;  %v15370_v3 = vrot.slane %v4001_v18, %v13517_v11  ;;  %v4712_v19 = vcombine.low %v15351_v63, %v15331_v10  ;;  %v20739_v16 = vld [vmem:[#allocation58_spill] sm:$0xff] }
 0x7c6   : > { %v7457_v13 = vsel %vm1786_vm9, %v4505_v40, -inf  ;;  %v4099_v34 = vcombine.high %v20737_v7, %v15088_v32  ;;  %v4241_v50 = vcombine.high %v20739_v16, %v20738_v45  ;;  %v15380_v46 = vrot.slane %v4289_v60, %v13517_v11  ;;  %v20747_v45 = vld [vmem:[#allocation157_spill] sm:$0xff] }
 0x7c7   : > { %7500 = vmax.xlane.f32.xlu0 %v7499_v42  ;;  %v4441_v29 = vcombine.high %v20741_v47, %v20740_v56  ;;  %v4236_v53 = vcombine.low %v15367_v27, %v15348_v17  ;;  %v4048_v42 = vcombine.low %v15324_v51, %v15340_v28  ;;  %v4609_v30 = vcombine.high %v15246_v55, %v15231_v54  ;;  %v20748_v47 = vld [vmem:[#allocation152_spill] sm:$0xff] }
 0x7c8   : > { %7476 = vmax.xlane.f32.xlu1 %v7475_v9  ;;  %v7502_v32 = vsel %vm1786_vm9, %v4371_v48, -inf  ;;  %v4752_v18 = vrot.slane %v4744_v14, %v13550_v57  ;;  %v4080_v62 = vcombine.low %v15370_v3, %v15343_v5  ;;  %v15395_v9 = vrot.slane %v4257_v26, %v13517_v11  ;;  %v15405_v55 = vpop.permute.xlu1 %2706 }
 0x7c9   : > { %v15398_v40 = vrot.slane %v4273_v21, %v13517_v11  ;;  %v15401_v60 = vrot.slane %v4473_v36, %v13550_v57  ;;  %v4577_v54 = vcombine.high %v15256_v35, %v15243_v15  ;;  %20742 = vst [vmem:[#allocation42_spill] sm:$0xff] %v15405_v55  ;;  %v7496_v14 = vsel %vm1786_vm9, %v4099_v34, -inf  ;;  %v20744_v36 = vld [vmem:[#allocation158_spill] sm:$0xff]  ;;  %v20746_v34 = vld [vmem:[#allocation159_spill] sm:$0xff]  ;;  %v20803_v55 = vld [vmem:[#allocation192_spill] sm:$0xff] }
 0x7ca   : > { %v4640_v48 = vcombine.low %v15302_v38, %v15286_v33  ;;  %v4720_v26 = vrot.slane %v4712_v19, %v13550_v57  ;;  %v15414_v21 = vrot.slane %v4241_v50, %v13517_v11  ;;  %v7523_v15 = vsel %vm1786_vm9, %v4236_v53, -inf }
 0x7cb   : > { %7461 = vmax.xlane.f32.xlu0 %v7460_v2  ;;  %v15407_v2 = vpop.permute.xlu0 %2718  ;;  %v4352_v44 = vcombine.low %v15398_v40, %v15380_v46  ;;  %v4455_v35 = vrot.slane %v4441_v29, %v13550_v57  ;;  %v4832_v16 = vcombine.low %v20747_v45, %v20746_v34  ;;  %v15425_v38 = vrot.slane %v4609_v30, %v13550_v57  ;;  %v20749_v29 = vld [vmem:[#allocation147_spill] sm:$0xff]  ;;  %v20791_v45 = vld [vmem:[#allocation184_spill] sm:$0xff] }
 0x7cc   : > { %7458 = vmax.xlane.f32.xlu1 %v7457_v13  ;;  %20743 = vst [vmem:[#allocation83_spill] sm:$0xff] %v15407_v2  ;;  %v20745_v13 = vld [vmem:[#allocation156_spill] sm:$0xff]  ;;  %v4776_v33 = vcombine.low %v4720_v26, %v4752_v18  ;;  %v4320_v19 = vcombine.low %v15414_v21, %v15395_v9  ;;  %v4088_v56 = vrot.slane %v4080_v62, %v13550_v57  ;;  %v7436_v0 = vsel %vm1786_vm9, %v4640_v48, -inf  ;;  %v15447_v24 = vpop.permute.xlu1 %2730 }
 0x7cd   : > { %v4816_v7 = vcombine.low %v20745_v13, %v20744_v36  ;;  %v4506_v50 = vcombine.low %v4455_v35, %v15401_v60  ;;  %v4784_v53 = vcombine.low %v20749_v29, %v20748_v47  ;;  %v4591_v8 = vrot.slane %v4577_v54, %v13550_v57  ;;  %20752 = vst [vmem:[#allocation79_spill] sm:$0xff] %v15447_v24  ;;  %v20792_v34 = vld [vmem:[#allocation180_spill] sm:$0xff]  ;;  %v20793_v13 = vld [vmem:[#allocation174_spill] sm:$0xff] }
 0x7ce   : > { %v4056_v30 = vrot.slane %v4048_v42, %v13550_v57  ;;  %v15439_v58 = vrot.slane %v4352_v44, %v13550_v57  ;;  %v15445_v62 = vrot.slane %v4832_v16, %v13517_v11  ;;  %v7439_v48 = vsel %vm1786_vm9, %v4776_v33, -inf  ;;  %v20804_v24 = vld [vmem:[#allocation188_spill] sm:$0xff] }
 0x7cf   : > { %7503 = vmax.xlane.f32.xlu0 %v7502_v32  ;;  %v20750_v32 = vld [vmem:[#allocation153_spill] sm:$0xff]  ;;  %v15449_v22 = vpop.permute.xlu0 %2742  ;;  %v4642_v54 = vcombine.low %v4591_v8, %v15425_v38  ;;  %v15454_v42 = vrot.slane %v4784_v53, %v13517_v11  ;;  %v4328_v16 = vrot.slane %v4320_v19, %v13550_v57  ;;  %v4777_v4 = vcombine.high %v4720_v26, %v4752_v18 }
 0x7d0   : > { %7497 = vmax.xlane.f32.xlu1 %v7496_v14  ;;  %v20751_v14 = vld [vmem:[#allocation150_spill] sm:$0xff]  ;;  %20753 = vst [vmem:[#allocation94_spill] sm:$0xff] %v15449_v22  ;;  %v5192_v6 = vcombine.low %v20804_v24, %v20803_v55 }
 0x7d1   : > { %v4800_v39 = vcombine.low %v20751_v14, %v20750_v32  ;;  %v7484_v33 = vsel %vm1786_vm9, %v4642_v54, -inf  ;;  %v4372_v25 = vcombine.low %v4328_v16, %v15439_v58  ;;  %v4507_v14 = vcombine.high %v4455_v35, %v15401_v60 }
 0x7d2   : > { %v4713_v60 = vcombine.high %v15351_v63, %v15331_v10  ;;  %v4643_v35 = vcombine.high %v4591_v8, %v15425_v38  ;;  %v4373_v8 = vcombine.high %v4328_v16, %v15439_v58  ;;  %v20766_v16 = vld [vmem:[#allocation167_spill] sm:$0xff] }
 0x7d3   : > { %7524 = vmax.xlane.f32.xlu0 %v7523_v15  ;;  %v15442_v15 = vrot.slane %v4816_v7, %v13517_v11  ;;  %v15457_v44 = vrot.slane %v4800_v39, %v13517_v11  ;;  %v7481_v7 = vsel %vm1786_vm9, %v4506_v50, -inf  ;;  %v15469_v39 = vpop.permute.xlu0 %2766  ;;  %v7526_v19 = vsel %vm1786_vm9, %v4372_v25, -inf }
 0x7d4   : > { %7437 = vmax.xlane.f32.xlu1 %v7436_v0  ;;  %v4100_v0 = vcombine.low %v4056_v30, %v4088_v56  ;;  %20755 = vst [vmem:[#allocation81_spill] sm:$0xff] %v15469_v39 }
 0x7d5   : > { %v4880_v37 = vcombine.low %v15442_v15, %v15445_v62  ;;  %v4848_v53 = vcombine.low %v15454_v42, %v15457_v44 }
 0x7d6   : > { %v7520_v50 = vsel %vm1786_vm9, %v4100_v0, -inf }
 0x7d7   : > { %7440 = vmax.xlane.f32.xlu0 %v7439_v48  ;;  %v15467_v48 = vpop.permute.xlu1 %2754  ;;  %v4888_v54 = vrot.slane %v4880_v37, %v13550_v57  ;;  %v4856_v32 = vrot.slane %v4848_v53, %v13550_v57  ;;  %v15481_v0 = vpop.permute.xlu0 %2790  ;;  %v7505_v37 = vsel %vm1786_vm9, %v4507_v14, -inf  ;;  %v4185_v53 = vcombine.high %v15311_v59, %v15289_v12  ;;  %v20762_v12 = vld [vmem:[#allocation97_spill] sm:$0xff]  ;;  %v20763_v59 = vld [vmem:[#allocation102_spill] sm:$0xff] }
 0x7d8   : > { %7482 = vmax.xlane.f32.xlu1 %v7481_v7  ;;  %20754 = vst [vmem:[#allocation87_spill] sm:$0xff] %v15467_v48  ;;  %v4237_v7 = vcombine.high %v15367_v27, %v15348_v17  ;;  %20757 = vst [vmem:[#allocation121_spill] sm:$0xff] %v15481_v0  ;;  %v4745_v17 = vcombine.high %v15334_v41, %v15318_v61  ;;  %v4101_v27 = vcombine.high %v4056_v30, %v4088_v56  ;;  %v20759_v61 = vld [vmem:[#allocation98_spill] sm:$0xff]  ;;  %v20764_v30 = vld [vmem:[#allocation171_spill] sm:$0xff] }
 0x7d9   : > { %v4913_v25 = vcombine.high %v4856_v32, %v4888_v54  ;;  %v4456_v38 = vcombine.low %v20763_v59, %v20762_v12  ;;  %v15520_v58 = vrot.slane %v4185_v53, %v13550_v57  ;;  %v4353_v12 = vcombine.high %v15398_v40, %v15380_v46  ;;  %v20772_v59 = vld [vmem:[#allocation123_spill] sm:$0xff] }
 0x7da   : > { %v7547_v18 = vsel %vm1786_vm9, %v4237_v7, -inf  ;;  %v15503_v10 = vrot.slane %v4745_v17, %v13550_v57 }
 0x7db   : > { %7485 = vmax.xlane.f32.xlu0 %v7484_v33  ;;  %v7463_v33 = vsel %vm1786_vm9, %v4777_v4, -inf  ;;  %v15479_v29 = vpop.permute.xlu1 %2778  ;;  %v4217_v4 = vcombine.high %v15292_v20, %v15280_v31  ;;  %v7466_v26 = vsel %vm1786_vm9, %v4913_v25, -inf  ;;  %v15499_v56 = vpop.permute.xlu0 %2814  ;;  %v7544_v31 = vsel %vm1786_vm9, %v4101_v27, -inf }
 0x7dc   : > { %7521 = vmax.xlane.f32.xlu1 %v7520_v50  ;;  %20756 = vst [vmem:[#allocation77_spill] sm:$0xff] %v15479_v29  ;;  %v20758_v50 = vld [vmem:[#allocation99_spill] sm:$0xff]  ;;  %20761 = vst [vmem:[#allocation110_spill] sm:$0xff] %v15499_v56  ;;  %v4912_v20 = vcombine.low %v4856_v32, %v4888_v54  ;;  %v4081_v32 = vcombine.high %v15370_v3, %v15343_v5  ;;  %v20767_v54 = vld [vmem:[#allocation166_spill] sm:$0xff]  ;;  %v4881_v3 = vcombine.high %v15442_v15, %v15445_v62 }
 0x7dd   : > { %v4488_v41 = vcombine.low %v20759_v61, %v20758_v50  ;;  %v15507_v63 = vrot.slane %v4217_v4, %v13550_v57  ;;  %v4984_v25 = vcombine.low %v20767_v54, %v20766_v16  ;;  %v4049_v4 = vcombine.high %v15324_v51, %v15340_v28  ;;  %v20775_v16 = vld [vmem:[#allocation112_spill] sm:$0xff] }
 0x7de   : > { %v7442_v17 = vsel %vm1786_vm9, %v4912_v20, -inf  ;;  %v15542_v53 = vrot.slane %v4456_v38, %v13550_v57  ;;  %v15546_v51 = vrot.slane %v4081_v32, %v13550_v57  ;;  %v4849_v28 = vcombine.high %v15454_v42, %v15457_v44  ;;  %v20773_v42 = vld [vmem:[#allocation122_spill] sm:$0xff]  ;;  %v20774_v32 = vld [vmem:[#allocation113_spill] sm:$0xff]  ;;  %v20799_v56 = vld [vmem:[#allocation200_spill] sm:$0xff] }
 0x7df   : > { %7527 = vmax.xlane.f32.xlu0 %v7526_v19  ;;  %v15497_v14 = vpop.permute.xlu1 %2802  ;;  %v20765_v19 = vld [vmem:[#allocation170_spill] sm:$0xff]  ;;  %v15528_v27 = vrot.slane %v4488_v41, %v13550_v57  ;;  %v4238_v5 = vcombine.low %v15520_v58, %v15507_v63  ;;  %v4992_v61 = vrot.slane %v4984_v25, %v13550_v57  ;;  %v20770_v41 = vlaneseq }
 0x7e0   : > { %7464 = vmax.xlane.f32.xlu1 %v7463_v33  ;;  %20760 = vst [vmem:[#allocation117_spill] sm:$0xff] %v15497_v14  ;;  %v5016_v7 = vcombine.low %v20765_v19, %v20764_v30  ;;  %v7508_v33 = vsel %vm1786_vm9, %v4643_v35, -inf  ;;  %v7550_v35 = vsel %vm1786_vm9, %v4373_v8, -inf  ;;  %v4063_v8 = vrot.slane %v4049_v4, %v13550_v57  ;;  %v20795_v14 = vld [vmem:[#allocation202_spill] sm:$0xff] }
 0x7e1   : > { %v4508_v62 = vcombine.low %v15542_v53, %v15528_v27  ;;  %v7571_v20 = vsel %vm1786_vm9, %v4238_v5, -inf  ;;  %v4624_v44 = vcombine.low %v20773_v42, %v20772_v59  ;;  %v15564_v30 = vrot.slane %v4881_v3, %v13550_v57 }
 0x7e2   : > { %v5024_v50 = vrot.slane %v5016_v7, %v13550_v57  ;;  %v4102_v7 = vcombine.low %v4063_v8, %v15546_v51  ;;  %v4592_v54 = vcombine.low %v20775_v16, %v20774_v32  ;;  %v4239_v32 = vcombine.high %v15520_v58, %v15507_v63 }
 0x7e3   : > { %7548 = vmax.xlane.f32.xlu0 %v7547_v18  ;;  %v15515_v18 = vrot.slane %v4713_v60, %v13550_v57  ;;  %v15536_v60 = vpop.permute.xlu1 %2826  ;;  %v7529_v40 = vsel %vm1786_vm9, %v4508_v62, -inf  ;;  %v4632_v3 = vrot.slane %v4624_v44, %v13550_v57  ;;  %v4103_v16 = vcombine.high %v4063_v8, %v15546_v51 }
 0x7e4   : > { %7506 = vmax.xlane.f32.xlu1 %v7505_v37  ;;  %20768 = vst [vmem:[#allocation104_spill] sm:$0xff] %v15536_v60  ;;  %v5048_v38 = vcombine.low %v4992_v61, %v5024_v50  ;;  %v7568_v59 = vsel %vm1786_vm9, %v4102_v7, -inf  ;;  %v5049_v42 = vcombine.high %v4992_v61, %v5024_v50  ;;  %v4509_v63 = vcombine.high %v15542_v53, %v15528_v27  ;;  %v20786_v27 = vld [vmem:[#allocation151_spill] sm:$0xff]  ;;  %v20796_v60 = vld [vmem:[#allocation198_spill] sm:$0xff] }
 0x7e5   : > { %v4778_v37 = vcombine.low %v15515_v18, %v15503_v10  ;;  %v4779_v8 = vcombine.high %v15515_v18, %v15503_v10  ;;  %v5240_v0 = vcombine.low %v20796_v60, %v20795_v14 }
 0x7e6   : > { %v7469_v51 = vsel %vm1786_vm9, %v5049_v42, -inf }
 0x7e7   : > { %7467 = vmax.xlane.f32.xlu0 %v7466_v26  ;;  %v15538_v26 = vpop.permute.xlu0 %2838  ;;  %v7487_v15 = vsel %vm1786_vm9, %v4778_v37, -inf  ;;  %v15572_v25 = vpop.permute.xlu1 %2850  ;;  %v20778_v37 = vld [vmem:[#allocation6_spill] sm:$0xff]  ;;  %v15687_v2 = vrot.slane %v5240_v0, %v13517_v11 }
 0x7e8   : > { %7545 = vmax.xlane.f32.xlu1 %v7544_v31  ;;  %20769 = vst [vmem:[#allocation119_spill] sm:$0xff] %v15538_v26  ;;  %v15555_v31 = vand.u32 127, %v20770_v41  ;;  %20776 = vst [vmem:[#allocation108_spill] sm:$0xff] %v15572_v25 }
 0x7ea   : > { %20771 = vst [vmem:[#allocation115_spill] sm:$0xff] %v15555_v31  ;;  %v8269_v19 = vadd.s32 4294967288, %v15555_v31  ;;  %v15582_v4 = vsub.s32 %v15555_v31, %v20778_v37  ;;  %v8276_v5 = vadd.s32 4294967280, %v15555_v31  ;;  %v8290_v62 = vadd.s32 4294967264, %v15555_v31 }
 0x7eb   : > { %7509 = vmax.xlane.f32.xlu0 %v7508_v33  ;;  %v4321_v33 = vcombine.high %v15414_v21, %v15395_v9  ;;  %v15574_v46 = vpop.permute.xlu0 %2862  ;;  %v7445_v9 = vsel %vm1786_vm9, %v5048_v38, -inf  ;;  %v8297_v41 = vadd.s32 4294967256, %v15555_v31  ;;  %v4600_v38 = vrot.slane %v4592_v54, %v13550_v57 }
 0x7ec   : > { %7443 = vmax.xlane.f32.xlu1 %v7442_v17  ;;  %20777 = vst [vmem:[#allocation101_spill] sm:$0xff] %v15574_v46  ;;  %v15578_v17 = vrot.slane %v4849_v28, %v13550_v57  ;;  %20779 = vst [vmem:[#allocation145_spill] sm:$0xff] %v15582_v4  ;;  %v8283_v28 = vadd.s32 4294967272, %v15555_v31 }
 0x7ed   : > { %v4335_v44 = vrot.slane %v4321_v33, %v13550_v57  ;;  %v4644_v50 = vcombine.low %v4600_v38, %v4632_v3 }
 0x7ee   : > { %v4914_v21 = vcombine.low %v15578_v17, %v15564_v30  ;;  %v15610_v33 = vsub.s32 %v8283_v28, %v20778_v37  ;;  %v20783_v28 = vld [vmem:[#allocation106_spill] sm:$0xff] }
 0x7ef   : > { %7551 = vmax.xlane.f32.xlu0 %v7550_v35  ;;  %v4367_v35 = vrot.slane %v4353_v12, %v13550_v57  ;;  %v15600_v12 = vsub.s32 %v8276_v5, %v20778_v37  ;;  %v15613_v5 = vsub.s32 %v8290_v62, %v20778_v37  ;;  %v7532_v47 = vsel %vm1786_vm9, %v4644_v50, -inf }
 0x7f0   : > { %7488 = vmax.xlane.f32.xlu1 %v7487_v15  ;;  %v15591_v15 = vsub.s32 %v8269_v19, %v20778_v37  ;;  %v8304_v19 = vadd.s32 4294967248, %v15555_v31  ;;  %v7490_v7 = vsel %vm1786_vm9, %v4914_v21, -inf  ;;  %v4645_v21 = vcombine.high %v4600_v38, %v4632_v3  ;;  %v20787_v3 = vld [vmem:[#allocation186_spill] sm:$0xff] }
 0x7f1   : > { %v4374_v61 = vcombine.low %v4335_v44, %v4367_v35  ;;  %v4375_v54 = vcombine.high %v4335_v44, %v4367_v35  ;;  %v20782_v35 = vld [vmem:[#allocation105_spill] sm:$0xff]  ;;  %v7592_v44 = vsel %vm1786_vm9, %v4103_v16, -inf  ;;  %v20788_v38 = vld [vmem:[#allocation182_spill] sm:$0xff]  ;;  %v7553_v16 = vsel %vm1786_vm9, %v4509_v63, -inf }
 0x7f2   : > { %20780 = vst [vmem:[#allocation139_spill] sm:$0xff] %v15591_v15  ;;  %v15626_v62 = vsub.s32 %v8304_v19, %v20778_v37  ;;  %v5104_v19 = vcombine.low %v20788_v38, %v20787_v3  ;;  %v7511_v50 = vsel %vm1786_vm9, %v4779_v8, -inf  ;;  %v20794_v8 = vld [vmem:[#allocation90_spill] sm:$0xff] }
 0x7f3   : > { %7572 = vmax.xlane.f32.xlu0 %v7571_v20  ;;  %v7574_v10 = vsel %vm1786_vm9, %v4374_v61, -inf  ;;  %v15635_v18 = vsel %vm1786_vm9, %v4375_v54, -inf  ;;  %v15646_v61 = vsel %vm1786_vm9, %v4645_v21, -inf  ;;  %v5056_v36 = vcombine.low %v20794_v8, %v20793_v13 }
 0x7f4   : > { %7530 = vmax.xlane.f32.xlu1 %v7529_v40  ;;  %v15606_v40 = vpop.permute.xlu1 %2874  ;;  %20784 = vst [vmem:[#allocation127_spill] sm:$0xff] %v15626_v62  ;;  %v5057_v21 = vcombine.high %v20794_v8, %v20793_v13  ;;  %v20798_v13 = vld [vmem:[#allocation190_spill] sm:$0xff] }
 0x7f5   : > { %20781 = vst [vmem:[#allocation135_spill] sm:$0xff] %v15606_v40 }
 0x7f7   : > { %7446 = vmax.xlane.f32.xlu0 %v7445_v9  ;;  %v15616_v9 = vsub.s32 %v8297_v41, %v20778_v37  ;;  %v7595_v41 = vsel %vm1786_vm9, %v4239_v32, -inf }
 0x7f8   : > { %v7234_v20 = vpop.xlane.xlu0 %7233  ;;  %7569 = vmax.xlane.f32.xlu1 %v7568_v59  ;;  %v4510_v59 = vcombine.low %v20783_v28, %v20782_v35  ;;  %v20789_v35 = vld [vmem:[#allocation178_spill] sm:$0xff]  ;;  %v20790_v28 = vld [vmem:[#allocation172_spill] sm:$0xff] }
 0x7fa   : > { %v15649_v54 = vsel %vm1786_vm9, %v4510_v59, -inf  ;;  %v5073_v59 = vcombine.high %v20790_v28, %v20789_v35 }
 0x7fb   : > { %7491 = vmax.xlane.f32.xlu0 %v7490_v7  ;;  %v20785_v7 = vld [vmem:[#allocation149_spill] sm:$0xff] }
 0x7fc   : > { %v7258_v58 = vpop.xlane.xlu0 %7257  ;;  %7470 = vmax.xlane.f32.xlu1 %v7469_v51  ;;  %v4780_v53 = vcombine.low %v20786_v27, %v20785_v7  ;;  %v8268_v51 = vrot.slane %v7234_v20, %v15582_v4  ;;  %v5072_v7 = vcombine.low %v20790_v28, %v20789_v35  ;;  %v5088_v20 = vcombine.low %v20792_v34, %v20791_v45  ;;  %v20800_v35 = vld [vmem:[#allocation196_spill] sm:$0xff] }
 0x7fd   : > { %v7237_v42 = vpop.xlane.xlu1 %7236  ;;  %v5224_v28 = vcombine.low %v20800_v35, %v20799_v56 }
 0x7fe   : > { %v8273_v32 = vrot.slane %v7237_v42, %v15591_v15  ;;  %v15657_v63 = vsel %vm1786_vm9, %v4780_v53, -inf  ;;  %v5080_v53 = vrot.slane %v5072_v7, %v13517_v11  ;;  %v5064_v7 = vrot.slane %v5056_v36, %v13517_v11 }
 0x7ff   : > { %7533 = vmax.xlane.f32.xlu0 %v7532_v47  ;;  %v4915_v47 = vcombine.high %v15578_v17, %v15564_v30  ;;  %v8321_v30 = vrot.slane %v7258_v58, %v15582_v4  ;;  %v15702_v0 = vrot.slane %v5224_v28, %v13517_v11  ;;  %v20806_v28 = vld [vmem:[#allocation218_spill] sm:$0xff] }
 0x800   : > { %v7264_v27 = vpop.xlane.xlu0 %7263  ;;  %v8275_v42 = vsel %vm8274_vm10, %v8273_v32, %v8268_v51  ;;  %7512 = vmax.xlane.f32.xlu1 %v7511_v50  ;;  %v15668_v32 = vrot.slane %v5104_v19, %v13517_v11  ;;  %v20797_v50 = vld [vmem:[#allocation194_spill] sm:$0xff]  ;;  %v5096_v19 = vrot.slane %v5088_v20, %v13517_v11  ;;  %v15691_v20 = vrot.slane %v5057_v21, %v13517_v11 }
 0x801   : > { %v7261_v51 = vpop.xlane.xlu1 %7260  ;;  %v5208_v8 = vcombine.low %v20798_v13, %v20797_v50  ;;  %v8330_v25 = vrot.slane %v7264_v27, %v15600_v12  ;;  %v7514_v58 = vsel %vm1786_vm9, %v4915_v47, -inf  ;;  %v5120_v36 = vcombine.low %v5064_v7, %v5080_v53 }
 0x802   : > { %v8325_v17 = vrot.slane %v7261_v51, %v15591_v15  ;;  %v20802_v51 = vld [vmem:[#allocation175_spill] sm:$0xff]  ;;  %20805 = vst [vmem:[#allocation141_spill] sm:$0xff] %v15691_v20  ;;  %v5152_v47 = vcombine.low %v5096_v19, %v15668_v32  ;;  %v5105_v21 = vcombine.high %v20788_v38, %v20787_v3 }
 0x803   : > { %7575 = vmax.xlane.f32.xlu0 %v7574_v10  ;;  %v20801_v10 = vld [vmem:[#allocation176_spill] sm:$0xff] }
 0x804   : > { %v7285_v40 = vpop.xlane.xlu0 %7284  ;;  %v8326_v26 = vsel %vm8274_vm10, %v8325_v17, %v8321_v30  ;;  %7554 = vmax.xlane.f32.xlu1 %v7553_v16  ;;  %v5050_v46 = vcombine.low %v20802_v51, %v20801_v10  ;;  %v15694_v16 = vrot.slane %v5073_v59, %v13517_v11  ;;  %v15699_v17 = vrot.slane %v5208_v8, %v13517_v11  ;;  %v20807_v51 = vld [vmem:[#allocation214_spill] sm:$0xff] }
 0x805   : > { %v7240_v27 = vpop.xlane.xlu1 %7239  ;;  %v8331_v48 = vsel %vm8281_vm14, %v8330_v25, %v8326_v26  ;;  %v5121_v25 = vcombine.high %v5064_v7, %v5080_v53  ;;  %v5288_v8 = vcombine.low %v15702_v0, %v15687_v2  ;;  %v5376_v29 = vcombine.low %v20807_v51, %v20806_v28 }
 0x806   : > { %v8280_v30 = vrot.slane %v7240_v27, %v15600_v12  ;;  %v15710_v27 = vrot.slane %v5192_v6, %v13517_v11  ;;  %v8364_v7 = vrot.slane %v7285_v40, %v15591_v15  ;;  %v7493_v40 = vsel %vm1786_vm9, %v5050_v46, -inf }
 0x807   : > { %7596 = vmax.xlane.f32.xlu0 %v7595_v41  ;;  %v5153_v41 = vcombine.high %v5096_v19, %v15668_v32  ;;  %v20809_v32 = vld [vmem:[#allocation206_spill] sm:$0xff]  ;;  %v15738_v43 = vrot.slane %v5376_v29, %v13517_v11  ;;  %v5296_v46 = vrot.slane %v5288_v8, %v13550_v57  ;;  %v15742_v1 = vrot.slane %v5121_v25, %v13550_v57 }
 0x808   : > { %v7267_v26 = vpop.xlane.xlu0 %7266  ;;  %v8282_v59 = vsel %vm8281_vm14, %v8280_v30, %v8275_v42  ;;  %7593 = vmax.xlane.f32.xlu1 %v7592_v44  ;;  %v5160_v44 = vrot.slane %v5152_v47, %v13550_v57  ;;  %v5256_v6 = vcombine.low %v15710_v27, %v15699_v17  ;;  %v20808_v42 = vld [vmem:[#allocation210_spill] sm:$0xff]  ;;  %v20810_v30 = vld [vmem:[#allocation216_spill] sm:$0xff]  ;;  %v5128_v47 = vrot.slane %v5120_v36, %v13550_v57 }
 0x809   : > { %v8335_v10 = vrot.slane %v7267_v26, %v15610_v33  ;;  %v7282_v53 = vpop.xlane.xlu1 %7281  ;;  %v5344_v19 = vcombine.low %v20809_v32, %v20808_v42  ;;  %v20811_v26 = vld [vmem:[#allocation212_spill] sm:$0xff]  ;;  %v15750_v36 = vrot.slane %v5153_v41, %v13550_v57 }
 0x80a   : > { %v8360_v38 = vrot.slane %v7282_v53, %v15582_v4  ;;  %v5360_v22 = vcombine.low %v20811_v26, %v20810_v30  ;;  %v20812_v53 = vld [vmem:[#allocation208_spill] sm:$0xff]  ;;  %v5264_v8 = vrot.slane %v5256_v6, %v13550_v57  ;;  %v5185_v41 = vcombine.high %v5128_v47, %v5160_v44 }
 0x80b   : > { %v8336_v3 = vsel %vm8288_vm4, %v8335_v10, %v8331_v48  ;;  %7515 = vmax.xlane.f32.xlu0 %v7514_v58  ;;  %v5089_v58 = vcombine.high %v20792_v34, %v20791_v45  ;;  %v5328_v23 = vcombine.low %v20813_v49, %v20812_v53  ;;  %v15745_v48 = vrot.slane %v5105_v21, %v13517_v11  ;;  %v20820_v26 = vld [vmem:[#allocation224_spill] sm:$0xff] }
 0x80c   : > { %v15726_v39 = vpop.xlane.xlu0 %7305  ;;  %v8365_v10 = vsel %vm8274_vm10, %v8364_v7, %v8360_v38  ;;  %7494 = vmax.xlane.f32.xlu1 %v7493_v40  ;;  %v5184_v45 = vcombine.low %v5128_v47, %v5160_v44  ;;  %v15753_v29 = vrot.slane %v5344_v19, %v13517_v11  ;;  %v15756_v7 = vrot.slane %v5360_v22, %v13517_v11  ;;  %v20814_v19 = vld [vmem:[#allocation234_spill] sm:$0xff]  ;;  %v20821_v30 = vld [vmem:[#allocation220_spill] sm:$0xff] }
 0x80d   : > { %v7243_v52 = vpop.xlane.xlu1 %7242  ;;  %v15760_v21 = vrot.slane %v5089_v58, %v13517_v11  ;;  %v15766_v38 = vrot.slane %v5328_v23, %v13517_v11  ;;  %v20815_v40 = vld [vmem:[#allocation230_spill] sm:$0xff]  ;;  %v5320_v31 = vcombine.low %v5264_v8, %v5296_v46  ;;  %v5186_v23 = vcombine.low %v15742_v1, %v15750_v36 }
 0x80e   : > { %v8287_v34 = vrot.slane %v7243_v52, %v15610_v33  ;;  %v5424_v22 = vcombine.low %v15756_v7, %v15738_v43  ;;  %v5512_v37 = vcombine.low %v20815_v40, %v20814_v19  ;;  %v20816_v44 = vld [vmem:[#allocation226_spill] sm:$0xff]  ;;  %v20818_v40 = vld [vmem:[#allocation232_spill] sm:$0xff]  ;;  %v7616_v58 = vsel %vm1786_vm9, %v5184_v45, -inf }
 0x80f   : > { %7557 = vmax.xlane.f32.xlu0 %v15646_v61  ;;  %v20817_v47 = vld [vmem:[#allocation222_spill] sm:$0xff]  ;;  %v20819_v19 = vld [vmem:[#allocation228_spill] sm:$0xff]  ;;  %v5464_v32 = vcombine.low %v20821_v30, %v20820_v26 }
 0x810   : > { %v7270_v25 = vpop.xlane.xlu0 %7269  ;;  %v8289_v52 = vsel %vm8288_vm4, %v8287_v34, %v8282_v59  ;;  %7536 = vmax.xlane.f32.xlu1 %v15657_v63  ;;  %v5392_v63 = vcombine.low %v15766_v38, %v15753_v29  ;;  %v5496_v49 = vcombine.low %v20819_v19, %v20818_v40  ;;  %v7619_v40 = vsel %vm1786_vm9, %v5320_v31, -inf }
 0x811   : > { %v8340_v61 = vrot.slane %v7270_v25, %v15613_v5  ;;  %v7288_v6 = vpop.xlane.xlu1 %7287  ;;  %v5480_v25 = vcombine.low %v20817_v47, %v20816_v44  ;;  %v15794_v47 = vrot.slane %v5512_v37, %v13517_v11  ;;  %v5432_v45 = vrot.slane %v5424_v22, %v13550_v57 }
 0x812   : > { %v8369_v34 = vrot.slane %v7288_v6, %v15600_v12  ;;  %v7640_v6 = vsel %vm1786_vm9, %v5185_v41, -inf  ;;  %v15821_v41 = vrot.slane %v5464_v32, %v13517_v11 }
 0x813   : > { %v8341_v59 = vsel %vm8295_vm6, %v8340_v61, %v8336_v3  ;;  %7599 = vmax.xlane.f32.xlu0 %v15635_v18  ;;  %v5209_v3 = vcombine.high %v20798_v13, %v20797_v50  ;;  %v5321_v61 = vcombine.high %v5264_v8, %v5296_v46  ;;  %v5257_v50 = vcombine.high %v15710_v27, %v15699_v17 }
 0x814   : > { %v7312_v53 = vpop.xlane.xlu0 %7311  ;;  %v8370_v18 = vsel %vm8281_vm14, %v8369_v34, %v8365_v10  ;;  %7578 = vmax.xlane.f32.xlu1 %v15649_v54  ;;  %v5289_v54 = vcombine.high %v15702_v0, %v15687_v2  ;;  %v8399_v13 = vrot.slane %v15726_v39, %v15582_v4  ;;  %v15806_v37 = vrot.slane %v5480_v25, %v13517_v11  ;;  %v20822_v34 = vld [vmem:[#allocation249_spill] sm:$0xff] }
 0x815   : > { %v7309_v19 = vpop.xlane.xlu1 %7308  ;;  %v15809_v46 = vrot.slane %v5496_v49, %v13517_v11  ;;  %v8408_v31 = vrot.slane %v7312_v53, %v15600_v12  ;;  %v5400_v17 = vrot.slane %v5392_v63, %v13550_v57  ;;  %v5193_v2 = vcombine.high %v20804_v24, %v20803_v55 }
 0x816   : > { %v8403_v10 = vrot.slane %v7309_v19, %v15591_v15  ;;  %v7643_v0 = vsel %vm1786_vm9, %v5321_v61, -inf  ;;  %v7664_v27 = vsel %vm1786_vm9, %v5186_v23, -inf  ;;  %v15831_v55 = vrot.slane %v5257_v50, %v13550_v57  ;;  %v20823_v23 = vld [vmem:[#allocation246_spill] sm:$0xff] }
 0x817   : > { %7620 = vmax.xlane.f32.xlu0 %v7619_v40  ;;  %v5560_v49 = vcombine.low %v15809_v46, %v15794_v47  ;;  %v5456_v22 = vcombine.low %v5400_v17, %v5432_v45  ;;  %v15827_v40 = vrot.slane %v5209_v3, %v13517_v11  ;;  %v5528_v32 = vcombine.low %v15821_v41, %v15806_v37 }
 0x818   : > { %v15812_v8 = vpop.xlane.xlu0 %7332  ;;  %v8404_v39 = vsel %vm8274_vm10, %v8403_v10, %v8399_v13  ;;  %7617 = vmax.xlane.f32.xlu1 %v7616_v58  ;;  %v15834_v58 = vrot.slane %v5289_v54, %v13550_v57  ;;  %v5648_v63 = vcombine.low %v20823_v23, %v20822_v34  ;;  %v5457_v61 = vcombine.high %v5400_v17, %v5432_v45  ;;  %v20824_v10 = vld [vmem:[#allocation242_spill] sm:$0xff] }
 0x819   : > { %v7246_v53 = vpop.xlane.xlu1 %7245  ;;  %v8409_v19 = vsel %vm8281_vm14, %v8408_v31, %v8404_v39  ;;  %v5241_v3 = vcombine.high %v20796_v60, %v20795_v14  ;;  %v5425_v13 = vcombine.high %v15756_v7, %v15738_v43  ;;  %v20825_v31 = vld [vmem:[#allocation238_spill] sm:$0xff]  ;;  %v7622_v45 = vsel %vm1786_vm9, %v5456_v22, -inf }
 0x81a   : > { %v8294_v24 = vrot.slane %v7246_v53, %v15613_v5  ;;  %v5616_v39 = vcombine.low %v20825_v31, %v20824_v10  ;;  %v20827_v53 = vld [vmem:[#allocation244_spill] sm:$0xff]  ;;  %v5568_v17 = vrot.slane %v5560_v49, %v13550_v57  ;;  %v5393_v14 = vcombine.high %v15766_v38, %v15753_v29 }
 0x81b   : > { %7644 = vmax.xlane.f32.xlu0 %v7643_v0  ;;  %v20826_v0 = vld [vmem:[#allocation248_spill] sm:$0xff]  ;;  %v5322_v7 = vcombine.low %v15831_v55, %v15834_v58  ;;  %v7646_v49 = vsel %vm1786_vm9, %v5457_v61, -inf  ;;  %v5536_v10 = vrot.slane %v5528_v32, %v13550_v57  ;;  %v5225_v29 = vcombine.high %v20800_v35, %v20799_v56 }
 0x81c   : > { %v7273_v25 = vpop.xlane.xlu0 %7272  ;;  %v8296_v50 = vsel %vm8295_vm6, %v8294_v24, %v8289_v52  ;;  %7641 = vmax.xlane.f32.xlu1 %v7640_v6  ;;  %v5632_v34 = vcombine.low %v20827_v53, %v20826_v0  ;;  %v20828_v52 = vld [vmem:[#allocation240_spill] sm:$0xff]  ;;  %v15868_v38 = vrot.slane %v5241_v3, %v13517_v11  ;;  %v15873_v31 = vrot.slane %v5616_v39, %v13517_v11 }
 0x81d   : > { %v8345_v54 = vrot.slane %v7273_v25, %v15616_v9  ;;  %v7291_v23 = vpop.xlane.xlu1 %7290  ;;  %v20829_v6 = vld [vmem:[#allocation236_spill] sm:$0xff]  ;;  %v15861_v25 = vrot.slane %v5648_v63, %v13517_v11  ;;  %v5592_v0 = vcombine.low %v5536_v10, %v5568_v17  ;;  %v15879_v32 = vrot.slane %v5425_v13, %v13550_v57 }
 0x81e   : > { %v8374_v60 = vrot.slane %v7291_v23, %v15610_v33  ;;  %v5600_v24 = vcombine.low %v20829_v6, %v20828_v52  ;;  %v15876_v63 = vrot.slane %v5632_v34, %v13517_v11  ;;  %v8442_v56 = vrot.slane %v15812_v8, %v15591_v15 }
 0x81f   : > { %v8346_v43 = vsel %vm8302_vm13, %v8345_v54, %v8341_v59  ;;  %7623 = vmax.xlane.f32.xlu0 %v7622_v45  ;;  %v7667_v3 = vsel %vm1786_vm9, %v5322_v7, -inf  ;;  %v5593_v13 = vcombine.high %v5536_v10, %v5568_v17  ;;  %v15894_v23 = vrot.slane %v5393_v14, %v13550_v57 }
 0x820   : > { %v7315_v22 = vpop.xlane.xlu0 %7314  ;;  %v8375_v59 = vsel %vm8288_vm4, %v8374_v60, %v8370_v18  ;;  %7647 = vmax.xlane.f32.xlu1 %v7646_v49  ;;  %v15887_v39 = vrot.slane %v5600_v24, %v13517_v11  ;;  %v5696_v53 = vcombine.low %v15876_v63, %v15861_v25  ;;  %v15897_v8 = vrot.slane %v5193_v2, %v13517_v11 }
 0x821   : > { %v8413_v54 = vrot.slane %v7315_v22, %v15610_v33  ;;  %v7330_v61 = vpop.xlane.xlu1 %7329  ;;  %v20830_v45 = vcombine.low %v15691_v20, %v15694_v16  ;;  %v7625_v7 = vsel %vm1786_vm9, %v5592_v0, -inf  ;;  %v5458_v2 = vcombine.low %v15894_v23, %v15879_v32 }
 0x822   : > { %v8438_v18 = vrot.slane %v7330_v61, %v15582_v4  ;;  %v5664_v17 = vcombine.low %v15887_v39, %v15873_v31  ;;  %v20831_v52 = vcombine.low %v15760_v21, %v15745_v48  ;;  %v5272_v24 = vcombine.low %v15897_v8, %v15827_v40 }
 0x823   : > { %v8414_v35 = vsel %vm8288_vm4, %v8413_v54, %v8409_v19  ;;  %7665 = vmax.xlane.f32.xlu0 %v7664_v27  ;;  %v15900_v19 = vrot.slane %v5225_v29, %v13517_v11  ;;  %v15907_v60 = vrot.slane %v20830_v45, %v13550_v57  ;;  %v5187_v10 = vcombine.high %v15742_v1, %v15750_v36  ;;  %v20832_v29 = vld [vmem:[#allocation47_spill] sm:$0xff]  ;;  %v20833_v54 = vld [vmem:[#allocation258_spill] sm:$0xff]  ;;  %v20834_v36 = vld [vmem:[#allocation65_spill] sm:$0xff] }
 0x824   : > { %v15891_v34 = vpop.xlane.xlu0 %7353  ;;  %v8443_v27 = vsel %vm8274_vm10, %v8442_v56, %v8438_v18  ;;  %7668 = vmax.xlane.f32.xlu1 %v7667_v3  ;;  %v15918_v6 = vrot.slane %v20831_v52, %v13550_v57  ;;  %v5784_v61 = vcombine.low %v20833_v54, %v20832_v29  ;;  %v7649_v56 = vsel %vm1786_vm9, %v5593_v13, -inf  ;;  %v20836_v29 = vld [vmem:[#allocation260_spill] sm:$0xff]  ;;  %v20837_v54 = vld [vmem:[#allocation257_spill] sm:$0xff] }
 0x825   : > { %v7249_v14 = vpop.xlane.xlu1 %7248  ;;  %v5304_v22 = vcombine.low %v15900_v19, %v15868_v38  ;;  %v5704_v18 = vrot.slane %v5696_v53, %v13550_v57  ;;  %v5561_v3 = vcombine.high %v15809_v46, %v15794_v47  ;;  %v5323_v1 = vcombine.high %v15831_v55, %v15834_v58  ;;  %v20839_v58 = vld [vmem:[#allocation67_spill] sm:$0xff] }
 0x826   : > { %v8301_v49 = vrot.slane %v7249_v14, %v15616_v9  ;;  %v5768_v13 = vcombine.low %v20837_v54, %v20836_v29  ;;  %v7670_v53 = vsel %vm1786_vm9, %v5458_v2, -inf  ;;  %v5672_v47 = vrot.slane %v5664_v17, %v13550_v57 }
 0x827   : > { %7626 = vmax.xlane.f32.xlu0 %v7625_v7  ;;  %v20835_v7 = vld [vmem:[#allocation255_spill] sm:$0xff]  ;;  %v5529_v46 = vcombine.high %v15821_v41, %v15806_v37  ;;  %v7688_v55 = vsel %vm1786_vm9, %v5187_v10, -inf  ;;  %v15958_v17 = vrot.slane %v5272_v24, %v13550_v57  ;;  %v5377_v29 = vcombine.high %v20807_v51, %v20806_v28  ;;  %v20842_v28 = vld [vmem:[#allocation206_spill] sm:$0xff] }
 0x828   : > { %v7276_v0 = vpop.xlane.xlu0 %7275  ;;  %v15934_v45 = vsel %vm8302_vm13, %v8301_v49, %v8296_v50  ;;  %7650 = vmax.xlane.f32.xlu1 %v7649_v56  ;;  %v5752_v52 = vcombine.low %v20835_v7, %v20834_v36  ;;  %v15955_v36 = vrot.slane %v5784_v61, %v13517_v11  ;;  %v5729_v7 = vcombine.high %v5672_v47, %v5704_v18 }
 0x829   : > { %v8350_v14 = vrot.slane %v7276_v0, %v15626_v62  ;;  %v7294_v20 = vpop.xlane.xlu1 %7293  ;;  %v20840_v0 = vld [vmem:[#allocation251_spill] sm:$0xff]  ;;  %v15974_v61 = vrot.slane %v5768_v13, %v13517_v11  ;;  %v5459_v51 = vcombine.high %v15894_v23, %v15879_v32  ;;  %v20845_v23 = vld [vmem:[#allocation208_spill] sm:$0xff] }
 0x82a   : > { %v8379_v49 = vrot.slane %v7294_v20, %v15613_v5  ;;  %v5736_v56 = vcombine.low %v20840_v0, %v20839_v58  ;;  %v15965_v20 = vrot.slane %v5561_v3, %v13550_v57  ;;  %v15971_v10 = vrot.slane %v5752_v52, %v13517_v11 }
 0x82b   : > { %v15948_v50 = vsel %vm8309_vm8, %v8350_v14, %v8346_v43  ;;  %7671 = vmax.xlane.f32.xlu0 %v7670_v53  ;;  %v15968_v43 = vrot.slane %v5304_v22, %v13550_v57  ;;  %v7691_v14 = vsel %vm1786_vm9, %v5323_v1, -inf  ;;  %v15984_v22 = vrot.slane %v5529_v46, %v13550_v57  ;;  %v20843_v53 = vld [vmem:[#allocation216_spill] sm:$0xff] }
 0x82c   : > { %20838 = vst [vmem:[#allocation137_spill] sm:$0xff] %v15948_v50  ;;  %v7318_v2 = vpop.xlane.xlu0 %7317  ;;  %v15961_v37 = vsel %vm8295_vm6, %v8379_v49, %v8375_v59  ;;  %7689 = vmax.xlane.f32.xlu1 %v7688_v55  ;;  %v5728_v59 = vcombine.low %v5672_v47, %v5704_v18  ;;  %v15987_v52 = vrot.slane %v5736_v56, %v13517_v11  ;;  %v7652_v18 = vsel %vm1786_vm9, %v5729_v7, -inf  ;;  %v20844_v47 = vld [vmem:[#allocation212_spill] sm:$0xff] }
 0x82d   : > { %v8418_v41 = vrot.slane %v7318_v2, %v15613_v5  ;;  %v7336_v24 = vpop.xlane.xlu1 %7335  ;;  %v5832_v13 = vcombine.low %v15974_v61, %v15955_v36  ;;  %v5361_v49 = vcombine.high %v20844_v47, %v20843_v53  ;;  %v5594_v55 = vcombine.low %v15984_v22, %v15965_v20  ;;  %v20846_v2 = vld [vmem:[#allocation204_spill] sm:$0xff] }
 0x82e   : > { %v8447_v3 = vrot.slane %v7336_v24, %v15600_v12  ;;  %v5800_v58 = vcombine.low %v15987_v52, %v15971_v10  ;;  %v7628_v56 = vsel %vm1786_vm9, %v5728_v59, -inf  ;;  %v5324_v32 = vcombine.low %v15958_v17, %v15968_v43 }
 0x82f   : > { %v15980_v54 = vsel %vm8295_vm6, %v8418_v41, %v8414_v35  ;;  %7692 = vmax.xlane.f32.xlu0 %v7691_v14  ;;  %v5345_v35 = vcombine.high %v20842_v28, %v20808_v42  ;;  %v5188_v42 = vcombine.low %v15907_v60, %v15918_v6  ;;  %v16013_v7 = vrot.slane %v5377_v29, %v13517_v11 }
 0x830   : > { %20841 = vst [vmem:[#allocation129_spill] sm:$0xff] %v15980_v54  ;;  %v7360_v1 = vpop.xlane.xlu0 %7359  ;;  %v15999_v46 = vsel %vm8281_vm14, %v8447_v3, %v8443_v27  ;;  %7653 = vmax.xlane.f32.xlu1 %v7652_v18  ;;  %v5329_v27 = vcombine.high %v20846_v2, %v20845_v23  ;;  %v8477_v41 = vrot.slane %v15891_v34, %v15582_v4  ;;  %v7694_v18 = vsel %vm1786_vm9, %v5459_v51, -inf }
 0x831   : > { %v7357_v0 = vpop.xlane.xlu1 %7356  ;;  %v5697_v14 = vcombine.high %v15876_v63, %v15861_v25  ;;  %v8486_v59 = vrot.slane %v7360_v1, %v15600_v12  ;;  %v5840_v28 = vrot.slane %v5832_v13, %v13550_v57  ;;  %v16026_v29 = vrot.slane %v5345_v35, %v13517_v11  ;;  %v20847_v63 = vld [vmem:[#allocation269_spill] sm:$0xff]  ;;  %v20848_v1 = vld [vmem:[#allocation266_spill] sm:$0xff] }
 0x832   : > { %v8481_v24 = vrot.slane %v7357_v0, %v15591_v15  ;;  %v16029_v53 = vrot.slane %v5361_v49, %v13517_v11  ;;  %v7673_v47 = vsel %vm1786_vm9, %v5594_v55, -inf  ;;  %v5665_v25 = vcombine.high %v15887_v39, %v15873_v31  ;;  %v20851_v49 = vld [vmem:[#allocation177_spill] sm:$0xff] }
 0x833   : > { %7629 = vmax.xlane.f32.xlu0 %v7628_v56  ;;  %v5904_v0 = vcombine.low %v20848_v1, %v20847_v63  ;;  %v5808_v13 = vrot.slane %v5800_v58, %v13550_v57  ;;  %v20850_v56 = vld [vmem:[#allocation179_spill] sm:$0xff]  ;;  %v16044_v2 = vrot.slane %v5329_v27, %v13517_v11  ;;  %v7715_v31 = vsel %vm1786_vm9, %v5324_v32, -inf  ;;  %v20855_v63 = vld [vmem:[#allocation173_spill] sm:$0xff] }
 0x834   : > { %v16021_v3 = vpop.xlane.xlu0 %7380  ;;  %v8482_v34 = vsel %vm8274_vm10, %v8481_v24, %v8477_v41  ;;  %7695 = vmax.xlane.f32.xlu1 %v7694_v18  ;;  %v5920_v23 = vcombine.low %v20851_v49, %v20850_v56  ;;  %v5440_v39 = vcombine.low %v16029_v53, %v16013_v7  ;;  %v20852_v41 = vld [vmem:[#allocation33_spill] sm:$0xff]  ;;  %v20853_v24 = vld [vmem:[#allocation46_spill] sm:$0xff]  ;;  %v7712_v32 = vsel %vm1786_vm9, %v5188_v42, -inf }
 0x835   : > { %v7252_v51 = vpop.xlane.xlu1 %7251  ;;  %v16039_v35 = vsel %vm8281_vm14, %v8486_v59, %v8482_v34  ;;  %v5872_v58 = vcombine.low %v20853_v24, %v20852_v41  ;;  %v5864_v59 = vcombine.low %v5808_v13, %v5840_v28  ;;  %v16055_v34 = vrot.slane %v5697_v14, %v13550_v57  ;;  %v20856_v1 = vld [vmem:[#allocation29_spill] sm:$0xff] }
 0x836   : > { %20849 = vst [vmem:[#allocation125_spill] sm:$0xff] %v16039_v35  ;;  %v8308_v55 = vrot.slane %v7252_v51, %v15626_v62  ;;  %v5408_v27 = vcombine.low %v16044_v2, %v16026_v29  ;;  %v5888_v51 = vcombine.low %v20856_v1, %v20855_v63  ;;  %v16067_v56 = vrot.slane %v5904_v0, %v13517_v11 }
 0x837   : > { %7674 = vmax.xlane.f32.xlu0 %v7673_v47  ;;  %v5865_v41 = vcombine.high %v5808_v13, %v5840_v28  ;;  %v16070_v14 = vrot.slane %v5665_v25, %v13550_v57  ;;  %v16073_v24 = vrot.slane %v5920_v23, %v13517_v11  ;;  %v16085_v28 = vrot.slane %v5440_v39, %v13550_v57  ;;  %v20857_v25 = vld [vmem:[#allocation187_spill] sm:$0xff]  ;;  %v20858_v13 = vld [vmem:[#allocation185_spill] sm:$0xff] }
 0x838   : > { %v16052_v18 = vpop.xlane.xlu0 %7425  ;;  %v16061_v47 = vsel %vm8309_vm8, %v8308_v55, %v15934_v45  ;;  %7716 = vmax.xlane.f32.xlu1 %v7715_v31  ;;  %v16077_v55 = vrot.slane %v5872_v58, %v13517_v11  ;;  %v7631_v31 = vsel %vm1786_vm9, %v5864_v59, -inf  ;;  %v6056_v23 = vcombine.low %v20858_v13, %v20857_v25  ;;  %v20860_v25 = vld [vmem:[#allocation183_spill] sm:$0xff]  ;;  %v20861_v13 = vld [vmem:[#allocation181_spill] sm:$0xff] }
 0x839   : > { %20854 = vst [vmem:[#allocation72_spill] sm:$0xff] %v16061_v47  ;;  %v7297_v49 = vpop.xlane.xlu1 %7296  ;;  %v5730_v0 = vcombine.low %v16070_v14, %v16055_v34  ;;  %v16094_v58 = vrot.slane %v5408_v27, %v13550_v57  ;;  %v5968_v59 = vcombine.low %v16067_v56, %v16073_v24  ;;  %v7655_v39 = vsel %vm1786_vm9, %v5865_v41, -inf }
 0x83a   : > { %v8384_v45 = vrot.slane %v7297_v49, %v15616_v9  ;;  %v5595_v49 = vcombine.high %v15984_v22, %v15965_v20  ;;  %v5189_v20 = vcombine.high %v15907_v60, %v15918_v6  ;;  %v16117_v22 = vrot.slane %v6056_v23, %v13517_v11 }
 0x83b   : > { %7713 = vmax.xlane.f32.xlu0 %v7712_v32  ;;  %v16097_v32 = vrot.slane %v5888_v51, %v13517_v11  ;;  %v5460_v41 = vcombine.low %v16094_v58, %v16085_v28  ;;  %v5325_v6 = vcombine.high %v15958_v17, %v15968_v43  ;;  %v5976_v23 = vrot.slane %v5968_v59, %v13550_v57  ;;  %v20870_v59 = vld [vmem:[#allocation38_spill] sm:$0xff] }
 0x83c   : > { %v16079_v42 = vpop.xlane.xlu0 %7449  ;;  %v16091_v63 = vsel %vm8302_vm13, %v8384_v45, %v15961_v37  ;;  %7632 = vmax.xlane.f32.xlu1 %v7631_v31  ;;  %v20862_v45 = vld [vmem:[#allocation234_spill] sm:$0xff]  ;;  %v7697_v60 = vsel %vm1786_vm9, %v5595_v49, -inf  ;;  %v5833_v49 = vcombine.high %v15974_v61, %v15955_v36  ;;  %v7736_v43 = vsel %vm1786_vm9, %v5189_v20, -inf  ;;  %v20869_v61 = vld [vmem:[#allocation53_spill] sm:$0xff] }
 0x83d   : > { %20859 = vst [vmem:[#allocation66_spill] sm:$0xff] %v16091_v63  ;;  %v7339_v1 = vpop.xlane.xlu1 %7338  ;;  %v20863_v31 = vld [vmem:[#allocation230_spill] sm:$0xff]  ;;  %v5936_v51 = vcombine.low %v16077_v55, %v16097_v32  ;;  %v7676_v63 = vsel %vm1786_vm9, %v5730_v0, -inf  ;;  %v5169_v0 = vcombine.high %v15760_v21, %v15745_v48  ;;  %v7718_v17 = vsel %vm1786_vm9, %v5460_v41, -inf }
 0x83e   : > { %v5513_v35 = vcombine.high %v20863_v31, %v20862_v45  ;;  %v8452_v27 = vrot.slane %v7339_v1, %v15610_v33  ;;  %v20864_v45 = vld [vmem:[#allocation222_spill] sm:$0xff]  ;;  %v20865_v1 = vld [vmem:[#allocation232_spill] sm:$0xff]  ;;  %v5801_v36 = vcombine.high %v15987_v52, %v15971_v10  ;;  %v6040_v41 = vcombine.low %v20870_v59, %v20869_v61  ;;  %v20871_v10 = vld [vmem:[#allocation59_spill] sm:$0xff] }
 0x83f   : > { %7656 = vmax.xlane.f32.xlu0 %v7655_v39  ;;  %v5481_v31 = vcombine.high %v20864_v45, %v20816_v44  ;;  %v20866_v39 = vld [vmem:[#allocation228_spill] sm:$0xff]  ;;  %v5465_v44 = vcombine.high %v20821_v30, %v20820_v26  ;;  %v5944_v30 = vrot.slane %v5936_v51, %v13550_v57  ;;  %v5305_v26 = vcombine.high %v15900_v19, %v15868_v38 }
 0x840   : > { %v7432_v54 = vpop.xlane.xlu0 %7431  ;;  %v5497_v37 = vcombine.high %v20866_v39, %v20865_v1  ;;  %v16125_v50 = vsel %vm8288_vm4, %v8452_v27, %v15999_v46  ;;  %7677 = vmax.xlane.f32.xlu1 %v7676_v63  ;;  %v16136_v45 = vrot.slane %v5513_v35, %v13517_v11  ;;  %v8520_v46 = vrot.slane %v16021_v3, %v15591_v15  ;;  %v20872_v52 = vld [vmem:[#allocation60_spill] sm:$0xff] }
 0x841   : > { %20867 = vst [vmem:[#allocation64_spill] sm:$0xff] %v16125_v50  ;;  %v7378_v47 = vpop.xlane.xlu1 %7377  ;;  %v16151_v35 = vrot.slane %v5481_v31, %v13517_v11  ;;  %v7739_v20 = vsel %vm1786_vm9, %v5325_v6, -inf  ;;  %v6001_v38 = vcombine.high %v5944_v30, %v5976_v23  ;;  %v16165_v19 = vrot.slane %v5465_v44, %v13517_v11  ;;  %v20916_v50 = vld [vmem:[#allocation223_spill] sm:$0xff] }
 0x842   : > { %v8516_v63 = vrot.slane %v7378_v47, %v15582_v4  ;;  %v16154_v3 = vrot.slane %v5497_v37, %v13517_v11  ;;  %v8594_v31 = vrot.slane %v16052_v18, %v15582_v4  ;;  %v6008_v39 = vcombine.low %v20872_v52, %v20871_v10 }
 0x843   : > { %7698 = vmax.xlane.f32.xlu0 %v7697_v60  ;;  %v8603_v60 = vrot.slane %v7432_v54, %v15600_v12  ;;  %v6000_v6 = vcombine.low %v5944_v30, %v5976_v23  ;;  %v5544_v44 = vcombine.low %v16165_v19, %v16151_v35  ;;  %v16185_v61 = vrot.slane %v6040_v41, %v13517_v11 }
 0x844   : > { %v16143_v27 = vpop.xlane.xlu0 %7473  ;;  %v16157_v47 = vsel %vm8274_vm10, %v8520_v46, %v8516_v63  ;;  %7719 = vmax.xlane.f32.xlu1 %v7718_v17  ;;  %v5576_v37 = vcombine.low %v16154_v3, %v16136_v45  ;;  %v16176_v63 = vrot.slane %v5833_v49, %v13550_v57  ;;  %v7658_v49 = vsel %vm1786_vm9, %v6001_v38, -inf }
 0x845   : > { %20868 = vst [vmem:[#allocation58_spill] sm:$0xff] %v16157_v47  ;;  %v7429_v51 = vpop.xlane.xlu1 %7428  ;;  %v16190_v30 = vrot.slane %v5801_v36, %v13550_v57  ;;  %v5273_v59 = vcombine.high %v15897_v8, %v15827_v40  ;;  %v7634_v38 = vsel %vm1786_vm9, %v6000_v6, -inf  ;;  %v20873_v8 = vld [vmem:[#allocation141_spill] sm:$0xff]  ;;  %v16219_v52 = vrot.slane %v5305_v26, %v13550_v57  ;;  %v20914_v47 = vld [vmem:[#allocation231_spill] sm:$0xff] }
 0x846   : > { %v8598_v1 = vrot.slane %v7429_v51, %v15591_v15  ;;  %v8633_v51 = vrot.slane %v16079_v42, %v15582_v4  ;;  %v16207_v40 = vrot.slane %v5576_v37, %v13550_v57  ;;  %v5137_v42 = vcombine.high %v20873_v8, %v15694_v16 }
 0x847   : > { %7737 = vmax.xlane.f32.xlu0 %v7736_v43  ;;  %v5731_v43 = vcombine.high %v16070_v14, %v16055_v34  ;;  %v16201_v14 = vrot.slane %v6008_v39, %v13517_v11  ;;  %v5866_v36 = vcombine.low %v16190_v30, %v16176_v63  ;;  %v6104_v39 = vcombine.low %v16185_v61, %v16117_v22 }
 0x848   : > { %v7435_v46 = vpop.xlane.xlu0 %7434  ;;  %v8599_v17 = vsel %vm8274_vm10, %v8598_v1, %v8594_v31  ;;  %7740 = vmax.xlane.f32.xlu1 %v7739_v20  ;;  %v20874_v31 = vcombine.low %v20861_v13, %v20860_v25  ;;  %v5461_v16 = vcombine.high %v16094_v58, %v16085_v28  ;;  %v16234_v13 = vrot.slane %v5169_v0, %v13550_v57 }
 0x849   : > { %v8608_v18 = vrot.slane %v7435_v46, %v15610_v33  ;;  %v8604_v54 = vsel %vm8281_vm14, %v8603_v60, %v8599_v17  ;;  %v7453_v23 = vpop.xlane.xlu1 %7452  ;;  %v7700_v60 = vsel %vm1786_vm9, %v5731_v43, -inf  ;;  %v16227_v46 = vrot.slane %v5544_v44, %v13550_v57 }
 0x84a   : > { %v8637_v34 = vrot.slane %v7453_v23, %v15591_v15  ;;  %v16215_v1 = vrot.slane %v20874_v31, %v13517_v11  ;;  %v7679_v17 = vsel %vm1786_vm9, %v5866_v36, -inf  ;;  %v16242_v58 = vrot.slane %v5273_v59, %v13550_v57 }
 0x84b   : > { %v16197_v20 = vsel %vm8288_vm4, %v8608_v18, %v8604_v54  ;;  %7659 = vmax.xlane.f32.xlu0 %v7658_v49  ;;  %v5596_v28 = vcombine.low %v16227_v46, %v16207_v40  ;;  %v16246_v18 = vrot.slane %v5137_v42, %v13550_v57  ;;  %v7742_v21 = vsel %vm1786_vm9, %v5461_v16, -inf }
 0x84c   : > { %v7480_v41 = vpop.xlane.xlu0 %7479  ;;  %v8638_v10 = vsel %vm8274_vm10, %v8637_v34, %v8633_v51  ;;  %7635 = vmax.xlane.f32.xlu1 %v7634_v38  ;;  %v6072_v26 = vcombine.low %v16201_v14, %v16215_v1  ;;  %v5326_v0 = vcombine.low %v16242_v58, %v16219_v52  ;;  %v6112_v43 = vrot.slane %v6104_v39, %v13550_v57 }
 0x84d   : > { %v7456_v37 = vpop.xlane.xlu1 %7455  ;;  %v8672_v54 = vrot.slane %v16143_v27, %v15582_v4  ;;  %v5190_v49 = vcombine.low %v16246_v18, %v16234_v13  ;;  %v5969_v59 = vcombine.high %v16067_v56, %v16073_v24  ;;  %v8681_v51 = vrot.slane %v7480_v41, %v15600_v12  ;;  %v20875_v56 = vld [vmem:[#allocation115_spill] sm:$0xff] }
 0x84e   : > { %v8642_v25 = vrot.slane %v7456_v37, %v15600_v12  ;;  %v7721_v38 = vsel %vm1786_vm9, %v5596_v28, -inf  ;;  %v6080_v36 = vrot.slane %v6072_v26, %v13550_v57  ;;  %v5937_v27 = vcombine.high %v16077_v55, %v16097_v32  ;;  %v20876_v41 = vld [vmem:[#allocation191_spill] sm:$0xff]  ;;  %v20878_v26 = vld [vmem:[#allocation252_spill] sm:$0xff] }
 0x84f   : > { %7701 = vmax.xlane.f32.xlu0 %v7700_v60  ;;  %v7763_v31 = vsel %vm1786_vm9, %v5326_v0, -inf  ;;  %v8311_v24 = vadd.s32 4294967240, %v20875_v56  ;;  %v20877_v37 = vld [vmem:[#allocation111_spill] sm:$0xff] }
 0x850   : > { %v7501_v6 = vpop.xlane.xlu0 %7500  ;;  %v8643_v44 = vsel %vm8281_vm14, %v8642_v25, %v8638_v10  ;;  %7680 = vmax.xlane.f32.xlu1 %v7679_v17  ;;  %v6137_v10 = vcombine.high %v6080_v36, %v6112_v43  ;;  %v6144_v60 = vcombine.low %v20877_v37, %v20876_v41  ;;  %v7760_v25 = vsel %vm1786_vm9, %v5190_v49, -inf  ;;  %v20879_v17 = vld [vmem:[#allocation254_spill] sm:$0xff] }
 0x851   : > { %v7477_v48 = vpop.xlane.xlu1 %7476  ;;  %v5712_v55 = vcombine.low %v20879_v17, %v20878_v26  ;;  %v6145_v0 = vcombine.high %v20877_v37, %v20876_v41  ;;  %v5441_v41 = vcombine.high %v16029_v53, %v16013_v7  ;;  %v5409_v7 = vcombine.high %v16044_v2, %v16026_v29 }
 0x852   : > { %v8676_v23 = vrot.slane %v7477_v48, %v15591_v15  ;;  %v6136_v48 = vcombine.low %v6080_v36, %v6112_v43  ;;  %v5867_v43 = vcombine.high %v16190_v30, %v16176_v63 }
 0x853   : > { %7743 = vmax.xlane.f32.xlu0 %v7742_v21  ;;  %v16278_v21 = vrot.slane %v5969_v59, %v13550_v57  ;;  %v16291_v59 = vrot.slane %v5937_v27, %v13550_v57 }
 0x854   : > { %v7462_v34 = vpop.xlane.xlu0 %7461  ;;  %v8677_v8 = vsel %vm8274_vm10, %v8676_v23, %v8672_v54  ;;  %7722 = vmax.xlane.f32.xlu1 %v7721_v38  ;;  %v20880_v54 = vld [vmem:[#allocation193_spill] sm:$0xff]  ;;  %v7637_v30 = vsel %vm1786_vm9, %v6136_v48, -inf  ;;  %v7703_v17 = vsel %vm1786_vm9, %v5867_v43, -inf  ;;  %v20884_v48 = vld [vmem:[#allocation6_spill] sm:$0xff] }
 0x855   : > { %v7459_v42 = vpop.xlane.xlu1 %7458  ;;  %v16267_v39 = vsel %vm8281_vm14, %v8681_v51, %v8677_v8  ;;  %v8652_v32 = vrot.slane %v7462_v34, %v15613_v5  ;;  %v20881_v23 = vld [vmem:[#allocation189_spill] sm:$0xff]  ;;  %v20883_v8 = vld [vmem:[#allocation256_spill] sm:$0xff]  ;;  %v7661_v34 = vsel %vm1786_vm9, %v6137_v10, -inf  ;;  %v6002_v27 = vcombine.low %v16291_v59, %v16278_v21 }
 0x856   : > { %v8647_v16 = vrot.slane %v7459_v42, %v15610_v33  ;;  %v6160_v51 = vcombine.low %v20881_v23, %v20880_v54  ;;  %v20882_v38 = vld [vmem:[#allocation253_spill] sm:$0xff]  ;;  %v6161_v56 = vcombine.high %v20881_v23, %v20880_v54  ;;  %v16329_v29 = vsub.s32 %v8311_v24, %v20884_v48 }
 0x857   : > { %7764 = vmax.xlane.f32.xlu0 %v7763_v31  ;;  %v5680_v42 = vcombine.low %v20883_v8, %v20882_v38  ;;  %v16342_v23 = vrot.slane %v5441_v41, %v13550_v57  ;;  %v16345_v24 = vrot.slane %v6145_v0, %v13517_v11  ;;  %v16357_v0 = vrot.slane %v5409_v7, %v13550_v57 }
 0x858   : > { %v7504_v28 = vpop.xlane.xlu0 %7503  ;;  %v8648_v49 = vsel %vm8288_vm4, %v8647_v16, %v8643_v44  ;;  %7761 = vmax.xlane.f32.xlu1 %v7760_v25  ;;  %v8715_v44 = vrot.slane %v7501_v6, %v15591_v15  ;;  %v16309_v16 = vrot.slane %v5712_v55, %v13550_v57  ;;  %v16312_v25 = vrot.slane %v6160_v51, %v13517_v11 }
 0x859   : > { %v7498_v31 = vpop.xlane.xlu1 %7497  ;;  %v16294_v36 = vsel %vm8295_vm6, %v8652_v32, %v8648_v49  ;;  %v8720_v10 = vrot.slane %v7504_v28, %v15600_v12  ;;  %v5191_v6 = vcombine.high %v16246_v18, %v16234_v13  ;;  %v5597_v32 = vcombine.high %v16227_v46, %v16207_v40  ;;  %20885 = vst [vmem:[#allocation76_spill] sm:$0xff] %v16329_v29  ;;  %v20889_v49 = vld [vmem:[#allocation197_spill] sm:$0xff] }
 0x85a   : > { %v8711_v37 = vrot.slane %v7498_v31, %v15582_v4  ;;  %v16323_v55 = vrot.slane %v5680_v42, %v13550_v57  ;;  %v16332_v2 = vrot.slane %v6161_v56, %v13517_v11  ;;  %v16336_v18 = vrot.slane %v6144_v60, %v13517_v11  ;;  %20887 = vst [vmem:[#allocation99_spill] sm:$0xff] %v16345_v24  ;;  %v20888_v42 = vld [vmem:[#allocation201_spill] sm:$0xff] }
 0x85b   : > { %7662 = vmax.xlane.f32.xlu0 %v7661_v34  ;;  %v7682_v40 = vsel %vm1786_vm9, %v6002_v27, -inf  ;;  %v7784_v60 = vsel %vm1786_vm9, %v5191_v6, -inf  ;;  %v6192_v31 = vcombine.low %v20889_v49, %v20888_v42  ;;  %v7745_v43 = vsel %vm1786_vm9, %v5597_v32, -inf }
 0x85c   : > { %v16303_v63 = vpop.xlane.xlu0 %7524  ;;  %v8716_v53 = vsel %vm8274_vm10, %v8715_v44, %v8711_v37  ;;  %7638 = vmax.xlane.f32.xlu1 %v7637_v30  ;;  %20886 = vst [vmem:[#allocation62_spill] sm:$0xff] %v16332_v2  ;;  %v5732_v46 = vcombine.low %v16323_v55, %v16309_v16  ;;  %v6208_v8 = vcombine.low %v16336_v18, %v16312_v25  ;;  %v20890_v37 = vld [vmem:[#allocation199_spill] sm:$0xff] }
 0x85d   : > { %v7438_v26 = vpop.xlane.xlu1 %7437  ;;  %v16326_v28 = vsel %vm8281_vm14, %v8720_v10, %v8716_v53  ;;  %v6224_v56 = vcombine.low %v16345_v24, %v16332_v2  ;;  %v20891_v10 = vld [vmem:[#allocation195_spill] sm:$0xff]  ;;  %v6105_v27 = vcombine.high %v16185_v61, %v16117_v22  ;;  %v5462_v6 = vcombine.low %v16357_v0, %v16342_v23 }
 0x85e   : > { %v8613_v13 = vrot.slane %v7438_v26, %v15613_v5  ;;  %v6176_v30 = vcombine.low %v20891_v10, %v20890_v37  ;;  %v7724_v53 = vsel %vm1786_vm9, %v5732_v46, -inf  ;;  %v6177_v22 = vcombine.high %v20891_v10, %v20890_v37  ;;  %v20896_v10 = vld [vmem:[#allocation32_spill] sm:$0xff] }
 0x85f   : > { %7704 = vmax.xlane.f32.xlu0 %v7703_v17  ;;  %v6193_v17 = vcombine.high %v20889_v49, %v20888_v42  ;;  %v6200_v61 = vrot.slane %v6192_v31, %v13517_v11  ;;  %v6003_v46 = vcombine.high %v16291_v59, %v16278_v21  ;;  %v5327_v42 = vcombine.high %v16242_v58, %v16219_v52  ;;  %v20892_v31 = vld [vmem:[#allocation31_spill] sm:$0xff]  ;;  %v20894_v58 = vld [vmem:[#allocation261_spill] sm:$0xff] }
 0x860   : > { %v7441_v54 = vpop.xlane.xlu0 %7440  ;;  %v8614_v51 = vsel %vm8295_vm6, %v8613_v13, %v16197_v20  ;;  %7683 = vmax.xlane.f32.xlu1 %v7682_v40  ;;  %v6209_v20 = vcombine.high %v16336_v18, %v16312_v25  ;;  %v6184_v49 = vrot.slane %v6176_v30, %v13517_v11  ;;  %v7766_v21 = vsel %vm1786_vm9, %v5462_v6, -inf  ;;  %v20897_v30 = vld [vmem:[#allocation41_spill] sm:$0xff] }
 0x861   : > { %v8618_v38 = vrot.slane %v7441_v54, %v15616_v9  ;;  %v7483_v34 = vpop.xlane.xlu1 %7482  ;;  %v6073_v54 = vcombine.high %v16201_v14, %v16215_v1  ;;  %v20893_v14 = vld [vmem:[#allocation262_spill] sm:$0xff]  ;;  %v16401_v59 = vrot.slane %v6105_v27, %v13550_v57  ;;  %v5733_v52 = vcombine.high %v16323_v55, %v16309_v16 }
 0x862   : > { %v8686_v44 = vrot.slane %v7483_v34, %v15610_v33  ;;  %v5848_v1 = vcombine.low %v20893_v14, %v20892_v31  ;;  %v7706_v27 = vsel %vm1786_vm9, %v6003_v46, -inf  ;;  %v7787_v16 = vsel %vm1786_vm9, %v5327_v42, -inf }
 0x863   : > { %v16364_v41 = vsel %vm8302_vm13, %v8618_v38, %v8614_v51  ;;  %7746 = vmax.xlane.f32.xlu0 %v7745_v43  ;;  %v8754_v51 = vrot.slane %v16303_v63, %v15591_v15  ;;  %v16404_v63 = vrot.slane %v6193_v17, %v13517_v11  ;;  %v16416_v6 = vrot.slane %v6073_v54, %v13550_v57 }
 0x864   : > { %v7486_v7 = vpop.xlane.xlu0 %7485  ;;  %v8687_v32 = vsel %vm8288_vm4, %v8686_v44, %v16267_v39  ;;  %7725 = vmax.xlane.f32.xlu1 %v7724_v53  ;;  %v20895_v44 = vld [vmem:[#allocation263_spill] sm:$0xff]  ;;  %v6240_v17 = vcombine.low %v6184_v49, %v6200_v61  ;;  %v5577_v55 = vcombine.high %v16154_v3, %v16136_v45  ;;  %v16430_v46 = vrot.slane %v5848_v1, %v13550_v57 }
 0x865   : > { %v8691_v13 = vrot.slane %v7486_v7, %v15613_v5  ;;  %v7522_v40 = vpop.xlane.xlu1 %7521  ;;  %v5816_v37 = vcombine.low %v20895_v44, %v20894_v58  ;;  %v5984_v7 = vcombine.low %v20897_v30, %v20896_v10  ;;  %v6138_v54 = vcombine.low %v16416_v6, %v16401_v59 }
 0x866   : > { %v8750_v38 = vrot.slane %v7522_v40, %v15582_v4  ;;  %v20898_v40 = vld [vmem:[#allocation264_spill] sm:$0xff]  ;;  %v16433_v14 = vrot.slane %v6177_v22, %v13517_v11  ;;  %v5463_v45 = vcombine.high %v16357_v0, %v16342_v23  ;;  %v5545_v3 = vcombine.high %v16165_v19, %v16151_v35 }
 0x867   : > { %v16391_v39 = vsel %vm8295_vm6, %v8691_v13, %v8687_v32  ;;  %7785 = vmax.xlane.f32.xlu0 %v7784_v60  ;;  %v16443_v1 = vrot.slane %v5816_v37, %v13550_v57  ;;  %v16446_v22 = vrot.slane %v5984_v7, %v13550_v57  ;;  %v16455_v35 = vrot.slane %v6208_v8, %v13550_v57 }
 0x868   : > { %v7528_v34 = vpop.xlane.xlu0 %7527  ;;  %v8755_v43 = vsel %vm8274_vm10, %v8754_v51, %v8750_v38  ;;  %7767 = vmax.xlane.f32.xlu1 %v7766_v21  ;;  %v20899_v51 = vld [vmem:[#allocation265_spill] sm:$0xff]  ;;  %v16458_v19 = vrot.slane %v6240_v17, %v13550_v57  ;;  %v7685_v0 = vsel %vm1786_vm9, %v6138_v54, -inf  ;;  %v16476_v44 = vrot.slane %v6209_v20, %v13550_v57 }
 0x869   : > { %v8759_v60 = vrot.slane %v7528_v34, %v15600_v12  ;;  %v7465_v53 = vpop.xlane.xlu1 %7464  ;;  %v5952_v38 = vcombine.low %v20899_v51, %v20898_v40  ;;  %v6241_v34 = vcombine.high %v6184_v49, %v6200_v61  ;;  %v6256_v61 = vcombine.low %v16433_v14, %v16404_v63  ;;  %v20900_v17 = vld [vmem:[#allocation217_spill] sm:$0xff] }
 0x86a   : > { %v8657_v13 = vrot.slane %v7465_v53, %v15616_v9  ;;  %v5868_v49 = vcombine.low %v16443_v1, %v16430_v46  ;;  %v7790_v30 = vsel %vm1786_vm9, %v5463_v45, -inf  ;;  %v16491_v53 = vrot.slane %v6224_v56, %v13550_v57  ;;  %v20903_v45 = vld [vmem:[#allocation205_spill] sm:$0xff] }
 0x86b   : > { %v16419_v32 = vsel %vm8281_vm14, %v8759_v60, %v8755_v43  ;;  %7707 = vmax.xlane.f32.xlu0 %v7706_v27  ;;  %v7748_v43 = vsel %vm1786_vm9, %v5733_v52, -inf  ;;  %v16464_v60 = vrot.slane %v5952_v38, %v13550_v57  ;;  %v16467_v52 = vrot.slane %v5577_v55, %v13550_v57 }
 0x86c   : > { %v7549_v31 = vpop.xlane.xlu0 %7548  ;;  %v8658_v42 = vsel %vm8302_vm13, %v8657_v13, %v16294_v36  ;;  %7788 = vmax.xlane.f32.xlu1 %v7787_v16  ;;  %v16479_v37 = vrot.slane %v6241_v34, %v13550_v57  ;;  %v16499_v27 = vrot.slane %v6256_v61, %v13550_v57  ;;  %v20901_v13 = vld [vmem:[#allocation213_spill] sm:$0xff]  ;;  %v7727_v40 = vsel %vm1786_vm9, %v5868_v49, -inf  ;;  %v20907_v49 = vld [vmem:[#allocation71_spill] sm:$0xff] }
 0x86d   : > { %v7507_v21 = vpop.xlane.xlu1 %7506  ;;  %v6004_v7 = vcombine.low %v16464_v60, %v16446_v22  ;;  %v8793_v25 = vrot.slane %v7549_v31, %v15591_v15  ;;  %v6328_v16 = vcombine.low %v20901_v13, %v20900_v17  ;;  %v6272_v51 = vcombine.low %v16455_v35, %v16458_v19 }
 0x86e   : > { %v8725_v36 = vrot.slane %v7507_v21, %v15610_v33  ;;  %v6273_v54 = vcombine.high %v16455_v35, %v16458_v19  ;;  %v20904_v21 = vld [vmem:[#allocation215_spill] sm:$0xff]  ;;  %v6139_v34 = vcombine.high %v16416_v6, %v16401_v59  ;;  %v6005_v6 = vcombine.high %v16464_v60, %v16446_v22 }
 0x86f   : > { %7749 = vmax.xlane.f32.xlu0 %v7748_v43  ;;  %v20905_v43 = vld [vmem:[#allocation211_spill] sm:$0xff]  ;;  %v5869_v60 = vcombine.high %v16443_v1, %v16430_v46 }
 0x870   : > { %v7468_v23 = vpop.xlane.xlu0 %7467  ;;  %v8726_v58 = vsel %vm8288_vm4, %v8725_v36, %v16326_v28  ;;  %7686 = vmax.xlane.f32.xlu1 %v7685_v0  ;;  %v16485_v28 = vrot.slane %v5545_v3, %v13550_v57  ;;  %v6312_v61 = vcombine.low %v20905_v43, %v20904_v21  ;;  %v20906_v0 = vld [vmem:[#allocation63_spill] sm:$0xff]  ;;  %v7709_v22 = vsel %vm1786_vm9, %v6139_v34, -inf }
 0x871   : > { %v8662_v8 = vrot.slane %v7468_v23, %v15626_v62  ;;  %v7546_v10 = vpop.xlane.xlu1 %7545  ;;  %v7730_v23 = vsel %vm1786_vm9, %v6004_v7, -inf  ;;  %v16532_v7 = vrot.slane %v6328_v16, %v13517_v11  ;;  %v7754_v46 = vsel %vm1786_vm9, %v6005_v6, -inf }
 0x872   : > { %v8789_v20 = vrot.slane %v7546_v10, %v15582_v4  ;;  %v5598_v56 = vcombine.low %v16485_v28, %v16467_v52  ;;  %v20908_v10 = vld [vmem:[#allocation207_spill] sm:$0xff]  ;;  %v7832_v1 = vsel %vm1786_vm9, %v6273_v54, -inf  ;;  %v5599_v6 = vcombine.high %v16485_v28, %v16467_v52  ;;  %v20918_v28 = vld [vmem:[#allocation250_spill] sm:$0xff] }
 0x873   : > { %v16495_v18 = vsel %vm8309_vm8, %v8662_v8, %v8658_v42  ;;  %7791 = vmax.xlane.f32.xlu0 %v7790_v30  ;;  %v20902_v42 = vld [vmem:[#allocation209_spill] sm:$0xff]  ;;  %v5734_v8 = vcombine.low %v20907_v49, %v20906_v0  ;;  %v20909_v30 = vld [vmem:[#allocation203_spill] sm:$0xff] }
 0x874   : > { %v7510_v55 = vpop.xlane.xlu0 %7509  ;;  %v8794_v38 = vsel %vm8274_vm10, %v8793_v25, %v8789_v20  ;;  %7728 = vmax.xlane.f32.xlu1 %v7727_v40  ;;  %v6296_v3 = vcombine.low %v20903_v45, %v20902_v42  ;;  %v6280_v25 = vcombine.low %v20909_v30, %v20908_v10  ;;  %v7769_v26 = vsel %vm1786_vm9, %v5598_v56, -inf  ;;  %v20917_v0 = vld [vmem:[#allocation219_spill] sm:$0xff] }
 0x875   : > { %v8730_v31 = vrot.slane %v7510_v55, %v15613_v5  ;;  %v7444_v36 = vpop.xlane.xlu1 %7443  ;;  %v6281_v55 = vcombine.high %v20909_v30, %v20908_v10  ;;  %v16548_v56 = vrot.slane %v6312_v61, %v13517_v11  ;;  %v7772_v59 = vsel %vm1786_vm9, %v5734_v8, -inf }
 0x876   : > { %v8623_v19 = vrot.slane %v7444_v36, %v15626_v62  ;;  %v20911_v36 = vld [vmem:[#allocation229_spill] sm:$0xff]  ;;  %v16545_v16 = vrot.slane %v6296_v3, %v13517_v11  ;;  %v6288_v61 = vrot.slane %v6280_v25, %v13517_v11  ;;  %v6416_v49 = vcombine.low %v20917_v0, %v20916_v50 }
 0x877   : > { %v16524_v35 = vsel %vm8295_vm6, %v8730_v31, %v8726_v58  ;;  %7731 = vmax.xlane.f32.xlu0 %v7730_v23  ;;  %v6297_v58 = vcombine.high %v20903_v45, %v20902_v42  ;;  %v20910_v31 = vld [vmem:[#allocation233_spill] sm:$0xff]  ;;  %v6376_v8 = vcombine.low %v16548_v56, %v16532_v7  ;;  %v7808_v25 = vsel %vm1786_vm9, %v6272_v51, -inf }
 0x878   : > { %v7552_v40 = vpop.xlane.xlu0 %7551  ;;  %v6464_v23 = vcombine.low %v20911_v36, %v20910_v31  ;;  %v8624_v20 = vsel %vm8309_vm8, %v8623_v19, %v16364_v41  ;;  %7770 = vmax.xlane.f32.xlu1 %v7769_v26  ;;  %v20912_v42 = vld [vmem:[#allocation225_spill] sm:$0xff]  ;;  %v20915_v41 = vld [vmem:[#allocation227_spill] sm:$0xff]  ;;  %v6344_v34 = vcombine.low %v6288_v61, %v16545_v16  ;;  %v6377_v52 = vcombine.high %v16548_v56, %v16532_v7 }
 0x879   : > { %v8798_v10 = vrot.slane %v7552_v40, %v15600_v12  ;;  %v7489_v30 = vpop.xlane.xlu1 %7488  ;;  %v20913_v45 = vld [vmem:[#allocation221_spill] sm:$0xff]  ;;  %v6448_v19 = vcombine.low %v20915_v41, %v20914_v47  ;;  %v16582_v2 = vrot.slane %v6297_v58, %v13517_v11  ;;  %v16595_v54 = vrot.slane %v6376_v8, %v13550_v57  ;;  %v20922_v56 = vld [vmem:[#allocation247_spill] sm:$0xff]  ;;  %v20924_v41 = vld [vmem:[#allocation68_spill] sm:$0xff] }
 0x87a   : > { %v6432_v48 = vcombine.low %v20913_v45, %v20912_v42  ;;  %v8696_v3 = vrot.slane %v7489_v30, %v15616_v9  ;;  %v16576_v30 = vrot.slane %v6281_v55, %v13517_v11  ;;  %v16598_v58 = vrot.slane %v6416_v49, %v13517_v11  ;;  %v20919_v8 = vld [vmem:[#allocation245_spill] sm:$0xff]  ;;  %v20925_v47 = vld [vmem:[#allocation55_spill] sm:$0xff] }
 0x87b   : > { %v16558_v26 = vsel %vm8281_vm14, %v8798_v10, %v8794_v38  ;;  %7773 = vmax.xlane.f32.xlu0 %v7772_v59  ;;  %v16570_v38 = vrot.slane %v6464_v23, %v13517_v11  ;;  %v16611_v49 = vrot.slane %v6344_v34, %v13550_v57  ;;  %v7793_v34 = vsel %vm1786_vm9, %v5599_v6, -inf }
 0x87c   : > { %v7573_v40 = vpop.xlane.xlu0 %7572  ;;  %v8697_v10 = vsel %vm8302_vm13, %v8696_v3, %v16391_v39  ;;  %7710 = vmax.xlane.f32.xlu1 %v7709_v22  ;;  %v16585_v23 = vrot.slane %v6432_v48, %v13517_v11  ;;  %v16588_v39 = vrot.slane %v6448_v19, %v13517_v11  ;;  %v7751_v3 = vsel %vm1786_vm9, %v5869_v60, -inf }
 0x87d   : > { %v7531_v59 = vpop.xlane.xlu1 %7530  ;;  %v6345_v60 = vcombine.high %v6288_v61, %v16545_v16  ;;  %v20920_v16 = vld [vmem:[#allocation241_spill] sm:$0xff]  ;;  %v6140_v45 = vcombine.low %v20925_v47, %v20924_v41  ;;  %v20928_v47 = vld [vmem:[#allocation268_spill] sm:$0xff] }
 0x87e   : > { %v8764_v51 = vrot.slane %v7531_v59, %v15610_v33  ;;  %v6512_v48 = vcombine.low %v16588_v39, %v16570_v38  ;;  %v6600_v59 = vcombine.low %v20919_v8, %v20918_v28  ;;  %v6480_v24 = vcombine.low %v16598_v58, %v16585_v23  ;;  %v20921_v61 = vld [vmem:[#allocation237_spill] sm:$0xff] }
 0x87f   : > { %7755 = vmax.xlane.f32.xlu0 %v7754_v46  ;;  %v6568_v7 = vcombine.low %v20921_v61, %v20920_v16  ;;  %v16638_v41 = vrot.slane %v6345_v60, %v13550_v57  ;;  %v20935_v61 = vld [vmem:[#allocation44_spill] sm:$0xff] }
 0x880   : > { %v7447_v55 = vpop.xlane.xlu0 %7446  ;;  %v8765_v19 = vsel %vm8288_vm4, %v8764_v51, %v16419_v32  ;;  %7752 = vmax.xlane.f32.xlu1 %v7751_v3  ;;  %v8832_v32 = vrot.slane %v7573_v40, %v15591_v15  ;;  %v20923_v3 = vld [vmem:[#allocation243_spill] sm:$0xff] }
 0x881   : > { %v8628_v22 = vrot.slane %v7447_v55, %v16329_v29  ;;  %v7570_v46 = vpop.xlane.xlu1 %7569  ;;  %v6584_v8 = vcombine.low %v20923_v3, %v20922_v56  ;;  %v16635_v56 = vrot.slane %v6600_v59, %v13517_v11  ;;  %v16651_v59 = vrot.slane %v6568_v7, %v13517_v11 }
 0x882   : > { %v8828_v55 = vrot.slane %v7570_v46, %v15582_v4  ;;  %v20927_v46 = vld [vmem:[#allocation235_spill] sm:$0xff] }
 0x883   : > { %v8629_v51 = vsel %vm8316_vm1, %v8628_v22, %v8624_v20  ;;  %7809 = vmax.xlane.f32.xlu0 %v7808_v25  ;;  %v6409_v20 = vcombine.high %v16611_v49, %v16595_v54  ;;  %v16630_v25 = vrot.slane %v6512_v48, %v13550_v57  ;;  %v20926_v22 = vld [vmem:[#allocation239_spill] sm:$0xff] }
 0x884   : > { %v7492_v28 = vpop.xlane.xlu0 %7491  ;;  %v8833_v42 = vsel %vm8274_vm10, %v8832_v32, %v8828_v55  ;;  %7794 = vmax.xlane.f32.xlu1 %v7793_v34  ;;  %v6552_v3 = vcombine.low %v20927_v46, %v20926_v22  ;;  %v16641_v32 = vrot.slane %v6377_v52, %v13550_v57  ;;  %v16648_v55 = vrot.slane %v6480_v24, %v13550_v57  ;;  %v20929_v46 = vld [vmem:[#allocation36_spill] sm:$0xff] }
 0x885   : > { %v8701_v40 = vrot.slane %v7492_v28, %v15626_v62  ;;  %v7471_v6 = vpop.xlane.xlu1 %7470  ;;  %v16654_v34 = vrot.slane %v6584_v8, %v13517_v11  ;;  %v7733_v52 = vsel %vm1786_vm9, %v6140_v45, -inf  ;;  %v7835_v24 = vsel %vm1786_vm9, %v6409_v20, -inf  ;;  %v20931_v22 = vld [vmem:[#allocation48_spill] sm:$0xff] }
 0x886   : > { %v8667_v48 = vrot.slane %v7471_v6, %v16329_v29  ;;  %v6545_v7 = vcombine.high %v16648_v55, %v16630_v25  ;;  %v16666_v8 = vrot.slane %v6552_v3, %v13517_v11  ;;  %v20930_v6 = vld [vmem:[#allocation267_spill] sm:$0xff]  ;;  %v6408_v3 = vcombine.low %v16611_v49, %v16595_v54 }
 0x887   : > { %v16644_v28 = vsel %vm8309_vm8, %v8701_v40, %v8697_v10  ;;  %7833 = vmax.xlane.f32.xlu0 %v7832_v1  ;;  %v5870_v10 = vcombine.low %v20929_v46, %v20928_v47  ;;  %v6648_v45 = vcombine.low %v16654_v34, %v16635_v56  ;;  %v6736_v47 = vcombine.low %v20931_v22, %v20930_v6  ;;  %v20932_v22 = vld [vmem:[#allocation259_spill] sm:$0xff] }
 0x888   : > { %v7534_v60 = vpop.xlane.xlu0 %7533  ;;  %v8668_v40 = vsel %vm8316_vm1, %v8667_v48, %v16495_v18  ;;  %7734 = vmax.xlane.f32.xlu1 %v7733_v52  ;;  %v6329_v48 = vcombine.high %v20901_v13, %v20900_v17  ;;  %v6616_v52 = vcombine.low %v16666_v8, %v16651_v59  ;;  %v20933_v6 = vld [vmem:[#allocation75_spill] sm:$0xff]  ;;  %v6313_v13 = vcombine.high %v20905_v43, %v20904_v21 }
 0x889   : > { %v8769_v1 = vrot.slane %v7534_v60, %v15613_v5  ;;  %v16673_v46 = vsel %vm9527_vm3, %v8668_v40, %v8629_v51  ;;  %v7513_v18 = vpop.xlane.xlu1 %7512  ;;  %v6704_v51 = vcombine.low %v20933_v6, %v20932_v22  ;;  %v20934_v40 = vld [vmem:[#allocation30_spill] sm:$0xff]  ;;  %v7775_v17 = vsel %vm1786_vm9, %v5870_v10, -inf }
 0x88a   : > { %v8735_v60 = vrot.slane %v7513_v18, %v15616_v9  ;;  %v6720_v16 = vcombine.low %v20935_v61, %v20934_v40  ;;  %v6410_v49 = vcombine.low %v16638_v41, %v16641_v32  ;;  %v16700_v61 = vrot.slane %v6736_v47, %v13517_v11 }
 0x88b   : > { %v16678_v20 = vsel %vm8295_vm6, %v8769_v1, %v8765_v19  ;;  %7836 = vmax.xlane.f32.xlu0 %v7835_v24  ;;  %v20936_v1 = vld [vmem:[#allocation61_spill] sm:$0xff]  ;;  %v7838_v10 = vsel %vm1786_vm9, %v6545_v7, -inf  ;;  %v16704_v21 = vrot.slane %v6648_v45, %v13550_v57  ;;  %v16707_v43 = vrot.slane %v6329_v48, %v13517_v11 }
 0x88c   : > { %v7576_v36 = vpop.xlane.xlu0 %7575  ;;  %v8736_v19 = vsel %vm8302_vm13, %v8735_v60, %v16524_v35  ;;  %7776 = vmax.xlane.f32.xlu1 %v7775_v17  ;;  %v20937_v24 = vld [vmem:[#allocation73_spill] sm:$0xff]  ;;  %v7811_v60 = vsel %vm1786_vm9, %v6408_v3, -inf  ;;  %v16715_v47 = vrot.slane %v6704_v51, %v13517_v11  ;;  %v16718_v17 = vrot.slane %v6720_v16, %v13517_v11 }
 0x88d   : > { %v8837_v54 = vrot.slane %v7576_v36, %v15600_v12  ;;  %v6688_v18 = vcombine.low %v20937_v24, %v20936_v1  ;;  %v7555_v40 = vpop.xlane.xlu1 %7554  ;;  %20938 = vst [vmem:[#allocation98_spill] sm:$0xff] %v16707_v43  ;;  %v6544_v45 = vcombine.low %v16648_v55, %v16630_v25  ;;  %v6624_v48 = vrot.slane %v6616_v52, %v13550_v57 }
 0x88e   : > { %v8803_v36 = vrot.slane %v7555_v40, %v15610_v33  ;;  %v7859_v51 = vsel %vm1786_vm9, %v6410_v49, -inf  ;;  %v6513_v16 = vcombine.high %v16588_v39, %v16570_v38  ;;  %v6784_v25 = vcombine.low %v16718_v17, %v16700_v61 }
 0x88f   : > { %v16710_v35 = vsel %vm8281_vm14, %v8837_v54, %v8833_v42  ;;  %7839 = vmax.xlane.f32.xlu0 %v7838_v10  ;;  %v16724_v42 = vrot.slane %v6313_v13, %v13517_v11  ;;  %v16733_v54 = vrot.slane %v6688_v18, %v13517_v11  ;;  %v6681_v52 = vcombine.high %v6624_v48, %v16704_v21  ;;  %v20943_v10 = vld [vmem:[#allocation43_spill] sm:$0xff] }
 0x890   : > { %v7597_v7 = vpop.xlane.xlu0 %7596  ;;  %v8804_v40 = vsel %vm8288_vm4, %v8803_v36, %v16558_v26  ;;  %7812 = vmax.xlane.f32.xlu1 %v7811_v60  ;;  %v20940_v26 = vcombine.low %v16476_v44, %v16479_v37  ;;  %v20941_v38 = vcombine.high %v16476_v44, %v16479_v37  ;;  %v6276_v18 = vcombine.low %v16491_v53, %v16499_v27 }
 0x891   : > { %20939 = vst [vmem:[#allocation97_spill] sm:$0xff] %v16724_v42  ;;  %v8871_v3 = vrot.slane %v7597_v7, %v15591_v15  ;;  %v7594_v55 = vpop.xlane.xlu1 %7593  ;;  %v6392_v36 = vcombine.low %v16724_v42, %v16707_v43  ;;  %v6752_v60 = vcombine.low %v16733_v54, %v16715_v47  ;;  %v6481_v44 = vcombine.high %v16598_v58, %v16585_v23 }
 0x892   : > { %v8867_v13 = vrot.slane %v7594_v55, %v15582_v4  ;;  %v7856_v49 = vsel %vm1786_vm9, %v20940_v26, -inf  ;;  %v7880_v39 = vsel %vm1786_vm9, %v20941_v38, -inf  ;;  %v6649_v37 = vcombine.high %v16654_v34, %v16635_v56  ;;  %v20942_v38 = vld [vmem:[#allocation92_spill] sm:$0xff]  ;;  %v20945_v34 = vld [vmem:[#allocation34_spill] sm:$0xff] }
 0x893   : > { %7860 = vmax.xlane.f32.xlu0 %v7859_v51  ;;  %v7814_v51 = vsel %vm1786_vm9, %v6544_v45, -inf  ;;  %v6872_v42 = vcombine.low %v20943_v10, %v20942_v38  ;;  %v7841_v24 = vsel %vm1786_vm9, %v6681_v52, -inf  ;;  %v16766_v1 = vrot.slane %v6784_v25, %v13550_v57  ;;  %v20947_v52 = vld [vmem:[#allocation96_spill] sm:$0xff] }
 0x894   : > { %v7516_v7 = vpop.xlane.xlu0 %7515  ;;  %v8872_v55 = vsel %vm8274_vm10, %v8871_v3, %v8867_v13  ;;  %7815 = vmax.xlane.f32.xlu1 %v7814_v51  ;;  %v16769_v45 = vrot.slane %v6513_v16, %v13550_v57  ;;  %v6617_v23 = vcombine.high %v16666_v8, %v16651_v59  ;;  %v20946_v3 = vld [vmem:[#allocation40_spill] sm:$0xff]  ;;  %v6680_v16 = vcombine.low %v6624_v48, %v16704_v21 }
 0x895   : > { %v8740_v26 = vrot.slane %v7516_v7, %v15626_v62  ;;  %v7495_v43 = vpop.xlane.xlu1 %7494  ;;  %v6840_v13 = vcombine.low %v20946_v3, %v20945_v34  ;;  %v20948_v7 = vld [vmem:[#allocation74_spill] sm:$0xff]  ;;  %v16783_v62 = vrot.slane %v6752_v60, %v13550_v57  ;;  %v16797_v21 = vrot.slane %v6872_v42, %v13517_v11 }
 0x896   : > { %v8706_v56 = vrot.slane %v7495_v43, %v16329_v29  ;;  %v6856_v25 = vcombine.low %v20948_v7, %v20947_v52  ;;  %v20949_v43 = vld [vmem:[#allocation54_spill] sm:$0xff]  ;;  %v6411_v42 = vcombine.high %v16638_v41, %v16641_v32  ;;  %v6277_v32 = vcombine.high %v16491_v53, %v16499_v27  ;;  %v20974_v7 = vld [vmem:[#allocation247_spill] sm:$0xff] }
 0x897   : > { %v16774_v58 = vsel %vm8309_vm8, %v8740_v26, %v8736_v19  ;;  %7842 = vmax.xlane.f32.xlu0 %v7841_v24  ;;  %v16789_v19 = vrot.slane %v6481_v44, %v13550_v57  ;;  %v16792_v24 = vrot.slane %v6649_v37, %v13550_v57  ;;  %v20950_v26 = vld [vmem:[#allocation39_spill] sm:$0xff]  ;;  %v7904_v53 = vsel %vm1786_vm9, %v6276_v18, -inf }
 0x898   : > { %20944 = vst [vmem:[#allocation102_spill] sm:$0xff] %v16774_v58  ;;  %v7558_v51 = vpop.xlane.xlu0 %7557  ;;  %v8707_v59 = vsel %vm8316_vm1, %v8706_v56, %v16644_v28  ;;  %7857 = vmax.xlane.f32.xlu1 %v7856_v49  ;;  %v6824_v58 = vcombine.low %v20950_v26, %v20949_v43  ;;  %v6816_v49 = vcombine.low %v16783_v62, %v16766_v1  ;;  %v20975_v52 = vld [vmem:[#allocation243_spill] sm:$0xff] }
 0x899   : > { %v8808_v8 = vrot.slane %v7558_v51, %v15613_v5  ;;  %v16801_v48 = vsel %vm9529_vm11, %v8707_v59, %v16673_v46  ;;  %v7537_v28 = vpop.xlane.xlu1 %7536  ;;  %v6546_v37 = vcombine.low %v16789_v19, %v16769_v45  ;;  %v16814_v56 = vrot.slane %v6840_v13, %v13517_v11 }
 0x89a   : > { %20951 = vst [vmem:[#allocation171_spill] sm:$0xff] %v16801_v48  ;;  %v8774_v44 = vrot.slane %v7537_v28, %v15616_v9  ;;  %v16817_v46 = vrot.slane %v6856_v25, %v13517_v11  ;;  %v7817_v59 = vsel %vm1786_vm9, %v6680_v16, -inf  ;;  %v16833_v13 = vrot.slane %v6824_v58, %v13517_v11 }
 0x89b   : > { %v16806_v60 = vsel %vm8295_vm6, %v8808_v8, %v8804_v40  ;;  %7881 = vmax.xlane.f32.xlu0 %v7880_v39  ;;  %v16821_v40 = vrot.slane %v6617_v23, %v13550_v57  ;;  %v7820_v16 = vsel %vm1786_vm9, %v6816_v49, -inf  ;;  %v16846_v27 = vrot.slane %v6392_v36, %v13550_v57  ;;  %v20956_v36 = vld [vmem:[#allocation229_spill] sm:$0xff]  ;;  %v20959_v39 = vld [vmem:[#allocation94_spill] sm:$0xff] }
 0x89c   : > { %20952 = vst [vmem:[#allocation170_spill] sm:$0xff] %v16806_v60  ;;  %v7600_v51 = vpop.xlane.xlu0 %7599  ;;  %v16827_v8 = vsel %vm8302_vm13, %v8774_v44, %v16678_v20  ;;  %7818 = vmax.xlane.f32.xlu1 %v7817_v59  ;;  %v6920_v23 = vcombine.low %v16817_v46, %v16797_v21  ;;  %v6888_v58 = vcombine.low %v16833_v13, %v16814_v56  ;;  %v7862_v49 = vsel %vm1786_vm9, %v6546_v37, -inf  ;;  %v20960_v60 = vld [vmem:[#allocation77_spill] sm:$0xff] }
 0x89d   : > { %20953 = vst [vmem:[#allocation167_spill] sm:$0xff] %v16827_v8  ;;  %v8876_v41 = vrot.slane %v7600_v51, %v15600_v12  ;;  %v7579_v25 = vpop.xlane.xlu1 %7578  ;;  %v6682_v28 = vcombine.low %v16821_v40, %v16792_v24  ;;  %v7883_v59 = vsel %vm1786_vm9, %v6411_v42, -inf  ;;  %v6417_v18 = vcombine.high %v20917_v0, %v20916_v50  ;;  %v20958_v42 = vld [vmem:[#allocation81_spill] sm:$0xff]  ;;  %v20961_v8 = vld [vmem:[#allocation87_spill] sm:$0xff] }
 0x89e   : > { %v8842_v44 = vrot.slane %v7579_v25, %v15610_v33  ;;  %v6465_v25 = vcombine.high %v20956_v36, %v20910_v31  ;;  %v16873_v50 = vrot.slane %v6920_v23, %v13550_v57  ;;  %v20962_v0 = vld [vmem:[#allocation225_spill] sm:$0xff]  ;;  %v6817_v43 = vcombine.high %v16783_v62, %v16766_v1 }
 0x89f   : > { %v16841_v20 = vsel %vm8281_vm14, %v8876_v41, %v8872_v55  ;;  %7821 = vmax.xlane.f32.xlu0 %v7820_v16  ;;  %v20955_v55 = vcombine.low %v16576_v30, %v16582_v2  ;;  %v7865_v29 = vsel %vm1786_vm9, %v6682_v28, -inf  ;;  %v20963_v31 = vld [vmem:[#allocation221_spill] sm:$0xff]  ;;  %v20969_v28 = vld [vmem:[#allocation42_spill] sm:$0xff] }
 0x8a0   : > { %20954 = vst [vmem:[#allocation166_spill] sm:$0xff] %v16841_v20  ;;  %v7621_v51 = vpop.xlane.xlu0 %7620  ;;  %v16864_v16 = vsel %vm8288_vm4, %v8842_v44, %v16710_v35  ;;  %7863 = vmax.xlane.f32.xlu1 %v7862_v49  ;;  %v6992_v20 = vcombine.low %v20959_v39, %v20958_v42  ;;  %v6433_v36 = vcombine.high %v20963_v31, %v20962_v0  ;;  %v20964_v35 = vld [vmem:[#allocation231_spill] sm:$0xff] }
 0x8a1   : > { %v16856_v41 = vrot.slane %v20955_v55, %v13550_v57  ;;  %20957 = vst [vmem:[#allocation123_spill] sm:$0xff] %v16864_v16  ;;  %v8910_v37 = vrot.slane %v7621_v51, %v15591_v15  ;;  %v7008_v55 = vcombine.low %v20961_v8, %v20960_v60  ;;  %v7618_v48 = vpop.xlane.xlu1 %7617  ;;  %v20965_v44 = vld [vmem:[#allocation227_spill] sm:$0xff]  ;;  %v20967_v8 = vld [vmem:[#allocation45_spill] sm:$0xff]  ;;  %v16889_v0 = vrot.slane %v6888_v58, %v13550_v57 }
 0x8a2   : > { %v6449_v16 = vcombine.high %v20965_v44, %v20964_v35  ;;  %v8906_v51 = vrot.slane %v7618_v48, %v15582_v4  ;;  %v20966_v39 = vld [vmem:[#allocation83_spill] sm:$0xff]  ;;  %v16892_v31 = vrot.slane %v6465_v25, %v13517_v11  ;;  %v16897_v35 = vsel %vm1786_vm9, %v6277_v32, -inf }
 0x8a3   : > { %7866 = vmax.xlane.f32.xlu0 %v7865_v29  ;;  %v6412_v49 = vcombine.low %v16856_v41, %v16846_v27  ;;  %v6960_v60 = vcombine.low %v20967_v8, %v20966_v39  ;;  %v20968_v42 = vld [vmem:[#allocation79_spill] sm:$0xff]  ;;  %v16900_v44 = vrot.slane %v6417_v18, %v13517_v11  ;;  %v16906_v62 = vrot.slane %v7008_v55, %v13517_v11 }
 0x8a4   : > { %v6976_v26 = vcombine.low %v20969_v28, %v20968_v42  ;;  %v7645_v23 = vpop.xlane.xlu0 %7644  ;;  %v8911_v29 = vsel %vm8274_vm10, %v8910_v37, %v8906_v51  ;;  %7884 = vmax.xlane.f32.xlu1 %v7883_v59  ;;  %v16903_v28 = vrot.slane %v6992_v20, %v13517_v11  ;;  %v6953_v58 = vcombine.high %v16889_v0, %v16873_v50  ;;  %v20972_v42 = vld [vmem:[#allocation241_spill] sm:$0xff] }
 0x8a5   : > { %v8949_v48 = vrot.slane %v7645_v23, %v15591_v15  ;;  %v7642_v1 = vpop.xlane.xlu1 %7641  ;;  %v16911_v25 = vrot.slane %v6433_v36, %v13517_v11  ;;  %v16914_v59 = vrot.slane %v6449_v16, %v13517_v11  ;;  %v7907_v18 = vsel %vm1786_vm9, %v6412_v49, -inf  ;;  %v20970_v23 = vld [vmem:[#allocation250_spill] sm:$0xff] }
 0x8a6   : > { %v8945_v32 = vrot.slane %v7642_v1, %v15582_v4  ;;  %v16919_v20 = vrot.slane %v6960_v60, %v13517_v11  ;;  %v16922_v37 = vrot.slane %v6976_v26, %v13517_v11  ;;  %v7844_v51 = vsel %vm1786_vm9, %v6817_v43, -inf  ;;  %v20971_v1 = vld [vmem:[#allocation245_spill] sm:$0xff] }
 0x8a7   : > { %7905 = vmax.xlane.f32.xlu0 %v7904_v53  ;;  %v6547_v36 = vcombine.high %v16789_v19, %v16769_v45  ;;  %v6528_v16 = vcombine.low %v16914_v59, %v16892_v31  ;;  %v6601_v53 = vcombine.high %v20971_v1, %v20970_v23  ;;  %v20973_v26 = vld [vmem:[#allocation237_spill] sm:$0xff]  ;;  %v7056_v43 = vcombine.low %v16903_v28, %v16906_v62  ;;  %v20977_v1 = vld [vmem:[#allocation235_spill] sm:$0xff] }
 0x8a8   : > { %v7624_v55 = vpop.xlane.xlu0 %7623  ;;  %v8950_v49 = vsel %vm8274_vm10, %v8949_v48, %v8945_v32  ;;  %7845 = vmax.xlane.f32.xlu1 %v7844_v51  ;;  %v6569_v8 = vcombine.high %v20973_v26, %v20972_v42  ;;  %v7847_v45 = vsel %vm1786_vm9, %v6953_v58, -inf  ;;  %v6683_v19 = vcombine.high %v16821_v40, %v16792_v24  ;;  %v20976_v51 = vld [vmem:[#allocation239_spill] sm:$0xff] }
 0x8a9   : > { %v8915_v60 = vrot.slane %v7624_v55, %v15600_v12  ;;  %v7648_v39 = vpop.xlane.xlu1 %7647  ;;  %v6585_v23 = vcombine.high %v20975_v52, %v20974_v7  ;;  %v6785_v48 = vcombine.high %v16718_v17, %v16700_v61  ;;  %v6496_v42 = vcombine.low %v16900_v44, %v16911_v25 }
 0x8aa   : > { %v8954_v55 = vrot.slane %v7648_v39, %v15600_v12  ;;  %v6553_v58 = vcombine.high %v20977_v1, %v20976_v51  ;;  %v7024_v24 = vcombine.low %v16919_v20, %v16922_v37  ;;  %v7886_v52 = vsel %vm1786_vm9, %v6547_v36, -inf  ;;  %v20981_v51 = vld [vmem:[#allocation101_spill] sm:$0xff]  ;;  %v20983_v1 = vld [vmem:[#allocation135_spill] sm:$0xff] }
 0x8ab   : > { %v8916_v32 = vsel %vm8281_vm14, %v8915_v60, %v8911_v29  ;;  %7848 = vmax.xlane.f32.xlu0 %v7847_v45  ;;  %v16954_v7 = vrot.slane %v6601_v53, %v13517_v11  ;;  %v6753_v61 = vcombine.high %v16733_v54, %v16715_v47  ;;  %v6921_v29 = vcombine.high %v16817_v46, %v16797_v21 }
 0x8ac   : > { %v7666_v40 = vpop.xlane.xlu0 %7665  ;;  %v8955_v17 = vsel %vm8281_vm14, %v8954_v55, %v8950_v49  ;;  %7887 = vmax.xlane.f32.xlu1 %v7886_v52  ;;  %v7889_v26 = vsel %vm1786_vm9, %v6683_v19, -inf  ;;  %v16964_v45 = vrot.slane %v7056_v43, %v13550_v57  ;;  %v16967_v36 = vrot.slane %v6528_v16, %v13550_v57 }
 0x8ad   : > { %v8984_v39 = vrot.slane %v7666_v40, %v15582_v4  ;;  %v7669_v60 = vpop.xlane.xlu1 %7668  ;;  %v16970_v53 = vrot.slane %v6569_v8, %v13517_v11  ;;  %v16973_v47 = vrot.slane %v6585_v23, %v13517_v11  ;;  %v16977_v21 = vrot.slane %v6785_v48, %v13550_v57 }
 0x8ae   : > { %v8988_v54 = vrot.slane %v7669_v60, %v15591_v15  ;;  %v16980_v46 = vrot.slane %v6553_v58, %v13517_v11  ;;  %v6889_v49 = vcombine.high %v16833_v13, %v16814_v56  ;;  %v6952_v8 = vcombine.low %v16889_v0, %v16873_v50  ;;  %v20982_v56 = vld [vmem:[#allocation119_spill] sm:$0xff]  ;;  %v20984_v58 = vld [vmem:[#allocation108_spill] sm:$0xff]  ;;  %v20985_v60 = vld [vmem:[#allocation110_spill] sm:$0xff] }
 0x8af   : > { %20978 = vst [vmem:[#allocation122_spill] sm:$0xff] %v16970_v53  ;;  %20979 = vst [vmem:[#allocation113_spill] sm:$0xff] %v16973_v47  ;;  %7890 = vmax.xlane.f32.xlu0 %v7889_v26  ;;  %v16987_v43 = vrot.slane %v7024_v24, %v13550_v57  ;;  %v6664_v19 = vcombine.low %v16973_v47, %v16954_v7  ;;  %v16994_v55 = vrot.slane %v6753_v61, %v13550_v57  ;;  %v20986_v26 = vld [vmem:[#allocation121_spill] sm:$0xff] }
 0x8b0   : > { %20980 = vst [vmem:[#allocation112_spill] sm:$0xff] %v16980_v46  ;;  %v7627_v16 = vpop.xlane.xlu0 %7626  ;;  %v8989_v23 = vsel %vm8274_vm10, %v8988_v54, %v8984_v39  ;;  %7908 = vmax.xlane.f32.xlu1 %v7907_v18  ;;  %v7128_v13 = vcombine.low %v20982_v56, %v20981_v51  ;;  %v7144_v50 = vcombine.low %v20984_v58, %v20983_v1  ;;  %v20988_v58 = vld [vmem:[#allocation117_spill] sm:$0xff]  ;;  %v7823_v56 = vsel %vm1786_vm9, %v6952_v8, -inf }
 0x8b1   : > { %v8920_v48 = vrot.slane %v7627_v16, %v15610_v33  ;;  %v7651_v0 = vpop.xlane.xlu1 %7650  ;;  %v7088_v24 = vcombine.low %v16987_v43, %v16964_v45  ;;  %v17003_v40 = vrot.slane %v6921_v29, %v13550_v57  ;;  %v6632_v52 = vcombine.low %v16980_v46, %v16970_v53  ;;  %v20987_v16 = vld [vmem:[#allocation104_spill] sm:$0xff] }
 0x8b2   : > { %v8959_v61 = vrot.slane %v7651_v0, %v15610_v33  ;;  %v6818_v39 = vcombine.low %v16994_v55, %v16977_v21  ;;  %v7096_v54 = vcombine.low %v20986_v26, %v20985_v60  ;;  %v7112_v1 = vcombine.low %v20988_v58, %v20987_v16  ;;  %v20993_v16 = vld [vmem:[#allocation267_spill] sm:$0xff] }
 0x8b3   : > { %v8921_v18 = vsel %vm8288_vm4, %v8920_v48, %v8916_v32  ;;  %7929 = vmax.xlane.f32.xlu0 %v16897_v35  ;;  %v17018_v51 = vrot.slane %v6889_v49, %v13550_v57  ;;  %v17023_v35 = vrot.slane %v6496_v42, %v13550_v57  ;;  %v17026_v0 = vrot.slane %v6664_v19, %v13550_v57 }
 0x8b4   : > { %v7672_v29 = vpop.xlane.xlu0 %7671  ;;  %v8960_v32 = vsel %vm8288_vm4, %v8959_v61, %v8955_v17  ;;  %7824 = vmax.xlane.f32.xlu1 %v7823_v56  ;;  %v17029_v26 = vrot.slane %v7128_v13, %v13517_v11  ;;  %v17032_v58 = vrot.slane %v7144_v50, %v13517_v11  ;;  %v7826_v49 = vsel %vm1786_vm9, %v7088_v24, -inf }
 0x8b5   : > { %v8993_v48 = vrot.slane %v7672_v29, %v15600_v12  ;;  %v7690_v8 = vpop.xlane.xlu1 %7689  ;;  %v6954_v17 = vcombine.low %v17018_v51, %v17003_v40  ;;  %v6548_v42 = vcombine.low %v17023_v35, %v16967_v36  ;;  %v20989_v19 = vcombine.high %v16433_v14, %v16404_v63  ;;  %v20990_v63 = vld [vmem:[#allocation99_spill] sm:$0xff]  ;;  %v20991_v14 = vld [vmem:[#allocation62_spill] sm:$0xff] }
 0x8b6   : > { %v17047_v50 = vrot.slane %v7096_v54, %v13517_v11  ;;  %v17050_v24 = vrot.slane %v7112_v1, %v13517_v11  ;;  %v7868_v29 = vsel %vm1786_vm9, %v6818_v39, -inf  ;;  %v20994_v1 = vld [vmem:[#allocation48_spill] sm:$0xff]  ;;  %v7192_v39 = vcombine.low %v17029_v26, %v17032_v58 }
 0x8b7   : > { %v8994_v56 = vsel %vm8281_vm14, %v8993_v48, %v8989_v23  ;;  %7827 = vmax.xlane.f32.xlu0 %v7826_v49  ;;  %v17044_v13 = vrot.slane %v20989_v19, %v13550_v57  ;;  %v17054_v23 = vrot.slane %v6632_v52, %v13550_v57  ;;  %v9023_v48 = vrot.slane %v7690_v8, %v15582_v4 }
 0x8b8   : > { %v7693_v61 = vpop.xlane.xlu0 %7692  ;;  %7869 = vmax.xlane.f32.xlu1 %v7868_v29  ;;  %v20992_v19 = vcombine.high %v20990_v63, %v20991_v14  ;;  %v6737_v60 = vcombine.high %v20994_v1, %v20993_v16  ;;  %v7871_v52 = vsel %vm1786_vm9, %v6954_v17, -inf  ;;  %v6413_v16 = vcombine.high %v16856_v41, %v16846_v27  ;;  %v20995_v14 = vld [vmem:[#allocation30_spill] sm:$0xff] }
 0x8b9   : > { %v9027_v49 = vrot.slane %v7693_v61, %v15591_v15  ;;  %v7654_v46 = vpop.xlane.xlu1 %7653  ;;  %v6684_v8 = vcombine.low %v17054_v23, %v17026_v0  ;;  %v6705_v61 = vcombine.high %v20933_v6, %v20932_v22  ;;  %v7160_v17 = vcombine.low %v17047_v50, %v17050_v24  ;;  %v20997_v6 = vld [vmem:[#allocation61_spill] sm:$0xff] }
 0x8ba   : > { %v17062_v54 = vrot.slane %v20992_v19, %v13550_v57  ;;  %v8964_v63 = vrot.slane %v7654_v46, %v15613_v5  ;;  %v20996_v19 = vld [vmem:[#allocation44_spill] sm:$0xff]  ;;  %v7910_v47 = vsel %vm1786_vm9, %v6548_v42, -inf  ;;  %v17091_v41 = vrot.slane %v6737_v60, %v13517_v11 }
 0x8bb   : > { %v9028_v29 = vsel %vm8274_vm10, %v9027_v49, %v9023_v48  ;;  %7872 = vmax.xlane.f32.xlu0 %v7871_v52  ;;  %v6721_v1 = vcombine.high %v20996_v19, %v20995_v14  ;;  %v20998_v48 = vld [vmem:[#allocation73_spill] sm:$0xff]  ;;  %v7057_v52 = vcombine.high %v16903_v28, %v16906_v62  ;;  %v7913_v42 = vsel %vm1786_vm9, %v6684_v8, -inf }
 0x8bc   : > { %v7630_v53 = vpop.xlane.xlu0 %7629  ;;  %v6278_v22 = vcombine.low %v17062_v54, %v17044_v13  ;;  %v6689_v49 = vcombine.high %v20998_v48, %v20997_v6  ;;  %v17087_v46 = vsel %vm8295_vm6, %v8964_v63, %v8960_v32  ;;  %7911 = vmax.xlane.f32.xlu1 %v7910_v47  ;;  %v17097_v19 = vrot.slane %v7192_v39, %v13550_v57 }
 0x8bd   : > { %v8925_v27 = vrot.slane %v7630_v53, %v15613_v5  ;;  %v7696_v14 = vpop.xlane.xlu1 %7695  ;;  %v20999_v6 = vmov 0.0   ;;  %v17102_v32 = vrot.slane %v6705_v61, %v13517_v11  ;;  %v7931_v28 = vsel %vm1786_vm9, %v6413_v16, -inf }
 0x8be   : > { %12010 = vmatprep.mubr.msk.f32.mxu0 %vm12307_vm0, %v20999_v6  ;;  %v9032_v47 = vrot.slane %v7696_v14, %v15600_v12  ;;  %v17108_v62 = vrot.slane %v6721_v1, %v13517_v11  ;;  %v7025_v60 = vcombine.high %v16919_v20, %v16922_v37  ;;  %v7089_v8 = vcombine.high %v16987_v43, %v16964_v45  ;;  %v1677_v1 = vld [vmem:[%s21000_s16] sm:$0x3]  ;;  %s21149_s16 = sld [smem:[#allocation279_spill]] }
 0x8bf   : > { %v8926_v53 = vsel %vm8295_vm6, %v8925_v27, %v8921_v18  ;;  %7914 = vmax.xlane.f32.xlu0 %v7913_v42  ;;  %v17115_v61 = vrot.slane %v7160_v17, %v13550_v57  ;;  %v7952_v16 = vsel %vm1786_vm9, %v6278_v22, -inf  ;;  %v17124_v20 = vrot.slane %v6689_v49, %v13517_v11  ;;  %12011 = vmatmul.mubr.msk.f32.vlgmr.msra.gmra.mxu0 %vm767_vm5, %v1677_v1  ;;  %v21001_v17 = vld [vmem:[#allocation98_spill] sm:$0xff]  ;;  %v21002_v22 = vld [vmem:[#allocation97_spill] sm:$0xff] }
 0x8c0   : > { %v7675_v39 = vpop.xlane.xlu0 %7674  ;;  %v9033_v18 = vsel %vm8281_vm14, %v9032_v47, %v9028_v29  ;;  %7932 = vmax.xlane.f32.xlu1 %v7931_v28  ;;  %v6800_v37 = vcombine.low %v17108_v62, %v17091_v41  ;;  %v17131_v29 = vrot.slane %v7057_v52, %v13550_v57  ;;  %v6393_v48 = vcombine.high %v21002_v22, %v21001_v17 }
 0x8c1   : > { %v8998_v63 = vrot.slane %v7675_v39, %v15610_v33  ;;  %v7717_v45 = vpop.xlane.xlu1 %7716  ;;  %v7224_v43 = vcombine.low %v17115_v61, %v17097_v19  ;;  %12029 = vmatprep.mubr.msk.f32.mxu0 %vm12307_vm0, %v20999_v6  ;;  %v6768_v49 = vcombine.low %v17124_v20, %v17102_v32  ;;  %v7850_v42 = vsel %vm1786_vm9, %v7089_v8, -inf }
 0x8c2   : > { %v6819_v52 = vcombine.high %v16994_v55, %v16977_v21  ;;  %v17145_v47 = vrot.slane %v7025_v60, %v13550_v57  ;;  %v6361_v28 = vcombine.high %v16576_v30, %v16582_v2  ;;  %v17157_v55 = vrot.slane %v6800_v37, %v13550_v57 }
 0x8c3   : > { %v8999_v27 = vsel %vm8288_vm4, %v8998_v63, %v8994_v56  ;;  %7953 = vmax.xlane.f32.xlu0 %v7952_v16  ;;  %v9066_v56 = vrot.slane %v7717_v45, %v15591_v15  ;;  %v6529_v63 = vcombine.high %v16914_v59, %v16892_v31  ;;  %v7829_v8 = vsel %vm1786_vm9, %v7224_v43, -inf }
 0x8c4   : > { %v7714_v14 = vpop.xlane.xlu0 %7713  ;;  %7851 = vmax.xlane.f32.xlu1 %v7850_v42  ;;  %v7090_v21 = vcombine.low %v17145_v47, %v17131_v29  ;;  %v6407_v30 = vrot.slane %v6393_v48, %v13550_v57  ;;  %v6497_v1 = vcombine.high %v16900_v44, %v16911_v25  ;;  %v7892_v59 = vsel %vm1786_vm9, %v6819_v52, -inf }
 0x8c5   : > { %v9062_v39 = vrot.slane %v7714_v14, %v15582_v4  ;;  %v7633_v16 = vpop.xlane.xlu1 %7632  ;;  %v6549_v45 = vcombine.high %v17023_v35, %v16967_v36  ;;  %v17168_v43 = vrot.slane %v6768_v49, %v13550_v57  ;;  %v6375_v25 = vrot.slane %v6361_v28, %v13550_v57 }
 0x8c6   : > { %v8930_v2 = vrot.slane %v7633_v16, %v15616_v9  ;;  %v7874_v48 = vsel %vm1786_vm9, %v7090_v21, -inf  ;;  %v17177_v14 = vrot.slane %v6529_v63, %v13550_v57  ;;  %v17184_v52 = vrot.slane %v6497_v1, %v13550_v57 }
 0x8c7   : > { %v9067_v60 = vsel %vm8274_vm10, %v9066_v56, %v9062_v39  ;;  %7830 = vmax.xlane.f32.xlu0 %v7829_v8  ;;  %v6820_v44 = vcombine.low %v17168_v43, %v17157_v55  ;;  %v7934_v49 = vsel %vm1786_vm9, %v6549_v45, -inf  ;;  %v6414_v42 = vcombine.low %v6375_v25, %v6407_v30 }
 0x8c8   : > { %v7657_v31 = vpop.xlane.xlu0 %7656  ;;  %v8931_v37 = vsel %vm8302_vm13, %v8930_v2, %v8926_v53  ;;  %7893 = vmax.xlane.f32.xlu1 %v7892_v59 }
 0x8c9   : > { %v8969_v17 = vrot.slane %v7657_v31, %v15616_v9  ;;  %v7678_v22 = vpop.xlane.xlu1 %7677  ;;  %v7916_v63 = vsel %vm1786_vm9, %v6820_v44, -inf  ;;  %v7955_v2 = vsel %vm1786_vm9, %v6414_v42, -inf  ;;  %v6279_v44 = vcombine.high %v17062_v54, %v17044_v13  ;;  %v21007_v42 = vld [vmem:[#allocation39_spill] sm:$0xff] }
 0x8ca   : > { %v9003_v35 = vrot.slane %v7678_v22, %v15613_v5 }
 0x8cb   : > { %v8970_v36 = vsel %vm8302_vm13, %v8969_v17, %v17087_v46  ;;  %7875 = vmax.xlane.f32.xlu0 %v7874_v48  ;;  %v6550_v46 = vcombine.low %v17184_v52, %v17177_v14  ;;  %v6415_v17 = vcombine.high %v6375_v25, %v6407_v30  ;;  %v6841_v48 = vcombine.high %v20946_v3, %v20945_v34  ;;  %v21004_v30 = vld [vmem:[#allocation74_spill] sm:$0xff] }
 0x8cc   : > { %v7699_v53 = vpop.xlane.xlu0 %7698  ;;  %v17187_v56 = vsel %vm8295_vm6, %v9003_v35, %v8999_v27  ;;  %7935 = vmax.xlane.f32.xlu1 %v7934_v49  ;;  %v7225_v27 = vcombine.high %v17115_v61, %v17097_v19  ;;  %v21003_v35 = vld [vmem:[#allocation96_spill] sm:$0xff]  ;;  %v21006_v49 = vld [vmem:[#allocation54_spill] sm:$0xff] }
 0x8cd   : > { %v9037_v28 = vrot.slane %v7699_v53, %v15610_v33  ;;  %v7720_v39 = vpop.xlane.xlu1 %7719  ;;  %v7958_v45 = vsel %vm1786_vm9, %v6550_v46, -inf  ;;  %v6857_v25 = vcombine.high %v21004_v30, %v21003_v35  ;;  %v6825_v34 = vcombine.high %v21007_v42, %v21006_v49  ;;  %v21015_v35 = vld [vmem:[#allocation79_spill] sm:$0xff]  ;;  %v21016_v30 = vld [vmem:[#allocation42_spill] sm:$0xff] }
 0x8ce   : > { %v9071_v8 = vrot.slane %v7720_v39, %v15600_v12  ;;  %v7853_v61 = vsel %vm1786_vm9, %v7225_v27, -inf  ;;  %v6685_v39 = vcombine.high %v17054_v23, %v17026_v0  ;;  %v7193_v46 = vcombine.high %v17029_v26, %v17032_v58  ;;  %v21017_v42 = vld [vmem:[#allocation122_spill] sm:$0xff] }
 0x8cf   : > { %v9038_v16 = vsel %vm8288_vm4, %v9037_v28, %v9033_v18  ;;  %7917 = vmax.xlane.f32.xlu0 %v7916_v63  ;;  %v6873_v18 = vcombine.high %v20943_v10, %v20942_v38  ;;  %v21005_v38 = vld [vmem:[#allocation127_spill] sm:$0xff]  ;;  %v7979_v28 = vsel %vm1786_vm9, %v6415_v17, -inf  ;;  %v17232_v63 = vrot.slane %v6841_v48, %v13517_v11  ;;  %v21011_v48 = vld [vmem:[#allocation77_spill] sm:$0xff] }
 0x8d0   : > { %v7738_v21 = vpop.xlane.xlu0 %7737  ;;  %v17199_v1 = vsel %vm8281_vm14, %v9071_v8, %v9067_v60  ;;  %7956 = vmax.xlane.f32.xlu1 %v7955_v2  ;;  %v6955_v60 = vcombine.high %v17018_v51, %v17003_v40  ;;  %v7091_v51 = vcombine.high %v17145_v47, %v17131_v29  ;;  %v7976_v47 = vsel %vm1786_vm9, %v6279_v44, -inf }
 0x8d1   : > { %v9101_v31 = vrot.slane %v7738_v21, %v15582_v4  ;;  %v7741_v59 = vpop.xlane.xlu1 %7740  ;;  %v17223_v40 = vrot.slane %v6873_v18, %v13517_v11  ;;  %v17241_v2 = vrot.slane %v6857_v25, %v13517_v11  ;;  %v17248_v23 = vrot.slane %v6825_v34, %v13517_v11  ;;  %v21010_v18 = vld [vmem:[#allocation94_spill] sm:$0xff]  ;;  %v21018_v34 = vld [vmem:[#allocation112_spill] sm:$0xff] }
 0x8d2   : > { %v9105_v22 = vrot.slane %v7741_v59, %v15591_v15  ;;  %v7895_v29 = vsel %vm1786_vm9, %v6955_v60, -inf  ;;  %v7161_v58 = vcombine.high %v17047_v50, %v17050_v24  ;;  %v7937_v17 = vsel %vm1786_vm9, %v6685_v39, -inf  ;;  %v21009_v24 = vld [vmem:[#allocation81_spill] sm:$0xff]  ;;  %v21013_v60 = vld [vmem:[#allocation83_spill] sm:$0xff] }
 0x8d3   : > { %7959 = vmax.xlane.f32.xlu0 %v7958_v45  ;;  %v6936_v59 = vcombine.low %v17241_v2, %v17223_v40  ;;  %v6904_v50 = vcombine.low %v17248_v23, %v17232_v63  ;;  %v6977_v25 = vcombine.high %v21016_v30, %v21015_v35 }
 0x8d4   : > { %v7660_v19 = vpop.xlane.xlu0 %7659  ;;  %v9106_v10 = vsel %vm8274_vm10, %v9105_v22, %v9101_v31  ;;  %7854 = vmax.xlane.f32.xlu1 %v7853_v61  ;;  %v7898_v31 = vsel %vm1786_vm9, %v7091_v51, -inf  ;;  %v6993_v22 = vcombine.high %v21010_v18, %v21009_v24  ;;  %v7207_v61 = vrot.slane %v7193_v46, %v13550_v57 }
 0x8d5   : > { %v8974_v53 = vrot.slane %v7660_v19, %v21005_v38  ;;  %v7636_v3 = vpop.xlane.xlu1 %7635  ;;  %v21012_v19 = vld [vmem:[#allocation87_spill] sm:$0xff]  ;;  %v7175_v39 = vrot.slane %v7161_v58, %v13550_v57  ;;  %v6912_v58 = vrot.slane %v6904_v50, %v13550_v57 }
 0x8d6   : > { %v8935_v54 = vrot.slane %v7636_v3, %v21005_v38  ;;  %v6633_v3 = vcombine.high %v21018_v34, %v21017_v42  ;;  %v21026_v34 = vld [vmem:[#allocation104_spill] sm:$0xff] }
 0x8d7   : > { %v17226_v13 = vsel %vm8309_vm8, %v8974_v53, %v8970_v36  ;;  %7980 = vmax.xlane.f32.xlu0 %v7979_v28  ;;  %v21008_v36 = vld [vmem:[#allocation113_spill] sm:$0xff] }
 0x8d8   : > { %v7702_v8 = vpop.xlane.xlu0 %7701  ;;  %v6665_v21 = vcombine.high %v21008_v36, %v16954_v7  ;;  %v17244_v27 = vsel %vm8309_vm8, %v8935_v54, %v8931_v37  ;;  %7896 = vmax.xlane.f32.xlu1 %v7895_v29  ;;  %v6821_v7 = vcombine.high %v17168_v43, %v17157_v55  ;;  %v7009_v55 = vcombine.high %v21012_v19, %v21011_v48  ;;  %v21020_v48 = vld [vmem:[#allocation119_spill] sm:$0xff] }
 0x8d9   : > { %v9042_v0 = vrot.slane %v7702_v8, %v15613_v5  ;;  %v7681_v26 = vpop.xlane.xlu1 %7680  ;;  %v6551_v54 = vcombine.high %v17184_v52, %v17177_v14  ;;  %v6944_v8 = vrot.slane %v6936_v59, %v13550_v57  ;;  %v17293_v36 = vrot.slane %v6993_v22, %v13517_v11  ;;  %v21019_v22 = vld [vmem:[#allocation101_spill] sm:$0xff]  ;;  %v21021_v19 = vld [vmem:[#allocation135_spill] sm:$0xff] }
 0x8da   : > { %v9008_v45 = vrot.slane %v7681_v26, %v15616_v9  ;;  %v7940_v51 = vsel %vm1786_vm9, %v6821_v7, -inf  ;;  %v17290_v29 = vrot.slane %v6665_v21, %v13550_v57  ;;  %v7226_v52 = vcombine.low %v7175_v39, %v7207_v61 }
 0x8db   : > { %v17258_v37 = vsel %vm8295_vm6, %v9042_v0, %v9038_v16  ;;  %7899 = vmax.xlane.f32.xlu0 %v7898_v31  ;;  %v21014_v16 = vld [vmem:[#allocation45_spill] sm:$0xff]  ;;  %v17296_v0 = vrot.slane %v7009_v55, %v13517_v11  ;;  %v17303_v26 = vrot.slane %v6977_v25, %v13517_v11  ;;  %v7982_v59 = vsel %vm1786_vm9, %v6551_v54, -inf  ;;  %v21022_v55 = vld [vmem:[#allocation108_spill] sm:$0xff]  ;;  %v21024_v25 = vld [vmem:[#allocation110_spill] sm:$0xff] }
 0x8dc   : > { %v7744_v43 = vpop.xlane.xlu0 %7743  ;;  %v6961_v44 = vcombine.high %v21014_v16, %v21013_v60  ;;  %v17275_v53 = vsel %vm8302_vm13, %v9008_v45, %v17187_v56  ;;  %7938 = vmax.xlane.f32.xlu1 %v7937_v17  ;;  %v7227_v45 = vcombine.high %v7175_v39, %v7207_v61  ;;  %v6956_v50 = vcombine.low %v6912_v58, %v6944_v8 }
 0x8dd   : > { %v9110_v49 = vrot.slane %v7744_v43, %v15600_v12  ;;  %v7723_v28 = vpop.xlane.xlu1 %7722  ;;  %v6647_v24 = vrot.slane %v6633_v3, %v13550_v57  ;;  %v7072_v18 = vcombine.low %v17293_v36, %v17296_v0  ;;  %v7145_v43 = vcombine.high %v21022_v55, %v21021_v19  ;;  %v21027_v3 = vld [vmem:[#allocation117_spill] sm:$0xff] }
 0x8de   : > { %v9076_v56 = vrot.slane %v7723_v28, %v15610_v33  ;;  %v7877_v60 = vsel %vm1786_vm9, %v7226_v52, -inf  ;;  %v7113_v28 = vcombine.high %v21027_v3, %v21026_v34  ;;  %v7901_v54 = vsel %vm1786_vm9, %v7227_v45, -inf }
 0x8df   : > { %v17285_v46 = vsel %vm8281_vm14, %v9110_v49, %v9106_v10  ;;  %7941 = vmax.xlane.f32.xlu0 %v7940_v51  ;;  %v17300_v10 = vrot.slane %v6961_v44, %v13517_v11  ;;  %v21023_v44 = vld [vmem:[#allocation76_spill] sm:$0xff]  ;;  %v6686_v30 = vcombine.low %v6647_v24, %v17290_v29  ;;  %v21025_v49 = vld [vmem:[#allocation121_spill] sm:$0xff]  ;;  %v6957_v39 = vcombine.high %v6912_v58, %v6944_v8 }
 0x8e0   : > { %v7765_v14 = vpop.xlane.xlu0 %7764  ;;  %v17307_v21 = vsel %vm8288_vm4, %v9076_v56, %v17199_v1  ;;  %7977 = vmax.xlane.f32.xlu1 %v7976_v47  ;;  %v7129_v1 = vcombine.high %v21020_v48, %v21019_v22  ;;  %v7097_v42 = vcombine.high %v21025_v49, %v21024_v25  ;;  %v6801_v56 = vcombine.high %v17108_v62, %v17091_v41 }
 0x8e1   : > { %v9144_v31 = vrot.slane %v7765_v14, %v15591_v15  ;;  %v7762_v7 = vpop.xlane.xlu1 %7761  ;;  %v7040_v61 = vcombine.low %v17300_v10, %v17303_v26  ;;  %v7919_v8 = vsel %vm1786_vm9, %v6956_v50, -inf  ;;  %v7080_v58 = vrot.slane %v7072_v18, %v13550_v57 }
 0x8e2   : > { %v9140_v17 = vrot.slane %v7762_v7, %v15582_v4  ;;  %v17339_v7 = vrot.slane %v7129_v1, %v13517_v11  ;;  %v6769_v41 = vcombine.high %v17124_v20, %v17102_v32  ;;  %v17353_v45 = vrot.slane %v7097_v42, %v13517_v11 }
 0x8e3   : > { %7983 = vmax.xlane.f32.xlu0 %v7982_v59  ;;  %v17342_v59 = vrot.slane %v7145_v43, %v13517_v11  ;;  %v7943_v32 = vsel %vm1786_vm9, %v6957_v39, -inf  ;;  %v7961_v1 = vsel %vm1786_vm9, %v6686_v30, -inf  ;;  %v6815_v55 = vrot.slane %v6801_v56, %v13550_v57 }
 0x8e4   : > { %v7663_v47 = vpop.xlane.xlu0 %7662  ;;  %v17323_v16 = vsel %vm8274_vm10, %v9144_v31, %v9140_v17  ;;  %7878 = vmax.xlane.f32.xlu1 %v7877_v60  ;;  %v6687_v31 = vcombine.high %v6647_v24, %v17290_v29  ;;  %v7048_v29 = vrot.slane %v7040_v61, %v13550_v57  ;;  %v17356_v24 = vrot.slane %v7113_v28, %v13517_v11 }
 0x8e5   : > { %v8979_v35 = vrot.slane %v7663_v47, %v21023_v44  ;;  %v7639_v51 = vpop.xlane.xlu1 %7638  ;;  %v7208_v22 = vcombine.low %v17339_v7, %v17342_v59  ;;  %v6783_v25 = vrot.slane %v6769_v41, %v13550_v57 }
 0x8e6   : > { %v8940_v52 = vrot.slane %v7639_v51, %v21023_v44  ;;  %v7092_v19 = vcombine.low %v7048_v29, %v7080_v58  ;;  %v7985_v61 = vsel %vm1786_vm9, %v6687_v31, -inf  ;;  %v21030_v31 = vld [vmem:[#allocation148_spill] sm:$0xff] }
 0x8e7   : > { %v8980_v14 = vsel %vm8316_vm1, %v8979_v35, %v17226_v13  ;;  %7902 = vmax.xlane.f32.xlu0 %v7901_v54  ;;  %v7093_v35 = vcombine.high %v7048_v29, %v7080_v58  ;;  %v6822_v3 = vcombine.low %v6783_v25, %v6815_v55  ;;  %v7216_v28 = vrot.slane %v7208_v22, %v13550_v57  ;;  %v21033_v29 = vld [vmem:[#allocation27_spill] sm:$0xff] }
 0x8e8   : > { %v7705_v17 = vpop.xlane.xlu0 %7704  ;;  %v8941_v62 = vsel %vm8316_vm1, %v8940_v52, %v17244_v27  ;;  %7920 = vmax.xlane.f32.xlu1 %v7919_v8  ;;  %v7922_v34 = vsel %vm1786_vm9, %v7092_v19, -inf  ;;  %v6823_v56 = vcombine.high %v6783_v25, %v6815_v55 }
 0x8e9   : > { %v9047_v13 = vrot.slane %v7705_v17, %v15616_v9  ;;  %v17359_v50 = vsel %vm9527_vm3, %v8980_v14, %v8941_v62  ;;  %v7684_v18 = vpop.xlane.xlu1 %7683  ;;  %v7946_v39 = vsel %vm1786_vm9, %v7093_v35, -inf  ;;  %v21029_v14 = vld [vmem:[#allocation25_spill] sm:$0xff]  ;;  %v21031_v17 = vld [vmem:[#allocation146_spill] sm:$0xff] }
 0x8ea   : > { %v9013_v27 = vrot.slane %v7684_v18, %v21005_v38  ;;  %v3864_v8 = vcombine.low %v21031_v17, %v21030_v31  ;;  %v7988_v19 = vsel %vm1786_vm9, %v6823_v56, -inf  ;;  %v21037_v56 = vld [vmem:[#allocation93_spill] sm:$0xff] }
 0x8eb   : > { %v9048_v20 = vsel %vm8302_vm13, %v9047_v13, %v17258_v37  ;;  %7944 = vmax.xlane.f32.xlu0 %v7943_v32  ;;  %v7176_v37 = vcombine.low %v17353_v45, %v17356_v24  ;;  %v21032_v13 = vld [vmem:[#allocation28_spill] sm:$0xff]  ;;  %v21034_v32 = vld [vmem:[#allocation143_spill] sm:$0xff] }
 0x8ec   : > { %v7747_v48 = vpop.xlane.xlu0 %7746  ;;  %v17371_v43 = vsel %vm8309_vm8, %v9013_v27, %v17275_v53  ;;  %7962 = vmax.xlane.f32.xlu1 %v7961_v1  ;;  %v6937_v53 = vcombine.high %v17241_v2, %v17223_v40  ;;  %v21028_v2 = vld [vmem:[#allocation26_spill] sm:$0xff]  ;;  %v3880_v18 = vcombine.low %v21033_v29, %v21032_v13  ;;  %v21035_v27 = vld [vmem:[#allocation140_spill] sm:$0xff] }
 0x8ed   : > { %v9115_v47 = vrot.slane %v7747_v48, %v15610_v33  ;;  %v7726_v60 = vpop.xlane.xlu1 %7725  ;;  %v7184_v40 = vrot.slane %v7176_v37, %v13550_v57  ;;  %v3848_v52 = vcombine.low %v21029_v14, %v21028_v2  ;;  %v3832_v22 = vcombine.low %v21035_v27, %v21034_v32 }
 0x8ee   : > { %v9081_v49 = vrot.slane %v7726_v60, %v15613_v5  ;;  %v6951_v62 = vrot.slane %v6937_v53, %v13550_v57  ;;  %v17416_v37 = vrot.slane %v3864_v8, %v13517_v11  ;;  %v17430_v53 = vrot.slane %v3880_v18, %v13517_v11  ;;  %v21040_v18 = vld [vmem:[#allocation95_spill] sm:$0xff] }
 0x8ef   : > { %v9116_v30 = vsel %vm8288_vm4, %v9115_v47, %v17285_v46  ;;  %7986 = vmax.xlane.f32.xlu0 %v7985_v61  ;;  %v6905_v46 = vcombine.high %v17248_v23, %v17232_v63  ;;  %v7964_v63 = vsel %vm1786_vm9, %v6822_v3, -inf  ;;  %v7228_v23 = vcombine.low %v7184_v40, %v7216_v28 }
 0x8f0   : > { %v7786_v42 = vpop.xlane.xlu0 %7785  ;;  %v17387_v51 = vsel %vm8295_vm6, %v9081_v49, %v17307_v21  ;;  %7923 = vmax.xlane.f32.xlu1 %v7922_v34  ;;  %v7073_v21 = vcombine.high %v17293_v36, %v17296_v0  ;;  %v7041_v36 = vcombine.high %v17300_v10, %v17303_v26  ;;  %v7229_v55 = vcombine.high %v7184_v40, %v7216_v28 }
 0x8f1   : > { %v7768_v54 = vpop.xlane.xlu1 %7767  ;;  %v6919_v47 = vrot.slane %v6905_v46, %v13550_v57  ;;  %v9179_v60 = vrot.slane %v7786_v42, %v15582_v4  ;;  %v7209_v10 = vcombine.high %v17339_v7, %v17342_v59  ;;  %v7925_v35 = vsel %vm1786_vm9, %v7228_v23, -inf  ;;  %v21039_v23 = vld [vmem:[#allocation80_spill] sm:$0xff] }
 0x8f2   : > { %v9149_v58 = vrot.slane %v7768_v54, %v15600_v12  ;;  %v17427_v49 = vrot.slane %v7073_v21, %v13550_v57  ;;  %v17433_v42 = vrot.slane %v3832_v22, %v13517_v11  ;;  %v7177_v7 = vcombine.high %v17353_v45, %v17356_v24 }
 0x8f3   : > { %7947 = vmax.xlane.f32.xlu0 %v7946_v39  ;;  %v6958_v25 = vcombine.low %v6919_v47, %v6951_v62  ;;  %v7949_v3 = vsel %vm1786_vm9, %v7229_v55, -inf  ;;  %v6959_v28 = vcombine.high %v6919_v47, %v6951_v62  ;;  %v7055_v46 = vrot.slane %v7041_v36, %v13550_v57  ;;  %v21036_v39 = vld [vmem:[#allocation100_spill] sm:$0xff] }
 0x8f4   : > { %v7708_v41 = vpop.xlane.xlu0 %7707  ;;  %v17408_v48 = vsel %vm8281_vm14, %v9149_v58, %v17323_v16  ;;  %7965 = vmax.xlane.f32.xlu1 %v7964_v63  ;;  %v17442_v54 = vrot.slane %v3848_v52, %v13517_v11  ;;  %v3473_v40 = vcombine.high %v21037_v56, %v21036_v39  ;;  %v3928_v45 = vcombine.low %v17416_v37, %v17430_v53  ;;  %v21038_v63 = vld [vmem:[#allocation86_spill] sm:$0xff] }
 0x8f5   : > { %v9052_v1 = vrot.slane %v7708_v41, %v21005_v38  ;;  %v7789_v0 = vpop.xlane.xlu1 %7788  ;;  %v7967_v21 = vsel %vm1786_vm9, %v6958_v25, -inf  ;;  %v7094_v41 = vcombine.low %v7055_v46, %v17427_v49  ;;  %v17455_v52 = vrot.slane %v7209_v10, %v13550_v57  ;;  %v21043_v10 = vld [vmem:[#allocation78_spill] sm:$0xff] }
 0x8f6   : > { %v9183_v61 = vrot.slane %v7789_v0, %v15591_v15  ;;  %v3441_v62 = vcombine.high %v21039_v23, %v21038_v63  ;;  %v3896_v0 = vcombine.low %v17433_v42, %v17442_v54  ;;  %v7991_v47 = vsel %vm1786_vm9, %v6959_v28, -inf }
 0x8f7   : > { %v17420_v16 = vsel %vm8309_vm8, %v9052_v1, %v9048_v20  ;;  %7989 = vmax.xlane.f32.xlu0 %v7988_v19 }
 0x8f8   : > { %v7750_v26 = vpop.xlane.xlu0 %7749  ;;  %v9184_v20 = vsel %vm8274_vm10, %v9183_v61, %v9179_v60  ;;  %7926 = vmax.xlane.f32.xlu1 %v7925_v35  ;;  %v17470_v60 = vrot.slane %v7177_v7, %v13550_v57  ;;  %v21042_v61 = vld [vmem:[#allocation82_spill] sm:$0xff]  ;;  %v3936_v7 = vrot.slane %v3928_v45, %v13550_v57  ;;  %v7095_v45 = vcombine.high %v7055_v46, %v17427_v49 }
 0x8f9   : > { %v9120_v34 = vrot.slane %v7750_v26, %v15613_v5  ;;  %v7687_v59 = vpop.xlane.xlu1 %7686  ;;  %v3425_v26 = vcombine.high %v21043_v10, %v21042_v61 }
 0x8fa   : > { %v9018_v58 = vrot.slane %v7687_v59, %v21023_v44  ;;  %v7230_v59 = vcombine.low %v17470_v60, %v17455_v52 }
 0x8fb   : > { %v17447_v8 = vsel %vm8295_vm6, %v9120_v34, %v9116_v30  ;;  %7950 = vmax.xlane.f32.xlu0 %v7949_v3  ;;  %v21041_v30 = vld [vmem:[#allocation91_spill] sm:$0xff]  ;;  %v17486_v3 = vrot.slane %v3441_v62, %v13517_v11  ;;  %v17501_v63 = vrot.slane %v3425_v26, %v13517_v11  ;;  %v21047_v26 = vld [vmem:[#allocation158_spill] sm:$0xff] }
 0x8fc   : > { %v7792_v24 = vpop.xlane.xlu0 %7791  ;;  %v3457_v22 = vcombine.high %v21041_v30, %v21040_v18  ;;  %v9019_v1 = vsel %vm8316_vm1, %v9018_v58, %v17371_v43  ;;  %7968 = vmax.xlane.f32.xlu1 %v7967_v21  ;;  %v17475_v43 = vrot.slane %v3473_v40, %v13517_v11  ;;  %v21044_v40 = vld [vmem:[#allocation71_spill] sm:$0xff]  ;;  %v7973_v30 = vsel %vm1786_vm9, %v7230_v59, -inf }
 0x8fd   : > { %v9188_v36 = vrot.slane %v7792_v24, %v15600_v12  ;;  %v9549_v19 = vsel %vm9529_vm11, %v9019_v1, %v17359_v50  ;;  %v7729_v55 = vpop.xlane.xlu1 %7728  ;;  %v7970_v50 = vsel %vm1786_vm9, %v7094_v41, -inf  ;;  %v21045_v58 = vld [vmem:[#allocation63_spill] sm:$0xff]  ;;  %v3904_v41 = vrot.slane %v3896_v0, %v13550_v57 }
 0x8fe   : > { %v9086_v25 = vrot.slane %v7729_v55, %v15616_v9  ;;  %v17489_v28 = vrot.slane %v3457_v22, %v13517_v11  ;;  %v21046_v24 = vcombine.high %v21044_v40, %v21045_v58  ;;  %v3504_v49 = vcombine.low %v17501_v63, %v17486_v3  ;;  %v21051_v40 = vld [vmem:[#allocation152_spill] sm:$0xff]  ;;  %v21052_v58 = vld [vmem:[#allocation147_spill] sm:$0xff] }
 0x8ff   : > { %v17478_v35 = vsel %vm8281_vm14, %v9188_v36, %v9184_v20  ;;  %7992 = vmax.xlane.f32.xlu0 %v7991_v47  ;;  %v3960_v22 = vcombine.low %v3904_v41, %v3936_v7  ;;  %v7994_v0 = vsel %vm1786_vm9, %v7095_v45, -inf  ;;  %v3961_v55 = vcombine.high %v3904_v41, %v3936_v7  ;;  %v21054_v45 = vld [vmem:[#allocation150_spill] sm:$0xff] }
 0x900   : > { %v7732_v34 = vpop.xlane.xlu0 %7731  ;;  %v9087_v20 = vsel %vm8302_vm13, %v9086_v25, %v17387_v51  ;;  %7971 = vmax.xlane.f32.xlu1 %v7970_v50  ;;  %v7796_v21 = vsel %vm1786_vm9, %v21046_v24, -inf  ;;  %v3536_v23 = vcombine.low %v17489_v28, %v17475_v43  ;;  %v21048_v25 = vld [vmem:[#allocation156_spill] sm:$0xff]  ;;  %v21050_v50 = vld [vmem:[#allocation157_spill] sm:$0xff]  ;;  %v4785_v24 = vcombine.high %v21052_v58, %v21051_v40 }
 0x901   : > { %v9091_v39 = vrot.slane %v7732_v34, %v21005_v38  ;;  %v7771_v56 = vpop.xlane.xlu1 %7770  ;;  %v21049_v34 = vld [vmem:[#allocation159_spill] sm:$0xff] }
 0x902   : > { %v9154_v62 = vrot.slane %v7771_v56, %v15610_v33  ;;  %v17521_v10 = vrot.slane %v3536_v23, %v13550_v57  ;;  %v4833_v59 = vcombine.high %v21050_v50, %v21049_v34  ;;  %v17531_v56 = vrot.slane %v3504_v49, %v13550_v57  ;;  %v21058_v34 = vld [vmem:[#allocation132_spill] sm:$0xff]  ;;  %v21059_v50 = vld [vmem:[#allocation130_spill] sm:$0xff] }
 0x903   : > { %v17506_v51 = vsel %vm8309_vm8, %v9091_v39, %v9087_v20  ;;  %7797 = vmax.xlane.f32.xlu0 %v7796_v21  ;;  %v7253_v39 = vsel %vm1786_vm9, %v3960_v22, -inf  ;;  %v21053_v21 = vld [vmem:[#allocation153_spill] sm:$0xff] }
 0x904   : > { %v7774_v18 = vpop.xlane.xlu0 %7773  ;;  %v9155_v46 = vsel %vm8288_vm4, %v9154_v62, %v17408_v48  ;;  %7974 = vmax.xlane.f32.xlu1 %v7973_v30  ;;  %v4817_v48 = vcombine.high %v21048_v25, %v21047_v26  ;;  %v4801_v41 = vcombine.high %v21054_v45, %v21053_v21  ;;  %v17546_v49 = vrot.slane %v4833_v59, %v13517_v11 }
 0x905   : > { %v9159_v1 = vrot.slane %v7774_v18, %v15613_v5  ;;  %v7711_v36 = vpop.xlane.xlu1 %7710  ;;  %v7277_v18 = vsel %vm1786_vm9, %v3961_v55, -inf  ;;  %v17556_v26 = vrot.slane %v4785_v24, %v13517_v11  ;;  %v21060_v59 = vcombine.high %v21058_v34, %v21059_v50 }
 0x906   : > { %v9057_v61 = vrot.slane %v7711_v36, %v21023_v44  ;;  %v17543_v22 = vrot.slane %v4817_v48, %v13517_v11  ;;  %v21055_v36 = vld [vmem:[#allocation144_spill] sm:$0xff]  ;;  %v17559_v25 = vrot.slane %v4801_v41, %v13517_v11  ;;  %v21063_v41 = vld [vmem:[#allocation85_spill] sm:$0xff] }
 0x907   : > { %v17517_v47 = vsel %vm8295_vm6, %v9159_v1, %v9155_v46  ;;  %7995 = vmax.xlane.f32.xlu0 %v7994_v0 }
 0x908   : > { %v7756_v20 = vpop.xlane.xlu0 %7755  ;;  %v9058_v7 = vsel %vm8316_vm1, %v9057_v61, %v17420_v16  ;;  %7254 = vmax.xlane.f32.xlu1 %v7253_v39  ;;  %v3556_v16 = vcombine.low %v17531_v56, %v17521_v10  ;;  %v4864_v21 = vcombine.low %v17556_v26, %v17559_v25 }
 0x909   : > { %v9550_v23 = vsel %vm9531_vm15, %v9058_v7, %v9549_v19  ;;  %v7753_v62 = vpop.xlane.xlu1 %7752  ;;  %v9130_v46 = vrot.slane %v7756_v20, %v21005_v38  ;;  %v21056_v19 = vld [vmem:[#allocation142_spill] sm:$0xff]  ;;  %v7319_v20 = vsel %vm1786_vm9, %v21060_v59, -inf  ;;  %v21111_v38 = vld [vmem:[#allocation57_spill] sm:$0xff] }
 0x90a   : > { %v9125_v30 = vrot.slane %v7753_v62, %v15616_v9  ;;  %v21057_v0 = vcombine.low %v21055_v36, %v21056_v19  ;;  %v7340_v58 = vsel %vm1786_vm9, %v3556_v16, -inf  ;;  %v21064_v62 = vld [vmem:[#allocation84_spill] sm:$0xff]  ;;  %v21066_v16 = vld [vmem:[#allocation69_spill] sm:$0xff] }
 0x90b   : > { %7278 = vmax.xlane.f32.xlu0 %v7277_v18  ;;  %v21065_v18 = vcombine.high %v21063_v41, %v21064_v62 }
 0x90c   : > { %v7810_v1 = vpop.xlane.xlu0 %7809  ;;  %v7298_v55 = vsel %vm1786_vm9, %v21057_v0, -inf  ;;  %v9126_v61 = vsel %vm8302_vm13, %v9125_v30, %v17447_v8  ;;  %v4896_v8 = vcombine.low %v17543_v22, %v17546_v49 }
 0x90d   : > { %7299 = vmax.xlane.f32.xlu1 %v7298_v55  ;;  %v7795_v48 = vpop.xlane.xlu1 %7794  ;;  %v17566_v39 = vsel %vm8309_vm8, %v9130_v46, %v9126_v61  ;;  %v7361_v30 = vsel %vm1786_vm9, %v21065_v18, -inf  ;;  %v21067_v55 = vld [vmem:[#allocation70_spill] sm:$0xff] }
 0x90e   : > { %21061 = vst [vmem:[#allocation186_spill] sm:$0xff] %v17566_v39  ;;  %v9193_v7 = vrot.slane %v7795_v48, %v15610_v33  ;;  %v21068_v61 = vcombine.low %v21066_v16, %v21067_v55  ;;  %v17588_v48 = vrot.slane %v4896_v8, %v13550_v57  ;;  %v17602_v8 = vrot.slane %v4864_v21, %v13550_v57 }
 0x90f   : > { %7320 = vmax.xlane.f32.xlu0 %v7319_v20 }
 0x910   : > { %v7834_v40 = vpop.xlane.xlu0 %7833  ;;  %v17574_v24 = vsel %vm8288_vm4, %v9193_v7, %v17478_v35  ;;  %v7382_v35 = vsel %vm1786_vm9, %v21068_v61, -inf  ;;  %v4916_v61 = vcombine.low %v17602_v8, %v17588_v48 }
 0x911   : > { %21062 = vst [vmem:[#allocation182_spill] sm:$0xff] %v17574_v24  ;;  %7341 = vmax.xlane.f32.xlu1 %v7340_v58  ;;  %v7735_v45 = vpop.xlane.xlu1 %7734  ;;  %v9257_v34 = vrot.slane %v7834_v40, %v15582_v4  ;;  %v21070_v58 = vld [vmem:[#allocation37_spill] sm:$0xff] }
 0x912   : > { %v9096_v46 = vrot.slane %v7735_v45, %v21023_v44  ;;  %v21071_v45 = vld [vmem:[#allocation35_spill] sm:$0xff]  ;;  %v7538_v24 = vsel %vm1786_vm9, %v4916_v61, -inf }
 0x913   : > { %7362 = vmax.xlane.f32.xlu0 %v7361_v30  ;;  %v21072_v41 = vcombine.high %v21070_v58, %v21071_v45  ;;  %v21073_v30 = vld [vmem:[#allocation52_spill] sm:$0xff] }
 0x914   : > { %v7837_v0 = vpop.xlane.xlu0 %7836  ;;  %v9097_v50 = vsel %vm8316_vm1, %v9096_v46, %v17506_v51  ;;  %v21074_v46 = vld [vmem:[#allocation51_spill] sm:$0xff]  ;;  %v21080_v45 = vld [vmem:[#allocation124_spill] sm:$0xff] }
 0x915   : > { %v9261_v59 = vrot.slane %v7837_v0, %v15591_v15  ;;  %7383 = vmax.xlane.f32.xlu1 %v7382_v35  ;;  %v17595_v20 = vsel %vm9533_vm7, %v9097_v50, %v9550_v23  ;;  %v7777_v7 = vpop.xlane.xlu1 %7776  ;;  %v7400_v62 = vsel %vm1786_vm9, %v21072_v41, -inf  ;;  %v21075_v0 = vcombine.high %v21073_v30, %v21074_v46  ;;  %v21077_v50 = vld [vmem:[#allocation175_spill] sm:$0xff]  ;;  %v21081_v41 = vld [vmem:[#allocation118_spill] sm:$0xff] }
 0x916   : > { %21069 = vst [vmem:[#allocation178_spill] sm:$0xff] %v17595_v20  ;;  %v9164_v18 = vrot.slane %v7777_v7, %v15616_v9  ;;  %v9218_v30 = vrot.slane %v7810_v1, %v15582_v4 }
 0x917   : > { %v9262_v40 = vsel %vm8274_vm10, %v9261_v59, %v9257_v34  ;;  %7401 = vmax.xlane.f32.xlu0 %v7400_v62  ;;  %v7403_v23 = vsel %vm1786_vm9, %v21075_v0, -inf  ;;  %v21078_v59 = vld [vmem:[#allocation176_spill] sm:$0xff]  ;;  %v3609_v62 = vcombine.high %v21081_v41, %v21080_v45  ;;  %v21086_v45 = vld [vmem:[#allocation109_spill] sm:$0xff]  ;;  %v21087_v41 = vld [vmem:[#allocation103_spill] sm:$0xff] }
 0x918   : > { %v7840_v51 = vpop.xlane.xlu0 %7839  ;;  %v17614_v35 = vsel %vm8302_vm13, %v9164_v18, %v17517_v47  ;;  %v21079_v7 = vcombine.high %v21077_v50, %v21078_v59  ;;  %v21082_v47 = vld [vmem:[#allocation114_spill] sm:$0xff]  ;;  %v21083_v18 = vld [vmem:[#allocation107_spill] sm:$0xff]  ;;  %v21085_v50 = vld [vmem:[#allocation116_spill] sm:$0xff]  ;;  %v3561_v1 = vcombine.high %v21087_v41, %v21086_v45 }
 0x919   : > { %21076 = vst [vmem:[#allocation172_spill] sm:$0xff] %v17614_v35  ;;  %v9266_v21 = vrot.slane %v7840_v51, %v15600_v12  ;;  %7404 = vmax.xlane.f32.xlu1 %v7403_v23  ;;  %v7813_v34 = vpop.xlane.xlu1 %7812  ;;  %v3577_v51 = vcombine.high %v21083_v18, %v21082_v47  ;;  %v21084_v35 = vld [vmem:[#allocation120_spill] sm:$0xff]  ;;  %v17639_v47 = vrot.slane %v3609_v62, %v13517_v11  ;;  %v21092_v18 = vld [vmem:[#allocation131_spill] sm:$0xff] }
 0x91a   : > { %v7517_v58 = vsel %vm1786_vm9, %v21079_v7, -inf  ;;  %v9222_v0 = vrot.slane %v7813_v34, %v15591_v15  ;;  %v3593_v59 = vcombine.high %v21085_v50, %v21084_v35  ;;  %v3897_v62 = vcombine.high %v17433_v42, %v17442_v54 }
 0x91b   : > { %v9267_v46 = vsel %vm8281_vm14, %v9266_v21, %v9262_v40  ;;  %7518 = vmax.xlane.f32.xlu0 %v7517_v58  ;;  %v21088_v40 = vld [vmem:[#allocation151_spill] sm:$0xff]  ;;  %v21089_v21 = vld [vmem:[#allocation149_spill] sm:$0xff]  ;;  %v17643_v35 = vrot.slane %v3577_v51, %v13517_v11 }
 0x91c   : > { %v7861_v23 = vpop.xlane.xlu0 %7860  ;;  %v9223_v7 = vsel %vm8274_vm10, %v9222_v0, %v9218_v30  ;;  %v21090_v34 = vcombine.high %v21088_v40, %v21089_v21  ;;  %v21091_v0 = vld [vmem:[#allocation133_spill] sm:$0xff]  ;;  %v17652_v41 = vrot.slane %v3593_v59, %v13517_v11  ;;  %v17659_v40 = vrot.slane %v3561_v1, %v13517_v11  ;;  %v21100_v1 = vld [vmem:[#allocation164_spill] sm:$0xff] }
 0x91d   : > { %7539 = vmax.xlane.f32.xlu1 %v7538_v24  ;;  %v7816_v6 = vpop.xlane.xlu1 %7815  ;;  %v3929_v24 = vcombine.high %v17416_v37, %v17430_v53  ;;  %v21093_v50 = vcombine.low %v21091_v0, %v21092_v18  ;;  %v21096_v53 = vld [vmem:[#allocation106_spill] sm:$0xff]  ;;  %v21097_v21 = vld [vmem:[#allocation105_spill] sm:$0xff] }
 0x91e   : > { %v7559_v58 = vsel %vm1786_vm9, %v21090_v34, -inf  ;;  %v9227_v61 = vrot.slane %v7816_v6, %v15600_v12  ;;  %21094 = vst [vmem:[#allocation184_spill] sm:$0xff] %v17652_v41  ;;  %21095 = vst [vmem:[#allocation180_spill] sm:$0xff] %v17659_v40  ;;  %v21098_v34 = vcombine.high %v21096_v53, %v21097_v21  ;;  %v3672_v59 = vcombine.low %v17652_v41, %v17639_v47  ;;  %v21103_v21 = vld [vmem:[#allocation55_spill] sm:$0xff] }
 0x91f   : > { %7560 = vmax.xlane.f32.xlu0 %v7559_v58  ;;  %v7580_v45 = vsel %vm1786_vm9, %v21093_v50, -inf  ;;  %v9300_v50 = vrot.slane %v7861_v23, %v15591_v15  ;;  %v17681_v23 = vrot.slane %v3929_v24, %v13550_v57 }
 0x920   : > { %v7843_v30 = vpop.xlane.xlu0 %7842  ;;  %v9228_v6 = vsel %vm8281_vm14, %v9227_v61, %v9223_v7  ;;  %v7601_v58 = vsel %vm1786_vm9, %v21098_v34, -inf  ;;  %v21099_v7 = vld [vmem:[#allocation168_spill] sm:$0xff] }
 0x921   : > { %v9271_v51 = vrot.slane %v7843_v30, %v15610_v33  ;;  %7581 = vmax.xlane.f32.xlu1 %v7580_v45  ;;  %v7858_v37 = vpop.xlane.xlu1 %7857  ;;  %v4953_v61 = vcombine.high %v21100_v1, %v21099_v7  ;;  %v21101_v30 = vld [vmem:[#allocation169_spill] sm:$0xff]  ;;  %v21104_v34 = vld [vmem:[#allocation68_spill] sm:$0xff] }
 0x922   : > { %v9296_v54 = vrot.slane %v7858_v37, %v15582_v4  ;;  %v21102_v45 = vld [vmem:[#allocation165_spill] sm:$0xff]  ;;  %v21105_v39 = vcombine.high %v21103_v21, %v21104_v34  ;;  %v17687_v37 = vrot.slane %v3897_v62, %v13550_v57  ;;  %v21107_v7 = vld [vmem:[#allocation160_spill] sm:$0xff]  ;;  %v17701_v62 = vrot.slane %v3672_v59, %v13550_v57 }
 0x923   : > { %v17669_v42 = vsel %vm8288_vm4, %v9271_v51, %v9267_v46  ;;  %7602 = vmax.xlane.f32.xlu0 %v7601_v58  ;;  %v4969_v20 = vcombine.high %v21102_v45, %v21101_v30  ;;  %v3640_v46 = vcombine.low %v17659_v40, %v17643_v35  ;;  %v21106_v58 = vld [vmem:[#allocation162_spill] sm:$0xff]  ;;  %v21108_v30 = vld [vmem:[#allocation163_spill] sm:$0xff]  ;;  %v21109_v45 = vld [vmem:[#allocation161_spill] sm:$0xff]  ;;  %v7231_v40 = vcombine.high %v17470_v60, %v17455_v52 }
 0x924   : > { %v7882_v53 = vpop.xlane.xlu0 %7881  ;;  %v7757_v44 = vsel %vm1786_vm9, %v21105_v39, -inf  ;;  %v9301_v51 = vsel %vm8274_vm10, %v9300_v50, %v9296_v54  ;;  %v4921_v1 = vcombine.high %v21107_v7, %v21106_v58  ;;  %v4937_v21 = vcombine.high %v21109_v45, %v21108_v30  ;;  %v21110_v39 = vld [vmem:[#allocation49_spill] sm:$0xff]  ;;  %v21113_v7 = vld [vmem:[#allocation36_spill] sm:$0xff] }
 0x925   : > { %7758 = vmax.xlane.f32.xlu1 %v7757_v44  ;;  %v7819_v34 = vpop.xlane.xlu1 %7818  ;;  %v21112_v24 = vcombine.low %v21110_v39, %v21111_v38  ;;  %v17704_v50 = vrot.slane %v4953_v61, %v13517_v11  ;;  %v17707_v54 = vrot.slane %v4969_v20, %v13517_v11  ;;  %v21114_v30 = vld [vmem:[#allocation268_spill] sm:$0xff]  ;;  %v3962_v52 = vcombine.low %v17687_v37, %v17681_v23 }
 0x926   : > { %v9232_v44 = vrot.slane %v7819_v34, %v15610_v33  ;;  %v21115_v45 = vcombine.high %v21113_v7, %v21114_v30  ;;  %v17718_v59 = vrot.slane %v4921_v1, %v13517_v11  ;;  %v17721_v20 = vrot.slane %v4937_v21, %v13517_v11 }
 0x927   : > { %v7778_v41 = vsel %vm1786_vm9, %v21112_v24, -inf  ;;  %v7997_v34 = vsel %vm1786_vm9, %v7231_v40, -inf  ;;  %v17725_v7 = vrot.slane %v3640_v46, %v13550_v57 }
 0x928   : > { %7779 = vmax.xlane.f32.xlu0 %v7778_v41  ;;  %v7822_v58 = vpop.xlane.xlu0 %7821  ;;  %v7799_v24 = vsel %vm1786_vm9, %v21115_v45, -inf  ;;  %v9233_v60 = vsel %vm8288_vm4, %v9232_v44, %v9228_v6  ;;  %v5032_v44 = vcombine.low %v17704_v50, %v17707_v54  ;;  %v5000_v45 = vcombine.low %v17718_v59, %v17721_v20 }
 0x929   : > { %v9237_v41 = vrot.slane %v7822_v58, %v15613_v5  ;;  %7800 = vmax.xlane.f32.xlu1 %v7799_v24  ;;  %v7864_v61 = vpop.xlane.xlu1 %7863  ;;  %v7301_v58 = vsel %vm1786_vm9, %v3962_v52, -inf  ;;  %v3692_v21 = vcombine.low %v17725_v7, %v17701_v62  ;;  %v3557_v52 = vcombine.high %v17531_v56, %v17521_v10  ;;  %v21119_v10 = vld [vmem:[#allocation138_spill] sm:$0xff]  ;;  %v21120_v56 = vld [vmem:[#allocation136_spill] sm:$0xff] }
 0x92a   : > { %v9305_v6 = vrot.slane %v7864_v61, %v15600_v12  ;;  %v9335_v61 = vrot.slane %v7882_v53, %v15582_v4  ;;  %v21126_v4 = vld [vmem:[#allocation89_spill] sm:$0xff] }
 0x92b   : > { %v17728_v30 = vsel %vm8295_vm6, %v9237_v41, %v9233_v60  ;;  %v21116_v60 = vcombine.high %v21055_v36, %v21056_v19  ;;  %v3729_v19 = vcombine.high %v21120_v56, %v21119_v10 }
 0x92c   : > { %7998 = vmax.xlane.f32.xlu0 %v7997_v34  ;;  %v7867_v1 = vpop.xlane.xlu0 %7866  ;;  %v9306_v40 = vsel %vm8281_vm14, %v9305_v6, %v9301_v51 }
 0x92d   : > { %v9310_v46 = vrot.slane %v7867_v1, %v15610_v33  ;;  %7302 = vmax.xlane.f32.xlu1 %v7301_v58  ;;  %v7885_v24 = vpop.xlane.xlu1 %7884  ;;  %v7322_v41 = vsel %vm1786_vm9, %v21116_v60, -inf  ;;  %v7343_v1 = vsel %vm1786_vm9, %v3692_v21, -inf  ;;  %v17755_v58 = vrot.slane %v5032_v44, %v13550_v57  ;;  %v21121_v21 = vld [vmem:[#allocation24_spill] sm:$0xff]  ;;  %v21122_v60 = vld [vmem:[#allocation10_spill] sm:$0xff] }
 0x92e   : > { %v9339_v51 = vrot.slane %v7885_v24, %v15591_v15  ;;  %v3745_v44 = vcombine.high %v21122_v60, %v21121_v21 }
 0x92f   : > { %v17748_v34 = vsel %vm8288_vm4, %v9310_v46, %v9306_v40  ;;  %v7364_v40 = vsel %vm1786_vm9, %v3557_v52, -inf  ;;  %v17764_v46 = vrot.slane %v5000_v45, %v13550_v57 }
 0x930   : > { %21117 = vst [vmem:[#allocation174_spill] sm:$0xff] %v17748_v34  ;;  %7323 = vmax.xlane.f32.xlu0 %v7322_v41  ;;  %v17751_v6 = vpop.xlane.xlu0 %7905  ;;  %v17758_v36 = vsel %vm8274_vm10, %v9339_v51, %v9335_v61  ;;  %v21123_v41 = vld [vmem:[#allocation134_spill] sm:$0xff]  ;;  %v4917_v34 = vcombine.high %v17602_v8, %v17588_v48 }
 0x931   : > { %21118 = vst [vmem:[#allocation90_spill] sm:$0xff] %v17751_v6  ;;  %7344 = vmax.xlane.f32.xlu1 %v7343_v1  ;;  %v7846_v53 = vpop.xlane.xlu1 %7845  ;;  %v21124_v6 = vld [vmem:[#allocation126_spill] sm:$0xff]  ;;  %v21125_v1 = vld [vmem:[#allocation88_spill] sm:$0xff]  ;;  %v5052_v52 = vcombine.low %v17764_v46, %v17755_v58 }
 0x932   : > { %v9276_v24 = vrot.slane %v7846_v53, %v15613_v5  ;;  %v3697_v61 = vcombine.high %v21124_v6, %v21123_v41  ;;  %v21127_v15 = vcombine.low %v21125_v1, %v21126_v4  ;;  %v21128_v53 = vld [vmem:[#allocation9_spill] sm:$0xff]  ;;  %v17783_v6 = vrot.slane %v3729_v19, %v13517_v11 }
 0x933   : > { %v7562_v8 = vsel %vm1786_vm9, %v4917_v34, -inf  ;;  %v21135_v34 = vcombine.high %v21091_v0, %v21092_v18  ;;  %v3865_v18 = vcombine.high %v21031_v17, %v21030_v31  ;;  %v3833_v31 = vcombine.high %v21035_v27, %v21034_v32 }
 0x934   : > { %7365 = vmax.xlane.f32.xlu0 %v7364_v40  ;;  %v7849_v51 = vpop.xlane.xlu0 %7848  ;;  %v7385_v10 = vsel %vm1786_vm9, %v21127_v15, -inf  ;;  %v9277_v45 = vsel %vm8295_vm6, %v9276_v24, %v17669_v42  ;;  %v21129_v40 = vld [vmem:[#allocation128_spill] sm:$0xff]  ;;  %v21130_v15 = vcombine.high %v21066_v16, %v21067_v55  ;;  %v17797_v24 = vrot.slane %v3745_v44, %v13517_v11 }
 0x935   : > { %v9281_v56 = vrot.slane %v7849_v51, %v15616_v9  ;;  %7386 = vmax.xlane.f32.xlu1 %v7385_v10  ;;  %v3713_v21 = vcombine.high %v21129_v40, %v21128_v53  ;;  %v17785_v60 = vpop.xlane.xlu1 %7887  ;;  %v17800_v19 = vrot.slane %v3697_v61, %v13517_v11  ;;  %v7541_v10 = vsel %vm1786_vm9, %v5052_v52, -inf }
 0x936   : > { %v7406_v41 = vsel %vm1786_vm9, %v21130_v15, -inf  ;;  %v3808_v55 = vcombine.low %v17783_v6, %v17797_v24  ;;  %v3537_v40 = vcombine.high %v17489_v28, %v17475_v43  ;;  %v7604_v15 = vsel %vm1786_vm9, %v21135_v34, -inf }
 0x937   : > { %v17794_v42 = vsel %vm8302_vm13, %v9281_v56, %v9277_v45  ;;  %v17806_v16 = vrot.slane %v3713_v21, %v13517_v11  ;;  %v21132_v45 = vld [vmem:[#allocation155_spill] sm:$0xff]  ;;  %v21133_v56 = vld [vmem:[#allocation154_spill] sm:$0xff]  ;;  %v3963_v28 = vcombine.high %v17687_v37, %v17681_v23  ;;  %v3881_v23 = vcombine.high %v21033_v29, %v21032_v13 }
 0x938   : > { %7407 = vmax.xlane.f32.xlu0 %v7406_v41  ;;  %v17802_v51 = vpop.xlane.xlu0 %7890  ;;  %v21134_v52 = vcombine.low %v21132_v45, %v21133_v56  ;;  %v17830_v41 = vrot.slane %v3808_v55, %v13550_v57  ;;  %v17856_v34 = vrot.slane %v3537_v40, %v13550_v57  ;;  %v3849_v13 = vcombine.high %v21029_v14, %v21028_v2 }
 0x939   : > { %7542 = vmax.xlane.f32.xlu1 %v7541_v10  ;;  %v17810_v48 = vpop.xlane.xlu1 %7908  ;;  %v3776_v44 = vcombine.low %v17800_v19, %v17806_v16  ;;  %v3505_v10 = vcombine.high %v17501_v63, %v17486_v3  ;;  %v21139_v3 = vcombine.high %v21110_v39, %v21111_v38  ;;  %v4897_v38 = vcombine.high %v17543_v22, %v17546_v49 }
 0x93a   : > { %v7583_v53 = vsel %vm1786_vm9, %v21134_v52, -inf  ;;  %v21136_v52 = vld [vmem:[#allocation56_spill] sm:$0xff]  ;;  %v7325_v39 = vsel %vm1786_vm9, %v3963_v28, -inf  ;;  %v17875_v29 = vrot.slane %v3865_v18, %v13517_v11  ;;  %v4865_v32 = vcombine.high %v17556_v26, %v17559_v25 }
 0x93b   : > { %v17843_v0 = vrot.slane %v3776_v44, %v13550_v57  ;;  %v7802_v63 = vsel %vm1786_vm9, %v21139_v3, -inf  ;;  %v17861_v37 = vrot.slane %v3505_v10, %v13550_v57  ;;  %v3693_v44 = vcombine.high %v17725_v7, %v17701_v62 }
 0x93c   : > { %7563 = vmax.xlane.f32.xlu0 %v7562_v8  ;;  %v17815_v61 = vpop.xlane.xlu0 %7929  ;;  %v17885_v62 = vrot.slane %v3881_v23, %v13517_v11  ;;  %v17888_v2 = vrot.slane %v3833_v31, %v13517_v11  ;;  %v17894_v26 = vrot.slane %v4897_v38, %v13550_v57  ;;  %v17897_v25 = vrot.slane %v3849_v13, %v13517_v11 }
 0x93d   : > { %21131 = vst [vmem:[#allocation202_spill] sm:$0xff] %v17815_v61  ;;  %7584 = vmax.xlane.f32.xlu1 %v7583_v53  ;;  %v17823_v21 = vpop.xlane.xlu1 %7824  ;;  %v21137_v53 = vld [vmem:[#allocation50_spill] sm:$0xff]  ;;  %v3558_v49 = vcombine.low %v17861_v37, %v17856_v34  ;;  %v7367_v7 = vsel %vm1786_vm9, %v3693_v44, -inf  ;;  %v17907_v28 = vrot.slane %v4865_v32, %v13550_v57  ;;  %v21142_v44 = vld [vmem:[#allocation180_spill] sm:$0xff] }
 0x93e   : > { %v21138_v61 = vcombine.low %v21136_v52, %v21137_v53  ;;  %v3944_v40 = vcombine.low %v17875_v29, %v17885_v62  ;;  %v3912_v18 = vcombine.low %v17888_v2, %v17897_v25  ;;  %v3641_v13 = vcombine.high %v21142_v44, %v17643_v35 }
 0x93f   : > { %v7388_v10 = vsel %vm1786_vm9, %v3558_v49, -inf  ;;  %v4918_v23 = vcombine.low %v17907_v28, %v17894_v26  ;;  %v21143_v49 = vcombine.high %v21132_v45, %v21133_v56  ;;  %v3829_v45 = vcombine.high %v17843_v0, %v17830_v41 }
 0x940   : > { %7605 = vmax.xlane.f32.xlu0 %v7604_v15  ;;  %v17834_v8 = vpop.xlane.xlu0 %7827  ;;  %v7781_v43 = vsel %vm1786_vm9, %v21138_v61, -inf  ;;  %v3828_v61 = vcombine.low %v17843_v0, %v17830_v41  ;;  %v3920_v32 = vrot.slane %v3912_v18, %v13550_v57  ;;  %v3655_v56 = vrot.slane %v3641_v13, %v13550_v57 }
 0x941   : > { %7782 = vmax.xlane.f32.xlu1 %v7781_v43  ;;  %v17847_v55 = vpop.xlane.xlu1 %7869  ;;  %v5053_v43 = vcombine.high %v17764_v46, %v17755_v58  ;;  %v21141_v58 = vld [vmem:[#allocation184_spill] sm:$0xff]  ;;  %v7370_v41 = vsel %vm1786_vm9, %v3829_v45, -inf }
 0x942   : > { %v7346_v22 = vsel %vm1786_vm9, %v3828_v61, -inf  ;;  %v3673_v46 = vcombine.high %v21141_v58, %v17639_v47 }
 0x943   : > { %v7565_v38 = vsel %vm1786_vm9, %v5053_v43, -inf }
 0x944   : > { %7803 = vmax.xlane.f32.xlu0 %v7802_v63  ;;  %v17867_v17 = vpop.xlane.xlu0 %7872  ;;  %v21140_v63 = vcombine.high %v21125_v1, %v21126_v4  ;;  %v7586_v1 = vsel %vm1786_vm9, %v4918_v23, -inf  ;;  %v17939_v35 = vrot.slane %v3673_v46, %v13550_v57  ;;  %v3777_v23 = vcombine.high %v17800_v19, %v17806_v16 }
 0x945   : > { %7326 = vmax.xlane.f32.xlu1 %v7325_v39  ;;  %v17879_v27 = vpop.xlane.xlu1 %7911  ;;  %v17923_v39 = vrot.slane %v3944_v40, %v13550_v57  ;;  %v4919_v19 = vcombine.high %v17907_v28, %v17894_v26 }
 0x946   : > { %v7409_v61 = vsel %vm1786_vm9, %v21140_v63, -inf }
 0x947   : > { %v3964_v40 = vcombine.low %v3920_v32, %v17923_v39 }
 0x948   : > { %7347 = vmax.xlane.f32.xlu0 %v7346_v22  ;;  %v17890_v14 = vpop.xlane.xlu0 %7914  ;;  %v5033_v22 = vcombine.high %v17704_v50, %v17707_v54  ;;  %v21144_v50 = vcombine.high %v21136_v52, %v21137_v53  ;;  %v3809_v52 = vcombine.high %v17783_v6, %v17797_v24  ;;  %v21145_v24 = vld [vmem:[#allocation127_spill] sm:$0xff] }
 0x949   : > { %7368 = vmax.xlane.f32.xlu1 %v7367_v7  ;;  %v17901_v15 = vpop.xlane.xlu1 %7932  ;;  %v7607_v7 = vsel %vm1786_vm9, %v21143_v49, -inf  ;;  %v7349_v63 = vsel %vm1786_vm9, %v3964_v40, -inf  ;;  %v3913_v40 = vcombine.high %v17888_v2, %v17897_v25 }
 0x94a   : > { %v7805_v54 = vsel %vm1786_vm9, %v21144_v50, -inf  ;;  %v3823_v16 = vrot.slane %v3809_v52, %v13550_v57 }
 0x94c   : > { %7389 = vmax.xlane.f32.xlu0 %v7388_v10  ;;  %v17911_v3 = vpop.xlane.xlu0 %7953  ;;  %v5001_v10 = vcombine.high %v17718_v59, %v17721_v20  ;;  %v5047_v59 = vrot.slane %v5033_v22, %v13550_v57  ;;  %v3559_v20 = vcombine.high %v17861_v37, %v17856_v34  ;;  %v9242_v34 = vrot.slane %v17823_v21, %v15616_v9 }
 0x94d   : > { %7410 = vmax.xlane.f32.xlu1 %v7409_v61  ;;  %v7852_v31 = vpop.xlane.xlu1 %7851  ;;  %v3694_v61 = vcombine.low %v3655_v56, %v17939_v35  ;;  %v9247_v37 = vrot.slane %v17834_v8, %v21145_v24  ;;  %v3945_v21 = vcombine.high %v17875_v29, %v17885_v62  ;;  %v3965_v8 = vcombine.high %v3920_v32, %v17923_v39 }
 0x94e   : > { %v5015_v0 = vrot.slane %v5001_v10, %v13550_v57  ;;  %v7412_v6 = vsel %vm1786_vm9, %v3559_v20, -inf  ;;  %v9286_v44 = vrot.slane %v7852_v31, %v21145_v24  ;;  %v3791_v31 = vrot.slane %v3777_v23, %v13550_v57 }
 0x94f   : > { %v7391_v46 = vsel %vm1786_vm9, %v3694_v61, -inf  ;;  %v9243_v26 = vsel %vm8302_vm13, %v9242_v34, %v17728_v30  ;;  %v7610_v39 = vsel %vm1786_vm9, %v4919_v19, -inf  ;;  %v7373_v50 = vsel %vm1786_vm9, %v3965_v8, -inf }
 0x950   : > { %7566 = vmax.xlane.f32.xlu0 %v7565_v38  ;;  %v7831_v4 = vpop.xlane.xlu0 %7830  ;;  %v5054_v38 = vcombine.low %v5015_v0, %v5047_v59  ;;  %v9287_v29 = vsel %vm8309_vm8, %v9286_v44, %v17794_v42  ;;  %v3830_v32 = vcombine.low %v3791_v31, %v3823_v16  ;;  %v3959_v45 = vrot.slane %v3945_v21, %v13550_v57  ;;  %v21147_v21 = vld [vmem:[#allocation174_spill] sm:$0xff] }
 0x951   : > { %7587 = vmax.xlane.f32.xlu1 %v7586_v1  ;;  %v17931_v47 = vpop.xlane.xlu1 %7893  ;;  %v21146_v1 = vld [vmem:[#allocation76_spill] sm:$0xff]  ;;  %v5055_v61 = vcombine.high %v5015_v0, %v5047_v59  ;;  %v3927_v20 = vrot.slane %v3913_v40, %v13550_v57  ;;  %v9315_v59 = vrot.slane %v17847_v55, %v15613_v5  ;;  %v9320_v44 = vrot.slane %v17867_v17, %v15616_v9 }
 0x952   : > { %v9252_v22 = vrot.slane %v7831_v4, %v21146_v1  ;;  %v9248_v4 = vsel %vm8309_vm8, %v9247_v37, %v9243_v26  ;;  %v9349_v37 = vrot.slane %v17802_v51, %v15610_v33  ;;  %v9354_v19 = vrot.slane %v17931_v47, %v15613_v5 }
 0x953   : > { %v3966_v23 = vcombine.low %v3927_v20, %v3959_v45  ;;  %v9316_v17 = vsel %vm8295_vm6, %v9315_v59, %v21147_v21 }
 0x954   : > { %7608 = vmax.xlane.f32.xlu0 %v7607_v7  ;;  %v17943_v43 = vpop.xlane.xlu0 %7875  ;;  %v7589_v7 = vsel %vm1786_vm9, %v5054_v38, -inf  ;;  %v9253_v10 = vsel %vm8316_vm1, %v9252_v22, %v9248_v4  ;;  %v9344_v38 = vrot.slane %v17785_v60, %v15600_v12  ;;  %v9321_v8 = vsel %vm8302_vm13, %v9320_v44, %v9316_v17  ;;  %v1765_v17 = vld [vmem:[%s21149_s16 + $0x18] sm:$0xff] }
 0x955   : > { %7806 = vmax.xlane.f32.xlu1 %v7805_v54  ;;  %v17952_v18 = vpop.xlane.xlu1 %7935  ;;  %v3695_v54 = vcombine.high %v3655_v56, %v17939_v35  ;;  %v7613_v35 = vsel %vm1786_vm9, %v5055_v61, -inf  ;;  %v3831_v56 = vcombine.high %v3791_v31, %v3823_v16  ;;  %v7397_v34 = vsel %vm1786_vm9, %v3966_v23, -inf  ;;  %v21150_v23 = vld [vmem:[#allocation145_spill] sm:$0xff] }
 0x956   : > { %v9325_v60 = vrot.slane %v17943_v43, %v21145_v24  ;;  %v9345_v51 = vsel %vm8281_vm14, %v9344_v38, %v17758_v36  ;;  %v9388_v38 = vrot.slane %v17890_v14, %v15610_v33 }
 0x957   : > { %v7418_v55 = vsel %vm1786_vm9, %v3831_v56, -inf  ;;  %v9350_v43 = vsel %vm8288_vm4, %v9349_v37, %v9345_v51 }
 0x958   : > { %7350 = vmax.xlane.f32.xlu0 %v7349_v63  ;;  %v17961_v53 = vpop.xlane.xlu0 %7917  ;;  %v7394_v63 = vsel %vm1786_vm9, %v3830_v32, -inf  ;;  %v9355_v40 = vsel %vm8295_vm6, %v9354_v19, %v9350_v43  ;;  %v9326_v26 = vsel %vm8309_vm8, %v9325_v60, %v9321_v8 }
 0x959   : > { %7371 = vmax.xlane.f32.xlu1 %v7370_v41  ;;  %v17967_v58 = vpop.xlane.xlu1 %7956  ;;  %v7415_v41 = vsel %vm1786_vm9, %v3695_v54, -inf  ;;  %v9393_v59 = vrot.slane %v17961_v53, %v15613_v5 }
 0x95c   : > { %7392 = vmax.xlane.f32.xlu0 %v7391_v46  ;;  %v17976_v13 = vpop.xlane.xlu0 %7959 }
 0x95d   : > { %7413 = vmax.xlane.f32.xlu1 %v7412_v6  ;;  %v7855_v49 = vpop.xlane.xlu1 %7854  ;;  %v3967_v6 = vcombine.high %v3927_v20, %v3959_v45  ;;  %v1762_v20 = vld [vmem:[%s21149_s16] sm:$0xff] }
 0x95e   : > { %v9291_v28 = vrot.slane %v7855_v49, %v21146_v1 }
 0x95f   : > { %v7421_v47 = vsel %vm1786_vm9, %v3967_v6, -inf }
 0x960   : > { %7590 = vmax.xlane.f32.xlu0 %v7589_v7  ;;  %v17995_v62 = vpop.xlane.xlu0 %7980  ;;  %v9292_v2 = vsel %vm8316_vm1, %v9291_v28, %v9287_v29 }
 0x961   : > { %7611 = vmax.xlane.f32.xlu1 %v7610_v39  ;;  %v9555_v30 = vsel %vm9527_vm3, %v9292_v2, %v9253_v10  ;;  %v7897_v25 = vpop.xlane.xlu1 %7896 }
 0x962   : > { %v9359_v22 = vrot.slane %v7897_v25, %v15616_v9 }
 0x964   : > { %7374 = vmax.xlane.f32.xlu0 %v7373_v50  ;;  %v7900_v42 = vpop.xlane.xlu0 %7899  ;;  %v9360_v28 = vsel %vm8302_vm13, %v9359_v22, %v9355_v40  ;;  %v1764_v40 = vld [vmem:[%s21149_s16 + $0x10] sm:$0xff] }
 0x965   : > { %7395 = vmax.xlane.f32.xlu1 %v7394_v63  ;;  %v18006_v52 = vpop.xlane.xlu1 %7938  ;;  %v9364_v49 = vrot.slane %v7900_v42, %v21145_v24  ;;  %v21148_v63 = vld [vmem:[#allocation139_spill] sm:$0xff] }
 0x966   : > { %v9378_v61 = vrot.slane %v17810_v48, %v21148_v63 }
 0x967   : > { %v9365_v39 = vsel %vm8309_vm8, %v9364_v49, %v9360_v28 }
 0x968   : > { %7416 = vmax.xlane.f32.xlu0 %v7415_v41  ;;  %v18009_v46 = vpop.xlane.xlu0 %7941 }
 0x969   : > { %7614 = vmax.xlane.f32.xlu1 %v7613_v35  ;;  %v18016_v0 = vpop.xlane.xlu1 %7977  ;;  %v21151_v35 = vld [vmem:[#allocation90_spill] sm:$0xff] }
 0x96a   : > { %v9374_v56 = vrot.slane %v21151_v35, %v21150_v23  ;;  %v21156_v35 = vld [vmem:[#allocation137_spill] sm:$0xff] }
 0x96c   : > { %7398 = vmax.xlane.f32.xlu0 %v7397_v34  ;;  %v18027_v16 = vpop.xlane.xlu0 %7983  ;;  %v9379_v34 = vsel %vm8274_vm10, %v9378_v61, %v9374_v56 }
 0x96d   : > { %7419 = vmax.xlane.f32.xlu1 %v7418_v55  ;;  %v7879_v7 = vpop.xlane.xlu1 %7878  ;;  %v1678_v55 = vld [vmem:[%s21152_s7] sm:$0x3]  ;;  %s21332_s7 = sld [smem:[#allocation284_spill]] }
 0x96e   : > { %v9330_v31 = vrot.slane %v7879_v7, %v21146_v1 }
 0x970   : > { %7422 = vmax.xlane.f32.xlu0 %v7421_v47  ;;  %v7903_v36 = vpop.xlane.xlu0 %7902  ;;  %v9331_v4 = vsel %vm8316_vm1, %v9330_v31, %v9326_v26  ;;  %v1758_v26 = vld [vmem:[%s21153_s11] sm:$0xff] }
 0x971   : > { %v9369_v29 = vrot.slane %v7903_v36, %v21146_v1  ;;  %v9556_v32 = vsel %vm9529_vm11, %v9331_v4, %v9555_v30  ;;  %v7921_v10 = vpop.xlane.xlu1 %7920  ;;  %v9383_v30 = vrot.slane %v17879_v27, %v15600_v12  ;;  %v1763_v27 = vld [vmem:[%s21149_s16 + $0x8] sm:$0xff]  ;;  %v8001_v36 = vld [vmem:[%s21154_s9] sm:$0x3]  ;;  %12015 = vmatprep.mubr.msk.f32.mxu1 %vm1786_vm9, %v1758_v26 }
 0x972   : > { %v9398_v6 = vrot.slane %v7921_v10, %v15616_v9 }
 0x973   : > { %v9370_v2 = vsel %vm8316_vm1, %v9369_v29, %v9365_v39  ;;  %v9384_v37 = vsel %vm8281_vm14, %v9383_v30, %v9379_v34 }
 0x974   : > { %v9557_v25 = vsel %vm9531_vm15, %v9370_v2, %v9556_v32  ;;  %v18049_v50 = vpop.xlane.xlu0 %7944  ;;  %v9389_v14 = vsel %vm8288_vm4, %v9388_v38, %v9384_v37 }
 0x975   : > { %v18051_v54 = vpop.xlane.xlu1 %7962  ;;  %v9394_v53 = vsel %vm8295_vm6, %v9393_v59, %v9389_v14 }
 0x976   : > { %v9399_v51 = vsel %vm8302_vm13, %v9398_v6, %v9394_v53 }
 0x978   : > { %v18053_v45 = vpop.xlane.xlu0 %7986 }
 0x979   : > { %v7924_v42 = vpop.xlane.xlu1 %7923 }
 0x97a   : > { %v9403_v44 = vrot.slane %v7924_v42, %v21145_v24 }
 0x97c   : > { %v18062_v41 = vpop.xlane.xlu0 %7947  ;;  %v9404_v49 = vsel %vm8309_vm8, %v9403_v44, %v9399_v51  ;;  %v9422_v51 = vrot.slane %v17952_v18, %v15600_v12  ;;  %v9427_v18 = vrot.slane %v18006_v52, %v15610_v33  ;;  %v9495_v52 = vrot.slane %v17995_v62, %v21148_v63 }
 0x97d   : > { %v18070_v48 = vpop.xlane.xlu1 %7965 }
 0x97e   : > { %1768 = vperm.xlu1 %12124, %v1762_v20   ;;  %v21155_v20 = vld [vmem:[#allocation72_spill] sm:$0xff] }
 0x97f   : > { %v18086_v22 = vpop.f32.mrf.mxu0 }
 0x980   : > { %v18079_v19 = vpop.xlane.xlu0 %7989 }
 0x981   : > { %v7927_v60 = vpop.xlane.xlu1 %7926  ;;  %v12012_v47 = vpop.f32.mrf.mxu0 }
 0x982   : > { %1773 = vperm.xlu1 %12124, %v1763_v27   ;;  %v9408_v21 = vrot.slane %v7927_v60, %v21146_v1  ;;  %v9417_v60 = vrot.slane %v17901_v15, %v21148_v63  ;;  %v9461_v15 = vrot.slane %v17976_v13, %v15600_v12 }
 0x984   : > { %v18094_v7 = vpop.xlane.xlu0 %7950  ;;  %v9409_v43 = vsel %vm8316_vm1, %v9408_v21, %v9404_v49  ;;  %v21157_v21 = vld [vmem:[#allocation102_spill] sm:$0xff] }
 0x985   : > { %v18098_v8 = vsel %vm9533_vm7, %v9409_v43, %v9557_v25  ;;  %v18100_v31 = vpop.xlane.xlu1 %7968  ;;  %v21158_v49 = vld [vmem:[#allocation202_spill] sm:$0xff]  ;;  %v9456_v43 = vrot.slane %v17967_v58, %v21148_v63  ;;  %v9432_v58 = vrot.slane %v18009_v46, %v15613_v5 }
 0x986   : > { %1681 = vperm.xlu0 %12123, %v1678_v55   ;;  %1783 = vperm.xlu1 %12124, %v1765_v17   ;;  %v9413_v47 = vrot.slane %v21158_v49, %v21150_v23 }
 0x988   : > { %v18112_v28 = vpop.xlane.xlu0 %7992 }
 0x989   : > { %v18114_v4 = vpop.xlane.xlu1 %7971 }
 0x98a   : > { %1778 = vperm.xlu0 %12123, %v1764_v40   ;;  %8004 = vperm.xlu1 %12124, %v8001_v36   ;;  %v21159_v40 = vld [vmem:[#allocation171_spill] sm:$0xff] }
 0x98c   : > { %v18116_v29 = vpop.xlane.xlu0 %7797 }
 0x98d   : > { %v18118_v39 = vpop.xlane.xlu1 %7974 }
 0x990   : > { %v18120_v32 = vpop.xlane.xlu0 %7995 }
 0x991   : > { %v7255_v10 = vpop.xlane.xlu1 %7254 }
 0x992   : > { %v8315_v2 = vrot.slane %v7255_v10, %v21146_v1  ;;  %v9418_v10 = vsel %vm8274_vm10, %v9417_v60, %v9413_v47 }
 0x994   : > { %v7279_v25 = vpop.xlane.xlu0 %7278  ;;  %v8317_v30 = vsel %vm8316_vm1, %v8315_v2, %v21155_v20  ;;  %v9452_v2 = vrot.slane %v17911_v3, %v21150_v23  ;;  %v9423_v20 = vsel %vm8281_vm14, %v9422_v51, %v9418_v10  ;;  %v9466_v3 = vrot.slane %v18051_v54, %v15610_v33 }
 0x995   : > { %v8355_v42 = vrot.slane %v7279_v25, %v21146_v1  ;;  %v9491_v25 = vrot.slane %v18016_v0, %v21150_v23  ;;  %v9476_v54 = vrot.slane %v18100_v31, %v15616_v9  ;;  %v9505_v51 = vrot.slane %v18053_v45, %v15610_v33 }
 0x996   : > { %v18124_v61 = vpop.xlane.xlu1 %7299  ;;  %v9457_v13 = vsel %vm8274_vm10, %v9456_v43, %v9452_v2  ;;  %v9486_v31 = vrot.slane %v18118_v39, %v21146_v1  ;;  %v21160_v43 = vld [vmem:[#allocation186_spill] sm:$0xff] }
 0x997   : > { %v8356_v56 = vsel %vm8316_vm1, %v8355_v42, %v21156_v35  ;;  %v9462_v0 = vsel %vm8281_vm14, %v9461_v15, %v9457_v13  ;;  %v9428_v35 = vsel %vm8288_vm4, %v9427_v18, %v9423_v20  ;;  %v21161_v39 = vld [vmem:[#allocation178_spill] sm:$0xff] }
 0x998   : > { %v18131_v38 = vsel %vm9527_vm3, %v8356_v56, %v8317_v30  ;;  %v18133_v59 = vpop.xlane.xlu0 %7320  ;;  %vm9535_vm3 = vcmask 1045509   ;;  %v9500_v30 = vrot.slane %v18027_v16, %v15600_v12  ;;  %v9437_v56 = vrot.slane %v18049_v50, %v15616_v9 }
 0x999   : > { %v9433_v62 = vsel %vm8295_vm6, %v9432_v58, %v9428_v35  ;;  %v9442_v16 = vrot.slane %v18062_v41, %v21145_v24  ;;  %v9447_v50 = vrot.slane %v18094_v7, %v21146_v1  ;;  %v9467_v49 = vsel %vm8288_vm4, %v9466_v3, %v9462_v0 }
 0x99a   : > { %v18135_v34 = vpop.xlane.xlu1 %7341  ;;  %v9510_v41 = vrot.slane %v18079_v19, %v15613_v5  ;;  %v9438_v45 = vsel %vm8302_vm13, %v9437_v56, %v9433_v62  ;;  %v9520_v19 = vrot.slane %v18120_v32, %v21145_v24 }
 0x99b   : > { %v9443_v15 = vsel %vm8309_vm8, %v9442_v16, %v9438_v45 }
 0x99c   : > { %v18137_v6 = vpop.xlane.xlu0 %7362 }
 0x99e   : > { %v18139_v27 = vpop.xlane.xlu1 %7383 }
 0x9a0   : > { %v18141_v37 = vpop.xlane.xlu0 %7401 }
 0x9a2   : > { %v18143_v44 = vpop.xlane.xlu1 %7404 }
 0x9a4   : > { %v7519_v14 = vpop.xlane.xlu0 %7518 }
 0x9a5   : > { %v8745_v53 = vrot.slane %v7519_v14, %v21146_v1  ;;  %v9471_v14 = vrot.slane %v18070_v48, %v15613_v5  ;;  %v9481_v48 = vrot.slane %v18114_v4, %v21145_v24  ;;  %v9515_v4 = vrot.slane %v18112_v28, %v15616_v9 }
 0x9a6   : > { %v18148_v55 = vpop.xlane.xlu1 %7539 }
 0x9a7   : > { %v8746_v17 = vsel %vm8316_vm1, %v8745_v53, %v21157_v21  ;;  %v9496_v53 = vsel %vm8274_vm10, %v9495_v52, %v9491_v25  ;;  %v9472_v7 = vsel %vm8295_vm6, %v9471_v14, %v9467_v49  ;;  %v9448_v25 = vsel %vm8316_vm1, %v9447_v50, %v9443_v15 }
 0x9a8   : > { %v18160_v26 = vsel %vm9531_vm15, %v8746_v17, %v21159_v40  ;;  %v18162_v36 = vpop.xlane.xlu0 %7560  ;;  %v9501_v17 = vsel %vm8281_vm14, %v9500_v30, %v9496_v53  ;;  %v9477_v18 = vsel %vm8302_vm13, %v9476_v54, %v9472_v7  ;;  %v8389_v52 = vrot.slane %v18124_v61, %v21145_v24  ;;  %v21162_v61 = vld [vmem:[#allocation66_spill] sm:$0xff]  ;;  %v21164_v7 = vld [vmem:[#allocation167_spill] sm:$0xff] }
 0x9a9   : > { %v9506_v58 = vsel %vm8288_vm4, %v9505_v51, %v9501_v17  ;;  %v9482_v28 = vsel %vm8309_vm8, %v9481_v48, %v9477_v18  ;;  %v9559_v56 = vsel %vm9535_vm3, %v9448_v25, %v18098_v8  ;;  %v21163_v8 = vmov 0.0   ;;  %v21165_v25 = vld [vmem:[#allocation172_spill] sm:$0xff] }
 0x9aa   : > { %v18175_v42 = vpop.xlane.xlu1 %7581  ;;  %v9511_v20 = vsel %vm8295_vm6, %v9510_v41, %v9506_v58  ;;  %v9487_v13 = vsel %vm8316_vm1, %v9486_v31, %v9482_v28  ;;  %v8390_v16 = vsel %vm8309_vm8, %v8389_v52, %v21162_v61  ;;  %v8779_v49 = vrot.slane %v18148_v55, %v21145_v24 }
 0x9ab   : > { %v9516_v32 = vsel %vm8302_vm13, %v9515_v4, %v9511_v20  ;;  %v9560_v53 = vsel %vm9537_vm2, %v9487_v13, %v9559_v56 }
 0x9ac   : > { %v18185_v46 = vpop.xlane.xlu0 %7602  ;;  %v9521_v0 = vsel %vm8309_vm8, %v9520_v19, %v9516_v32  ;;  %v8780_v4 = vsel %vm8309_vm8, %v8779_v49, %v21164_v7  ;;  %v9198_v49 = vrot.slane %v18116_v29, %v15613_v5  ;;  %v8457_v7 = vrot.slane %v18135_v34, %v15613_v5  ;;  %v21168_v29 = vld [vmem:[#allocation182_spill] sm:$0xff] }
 0x9ae   : > { %v7759_v60 = vpop.xlane.xlu1 %7758 }
 0x9af   : > { %v9135_v21 = vrot.slane %v7759_v60, %v21146_v1 }
 0x9b1   : > { %v7780_v47 = vpop.xlane.xlu0 %7779  ;;  %v9136_v40 = vsel %vm8316_vm1, %v9135_v21, %v21160_v43 }
 0x9b2   : > { %v18222_v10 = vpop.xlane.xlu1 %7800  ;;  %v9552_v2 = vsel %vm9535_vm3, %v9136_v40, %v21161_v39  ;;  %v9169_v18 = vrot.slane %v7780_v47, %v21145_v24  ;;  %v8423_v39 = vrot.slane %v18133_v59, %v15616_v9  ;;  %v21166_v47 = vld [vmem:[#allocation129_spill] sm:$0xff] }
 0x9b4   : > { %v9170_v28 = vsel %vm8309_vm8, %v9169_v18, %v21165_v25  ;;  %v8424_v32 = vsel %vm8302_vm13, %v8423_v39, %v21166_v47 }
 0x9b5   : > { %v7999_v30 = vpop.xlane.xlu0 %7998 }
 0x9b6   : > { %v9525_v3 = vrot.slane %v7999_v30, %v21146_v1  ;;  %v7303_v35 = vpop.xlane.xlu1 %7302 }
 0x9b7   : > { %v8394_v14 = vrot.slane %v7303_v35, %v21146_v1 }
 0x9b8   : > { %v9526_v62 = vsel %vm8316_vm1, %v9525_v3, %v9521_v0 }
 0x9b9   : > { %v7324_v54 = vpop.xlane.xlu0 %7323  ;;  %v9561_v60 = vsel %vm9539_vm12, %v9526_v62, %v9560_v53  ;;  %v8395_v51 = vsel %vm8316_vm1, %v8394_v14, %v8390_v16  ;;  %v8813_v53 = vrot.slane %v18162_v36, %v15616_v9 }
 0x9ba   : > { %12022 = vmatpush3.msra.mxu0 %v9561_v60  ;;  %v9530_v50 = vsel %vm9529_vm11, %v8395_v51, %v18131_v38  ;;  %v7345_v48 = vpop.xlane.xlu1 %7344  ;;  %v8428_v20 = vrot.slane %v7324_v54, %v21145_v24  ;;  %v21167_v54 = vld [vmem:[#allocation170_spill] sm:$0xff]  ;;  %vm9721_vm11 = vcmask 588800  }
 0x9bb   : > { %12023 = vmatprep.subr.mxu0 %v21163_v8  ;;  %v8814_v60 = vsel %vm8302_vm13, %v8813_v53, %v21167_v54  ;;  %v8462_v18 = vrot.slane %v7345_v48, %v15616_v9  ;;  %v21170_v54 = vld [vmem:[#allocation123_spill] sm:$0xff] }
 0x9bc   : > { %v8429_v59 = vsel %vm8309_vm8, %v8428_v20, %v8424_v32 }
 0x9bd   : > { %v18248_v21 = vpop.xlane.xlu0 %7365 }
 0x9be   : > { %v18250_v17 = vpop.xlane.xlu1 %7386 }
 0x9c1   : > { %v18254_v41 = vpop.xlane.xlu0 %7407 }
 0x9c2   : > { %v7543_v31 = vpop.xlane.xlu1 %7542 }
 0x9c3   : > { %v8784_v45 = vrot.slane %v7543_v31, %v21146_v1 }
 0x9c5   : > { %v7564_v43 = vpop.xlane.xlu0 %7563  ;;  %v8785_v38 = vsel %vm8316_vm1, %v8784_v45, %v8780_v4  ;;  %v9203_v45 = vrot.slane %v18222_v10, %v15616_v9 }
 0x9c6   : > { %v9544_v40 = vsel %vm9533_vm7, %v8785_v38, %v18160_v26  ;;  %v18262_v15 = vpop.xlane.xlu1 %7584 }
 0x9c7   : > { %v8852_v53 = vrot.slane %v18262_v15, %v15616_v9 }
 0x9c9   : > { %v18265_v19 = vpop.xlane.xlu0 %7605 }
 0x9ca   : > { %v7783_v55 = vpop.xlane.xlu1 %7782 }
 0x9cb   : > { %v9174_v58 = vrot.slane %v7783_v55, %v21146_v1  ;;  %v9199_v55 = vsel %vm8295_vm6, %v9198_v49, %v21168_v29 }
 0x9cc   : > { %v9204_v10 = vsel %vm8302_vm13, %v9203_v45, %v9199_v55 }
 0x9cd   : > { %v7804_v13 = vpop.xlane.xlu0 %7803  ;;  %v9175_v26 = vsel %vm8316_vm1, %v9174_v58, %v9170_v28  ;;  %v21169_v28 = vld [vmem:[#allocation64_spill] sm:$0xff] }
 0x9ce   : > { %v7327_v52 = vpop.xlane.xlu1 %7326  ;;  %v9553_v30 = vsel %vm9537_vm2, %v9175_v26, %v9552_v2  ;;  %v8818_v2 = vrot.slane %v7564_v43, %v21145_v24  ;;  %v9208_v4 = vrot.slane %v7804_v13, %v21145_v24  ;;  %v8458_v34 = vsel %vm8295_vm6, %v8457_v7, %v21169_v28 }
 0x9cf   : > { %v8433_v3 = vrot.slane %v7327_v52, %v21146_v1  ;;  %v8555_v28 = vrot.slane %v18141_v37, %v21150_v23  ;;  %v21172_v23 = vld [vmem:[#allocation166_spill] sm:$0xff] }
 0x9d0   : > { %v9209_v20 = vsel %vm8309_vm8, %v9208_v4, %v9204_v10 }
 0x9d1   : > { %v7348_v0 = vpop.xlane.xlu0 %7347  ;;  %v8434_v35 = vsel %vm8316_vm1, %v8433_v3, %v8429_v59  ;;  %v8847_v59 = vrot.slane %v18175_v42, %v15613_v5  ;;  %v8496_v42 = vrot.slane %v18248_v21, %v15613_v5 }
 0x9d2   : > { %v9532_v56 = vsel %vm9531_vm15, %v8434_v35, %v9530_v50  ;;  %v7369_v14 = vpop.xlane.xlu1 %7368  ;;  %v8819_v50 = vsel %vm8309_vm8, %v8818_v2, %v8814_v60  ;;  %v8467_v39 = vrot.slane %v7348_v0, %v21145_v24  ;;  %vm9728_vm15 = vcmask 982016  }
 0x9d3   : > { %v8848_v60 = vsel %vm8295_vm6, %v8847_v59, %v21170_v54  ;;  %v8501_v49 = vrot.slane %v7369_v14, %v15616_v9  ;;  %v8881_v14 = vrot.slane %v18185_v46, %v15610_v33 }
 0x9d5   : > { %v18281_v62 = vpop.xlane.xlu0 %7389  ;;  %v8882_v37 = vsel %vm8288_vm4, %v8881_v14, %v21172_v23 }
 0x9d6   : > { %v18286_v61 = vpop.xlane.xlu1 %7410 }
 0x9d9   : > { %v7567_v16 = vpop.xlane.xlu0 %7566 }
 0x9da   : > { %v8823_v51 = vrot.slane %v7567_v16, %v21146_v1  ;;  %v7588_v31 = vpop.xlane.xlu1 %7587 }
 0x9db   : > { %v8857_v2 = vrot.slane %v7588_v31, %v21145_v24 }
 0x9dc   : > { %v8824_v36 = vsel %vm8316_vm1, %v8823_v51, %v8819_v50 }
 0x9dd   : > { %v18300_v43 = vpop.xlane.xlu0 %7608  ;;  %v9545_v38 = vsel %vm9535_vm3, %v8824_v36, %v9544_v40  ;;  %v8463_v40 = vsel %vm8302_vm13, %v8462_v18, %v8458_v34  ;;  %v21171_v36 = vld [vmem:[#allocation125_spill] sm:$0xff] }
 0x9de   : > { %v7807_v58 = vpop.xlane.xlu1 %7806  ;;  %v8468_v52 = vsel %vm8309_vm8, %v8467_v39, %v8463_v40  ;;  %v8525_v39 = vrot.slane %v18139_v27, %v15600_v12  ;;  %v8891_v46 = vrot.slane %v18300_v43, %v15616_v9  ;;  %v8559_v27 = vrot.slane %v18143_v44, %v21148_v63 }
 0x9df   : > { %v9213_v25 = vrot.slane %v7807_v58, %v21146_v1  ;;  %v8886_v58 = vrot.slane %v18265_v19, %v15613_v5  ;;  %v8535_v19 = vrot.slane %v18281_v62, %v15613_v5 }
 0x9e0   : > { %v8560_v59 = vsel %vm8274_vm10, %v8559_v27, %v8555_v28  ;;  %vm21186_vm10 = vcmask 883712  }
 0x9e1   : > { %v7351_v13 = vpop.xlane.xlu0 %7350  ;;  %v9214_v26 = vsel %vm8316_vm1, %v9213_v25, %v9209_v20  ;;  %v8887_v63 = vsel %vm8295_vm6, %v8886_v58, %v8882_v37 }
 0x9e2   : > { %v8472_v48 = vrot.slane %v7351_v13, %v21146_v1  ;;  %v7372_v47 = vpop.xlane.xlu1 %7371  ;;  %v9554_v32 = vsel %vm9539_vm12, %v9214_v26, %v9553_v30  ;;  %v8491_v30 = vrot.slane %v18137_v6, %v15610_v33  ;;  %v8564_v26 = vrot.slane %v18254_v41, %v15600_v12 }
 0x9e3   : > { %12024 = vmatpush3.msra.mxu0 %v9554_v32  ;;  %v8506_v31 = vrot.slane %v7372_v47, %v21145_v24  ;;  %v8569_v47 = vrot.slane %v18286_v61, %v15610_v33  ;;  %v8892_v32 = vsel %vm8302_vm13, %v8891_v46, %v8887_v63 }
 0x9e4   : > { %v8473_v3 = vsel %vm8316_vm1, %v8472_v48, %v8468_v52  ;;  %12025 = vmatprep.subr.mxu0 %v21163_v8  ;;  %v8492_v6 = vsel %vm8288_vm4, %v8491_v30, %v21171_v36  ;;  %v21173_v48 = vld [vmem:[#allocation58_spill] sm:$0xff]  ;;  %v8565_v61 = vsel %vm8281_vm14, %v8564_v26, %v8560_v59 }
 0x9e5   : > { %v9534_v0 = vsel %vm9533_vm7, %v8473_v3, %v9532_v56  ;;  %v7393_v35 = vpop.xlane.xlu0 %7392  ;;  %v8853_v56 = vsel %vm8302_vm13, %v8852_v53, %v8848_v60  ;;  %v8497_v4 = vsel %vm8295_vm6, %v8496_v42, %v8492_v6  ;;  %v8526_v43 = vsel %vm8281_vm14, %v8525_v39, %v21173_v48 }
 0x9e6   : > { %v7414_v16 = vpop.xlane.xlu1 %7413  ;;  %v8858_v15 = vsel %vm8309_vm8, %v8857_v2, %v8853_v56  ;;  %v8502_v29 = vsel %vm8302_vm13, %v8501_v49, %v8497_v4  ;;  %vm1799_vm7 = vcmask 1041408   ;;  %vm9769_vm14 = vcmask 621568  }
 0x9e7   : > { %v8507_v10 = vsel %vm8309_vm8, %v8506_v31, %v8502_v29  ;;  %v8574_v12 = vrot.slane %v7414_v16, %v15613_v5  ;;  %v8570_v5 = vsel %vm8288_vm4, %v8569_v47, %v8565_v61 }
 0x9e9   : > { %v7591_v51 = vpop.xlane.xlu0 %7590 }
 0x9ea   : > { %v8862_v50 = vrot.slane %v7591_v51, %v21146_v1  ;;  %v7612_v45 = vpop.xlane.xlu1 %7611 }
 0x9eb   : > { %v8896_v20 = vrot.slane %v7612_v45, %v21145_v24 }
 0x9ec   : > { %v8863_v7 = vsel %vm8316_vm1, %v8862_v50, %v8858_v15 }
 0x9ed   : > { %v7375_v21 = vpop.xlane.xlu0 %7374  ;;  %v9546_v18 = vsel %vm9537_vm2, %v8863_v7, %v9545_v38  ;;  %v8530_v38 = vrot.slane %v18250_v17, %v15610_v33  ;;  %v8540_v17 = vrot.slane %v7393_v35, %v15616_v9  ;;  %v8897_v41 = vsel %vm8309_vm8, %v8896_v20, %v8892_v32 }
 0x9ee   : > { %v8511_v55 = vrot.slane %v7375_v21, %v21146_v1  ;;  %v7396_v25 = vpop.xlane.xlu1 %7395  ;;  %v1760_v21 = vld [vmem:[%s21153_s11 + $0x10] sm:$0xff] }
 0x9ef   : > { %v8545_v44 = vrot.slane %v7396_v25, %v21145_v24  ;;  %v8531_v52 = vsel %vm8288_vm4, %v8530_v38, %v8526_v43  ;;  %vm9772_vm4 = vcmask 1043456  }
 0x9f0   : > { %v8512_v34 = vsel %vm8316_vm1, %v8511_v55, %v8507_v10 }
 0x9f1   : > { %v7417_v13 = vpop.xlane.xlu0 %7416  ;;  %v9536_v40 = vsel %vm9535_vm3, %v8512_v34, %v9534_v0  ;;  %v8536_v0 = vsel %vm8295_vm6, %v8535_v19, %v8531_v52  ;;  %vm9762_vm3 = vcmask 637952  }
 0x9f2   : > { %v7615_v62 = vpop.xlane.xlu1 %7614  ;;  %v8541_v53 = vsel %vm8302_vm13, %v8540_v17, %v8536_v0  ;;  %v8579_v2 = vrot.slane %v7417_v13, %v15616_v9  ;;  %v8575_v9 = vsel %vm8295_vm6, %v8574_v12, %v8570_v5  ;;  %vm21192_vm6 = vcmask 654336  }
 0x9f3   : > { %v8901_v3 = vrot.slane %v7615_v62, %v21146_v1  ;;  %v8546_v54 = vsel %vm8309_vm8, %v8545_v44, %v8541_v53 }
 0x9f4   : > { %v8580_v50 = vsel %vm8302_vm13, %v8579_v2, %v8575_v9  ;;  %v9757_v9 = vrot.slane %v21163_v8, 2  ;;  %vm21184_vm13 = vcmask 392192  }
 0x9f5   : > { %v7399_v35 = vpop.xlane.xlu0 %7398  ;;  %v8902_v33 = vsel %vm8316_vm1, %v8901_v3, %v8897_v41 }
 0x9f6   : > { %v8550_v30 = vrot.slane %v7399_v35, %v21146_v1  ;;  %v7420_v60 = vpop.xlane.xlu1 %7419  ;;  %v9547_v42 = vsel %vm9539_vm12, %v8902_v33, %v9546_v18 }
 0x9f7   : > { %v8584_v51 = vrot.slane %v7420_v60, %v21145_v24  ;;  %12026 = vmatpush3.msra.mxu0 %v9547_v42  ;;  %v8000_v24 = vld [vmem:[%s21174_s24] sm:$0x3]  ;;  %s21177_s24 = smov 127  }
 0x9f8   : > { %v8551_v16 = vsel %vm8316_vm1, %v8550_v30, %v8546_v54  ;;  %12027 = vmatprep.subr.mxu0 %v21163_v8 }
 0x9f9   : > { %v7423_v56 = vpop.xlane.xlu0 %7422  ;;  %v9538_v49 = vsel %vm9537_vm2, %v8551_v16, %v9536_v40  ;;  %v8585_v31 = vsel %vm8309_vm8, %v8584_v51, %v8580_v50  ;;  %v9750_v51 = vrot.slane %v21163_v8, 4  ;;  %vm20214_vm8 = vcmask 293888  }
 0x9fa   : > { %v8589_v15 = vrot.slane %v7423_v56, %v21146_v1  ;;  %v1759_v1 = vld [vmem:[%s21153_s11 + $0x8] sm:$0xff]  ;;  %v1769_v18 = vpop.permute.xlu1 %1768  ;;  %vm21185_vm2 = vcmask 785408  }
 0x9fc   : > { %v8590_v45 = vsel %vm8316_vm1, %v8589_v15, %v8585_v31  ;;  %vm9645_vm1 = vcmask 80896  }
 0x9fd   : > { %v9540_v36 = vsel %vm9539_vm12, %v8590_v45, %v9538_v49  ;;  %vm9723_vm12 = vcmask 687104  }
 0x9fe   : > { %12028 = vmatpush3.msra.mxu0 %v9540_v36  ;;  %v1774_v29 = vpop.permute.xlu1 %1773 }
 0x9ff   : > { %12030 = vmatmul.mubr.msk.f32.vlgmr.msra.gmra.mxu0 %vm767_vm5, %v8000_v24  ;;  %vm9714_vm5 = vcmask 195584  }
 0xa01   : > { %v1682_v6 = vpop.permute.xlu0 %1681 }
 0xa02   : > { %v1754_v7 = vadd.f32 %v18086_v22, %v1682_v6  ;;  %v1761_v22 = vld [vmem:[%s21153_s11 + $0x18] sm:$0xff]  ;;  %v1784_v39 = vpop.permute.xlu1 %1783 }
 0xa04   : > { %v1757_v4 = vmax.f32 %v1754_v7, 0.0 }
 0xa05   : > { %v1779_v19 = vpop.permute.xlu0 %1778 }
 0xa06   : > { %12013 = vmatprep.subr.msk.mxu1 %vm1799_vm7, %v1757_v4  ;;  %v8005_v38 = vpop.permute.xlu1 %8004 }
 0xa07   : > { %12014 = vmatpush3.msk.msra.mxu1 %vm1799_vm7, %v1757_v4 }
 0xa08   : > { %12016 = vmatmul.mubr.msk.f32.vlgmr.msra.gmra.mxu1 %vm1786_vm9, %v1759_v1  ;;  %12032 = vmatprep.subr.mxu1 %v21163_v8 }
 0xa09   : > { %12018 = vmatprep.mubr.msk.f32.mxu1 %vm1786_vm9, %v1760_v21 }
 0xa0c   : > { %12019 = vmatmul.mubr.msk.f32.gmra.mxu1 %vm1786_vm9, %v1761_v22 }
 0xa0d   : > { %12038 = vmatprep.mubr.msk.f32.mxu1 %vm12307_vm0, %v21163_v8  ;;  %vm9719_vm0 = vcmask 490496  }
 0xabf   : > { %v9635_v14 = vpop.f32.mrf.mxu0 }
 0xac0   : > { %v9636_v34 = vadd.f32 %v9635_v14, %v8005_v38 }
 0xac1   : > { %v12031_v55 = vpop.f32.mrf.mxu0 }
 0xac2   : > { %v9639_v40 = vmax.f32 %v9636_v34, 0.0 }
 0xac8   : > { %v12017_v58 = vpop.f32.mrf.mxu1 }
 0xac9   : > { %v18421_v10 = vadd.f32 %v12017_v58, %v1774_v29 }
 0xaca   : > { %v1869_v25 = vpop.f32.mrf.mxu1 }
 0xacb   : > { %21175 = vst [vmem:[#allocation198_spill] sm:$0xff] %v18421_v10  ;;  %v18423_v28 = vadd.f32 %v1869_v25, %v1769_v18  ;;  %1894 = vrot.lane.b32.xlu1 %v18421_v10, %s21177_s24 }
 0xacc   : > { %v12020_v46 = vpop.f32.mrf.mxu1 }
 0xacd   : > { %21176 = vst [vmem:[#allocation194_spill] sm:$0xff] %v18423_v28  ;;  %v18427_v27 = vadd.f32 %v12020_v46, %v1784_v39  ;;  %1892 = vrot.lane.b32.xlu0 %v18423_v28, %s21177_s24 }
 0xace   : > { %v1879_v20 = vpop.f32.mrf.mxu1 }
 0xacf   : > { %21178 = vst [vmem:[#allocation190_spill] sm:$0xff] %v18427_v27  ;;  %v18431_v13 = vadd.f32 %v1879_v20, %v1779_v19  ;;  %1898 = vrot.lane.b32.xlu1 %v18427_v27, %s21177_s24 }
 0xad1   : > { %21179 = vst [vmem:[#allocation200_spill] sm:$0xff] %v18431_v13  ;;  %1896 = vrot.lane.b32.xlu0 %v18431_v13, %s21177_s24 }
 0xad3   : > { %9647 = vrot.lane.b32.xlu1 %v9639_v40, %s20402_s13 }
 0xad5   : > { %9641 = vrot.lane.b32.xlu0 %v9639_v40, %s20391_s8 }
 0xad7   : > { %9652 = vrot.lane.b32.xlu1 %v9639_v40, %s20276_s21  ;;  %s21189_s21 = sld [smem:[#allocation283_spill]] }
 0xad9   : > { %9657 = vrot.lane.b32.xlu0 %v9639_v40, %s20278_s22  ;;  %s21217_s22 = smov 12  }
 0xadb   : > { %9662 = vrot.lane.b32.xlu1 %v9639_v40, %s20281_s0  ;;  %s21187_s0 = smov 100  }
 0xadd   : > { %9667 = vrot.lane.b32.xlu0 %v9639_v40, %s20252_s26  ;;  %v9780_v58 = vld [vmem:[%s21189_s21] sm:$0xf] }
 0xadf   : > { %9672 = vrot.lane.b32.xlu1 %v9639_v40, %s20288_s23  ;;  %s21191_s23 = smov 104  }
 0xae1   : > { %9677 = vrot.lane.b32.xlu0 %v9639_v40, %s20296_s28  ;;  %s21190_s28 = smov 126  }
 0xb3d   : > { %v18445_v23 = vpop.permute.xlu1 %1894 }
 0xb3e   : > { %21180 = vst [vmem:[#allocation196_spill] sm:$0xff] %v18445_v23 }
 0xb3f   : > { %v18447_v37 = vpop.permute.xlu0 %1892 }
 0xb40   : > { %21181 = vst [vmem:[#allocation192_spill] sm:$0xff] %v18447_v37 }
 0xb41   : > { %v18449_v17 = vpop.permute.xlu1 %1898 }
 0xb42   : > { %21182 = vst [vmem:[#allocation188_spill] sm:$0xff] %v18449_v17 }
 0xb43   : > { %v18451_v48 = vpop.permute.xlu0 %1896 }
 0xb44   : > { %21183 = vst [vmem:[#allocation218_spill] sm:$0xff] %v18451_v48 }
 0xb45   : > { %v9648_v43 = vpop.permute.xlu1 %9647 }
 0xb46   : > { %v9650_v26 = vsel %vm1786_vm9, 0.0, %v9648_v43 }
 0xb47   : > { %v9651_v63 = vsel %vm9645_vm1, %v9650_v26, 0.0  ;;  %v9642_v44 = vpop.permute.xlu0 %9641 }
 0xb48   : > { %v9644_v62 = vsel %vm1786_vm9, 0.0, %v9642_v44  ;;  %9687 = vrot.lane.b32.xlu0 %v9651_v63, %s20537_s20 }
 0xb49   : > { %v9646_v52 = vsel %vm9645_vm1, %v9644_v62, 0.0  ;;  %v9653_v47 = vpop.permute.xlu1 %9652 }
 0xb4a   : > { %v9655_v32 = vsel %vm1786_vm9, 0.0, %v9653_v47  ;;  %9683 = vrot.lane.b32.xlu1 %v9646_v52, %s20552_s3  ;;  %s21330_s3 = sld [smem:[#allocation4_spill]] }
 0xb4b   : > { %v9658_v3 = vpop.permute.xlu0 %9657  ;;  %v9656_v0 = vsel %vm9645_vm1, %v9655_v32, 0.0 }
 0xb4c   : > { %v9660_v59 = vsel %vm1786_vm9, 0.0, %v9658_v3 }
 0xb4d   : > { %v9661_v12 = vsel %vm9645_vm1, %v9660_v59, 0.0  ;;  %v9663_v41 = vpop.permute.xlu1 %9662 }
 0xb4e   : > { %v9665_v35 = vsel %vm1786_vm9, 0.0, %v9663_v41  ;;  %9695 = vrot.lane.b32.xlu0 %v9661_v12, %s20501_s30  ;;  %9691 = vrot.lane.b32.xlu1 %v9656_v0, %s20519_s17  ;;  %s21219_s30 = smov 10   ;;  %s21228_s17 = smov 14  }
 0xb4f   : > { %v9668_v53 = vpop.permute.xlu0 %9667  ;;  %v9666_v30 = vsel %vm9645_vm1, %v9665_v35, 0.0 }
 0xb50   : > { %v9670_v2 = vsel %vm1786_vm9, 0.0, %v9668_v53 }
 0xb51   : > { %v9671_v33 = vsel %vm9645_vm1, %v9670_v2, 0.0  ;;  %v9673_v61 = vpop.permute.xlu1 %9672 }
 0xb52   : > { %v9675_v54 = vsel %vm1786_vm9, 0.0, %v9673_v61  ;;  %9703 = vrot.lane.b32.xlu0 %v9671_v33, %s20285_s4  ;;  %9699 = vrot.lane.b32.xlu1 %v9666_v30, %s20298_s18 }
 0xb53   : > { %v9678_v60 = vpop.permute.xlu0 %9677  ;;  %v9676_v5 = vsel %vm9645_vm1, %v9675_v54, 0.0  ;;  %v21194_v54 = vld [vmem:[#allocation8_spill] sm:$0xff] }
 0xb54   : > { %v9680_v42 = vsel %vm1786_vm9, 0.0, %v9678_v60 }
 0xb55   : > { %v9681_v16 = vsel %vm9645_vm1, %v9680_v42, 0.0  ;;  %v21195_v42 = vld [vmem:[#allocation7_spill] sm:$0xff] }
 0xb56   : > { %9711 = vrot.lane.b32.xlu0 %v9681_v16, %s20249_s15  ;;  %9707 = vrot.lane.b32.xlu1 %v9676_v5, %s20282_s2  ;;  %s21188_s2 = smov 124   ;;  %v21196_v16 = vld [vmem:[#allocation6_spill] sm:$0xff] }
 0xb5a   : > { %9753 = vrot.lane.b32.xlu0 %v9750_v51, %s20290_s1  ;;  %v9975_v51 = vsub.s32 3, %v21196_v16 }
 0xb5e   : > { %9767 = vrot.lane.b32.xlu0 %v21163_v8, %s20294_s5 }
 0xb62   : > { %9760 = vrot.lane.b32.xlu0 %v9757_v9, %s20292_s14  ;;  %v21197_v9 = vld [vmem:[#allocation11_spill] sm:$0xff] }
 0xbba   : > { %v9688_v56 = vpop.permute.xlu0 %9687 }
 0xbbc   : > { %v9684_v49 = vpop.permute.xlu1 %9683 }
 0xbbd   : > { %v9715_v50 = vsel %vm9714_vm5, 0.0, %v9684_v49  ;;  %vm9774_vm5 = vcmask 1045504  }
 0xbbe   : > { %v9717_v31 = vsel %vm20214_vm8, %v9715_v50, %v9688_v56 }
 0xbc0   : > { %v9696_v15 = vpop.permute.xlu0 %9695  ;;  %v9692_v45 = vpop.permute.xlu1 %9691 }
 0xbc1   : > { %v9718_v24 = vsel %vm21184_vm13, %v9717_v31, %v9692_v45  ;;  %vm9786_vm13 = vcmask 146432  }
 0xbc2   : > { %v9720_v6 = vsel %vm9719_vm0, %v9718_v24, %v9696_v15 }
 0xbc4   : > { %v9704_v36 = vpop.permute.xlu0 %9703  ;;  %v9700_v7 = vpop.permute.xlu1 %9699 }
 0xbc5   : > { %v9722_v4 = vsel %vm9721_vm11, %v9720_v6, %v9700_v7 }
 0xbc6   : > { %v9724_v21 = vsel %vm9723_vm12, %v9722_v4, %v9704_v36 }
 0xbc8   : > { %v9712_v1 = vpop.permute.xlu0 %9711  ;;  %v9708_v22 = vpop.permute.xlu1 %9707 }
 0xbc9   : > { %v9725_v18 = vsel %vm21185_vm2, %v9724_v21, %v9708_v22 }
 0xbca   : > { %v9727_v14 = vsel %vm21186_vm10, %v9725_v18, %v9712_v1 }
 0xbcb   : > { %v9729_v29 = vsel %vm9728_vm15, %v9727_v14, 0.0 }
 0xbcc   : > { %9743 = vrot.lane.b32.xlu1 %v9729_v29, %s20280_s27  ;;  %v9731_v55 = vrot.slane %v9729_v29, 6  ;;  %v9735_v39 = vrot.slane %v9729_v29, 4  ;;  %v9739_v25 = vrot.slane %v9729_v29, 2  ;;  %v9754_v38 = vpop.permute.xlu0 %9753  ;;  %s21218_s27 = smov 6  }
 0xbce   : > { %9746 = vrot.lane.b32.xlu0 %v9731_v55, %s21187_s0 }
 0xbd0   : > { %9765 = vrot.lane.b32.xlu1 %v9729_v29, %s20294_s5  ;;  %v9768_v46 = vpop.permute.xlu0 %9767 }
 0xbd2   : > { %9736 = vrot.lane.b32.xlu0 %v9735_v39, %s21188_s2 }
 0xbd4   : > { %9751 = vrot.lane.b32.xlu1 %v9735_v39, %s20290_s1  ;;  %v9761_v19 = vpop.permute.xlu0 %9760 }
 0xbd6   : > { %9783 = vperm.xlu0 %12123, %v9780_v58  }
 0xbd8   : > { %9758 = vrot.lane.b32.xlu1 %v9739_v25, %s20292_s14  ;;  %s21193_s14 = sld [smem:[#allocation282_spill]] }
 0xbdc   : > { %9732 = vrot.lane.b32.xlu1 %v9731_v55, %s21190_s28 }
 0xbde   : > { %v9779_v35 = vld [vmem:[%s21193_s14] sm:$0xf] }
 0xbe0   : > { %9740 = vrot.lane.b32.xlu1 %v9739_v25, %s21191_s23 }
 0xc3e   : > { %v9744_v34 = vpop.permute.xlu1 %9743 }
 0xc40   : > { %v9747_v26 = vpop.permute.xlu0 %9746 }
 0xc41   : > { %v9776_v44 = vsel %vm1799_vm7, %v9744_v34, %v9747_v26 }
 0xc42   : > { %v9766_v20 = vpop.permute.xlu1 %9765 }
 0xc43   : > { %v9770_v40 = vsel %vm9769_vm14, %v9766_v20, %v9768_v46 }
 0xc44   : > { %12033 = vmatpush3.msk.msra.mxu1 %vm1799_vm7, %v9770_v40  ;;  %v9737_v0 = vpop.permute.xlu0 %9736 }
 0xc45   : > { %12034 = vmatprep.subr.mxu1 %v21163_v8 }
 0xc46   : > { %v9752_v43 = vpop.permute.xlu1 %9751 }
 0xc47   : > { %v9755_v63 = vsel %vm21192_vm6, %v9752_v43, %v9754_v38 }
 0xc48   : > { %v9777_v52 = vsel %vm9772_vm4, %v9776_v44, %v9755_v63 }
 0xc4a   : > { %v9759_v62 = vpop.permute.xlu1 %9758 }
 0xc4b   : > { %v9763_v47 = vsel %vm9762_vm3, %v9759_v62, %v9761_v19 }
 0xc4c   : > { %v9778_v32 = vsel %vm9774_vm5, %v9777_v52, %v9763_v47 }
 0xc4d   : > { %12035 = vmatpush3.msra.mxu1 %v9778_v32 }
 0xc4e   : > { %v9733_v3 = vpop.permute.xlu1 %9732  ;;  %12036 = vmatprep.subr.mxu1 %v21163_v8 }
 0xc4f   : > { %v9771_v59 = vsel %vm1799_vm7, %v9729_v29, %v9733_v3  ;;  %vm21198_vm7 = vcmask 7168  }
 0xc50   : > { %v9773_v41 = vsel %vm9772_vm4, %v9771_v59, %v9737_v0  ;;  %vm21200_vm0 = vmmov %vm21198_vm7 }
 0xc51   : > { %v9784_v2 = vpop.permute.xlu0 %9783  ;;  %vm21202_vm12 = vmmov %vm21200_vm0 }
 0xc52   : > { %v9741_v12 = vpop.permute.xlu1 %9740  ;;  %vm21203_vm15 = vmmov %vm21200_vm0 }
 0xc53   : > { %v9775_v53 = vsel %vm9774_vm5, %v9773_v41, %v9741_v12  ;;  %vm21204_vm2 = vmmov %vm21200_vm0 }
 0xc54   : > { %12037 = vmatpush3.msra.mxu1 %v9775_v53  ;;  %vm21206_vm10 = vmmov %vm21200_vm0 }
 0xc55   : > { %12039 = vmatmul.mubr.msk.f32.vlgmr.msra.gmra.mxu1 %vm9786_vm13, %v9779_v35  ;;  %vm21207_vm14 = vmmov %vm21200_vm0 }
 0xc56   : > { %vm21208_vm4 = vmmov %vm21200_vm0 }
 0xc57   : > { %vm21209_vm6 = vmmov %vm21200_vm0 }
 0xc58   : > { %vm21210_vm3 = vmmov %vm21200_vm0 }
 0xc59   : > { %vm21211_vm5 = vmmov %vm21200_vm0 }
 0xd15   : > { %v9858_v30 = vpop.f32.mrf.mxu1 }
 0xd16   : > { %v9859_v33 = vadd.f32 %v9858_v30, %v9784_v2 }
 0xd17   : > { %v12040_v61 = vpop.f32.mrf.mxu1 }
 0xd18   : > { %v9865_v60 = vrot.slane %v9859_v33, %v21194_v54  ;;  %v9872_v5 = vrot.slane %v9859_v33, %v21195_v42  ;;  %v9969_v56 = vrot.slane %v9859_v33, %v21197_v9  ;;  %v9976_v49 = vrot.slane %v9859_v33, %v9975_v51 }
 0xd1a   : > { %9874 = vbcast.lane.b32.xlu0 %v9872_v5, 256  ;;  %9867 = vbcast.lane.b32.xlu1 %v9865_v60, 256 }
 0xd1e   : > { %9971 = vbcast.lane.b32.xlu0 %v9969_v56, 256  ;;  %9978 = vbcast.lane.b32.xlu1 %v9976_v49, 256 }
 0xd22   : > { %10722 = vbcast.lane.b32.xlu0 %v9976_v49, 304  ;;  %10718 = vbcast.lane.b32.xlu1 %v9969_v56, 304 }
 0xd26   : > { %10815 = vbcast.lane.b32.xlu0 %v9872_v5, 316  ;;  %10811 = vbcast.lane.b32.xlu1 %v9865_v60, 316 }
 0xd2a   : > { %10908 = vbcast.lane.b32.xlu0 %v9976_v49, 316  ;;  %10904 = vbcast.lane.b32.xlu1 %v9969_v56, 316 }
 0xd2e   : > { %11001 = vbcast.lane.b32.xlu0 %v9872_v5, 328  ;;  %10997 = vbcast.lane.b32.xlu1 %v9865_v60, 328 }
 0xd32   : > { %11094 = vbcast.lane.b32.xlu0 %v9976_v49, 328  ;;  %11090 = vbcast.lane.b32.xlu1 %v9969_v56, 328 }
 0xd36   : > { %11187 = vbcast.lane.b32.xlu0 %v9872_v5, 340  ;;  %11183 = vbcast.lane.b32.xlu1 %v9865_v60, 340 }
 0xd3a   : > { %11280 = vbcast.lane.b32.xlu0 %v9976_v49, 340  ;;  %11276 = vbcast.lane.b32.xlu1 %v9969_v56, 340 }
 0xd3e   : > { %10071 = vbcast.lane.b32.xlu0 %v9872_v5, 268  ;;  %10067 = vbcast.lane.b32.xlu1 %v9865_v60, 268 }
 0xd42   : > { %10629 = vbcast.lane.b32.xlu0 %v9872_v5, 304  ;;  %10625 = vbcast.lane.b32.xlu1 %v9865_v60, 304 }
 0xd46   : > { %10160 = vbcast.lane.b32.xlu0 %v9969_v56, 268  ;;  %10164 = vbcast.lane.b32.xlu1 %v9976_v49, 268 }
 0xd4a   : > { %10253 = vbcast.lane.b32.xlu0 %v9865_v60, 280  ;;  %10257 = vbcast.lane.b32.xlu1 %v9872_v5, 280 }
 0xd4e   : > { %10346 = vbcast.lane.b32.xlu0 %v9969_v56, 280  ;;  %10350 = vbcast.lane.b32.xlu1 %v9976_v49, 280 }
 0xd52   : > { %10439 = vbcast.lane.b32.xlu0 %v9865_v60, 292  ;;  %10443 = vbcast.lane.b32.xlu1 %v9872_v5, 292 }
 0xd56   : > { %10536 = vbcast.lane.b32.xlu0 %v9976_v49, 292  ;;  %10532 = vbcast.lane.b32.xlu1 %v9969_v56, 292 }
 0xd8c   : > { %v9875_v50 = vpop.permute.xlu0 %9874  ;;  %v9868_v15 = vpop.permute.xlu1 %9867 }
 0xd8d   : > { %v9876_v31 = vsel %vm21198_vm7, %v9868_v15, %v9875_v50  ;;  %vm21212_vm7 = vmmov %vm21200_vm0 }
 0xd8e   : > { %v9877_v45 = vcombine.high %v9876_v31, %v21163_v8  ;;  %v9884_v24 = vrot.slane %v9876_v31, %v13517_v11 }
 0xd90   : > { %v9892_v36 = vcombine.high %v9884_v24, %v21163_v8  ;;  %v18518_v6 = vrot.slane %v9884_v24, %v13550_v57  ;;  %v9972_v7 = vpop.permute.xlu0 %9971  ;;  %v9979_v4 = vpop.permute.xlu1 %9978  ;;  %v18522_v21 = vrot.slane %v9877_v45, %v13517_v11 }
 0xd91   : > { %v9980_v1 = vsel %vm21200_vm0, %v9972_v7, %v9979_v4 }
 0xd92   : > { %21199 = vst [vmem:[#allocation214_spill] sm:$0xff] %v18518_v6  ;;  %v18525_v22 = vrot.slane %v9892_v36, %v13550_v57  ;;  %v9922_v18 = vcombine.high %v18518_v6, %v21163_v8  ;;  %v9981_v14 = vcombine.high %v9980_v1, %v21163_v8  ;;  %v9988_v29 = vrot.slane %v9980_v1, %v13517_v11 }
 0xd93   : > { %v18537_v25 = vrot.slane %v18522_v21, %v13550_v57 }
 0xd94   : > { %v10723_v55 = vpop.permute.xlu0 %10722  ;;  %9927 = vrot.lane.b32.xlu1 %v9922_v18, %s20391_s8  ;;  %9931 = vrot.lane.b32.xlu0 %v18525_v22, %s20567_s6  ;;  %v10719_v39 = vpop.permute.xlu1 %10718  ;;  %v9996_v58 = vcombine.high %v9988_v29, %v21163_v8  ;;  %v18540_v38 = vrot.slane %v9988_v29, %v13550_v57  ;;  %v18543_v46 = vrot.slane %v9981_v14, %v13517_v11 }
 0xd95   : > { %v10724_v12 = vsel %vm21202_vm12, %v10719_v39, %v10723_v55  ;;  %vm21215_vm12 = vmmov %vm21200_vm0 }
 0xd96   : > { %21201 = vst [vmem:[#allocation210_spill] sm:$0xff] %v18540_v38  ;;  %v18546_v34 = vrot.slane %v9996_v58, %v13550_v57  ;;  %v10026_v40 = vcombine.high %v18540_v38, %v21163_v8  ;;  %v18556_v43 = vrot.slane %v18543_v46, %v13550_v57  ;;  %v10732_v2 = vrot.slane %v10724_v12, %v13517_v11 }
 0xd97   : > { %v10725_v49 = vcombine.high %v10724_v12, %v21163_v8 }
 0xd98   : > { %v10816_v19 = vpop.permute.xlu0 %10815  ;;  %9939 = vrot.lane.b32.xlu0 %v18537_v25, %s20564_s19  ;;  %v10812_v20 = vpop.permute.xlu1 %10811  ;;  %10035 = vrot.lane.b32.xlu1 %v18546_v34, %s20567_s6  ;;  %v10740_v5 = vcombine.high %v10732_v2, %v21163_v8  ;;  %v18590_v50 = vrot.slane %v10732_v2, %v13550_v57  ;;  %v10028_v17 = vcombine.high %v18556_v43, %v21163_v8 }
 0xd99   : > { %v10817_v61 = vsel %vm21204_vm2, %v10812_v20, %v10816_v19  ;;  %v18608_v36 = vrot.slane %v10725_v49, %v13517_v11  ;;  %vm21232_vm2 = vmmov %vm21200_vm0 }
 0xd9a   : > { %v10825_v16 = vrot.slane %v10817_v61, %v13517_v11  ;;  %v18593_v15 = vrot.slane %v10740_v5, %v13550_v57  ;;  %v10770_v7 = vcombine.high %v18590_v50, %v21163_v8  ;;  %v10818_v55 = vcombine.high %v10817_v61, %v21163_v8 }
 0xd9b   : > { %v18621_v29 = vrot.slane %v18608_v36, %v13550_v57 }
 0xd9c   : > { %v10909_v26 = vpop.permute.xlu0 %10908  ;;  %10031 = vrot.lane.b32.xlu0 %v10026_v40, %s20391_s8  ;;  %v10905_v63 = vpop.permute.xlu1 %10904  ;;  %10043 = vrot.lane.b32.xlu1 %v18556_v43, %s20564_s19  ;;  %v18596_v31 = vrot.slane %v10825_v16, %v13550_v57  ;;  %v10833_v4 = vcombine.high %v10825_v16, %v21163_v8 }
 0xd9d   : > { %v10910_v24 = vsel %vm21206_vm10, %v10905_v63, %v10909_v26  ;;  %v18638_v26 = vrot.slane %v10818_v55, %v13517_v11  ;;  %vm9955_vm10 = vcmask 31744  }
 0xd9e   : > { %v10863_v1 = vcombine.high %v18596_v31, %v21163_v8  ;;  %v10918_v18 = vrot.slane %v10910_v24, %v13517_v11  ;;  %v18625_v39 = vrot.slane %v10833_v4, %v13550_v57  ;;  %v10911_v40 = vcombine.high %v10910_v24, %v21163_v8 }
 0xda0   : > { %v11002_v44 = vpop.permute.xlu0 %11001  ;;  %v10998_v62 = vpop.permute.xlu1 %10997  ;;  %v10926_v58 = vcombine.high %v10918_v18, %v21163_v8  ;;  %v18629_v19 = vrot.slane %v10918_v18, %v13550_v57 }
 0xda1   : > { %v11003_v14 = vsel %vm21207_vm14, %v10998_v62, %v11002_v44  ;;  %vm9957_vm14 = vcmask 48128  }
 0xda2   : > { %v11011_v20 = vrot.slane %v11003_v14, %v13517_v11  ;;  %v18641_v63 = vrot.slane %v10926_v58, %v13550_v57  ;;  %v10956_v44 = vcombine.high %v18629_v19, %v21163_v8 }
 0xda4   : > { %v11095_v52 = vpop.permute.xlu0 %11094  ;;  %v11091_v47 = vpop.permute.xlu1 %11090  ;;  %v18646_v62 = vrot.slane %v11011_v20, %v13550_v57 }
 0xda5   : > { %v11096_v12 = vsel %vm21208_vm4, %v11091_v47, %v11095_v52  ;;  %vm9959_vm4 = vcmask 64512  }
 0xda6   : > { %v11049_v2 = vcombine.high %v18646_v62, %v21163_v8 }
 0xda8   : > { %v11188_v32 = vpop.permute.xlu0 %11187  ;;  %v11184_v3 = vpop.permute.xlu1 %11183 }
 0xda9   : > { %v11189_v52 = vsel %vm21209_vm6, %v11184_v3, %v11188_v32  ;;  %v11097_v3 = vcombine.high %v11096_v12, %v21163_v8  ;;  %vm9962_vm6 = vcmask 97280  }
 0xdaa   : > { %v11197_v32 = vrot.slane %v11189_v52, %v13517_v11 }
 0xdab   : > { %v18703_v18 = vrot.slane %v11097_v3, %v13517_v11 }
 0xdac   : > { %v18561_v59 = vpop.permute.xlu0 %11280  ;;  %v18563_v0 = vpop.permute.xlu1 %11276  ;;  %v18694_v24 = vrot.slane %v11197_v32, %v13550_v57  ;;  %v11205_v55 = vcombine.high %v11197_v32, %v21163_v8 }
 0xdae   : > { %v11235_v58 = vcombine.high %v18694_v24, %v21163_v8 }
 0xdb0   : > { %v10072_v41 = vpop.permute.xlu0 %10071  ;;  %v10068_v35 = vpop.permute.xlu1 %10067 }
 0xdb1   : > { %v10073_v53 = vsel %vm21203_vm15, %v10068_v35, %v10072_v41  ;;  %v18653_v41 = vrot.slane %v10911_v40, %v13517_v11  ;;  %v18657_v35 = vrot.slane %v18638_v26, %v13550_v57  ;;  %vm21229_vm15 = vmmov %vm21200_vm0 }
 0xdb2   : > { %v10074_v30 = vcombine.high %v10073_v53, %v21163_v8  ;;  %v10081_v33 = vrot.slane %v10073_v53, %v13517_v11  ;;  %v11019_v53 = vcombine.high %v11011_v20, %v21163_v8 }
 0xdb3   : > { %v18669_v47 = vrot.slane %v18653_v41, %v13550_v57 }
 0xdb4   : > { %v10089_v60 = vcombine.high %v10081_v33, %v21163_v8  ;;  %v18573_v42 = vrot.slane %v10081_v33, %v13550_v57  ;;  %v18578_v51 = vrot.slane %v10074_v30, %v13517_v11  ;;  %v11104_v30 = vrot.slane %v11096_v12, %v13517_v11  ;;  %v10626_v4 = vpop.permute.xlu1 %10625 }
 0xdb5   : > { %v11004_v33 = vcombine.high %v11003_v14, %v21163_v8  ;;  %v18673_v61 = vrot.slane %v11019_v53, %v13550_v57  ;;  %v11190_v12 = vcombine.high %v11189_v52, %v21163_v8  ;;  %v18723_v53 = vrot.slane %v11205_v55, %v13550_v57 }
 0xdb6   : > { %21205 = vst [vmem:[#allocation226_spill] sm:$0xff] %v18573_v42  ;;  %v18581_v9 = vrot.slane %v10089_v60, %v13550_v57  ;;  %v10119_v56 = vcombine.high %v18573_v42, %v21163_v8  ;;  %v18600_v45 = vrot.slane %v18578_v51, %v13550_v57  ;;  %v11112_v60 = vcombine.high %v11104_v30, %v21163_v8 }
 0xdb7   : > { %v18677_v5 = vrot.slane %v11104_v30, %v13550_v57  ;;  %v18686_v16 = vrot.slane %v11004_v33, %v13517_v11  ;;  %v18736_v52 = vrot.slane %v11190_v12, %v13517_v11 }
 0xdb8   : > { %10124 = vrot.lane.b32.xlu1 %v10119_v56, %s20391_s8  ;;  %10128 = vrot.lane.b32.xlu0 %v18581_v9, %s20567_s6  ;;  %v18689_v56 = vrot.slane %v11112_v60, %v13550_v57  ;;  %v10165_v40 = vpop.permute.xlu1 %10164  ;;  %v10121_v43 = vcombine.high %v18600_v45, %v21163_v8 }
 0xdb9   : > { %v11142_v49 = vcombine.high %v18677_v5, %v21163_v8  ;;  %v18707_v14 = vrot.slane %v18686_v16, %v13550_v57 }
 0xdbc   : > { %10779 = vrot.lane.b32.xlu1 %v18593_v15, %s20567_s6  ;;  %10136 = vrot.lane.b32.xlu0 %v18600_v45, %s20564_s19 }
 0xdc0   : > { %10868 = vrot.lane.b32.xlu1 %v10863_v1, %s20391_s8  ;;  %10775 = vrot.lane.b32.xlu0 %v10770_v7, %s20391_s8  ;;  %v10630_v7 = vpop.permute.xlu0 %10629  ;;  %v11282_v1 = vsel %vm21210_vm3, %v18563_v0, %v18561_v59  ;;  %vm9964_vm3 = vcmask 113664  }
 0xdc1   : > { %v11290_v20 = vrot.slane %v11282_v1, %v13517_v11  ;;  %v10631_v59 = vsel %vm21211_vm5, %v10626_v4, %v10630_v7  ;;  %v11283_v32 = vcombine.high %v11282_v1, %v21163_v8  ;;  %vm21286_vm5 = vcmask 130048  }
 0xdc2   : > { %v10639_v33 = vrot.slane %v10631_v59, %v13517_v11 }
 0xdc3   : > { %v18727_v30 = vrot.slane %v11290_v20, %v13550_v57  ;;  %v18752_v1 = vrot.slane %v11283_v32, %v13517_v11  ;;  %v10632_v32 = vcombine.high %v10631_v59, %v21163_v8 }
 0xdc4   : > { %10872 = vrot.lane.b32.xlu1 %v18625_v39, %s20567_s6  ;;  %10787 = vrot.lane.b32.xlu0 %v18621_v29, %s20564_s19  ;;  %v10161_v0 = vpop.permute.xlu0 %10160  ;;  %v18745_v7 = vrot.slane %v10639_v33, %v13550_v57 }
 0xdc5   : > { %v10166_v60 = vsel %vm21212_vm7, %v10161_v0, %v10165_v40  ;;  %vm11397_vm7 = vcmask 277504  }
 0xdc6   : > { %v10174_v4 = vrot.slane %v10166_v60, %v13517_v11  ;;  %v10677_v0 = vcombine.high %v18745_v7, %v21163_v8 }
 0xdc8   : > { %10965 = vrot.lane.b32.xlu1 %v18641_v63, %s20567_s6  ;;  %10961 = vrot.lane.b32.xlu0 %v10956_v44, %s20391_s8  ;;  %v18719_v44 = vrot.slane %v18703_v18, %v13550_v57  ;;  %v10254_v55 = vpop.permute.xlu0 %10253  ;;  %v18761_v40 = vrot.slane %v10174_v4, %v13550_v57  ;;  %v10182_v54 = vcombine.high %v10174_v4, %v21163_v8 }
 0xdca   : > { %21213 = vst [vmem:[#allocation224_spill] sm:$0xff] %v18761_v40  ;;  %v10212_v6 = vcombine.high %v18761_v40, %v21163_v8  ;;  %v18791_v4 = vrot.slane %v10182_v54, %v13550_v57 }
 0xdcc   : > { %11054 = vrot.lane.b32.xlu1 %v11049_v2, %s20391_s8  ;;  %10880 = vrot.lane.b32.xlu0 %v18657_v35, %s20564_s19  ;;  %v11298_v2 = vcombine.high %v11290_v20, %v21163_v8  ;;  %v18756_v20 = vrot.slane %v18736_v52, %v13550_v57 }
 0xdce   : > { %v18740_v3 = vrot.slane %v11298_v2, %v13550_v57  ;;  %v18771_v2 = vrot.slane %v18752_v1, %v13550_v57 }
 0xdd0   : > { %10973 = vrot.lane.b32.xlu1 %v18669_v47, %s20564_s19  ;;  %11058 = vrot.lane.b32.xlu0 %v18673_v61, %s20567_s6 }
 0xdd4   : > { %11151 = vrot.lane.b32.xlu1 %v18689_v56, %s20567_s6  ;;  %11147 = vrot.lane.b32.xlu0 %v11142_v49, %s20391_s8  ;;  %v11328_v49 = vcombine.high %v18727_v30, %v21163_v8 }
 0xdd8   : > { %11240 = vrot.lane.b32.xlu1 %v11235_v58, %s20391_s8  ;;  %11066 = vrot.lane.b32.xlu0 %v18707_v14, %s20564_s19  ;;  %v10258_v58 = vpop.permute.xlu1 %10257 }
 0xdd9   : > { %v18764_v12 = vsel %vm21200_vm0, %v10254_v55, %v10258_v58  ;;  %v10347_v58 = vpop.permute.xlu0 %10346  ;;  %vm20215_vm0 = vcmask 424960  }
 0xdda   : > { %v10267_v55 = vrot.slane %v18764_v12, %v13517_v11 }
 0xddc   : > { %11159 = vrot.lane.b32.xlu1 %v18719_v44, %s20564_s19  ;;  %11244 = vrot.lane.b32.xlu0 %v18723_v53, %s20567_s6  ;;  %v10351_v48 = vpop.permute.xlu1 %10350  ;;  %v18794_v40 = vrot.slane %v10267_v55, %v13550_v57  ;;  %v10275_v54 = vcombine.high %v10267_v55, %v21163_v8 }
 0xddd   : > { %v18797_v13 = vsel %vm21215_vm12, %v10347_v58, %v10351_v48  ;;  %vm20216_vm12 = vcmask 441344  }
 0xdde   : > { %21214 = vst [vmem:[#allocation220_spill] sm:$0xff] %v18794_v40  ;;  %v18815_v48 = vrot.slane %v18797_v13, %v13517_v11  ;;  %v18827_v55 = vrot.slane %v10275_v54, %v13550_v57  ;;  %v10027_v54 = vcombine.high %v18546_v34, %v21163_v8 }
 0xde0   : > { %11337 = vrot.lane.b32.xlu1 %v18740_v3, %s20567_s6  ;;  %11333 = vrot.lane.b32.xlu0 %v11328_v49, %s20391_s8  ;;  %v10647_v49 = vcombine.high %v10639_v33, %v21163_v8  ;;  %v10167_v33 = vcombine.high %v10166_v60, %v21163_v8 }
 0xde2   : > { %v18787_v59 = vrot.slane %v10647_v49, %v13550_v57  ;;  %v18808_v60 = vrot.slane %v10167_v33, %v13517_v11  ;;  %v9907_v49 = vcombine.high %v18522_v21, %v21163_v8  ;;  %v18831_v33 = vrot.slane %v18815_v48, %v13550_v57 }
 0xde4   : > { %11252 = vrot.lane.b32.xlu0 %v18756_v20, %s20564_s19  ;;  %10682 = vrot.lane.b32.xlu1 %v10677_v0, %s20391_s8  ;;  %v18784_v0 = vrot.slane %v10632_v32, %v13517_v11  ;;  %v10305_v32 = vcombine.high %v18794_v40, %v21163_v8  ;;  %v18824_v58 = vrot.slane %v18808_v60, %v13550_v57 }
 0xde5   : > { %21216 = vst [vmem:[#allocation249_spill] sm:$0xff] %v18831_v33  ;;  %v10398_v21 = vcombine.high %v18831_v33, %v21163_v8  ;;  %v9923_v40 = vcombine.high %v18525_v22, %v21163_v8  ;;  %v10011_v33 = vcombine.high %v18543_v46, %v21163_v8  ;;  %v10771_v46 = vcombine.high %v18593_v15, %v21163_v8 }
 0xde6   : > { %v10957_v15 = vcombine.high %v18641_v63, %v21163_v8  ;;  %v10958_v63 = vcombine.high %v18669_v47, %v21163_v8  ;;  %v11143_v47 = vcombine.high %v18689_v56, %v21163_v8  ;;  %v11051_v56 = vcombine.high %v18707_v14, %v21163_v8 }
 0xde7   : > { %v18865_v34 = vrot.slane %v10011_v33, %v13550_v57  ;;  %v18893_v33 = vpop.permute.xlu1 %10443  ;;  %v10662_v14 = vcombine.high %v18784_v0, %v21163_v8 }
 0xde8   : > { %11345 = vrot.lane.b32.xlu0 %v18771_v2, %s20564_s19  ;;  %10217 = vrot.lane.b32.xlu1 %v10212_v6, %s20391_s8  ;;  %v18805_v6 = vrot.slane %v18784_v0, %v13550_v57 }
 0xde9   : > { %v18978_v0 = vrot.slane %v10662_v14, %v13550_v57  ;;  %v10029_v14 = vcombine.high %v18865_v34, %v21163_v8 }
 0xdec   : > { %10686 = vrot.lane.b32.xlu0 %v18787_v59, %s20567_s6  ;;  %10221 = vrot.lane.b32.xlu1 %v18791_v4, %s20567_s6 }
 0xdf0   : > { %10694 = vrot.lane.b32.xlu0 %v18805_v6, %s20564_s19  ;;  %10310 = vrot.lane.b32.xlu1 %v10305_v32, %s20391_s8  ;;  %v18840_v32 = vrot.slane %v9907_v49, %v13550_v57  ;;  %v10104_v49 = vcombine.high %v18578_v51, %v21163_v8  ;;  %v10755_v51 = vcombine.high %v18608_v36, %v21163_v8 }
 0xdf2   : > { %v18862_v22 = vrot.slane %v10104_v49, %v13550_v57  ;;  %v18901_v36 = vrot.slane %v10755_v51, %v13550_v57  ;;  %v10941_v49 = vcombine.high %v18653_v41, %v21163_v8  ;;  %v11127_v51 = vcombine.high %v18703_v18, %v21163_v8 }
 0xdf4   : > { %10229 = vrot.lane.b32.xlu1 %v18824_v58, %s20564_s19  ;;  %10314 = vrot.lane.b32.xlu0 %v18827_v55, %s20567_s6  ;;  %v10955_v41 = vrot.slane %v10941_v49, %v13550_v57  ;;  %v11141_v49 = vrot.slane %v11127_v51, %v13550_v57 }
 0xdf8   : > { %9947 = vrot.lane.b32.xlu0 %v18840_v32, %s21217_s22  ;;  %10403 = vrot.lane.b32.xlu1 %v10398_v21, %s20391_s8  ;;  %v9924_v21 = vcombine.high %v18537_v25, %v21163_v8  ;;  %v10772_v25 = vcombine.high %v18621_v29, %v21163_v8  ;;  %v18891_v29 = vpop.permute.xlu0 %10439 }
 0xdfc   : > { %10039 = vrot.lane.b32.xlu0 %v10027_v54, %s21218_s27  ;;  %9935 = vrot.lane.b32.xlu1 %v9923_v40, %s21218_s27  ;;  %v10864_v40 = vcombine.high %v18625_v39, %v21163_v8  ;;  %v18907_v39 = vpop.permute.xlu0 %10536  ;;  %v10865_v54 = vcombine.high %v18657_v35, %v21163_v8  ;;  %v11050_v35 = vcombine.high %v18673_v61, %v21163_v8 }
 0xdfd   : > { %v11144_v61 = vcombine.high %v18719_v44, %v21163_v8  ;;  %v11236_v44 = vcombine.high %v18723_v53, %v21163_v8  ;;  %v11220_v53 = vcombine.high %v18736_v52, %v21163_v8 }
 0xe00   : > { %10047 = vrot.lane.b32.xlu0 %v10028_v17, %s21219_s30  ;;  %9943 = vrot.lane.b32.xlu1 %v9924_v21, %s21219_s30  ;;  %v10120_v17 = vcombine.high %v18581_v9, %v21163_v8  ;;  %v10848_v9 = vcombine.high %v18638_v26, %v21163_v8  ;;  %v18909_v26 = vpop.permute.xlu1 %10532  ;;  %v11034_v21 = vcombine.high %v18686_v16, %v21163_v8 }
 0xe02   : > { %v18898_v45 = vrot.slane %v10848_v9, %v13550_v57 }
 0xe04   : > { %10144 = vrot.lane.b32.xlu0 %v18862_v22, %s21217_s22  ;;  %10051 = vrot.lane.b32.xlu1 %v18865_v34, %s21217_s22 }
 0xe08   : > { %10783 = vrot.lane.b32.xlu0 %v10771_v46, %s21218_s27  ;;  %10132 = vrot.lane.b32.xlu1 %v10120_v17, %s21218_s27  ;;  %v18921_v46 = vpop.permute.xlu0 %9931  ;;  %v18923_v17 = vpop.permute.xlu1 %9927 }
 0xe09   : > { %21220 = vst [vmem:[#allocation246_spill] sm:$0xff] %v18921_v46  ;;  %21221 = vst [vmem:[#allocation242_spill] sm:$0xff] %v18923_v17 }
 0xe0c   : > { %10791 = vrot.lane.b32.xlu0 %v10772_v25, %s21219_s30  ;;  %10140 = vrot.lane.b32.xlu1 %v10121_v43, %s21219_s30  ;;  %v18932_v25 = vrot.slane %v11034_v21, %v13550_v57  ;;  %v18935_v16 = vpop.permute.xlu0 %9939  ;;  %v18937_v43 = vpop.permute.xlu1 %10035 }
 0xe0d   : > { %21222 = vst [vmem:[#allocation238_spill] sm:$0xff] %v18935_v16  ;;  %21223 = vst [vmem:[#allocation248_spill] sm:$0xff] %v18937_v43 }
 0xe10   : > { %10969 = vrot.lane.b32.xlu0 %v10957_v15, %s21218_s27  ;;  %10876 = vrot.lane.b32.xlu1 %v10864_v40, %s21218_s27  ;;  %v18950_v9 = vpop.permute.xlu0 %10031  ;;  %v18952_v15 = vpop.permute.xlu1 %10043  ;;  %v11329_v40 = vcombine.high %v18740_v3, %v21163_v8 }
 0xe11   : > { %21224 = vst [vmem:[#allocation244_spill] sm:$0xff] %v18950_v9  ;;  %21225 = vst [vmem:[#allocation240_spill] sm:$0xff] %v18952_v15 }
 0xe14   : > { %10888 = vrot.lane.b32.xlu0 %v18898_v45, %s21217_s22  ;;  %10795 = vrot.lane.b32.xlu1 %v18901_v36, %s21217_s22 }
 0xe18   : > { %10977 = vrot.lane.b32.xlu0 %v10958_v63, %s21219_s30  ;;  %10884 = vrot.lane.b32.xlu1 %v10865_v54, %s21219_s30  ;;  %v11330_v54 = vcombine.high %v18771_v2, %v21163_v8  ;;  %v11313_v2 = vcombine.high %v18752_v1, %v21163_v8  ;;  %v10306_v1 = vcombine.high %v18827_v55, %v21163_v8 }
 0xe1c   : > { %11155 = vrot.lane.b32.xlu0 %v11143_v47, %s21218_s27  ;;  %11062 = vrot.lane.b32.xlu1 %v11050_v35, %s21218_s27  ;;  %v11237_v47 = vcombine.high %v18756_v20, %v21163_v8 }
 0xe20   : > { %11074 = vrot.lane.b32.xlu0 %v18932_v25, %s21217_s22  ;;  %10981 = vrot.lane.b32.xlu1 %v10955_v41, %s21217_s22 }
 0xe24   : > { %11163 = vrot.lane.b32.xlu0 %v11144_v61, %s21219_s30  ;;  %11070 = vrot.lane.b32.xlu1 %v11051_v56, %s21219_s30  ;;  %v10213_v61 = vcombine.high %v18791_v4, %v21163_v8  ;;  %v18994_v56 = vrot.slane %v11220_v53, %v13550_v57 }
 0xe26   : > { %v11238_v46 = vcombine.high %v18994_v56, %v21163_v8 }
 0xe28   : > { %11341 = vrot.lane.b32.xlu0 %v11329_v40, %s21218_s27  ;;  %11248 = vrot.lane.b32.xlu1 %v11236_v44, %s21218_s27  ;;  %v11327_v40 = vrot.slane %v11313_v2, %v13550_v57  ;;  %v10679_v2 = vcombine.high %v18805_v6, %v21163_v8 }
 0xe2a   : > { %v18962_v63 = vpop.permute.xlu0 %10128  ;;  %v18964_v18 = vpop.permute.xlu1 %10124  ;;  %v11331_v17 = vcombine.high %v11327_v40, %v21163_v8 }
 0xe2b   : > { %21226 = vst [vmem:[#allocation236_spill] sm:$0xff] %v18962_v63 }
 0xe2c   : > { %11349 = vrot.lane.b32.xlu0 %v11330_v54, %s21219_s30  ;;  %11167 = vrot.lane.b32.xlu1 %v11141_v49, %s21217_s22  ;;  %v10678_v54 = vcombine.high %v18787_v59, %v21163_v8  ;;  %v10260_v59 = vcombine.high %v18764_v12, %v21163_v8 }
 0xe2e   : > { %v18973_v3 = vpop.permute.xlu0 %10136  ;;  %v18975_v21 = vpop.permute.xlu1 %10779  ;;  %v10274_v6 = vrot.slane %v10260_v59, %v13517_v11 }
 0xe2f   : > { %21227 = vst [vmem:[#allocation47_spill] sm:$0xff] %v18973_v3 }
 0xe30   : > { %10702 = vrot.lane.b32.xlu0 %v18978_v0, %s21217_s22  ;;  %11256 = vrot.lane.b32.xlu1 %v11237_v47, %s21219_s30  ;;  %v10773_v47 = vcombine.high %v18901_v36, %v21163_v8  ;;  %v10368_v36 = vcombine.high %v18815_v48, %v21163_v8 }
 0xe32   : > { %v18987_v35 = vpop.permute.xlu0 %10775  ;;  %v18989_v52 = vpop.permute.xlu1 %10868  ;;  %v10382_v48 = vrot.slane %v10368_v36, %v13550_v57 }
 0xe33   : > { %v10802_v37 = vsel %vm1786_vm9, %v18590_v50, %v18987_v35 }
 0xe34   : > { %10225 = vrot.lane.b32.xlu0 %v10213_v61, %s21218_s27  ;;  %11260 = vrot.lane.b32.xlu1 %v18994_v56, %s21217_s22  ;;  %v10399_v36 = vcombine.high %v10382_v48, %v21163_v8  ;;  %v10445_v56 = vsel %vm21232_vm2, %v18891_v29, %v18893_v33  ;;  %v10803_v10 = vsel %vm9955_vm10, %v10802_v37, %v18975_v21  ;;  %vm11407_vm2 = vcmask 719872  }
 0xe36   : > { %v18999_v20 = vpop.permute.xlu0 %10787  ;;  %v19001_v51 = vpop.permute.xlu1 %10872 }
 0xe38   : > { %10318 = vrot.lane.b32.xlu0 %v10306_v1, %s21218_s27  ;;  %11353 = vrot.lane.b32.xlu1 %v11327_v40, %s21217_s22  ;;  %v10959_v1 = vcombine.high %v10955_v41, %v21163_v8  ;;  %v9925_v41 = vcombine.high %v18840_v32, %v21163_v8 }
 0xe3a   : > { %v19008_v4 = vpop.permute.xlu0 %10961  ;;  %v19010_v44 = vpop.permute.xlu1 %10965 }
 0xe3c   : > { %10055 = vrot.lane.b32.xlu0 %v10029_v14, %s21228_s17  ;;  %10690 = vrot.lane.b32.xlu1 %v10678_v54, %s21218_s27  ;;  %v10214_v14 = vcombine.high %v18824_v58, %v21163_v8  ;;  %v10297_v58 = vrot.slane %v10274_v6, %v13550_v57 }
 0xe3e   : > { %v19018_v55 = vpop.permute.xlu0 %10880  ;;  %v19020_v53 = vpop.permute.xlu1 %11054  ;;  %v10307_v29 = vcombine.high %v10297_v58, %v21163_v8 }
 0xe40   : > { %10799 = vrot.lane.b32.xlu0 %v10773_v47, %s21228_s17  ;;  %10698 = vrot.lane.b32.xlu1 %v10679_v2, %s21219_s30  ;;  %v11145_v47 = vcombine.high %v11141_v49, %v21163_v8  ;;  %v10353_v2 = vcombine.high %v18797_v13, %v21163_v8  ;;  %v10122_v49 = vcombine.high %v18862_v22, %v21163_v8 }
 0xe41   : > { %v10866_v13 = vcombine.high %v18898_v45, %v21163_v8  ;;  %v11052_v45 = vcombine.high %v18932_v25, %v21163_v8 }
 0xe42   : > { %v19030_v34 = vpop.permute.xlu0 %11058  ;;  %v19032_v61 = vpop.permute.xlu1 %10973  ;;  %v10367_v32 = vrot.slane %v10353_v2, %v13517_v11 }
 0xe44   : > { %10985 = vrot.lane.b32.xlu0 %v10959_v1, %s21228_s17  ;;  %10233 = vrot.lane.b32.xlu1 %v10214_v14, %s21219_s30  ;;  %v10390_v22 = vrot.slane %v10367_v32, %v13550_v57  ;;  %v10383_v33 = vcombine.high %v10367_v32, %v21163_v8 }
 0xe46   : > { %v19042_v54 = vpop.permute.xlu0 %11147  ;;  %v19044_v12 = vpop.permute.xlu1 %11151 }
 0xe48   : > { %11171 = vrot.lane.b32.xlu0 %v11145_v47, %s21228_s17  ;;  %9951 = vrot.lane.b32.xlu1 %v9925_v41, %s21228_s17  ;;  %v10538_v41 = vsel %vm21229_vm15, %v18909_v26, %v18907_v39  ;;  %v10197_v39 = vcombine.high %v18808_v60, %v21163_v8  ;;  %vm11404_vm15 = vcmask 572416  }
 0xe49   : > { %v10546_v2 = vrot.slane %v10538_v41, %v13517_v11 }
 0xe4a   : > { %v19055_v59 = vpop.permute.xlu0 %11066  ;;  %v19057_v1 = vpop.permute.xlu1 %11240  ;;  %v19107_v15 = vrot.slane %v10197_v39, %v13550_v57  ;;  %v10400_v39 = vcombine.high %v10390_v22, %v21163_v8 }
 0xe4b   : > { %v19089_v26 = vrot.slane %v10546_v2, %v13550_v57 }
 0xe4c   : > { %10322 = vrot.lane.b32.xlu0 %v10297_v58, %s20564_s19  ;;  %10148 = vrot.lane.b32.xlu1 %v10122_v49, %s21228_s17 }
 0xe4d   : > { %21230 = vst [vmem:[#allocation258_spill] sm:$0xff] %v19089_v26  ;;  %v10584_v25 = vcombine.high %v19089_v26, %v21163_v8 }
 0xe4e   : > { %v19064_v14 = vpop.permute.xlu0 %11244  ;;  %v19066_v47 = vpop.permute.xlu1 %11159 }
 0xe50   : > { %10892 = vrot.lane.b32.xlu1 %v10866_v13, %s21228_s17  ;;  %10411 = vrot.lane.b32.xlu0 %v10399_v36, %s21218_s27 }
 0xe52   : > { %v19078_v49 = vpop.permute.xlu0 %11333  ;;  %v19080_v16 = vpop.permute.xlu1 %11337 }
 0xe54   : > { %11078 = vrot.lane.b32.xlu1 %v11052_v45, %s21228_s17  ;;  %10415 = vrot.lane.b32.xlu0 %v10390_v22, %s20564_s19  ;;  %v10539_v22 = vcombine.high %v10538_v41, %v21163_v8 }
 0xe56   : > { %v19091_v13 = vpop.permute.xlu0 %11252  ;;  %v19093_v36 = vpop.permute.xlu1 %10682 }
 0xe57   : > { %v10709_v38 = vsel %vm1786_vm9, %v18745_v7, %v19093_v36 }
 0xe58   : > { %11264 = vrot.lane.b32.xlu1 %v11238_v46, %s21228_s17  ;;  %11357 = vrot.lane.b32.xlu0 %v11331_v17, %s21228_s17  ;;  %v10453_v46 = vrot.slane %v10445_v56, %v13517_v11  ;;  %v10554_v17 = vcombine.high %v10546_v2, %v21163_v8 }
 0xe5a   : > { %v19102_v60 = vpop.permute.xlu0 %11345  ;;  %v19104_v45 = vpop.permute.xlu1 %10217  ;;  %v10568_v2 = vrot.slane %v10554_v17, %v13550_v57 }
 0xe5b   : > { %21231 = vst [vmem:[#allocation65_spill] sm:$0xff] %v19104_v45  ;;  %v19128_v45 = vrot.slane %v10453_v46, %v13550_v57 }
 0xe5c   : > { %10237 = vrot.lane.b32.xlu1 %v19107_v15, %s21217_s22  ;;  %10589 = vrot.lane.b32.xlu0 %v10584_v25, %s20391_s8  ;;  %v10446_v25 = vcombine.high %v10445_v56, %v21163_v8 }
 0xe5d   : > { %21234 = vst [vmem:[#allocation260_spill] sm:$0xff] %v19128_v45  ;;  %v10491_v32 = vcombine.high %v19128_v45, %v21163_v8  ;;  %v10553_v45 = vrot.slane %v10539_v22, %v13517_v11 }
 0xe5e   : > { %v19117_v40 = vpop.permute.xlu0 %10686  ;;  %v19119_v26 = vpop.permute.xlu1 %10221  ;;  %v10460_v58 = vrot.slane %v10446_v25, %v13517_v11 }
 0xe5f   : > { %21233 = vst [vmem:[#allocation255_spill] sm:$0xff] %v19119_v26  ;;  %v10710_v9 = vsel %vm9955_vm10, %v10709_v38, %v19117_v40 }
 0xe60   : > { %10407 = vrot.lane.b32.xlu1 %v10382_v48, %s20567_s6  ;;  %10419 = vrot.lane.b32.xlu0 %v10400_v39, %s21219_s30  ;;  %v10290_v48 = vcombine.high %v10274_v6, %v21163_v8  ;;  %v10397_v39 = vrot.slane %v10383_v33, %v13550_v57  ;;  %v10461_v6 = vcombine.high %v10453_v46, %v21163_v8 }
 0xe61   : > { %v10483_v25 = vrot.slane %v10460_v58, %v13550_v57 }
 0xe62   : > { %v19131_v3 = vpop.permute.xlu0 %10694  ;;  %v19133_v26 = vpop.permute.xlu1 %10310  ;;  %v10475_v33 = vrot.slane %v10461_v6, %v13550_v57 }
 0xe63   : > { %21235 = vst [vmem:[#allocation257_spill] sm:$0xff] %v19133_v26  ;;  %v10493_v11 = vcombine.high %v10483_v25, %v21163_v8 }
 0xe64   : > { %10326 = vrot.lane.b32.xlu1 %v10307_v29, %s21219_s30  ;;  %10593 = vrot.lane.b32.xlu0 %v10568_v2, %s20567_s6  ;;  %v10304_v29 = vrot.slane %v10290_v48, %v13550_v57  ;;  %v10576_v48 = vrot.slane %v10553_v45, %v13550_v57 }
 0xe66   : > { %v19142_v56 = vpop.permute.xlu0 %10314  ;;  %v19144_v17 = vpop.permute.xlu1 %10229  ;;  %v10586_v6 = vcombine.high %v10576_v48, %v21163_v8 }
 0xe67   : > { %21236 = vst [vmem:[#allocation67_spill] sm:$0xff] %v19142_v56  ;;  %21237 = vst [vmem:[#allocation251_spill] sm:$0xff] %v19144_v17  ;;  %v10585_v56 = vcombine.high %v10568_v2, %v21163_v8  ;;  %v10569_v2 = vcombine.high %v10553_v45, %v21163_v8  ;;  %v10476_v45 = vcombine.high %v10460_v58, %v21163_v8 }
 0xe68   : > { %10496 = vrot.lane.b32.xlu1 %v10491_v32, %s20391_s8  ;;  %10423 = vrot.lane.b32.xlu0 %v10397_v39, %s21217_s22  ;;  %s21250_s8 = smov 18  }
 0xe6a   : > { %v19153_v26 = vpop.permute.xlu0 %9947  ;;  %v19155_v41 = vpop.permute.xlu1 %10403 }
 0xe6b   : > { %21238 = vst [vmem:[#allocation206_spill] sm:$0xff] %v19153_v26  ;;  %21239 = vst [vmem:[#allocation216_spill] sm:$0xff] %v19155_v41  ;;  %v10492_v26 = vcombine.high %v10475_v33, %v21163_v8  ;;  %v10215_v41 = vcombine.high %v19107_v15, %v21163_v8 }
 0xe6c   : > { %10597 = vrot.lane.b32.xlu0 %v10585_v56, %s21218_s27  ;;  %10330 = vrot.lane.b32.xlu1 %v10304_v29, %s21217_s22 }
 0xe6e   : > { %v19162_v32 = vpop.permute.xlu0 %10039  ;;  %v19164_v46 = vpop.permute.xlu1 %9935 }
 0xe6f   : > { %21240 = vst [vmem:[#allocation212_spill] sm:$0xff] %v19162_v32  ;;  %21241 = vst [vmem:[#allocation208_spill] sm:$0xff] %v19164_v46 }
 0xe70   : > { %10512 = vrot.lane.b32.xlu0 %v10493_v11, %s21219_s30  ;;  %10500 = vrot.lane.b32.xlu1 %v10475_v33, %s20567_s6  ;;  %v19183_v11 = vrot.slane %v10569_v2, %v13550_v57  ;;  %s21251_s6 = smov 54  }
 0xe72   : > { %v19170_v22 = vpop.permute.xlu0 %10047  ;;  %v19172_v56 = vpop.permute.xlu1 %9943 }
 0xe73   : > { %21242 = vst [vmem:[#allocation204_spill] sm:$0xff] %v19170_v22  ;;  %21243 = vst [vmem:[#allocation269_spill] sm:$0xff] %v19172_v56 }
 0xe74   : > { %10605 = vrot.lane.b32.xlu0 %v10586_v6, %s21219_s30  ;;  %10504 = vrot.lane.b32.xlu1 %v10492_v26, %s21218_s27  ;;  %v10680_v26 = vcombine.high %v18978_v0, %v21163_v8  ;;  %v10308_v0 = vcombine.high %v10304_v29, %v21163_v8 }
 0xe76   : > { %v19178_v46 = vpop.permute.xlu0 %10144  ;;  %v19180_v17 = vpop.permute.xlu1 %10051 }
 0xe77   : > { %21244 = vst [vmem:[#allocation266_spill] sm:$0xff] %v19178_v46  ;;  %21245 = vst [vmem:[#allocation179_spill] sm:$0xff] %v19180_v17  ;;  %v10401_v17 = vcombine.high %v10397_v39, %v21163_v8 }
 0xe78   : > { %10609 = vrot.lane.b32.xlu0 %v19183_v11, %s21217_s22  ;;  %10508 = vrot.lane.b32.xlu1 %v10483_v25, %s20564_s19  ;;  %v10490_v25 = vrot.slane %v10476_v45, %v13550_v57 }
 0xe7a   : > { %v10784_v56 = vpop.permute.xlu0 %10783  ;;  %v19189_v33 = vpop.permute.xlu1 %10132 }
 0xe7b   : > { %21246 = vst [vmem:[#allocation177_spill] sm:$0xff] %v19189_v33 }
 0xe7c   : > { %10706 = vrot.lane.b32.xlu0 %v10680_v26, %s21228_s17  ;;  %10601 = vrot.lane.b32.xlu1 %v10576_v48, %s20564_s19  ;;  %s12042_s19 = smul.u32 96, %s21330_s3 }
 0xe7e   : > { %v10792_v6 = vpop.permute.xlu0 %10791  ;;  %v19195_v2 = vpop.permute.xlu1 %10140  ;;  %s19599_s29 = scalar_lea.vmem %s21332_s7, %s12042_s19 }
 0xe7f   : > { %21247 = vst [vmem:[#allocation33_spill] sm:$0xff] %v19195_v2 }
 0xe80   : > { %10241 = vrot.lane.b32.xlu0 %v10215_v41, %s21228_s17  ;;  %10516 = vrot.lane.b32.xlu1 %v10490_v25, %s21217_s22  ;;  %v10494_v41 = vcombine.high %v10490_v25, %v21163_v8 }
 0xe82   : > { %v19202_v58 = vpop.permute.xlu0 %10969  ;;  %v10877_v46 = vpop.permute.xlu1 %10876 }
 0xe84   : > { %10334 = vrot.lane.b32.xlu1 %v10308_v0, %s21228_s17 }
 0xe86   : > { %v19206_v48 = vpop.permute.xlu0 %10888  ;;  %v10796_v26 = vpop.permute.xlu1 %10795 }
 0xe88   : > { %10427 = vrot.lane.b32.xlu1 %v10401_v17, %s21228_s17 }
 0xe8a   : > { %v19210_v15 = vpop.permute.xlu0 %10977  ;;  %v10885_v57 = vpop.permute.xlu1 %10884 }
 0xe8c   : > { %10520 = vrot.lane.b32.xlu1 %v10494_v41, %s21228_s17 }
 0xe8e   : > { %v19214_v45 = vpop.permute.xlu0 %11155  ;;  %v11063_v22 = vpop.permute.xlu1 %11062 }
 0xe92   : > { %v19216_v29 = vpop.permute.xlu0 %11074  ;;  %v19218_v0 = vpop.permute.xlu1 %10981 }
 0xe96   : > { %v19220_v2 = vpop.permute.xlu0 %11163  ;;  %v11071_v27 = vpop.permute.xlu1 %11070 }
 0xe9a   : > { %v19222_v39 = vpop.permute.xlu0 %11341  ;;  %v19224_v17 = vpop.permute.xlu1 %11248 }
 0xe9e   : > { %v19226_v32 = vpop.permute.xlu0 %11349  ;;  %v19228_v43 = vpop.permute.xlu1 %11167 }
 0xea2   : > { %v10703_v25 = vpop.permute.xlu0 %10702  ;;  %v19230_v41 = vpop.permute.xlu1 %11256 }
 0xea6   : > { %v19232_v33 = vpop.permute.xlu0 %10225  ;;  %v19234_v63 = vpop.permute.xlu1 %11260 }
 0xea7   : > { %21248 = vst [vmem:[#allocation46_spill] sm:$0xff] %v19232_v33  ;;  %v10804_v33 = vsel %vm9957_vm14, %v10803_v10, %v10784_v56 }
 0xeaa   : > { %v19239_v28 = vpop.permute.xlu0 %10318  ;;  %v19241_v23 = vpop.permute.xlu1 %11353 }
 0xeab   : > { %21249 = vst [vmem:[#allocation173_spill] sm:$0xff] %v19239_v28  ;;  %v10805_v28 = vsel %vm9959_vm4, %v10804_v33, %v18999_v20 }
 0xeac   : > { %v10806_v37 = vsel %vm9645_vm1, %v10805_v28, %v10792_v6  ;;  %v10895_v28 = vsel %vm1786_vm9, %v18596_v31, %v18989_v52 }
 0xead   : > { %v10807_v21 = vsel %vm9962_vm6, %v10806_v37, %v10796_v26 }
 0xeae   : > { %v19251_v42 = vpop.permute.xlu0 %10055  ;;  %v10691_v50 = vpop.permute.xlu1 %10690 }
 0xeaf   : > { %v10711_v35 = vsel %vm9957_vm14, %v10710_v9, %v10691_v50  ;;  %v11081_v50 = vsel %vm1786_vm9, %v18646_v62, %v19020_v53  ;;  %v11174_v62 = vsel %vm1786_vm9, %v18677_v5, %v19042_v54 }
 0xeb0   : > { %v10712_v10 = vsel %vm9959_vm4, %v10711_v35, %v19131_v3  ;;  %v10896_v3 = vsel %vm9955_vm10, %v10895_v28, %v19001_v51  ;;  %v11082_v35 = vsel %vm9955_vm10, %v11081_v50, %v19030_v34  ;;  %v11175_v54 = vsel %vm9955_vm10, %v11174_v62, %v19044_v12  ;;  %v21257_v50 = vld [vmem:[#allocation194_spill] sm:$0xff]  ;;  %v21261_v62 = vld [vmem:[#allocation248_spill] sm:$0xff] }
 0xeb1   : > { %v10897_v26 = vsel %vm9957_vm14, %v10896_v3, %v10877_v46  ;;  %v11083_v37 = vsel %vm9957_vm14, %v11082_v35, %v11063_v22  ;;  %v21253_v3 = vld [vmem:[#allocation244_spill] sm:$0xff] }
 0xeb2   : > { %v10800_v7 = vpop.permute.xlu0 %10799  ;;  %v10699_v38 = vpop.permute.xlu1 %10698  ;;  %v10898_v31 = vsel %vm9959_vm4, %v10897_v26, %v19018_v55  ;;  %v11084_v55 = vsel %vm9959_vm4, %v11083_v37, %v19055_v59  ;;  %v21256_v26 = vld [vmem:[#allocation196_spill] sm:$0xff]  ;;  %v21260_v37 = vld [vmem:[#allocation177_spill] sm:$0xff] }
 0xeb3   : > { %v10808_v36 = vsel %vm9964_vm3, %v10807_v21, %v10800_v7  ;;  %v10713_v40 = vsel %vm9645_vm1, %v10712_v10, %v10699_v38  ;;  %v10899_v46 = vsel %vm9645_vm1, %v10898_v31, %v10885_v57  ;;  %v11085_v22 = vsel %vm9645_vm1, %v11084_v55, %v11071_v27  ;;  %v21258_v35 = vld [vmem:[#allocation192_spill] sm:$0xff] }
 0xeb4   : > { %11420 = vrot.lane.b32.xlu0 %v10808_v36, %s21250_s8  ;;  %v19264_v9 = vsel %vm9962_vm6, %v10713_v40, %v10703_v25  ;;  %v10988_v25 = vsel %vm1786_vm9, %v18629_v19, %v19008_v4  ;;  %v10900_v34 = vsel %vm9962_vm6, %v10899_v46, %v19206_v48  ;;  %v11360_v48 = vsel %vm1786_vm9, %v18727_v30, %v19078_v49  ;;  %v21262_v55 = vld [vmem:[#allocation212_spill] sm:$0xff] }
 0xeb5   : > { %v10989_v19 = vsel %vm9955_vm10, %v10988_v25, %v19010_v44  ;;  %v11267_v44 = vsel %vm1786_vm9, %v18694_v24, %v19057_v1  ;;  %v11176_v24 = vsel %vm9957_vm14, %v11175_v54, %v19214_v45  ;;  %v10587_v40 = vcombine.high %v19183_v11, %v21163_v8  ;;  %v21259_v11 = vld [vmem:[#allocation236_spill] sm:$0xff]  ;;  %v21266_v54 = vld [vmem:[#allocation218_spill] sm:$0xff] }
 0xeb6   : > { %v10986_v20 = vpop.permute.xlu0 %10985  ;;  %v19266_v56 = vpop.permute.xlu1 %10233  ;;  %v10990_v4 = vsel %vm9957_vm14, %v10989_v19, %v19202_v58  ;;  %v11268_v59 = vsel %vm9955_vm10, %v11267_v44, %v19064_v14  ;;  %v11177_v45 = vsel %vm9959_vm4, %v11176_v24, %v19066_v47  ;;  %v1904_v8 = vadd.f32 %v21258_v35, %v21257_v50  ;;  %v21264_v44 = vld [vmem:[#allocation188_spill] sm:$0xff] }
 0xeb7   : > { %v10991_v58 = vsel %vm9959_vm4, %v10990_v4, %v19032_v61  ;;  %v11269_v12 = vsel %vm9957_vm14, %v11268_v59, %v19224_v17  ;;  %v11086_v61 = vsel %vm9962_vm6, %v11085_v22, %v19216_v29  ;;  %v11178_v29 = vsel %vm9645_vm1, %v11177_v45, %v19220_v2  ;;  %v21271_v45 = vld [vmem:[#allocation204_spill] sm:$0xff] }
 0xeb8   : > { %v10992_v27 = vsel %vm9645_vm1, %v10991_v58, %v19210_v15  ;;  %v11361_v15 = vsel %vm9955_vm10, %v11360_v48, %v19080_v16  ;;  %v11270_v17 = vsel %vm9959_vm4, %v11269_v12, %v19091_v13  ;;  %v11179_v16 = vsel %vm9962_vm6, %v11178_v29, %v19228_v43  ;;  %v21267_v58 = vld [vmem:[#allocation47_spill] sm:$0xff]  ;;  %v21278_v35 = vld [vmem:[#allocation216_spill] sm:$0xff] }
 0xeb9   : > { %v10993_v1 = vsel %vm9962_vm6, %v10992_v27, %v19218_v0  ;;  %v11362_v0 = vsel %vm9957_vm14, %v11361_v15, %v19222_v39  ;;  %v11271_v7 = vsel %vm9645_vm1, %v11270_v17, %v19230_v41  ;;  %v21268_v27 = vld [vmem:[#allocation258_spill] sm:$0xff]  ;;  %v21272_v29 = vld [vmem:[#allocation179_spill] sm:$0xff] }
 0xeba   : > { %v11172_v33 = vpop.permute.xlu0 %11171  ;;  %v19273_v6 = vpop.permute.xlu1 %9951  ;;  %v10994_v30 = vsel %vm9964_vm3, %v10993_v1, %v10986_v20  ;;  %v11272_v47 = vsel %vm9962_vm6, %v11271_v7, %v19234_v63  ;;  %v11363_v2 = vsel %vm9959_vm4, %v11362_v0, %v19102_v60  ;;  %v21252_v20 = vld [vmem:[#allocation226_spill] sm:$0xff] }
 0xebb   : > { %v11180_v38 = vsel %vm9964_vm3, %v11179_v16, %v11172_v33  ;;  %v11364_v39 = vsel %vm9645_vm1, %v11363_v2, %v19226_v32  ;;  %v10151_v28 = vsel %vm1786_vm9, %v21252_v20, %v18964_v18  ;;  %v21254_v32 = vld [vmem:[#allocation210_spill] sm:$0xff] }
 0xebc   : > { %v11365_v43 = vsel %vm9962_vm6, %v11364_v39, %v19241_v23  ;;  %v10058_v33 = vsel %vm1786_vm9, %v21254_v32, %v21253_v3  ;;  %v21255_v23 = vld [vmem:[#allocation198_spill] sm:$0xff]  ;;  %v10152_v31 = vsel %vm9955_vm10, %v10151_v28, %v21259_v11  ;;  %v21274_v3 = vld [vmem:[#allocation65_spill] sm:$0xff]  ;;  %v21275_v32 = vld [vmem:[#allocation224_spill] sm:$0xff] }
 0xebd   : > { %v1905_v25 = vadd.f32 %v21256_v26, %v21255_v23  ;;  %v10153_v19 = vsel %vm9957_vm14, %v10152_v31, %v21260_v37  ;;  %v10059_v4 = vsel %vm9955_vm10, %v10058_v33, %v21261_v62  ;;  %v21273_v7 = vld [vmem:[#allocation266_spill] sm:$0xff]  ;;  %v21276_v33 = vld [vmem:[#allocation255_spill] sm:$0xff] }
 0xebe   : > { %v19286_v52 = vpop.permute.xlu0 %10322  ;;  %v19288_v51 = vpop.permute.xlu1 %10148  ;;  %v10154_v48 = vsel %vm9959_vm4, %v10153_v19, %v21267_v58  ;;  %v21277_v23 = vld [vmem:[#allocation46_spill] sm:$0xff]  ;;  %v21280_v19 = vld [vmem:[#allocation251_spill] sm:$0xff] }
 0xec2   : > { %v19301_v53 = vpop.permute.xlu0 %10411  ;;  %v10893_v57 = vpop.permute.xlu1 %10892 }
 0xec3   : > { %v10901_v5 = vsel %vm9964_vm3, %v10900_v34, %v10893_v57  ;;  %v10060_v34 = vsel %vm9957_vm14, %v10059_v4, %v21262_v55  ;;  %v21263_v57 = vld [vmem:[#allocation190_spill] sm:$0xff] }
 0xec4   : > { %11424 = vrot.lane.b32.xlu0 %v10901_v5, %s20537_s20  ;;  %v1907_v22 = vadd.f32 %v21264_v44, %v21263_v57  ;;  %v21265_v5 = vld [vmem:[#allocation200_spill] sm:$0xff] }
 0xec5   : > { %v1906_v59 = vadd.f32 %v21266_v54, %v21265_v5  ;;  %v21282_v57 = vld [vmem:[#allocation220_spill] sm:$0xff] }
 0xec6   : > { %v19328_v14 = vpop.permute.xlu0 %10415  ;;  %v11079_v21 = vpop.permute.xlu1 %11078 }
 0xec7   : > { %v11087_v49 = vsel %vm9964_vm3, %v11086_v61, %v11079_v21  ;;  %v21269_v61 = vld [vmem:[#allocation33_spill] sm:$0xff] }
 0xec8   : > { %11428 = vrot.lane.b32.xlu0 %v10994_v30, %s21251_s6  ;;  %11432 = vrot.lane.b32.xlu1 %v11087_v49, %s20298_s18  ;;  %v10155_v21 = vsel %vm9645_vm1, %v10154_v48, %v21269_v61  ;;  %v21270_v49 = vld [vmem:[#allocation240_spill] sm:$0xff] }
 0xec9   : > { %v10061_v15 = vsel %vm9959_vm4, %v10060_v34, %v21270_v49  ;;  %v10156_v16 = vsel %vm9962_vm6, %v10155_v21, %v21273_v7  ;;  %v21281_v34 = vld [vmem:[#allocation257_spill] sm:$0xff]  ;;  %v21285_v49 = vld [vmem:[#allocation260_spill] sm:$0xff] }
 0xeca   : > { %v11358_v13 = vpop.permute.xlu0 %11357  ;;  %v11265_v10 = vpop.permute.xlu1 %11264  ;;  %v10062_v17 = vsel %vm9645_vm1, %v10061_v15, %v21271_v45  ;;  %v10337_v44 = vsel %vm1786_vm9, %v21282_v57, %v21281_v34 }
 0xecb   : > { %v11273_v36 = vsel %vm9964_vm3, %v11272_v47, %v11265_v10  ;;  %v11366_v60 = vsel %vm9964_vm3, %v11365_v43, %v11358_v13  ;;  %v10063_v0 = vsel %vm9962_vm6, %v10062_v17, %v21272_v29 }
 0xecc   : > { %11436 = vrot.lane.b32.xlu0 %v11180_v38, %s20252_s26  ;;  %11440 = vrot.lane.b32.xlu1 %v11273_v36, %s20249_s15  ;;  %v10064_v10 = vsel %vm9964_vm3, %v10063_v0, %v19251_v42  ;;  %v10157_v38 = vsel %vm9964_vm3, %v10156_v16, %v19288_v51  ;;  %v10244_v42 = vsel %vm1786_vm9, %v21275_v32, %v21274_v3 }
 0xecd   : > { %v10245_v51 = vsel %vm9955_vm10, %v10244_v42, %v21276_v33 }
 0xece   : > { %v10590_v63 = vpop.permute.xlu0 %10589  ;;  %v10238_v41 = vpop.permute.xlu1 %10237  ;;  %v10246_v26 = vsel %vm9957_vm14, %v10245_v51, %v21277_v23 }
 0xecf   : > { %v10616_v24 = vsel %vm1786_vm9, %v21268_v27, %v10590_v63  ;;  %v10247_v62 = vsel %vm9959_vm4, %v10246_v26, %v21280_v19 }
 0xed0   : > { %10613 = vrot.lane.b32.xlu0 %v10587_v40, %s21228_s17  ;;  %11444 = vrot.lane.b32.xlu1 %v11366_v60, %s21190_s28 }
 0xed2   : > { %v19379_v18 = vpop.permute.xlu0 %10419  ;;  %v10408_v46 = vpop.permute.xlu1 %10407 }
 0xed4   : > { %11472 = vperm.xlu0 %12123, %v1904_v8   ;;  %11477 = vperm.xlu1 %12124, %v1905_v25   ;;  %v21279_v8 = vld [vmem:[#allocation249_spill] sm:$0xff] }
 0xed5   : > { %v10430_v11 = vsel %vm1786_vm9, %v21279_v8, %v21278_v35 }
 0xed6   : > { %v10594_v12 = vpop.permute.xlu0 %10593  ;;  %v10327_v1 = vpop.permute.xlu1 %10326  ;;  %v10431_v4 = vsel %vm9955_vm10, %v10430_v11, %v10408_v46  ;;  %v21284_v46 = vld [vmem:[#allocation173_spill] sm:$0xff] }
 0xed7   : > { %v10617_v30 = vsel %vm9955_vm10, %v10616_v24, %v10594_v12  ;;  %v10432_v24 = vsel %vm9957_vm14, %v10431_v4, %v19301_v53 }
 0xed8   : > { %11482 = vperm.xlu0 %12123, %v1906_v59   ;;  %11487 = vperm.xlu1 %12124, %v1907_v22   ;;  %v10248_v22 = vsel %vm9645_vm1, %v10247_v62, %v19266_v56 }
 0xed9   : > { %v10249_v59 = vsel %vm9962_vm6, %v10248_v22, %v10238_v41  ;;  %v10433_v41 = vsel %vm9959_vm4, %v10432_v24, %v19328_v14 }
 0xeda   : > { %v10424_v47 = vpop.permute.xlu0 %10423  ;;  %v10497_v13 = vpop.permute.xlu1 %10496 }
 0xedb   : > { %v10523_v15 = vsel %vm1786_vm9, %v21285_v49, %v10497_v13 }
 0xedc   : > { %11368 = vrot.lane.b32.xlu0 %v10064_v10, %s21250_s8  ;;  %11372 = vrot.lane.b32.xlu1 %v10157_v38, %s20537_s20  ;;  %s21319_s20 = smov 19  }
 0xede   : > { %v10598_v36 = vpop.permute.xlu0 %10597  ;;  %v10331_v2 = vpop.permute.xlu1 %10330 }
 0xedf   : > { %v10618_v39 = vsel %vm9957_vm14, %v10617_v30, %v10598_v36 }
 0xee2   : > { %v10513_v43 = vpop.permute.xlu0 %10512  ;;  %v10501_v63 = vpop.permute.xlu1 %10500 }
 0xee3   : > { %v10524_v45 = vsel %vm9955_vm10, %v10523_v15, %v10501_v63 }
 0xee6   : > { %v10606_v40 = vpop.permute.xlu0 %10605  ;;  %v10505_v20 = vpop.permute.xlu1 %10504 }
 0xeea   : > { %v10610_v28 = vpop.permute.xlu0 %10609  ;;  %v10509_v60 = vpop.permute.xlu1 %10508 }
 0xeee   : > { %v10707_v25 = vpop.permute.xlu0 %10706  ;;  %v10602_v50 = vpop.permute.xlu1 %10601 }
 0xeef   : > { %v10715_v31 = vsel %vm9964_vm3, %v19264_v9, %v10707_v25  ;;  %v10619_v37 = vsel %vm9959_vm4, %v10618_v39, %v10602_v50  ;;  %v21283_v9 = vld [vmem:[#allocation67_spill] sm:$0xff] }
 0xef0   : > { %v10620_v55 = vsel %vm9645_vm1, %v10619_v37, %v10606_v40  ;;  %v10338_v54 = vsel %vm9955_vm10, %v10337_v44, %v21283_v9  ;;  %v11447_v38 = vsel %vm21286_vm5, %v10715_v31, 0.0  ;;  %vm11411_vm5 = vcmask 867328  }
 0xef1   : > { %v19436_v5 = vsel %vm9962_vm6, %v10620_v55, %v10610_v28  ;;  %v10339_v27 = vsel %vm9957_vm14, %v10338_v54, %v21284_v46 }
 0xef2   : > { %v10242_v58 = vpop.permute.xlu0 %10241  ;;  %v10517_v48 = vpop.permute.xlu1 %10516  ;;  %v10340_v56 = vsel %vm9959_vm4, %v10339_v27, %v19286_v52  ;;  %v10434_v52 = vsel %vm9645_vm1, %v10433_v41, %v19379_v18 }
 0xef3   : > { %v10250_v12 = vsel %vm9964_vm3, %v10249_v59, %v10242_v58  ;;  %v10341_v61 = vsel %vm9645_vm1, %v10340_v56, %v10327_v1  ;;  %v10525_v1 = vsel %vm9957_vm14, %v10524_v45, %v10505_v20  ;;  %v10435_v17 = vsel %vm9962_vm6, %v10434_v52, %v10424_v47  ;;  %v21292_v59 = vld [vmem:[#allocation242_spill] sm:$0xff] }
 0xef4   : > { %11376 = vrot.lane.b32.xlu0 %v10250_v12, %s21251_s6  ;;  %v10342_v21 = vsel %vm9962_vm6, %v10341_v61, %v10331_v2  ;;  %v10526_v14 = vsel %vm9959_vm4, %v10525_v1, %v10509_v60  ;;  %v21293_v58 = vld [vmem:[#allocation214_spill] sm:$0xff] }
 0xef5   : > { %v10527_v7 = vsel %vm9645_vm1, %v10526_v14, %v10513_v43  ;;  %v21295_v61 = vld [vmem:[#allocation246_spill] sm:$0xff] }
 0xef6   : > { %v10335_v30 = vpop.permute.xlu1 %10334  ;;  %v10528_v16 = vsel %vm9962_vm6, %v10527_v7, %v10517_v48  ;;  %v9954_v48 = vsel %vm1786_vm9, %v21293_v58, %v21292_v59  ;;  %v21297_v52 = vld [vmem:[#allocation238_spill] sm:$0xff]  ;;  %vm21300_vm9 = vcmask 130048  }
 0xef7   : > { %v10343_v53 = vsel %vm9964_vm3, %v10342_v21, %v10335_v30  ;;  %v9956_v41 = vsel %vm9955_vm10, %v9954_v48, %v21295_v61  ;;  %v21296_v21 = vld [vmem:[#allocation208_spill] sm:$0xff]  ;;  %vm21302_vm10 = vcmask 424960  }
 0xef8   : > { %11380 = vrot.lane.b32.xlu1 %v10343_v53, %s20298_s18  ;;  %s21287_s18 = sld [smem:[#allocation5_spill]]  ;;  %v9958_v30 = vsel %vm9957_vm14, %v9956_v41, %v21296_v21  ;;  %vm21303_vm14 = vcmask 441344  }
 0xef9   : > { %v9960_v1 = vsel %vm9959_vm4, %v9958_v30, %v21297_v52  ;;  %vm21304_vm4 = vcmask 736256  }
 0xefa   : > { %v10428_v29 = vpop.permute.xlu1 %10427 }
 0xefb   : > { %v10436_v0 = vsel %vm9964_vm3, %v10435_v17, %v10428_v29  ;;  %v21298_v29 = vld [vmem:[#allocation269_spill] sm:$0xff] }
 0xefc   : > { %11384 = vrot.lane.b32.xlu0 %v10436_v0, %s20252_s26  ;;  %s21294_s26 = smov 109   ;;  %v9961_v0 = vsel %vm9645_vm1, %v9960_v1, %v21298_v29  ;;  %vm21301_vm1 = vcmask 293888  }
 0xefe   : > { %v10521_v13 = vpop.permute.xlu1 %10520  ;;  %v11586_v3 = vld [vmem:[%s21287_s18] sm:$0xff]  ;;  %v11587_v50 = vld [vmem:[%s21287_s18 + $0x8] ss:$12 sps:$4 sm:$0xff]   ;;  %v11588_v8 = vld [vmem:[%s21287_s18 + $0xc] sm:$0xff] }
 0xeff   : > { %v10529_v10 = vsel %vm9964_vm3, %v10528_v16, %v10521_v13  ;;  %v11594_v26 = vunpack.c.l.bf16 %v11586_v3  ;;  %v11595_v25 = vunpack.c.h.bf16 %v11586_v3  ;;  %v11596_v4 = vunpack.c.l.bf16 %v11587_v50  ;;  %v11590_v22 = vld [vmem:[%s21287_s18 + $0x18] sm:$0xff]  ;;  %v11591_v9 = vld [vmem:[%s21287_s18 + $0x20] ss:$12 sps:$4 sm:$0xff]   ;;  %v11592_v54 = vld [vmem:[%s21287_s18 + $0x24] sm:$0xff] }
 0xf00   : > { %11388 = vrot.lane.b32.xlu1 %v10529_v10, %s20249_s15  ;;  %s21291_s15 = smov 16   ;;  %v11597_v34 = vunpack.c.l.bf16 %v11588_v8  ;;  %v11598_v57 = vunpack.c.h.bf16 %v11588_v8  ;;  %v11599_v44 = vunpack.c.h.bf16 %v11587_v50  ;;  %v11600_v46 = vunpack.c.l.bf16 %v11590_v22  ;;  %v21299_v16 = vld [vmem:[#allocation206_spill] sm:$0xff] }
 0xf01   : > { %v12125_v55 = vpack.i.bf16 %v11595_v25, %v11594_v26  ;;  %v11602_v12 = vunpack.c.l.bf16 %v11591_v9  ;;  %v11603_v56 = vunpack.c.l.bf16 %v11592_v54  ;;  %v11604_v53 = vunpack.c.h.bf16 %v11592_v54 }
 0xf02   : > { %v12130_v27 = vpack.i.bf16 %v11597_v34, %v11596_v4  ;;  %v12135_v24 = vpack.i.bf16 %v11599_v44, %v11598_v57  ;;  %v11605_v45 = vunpack.c.h.bf16 %v11591_v9  ;;  %v9963_v13 = vsel %vm9962_vm6, %v9961_v0, %v21299_v16 }
 0xf03   : > { %v12145_v15 = vpack.i.bf16 %v11603_v56, %v11602_v12 }
 0xf04   : > { %v12150_v7 = vpack.i.bf16 %v11605_v45, %v11604_v53 }
 0xf26   : > { %v11421_v18 = vpop.permute.xlu0 %11420 }
 0xf27   : > { %v11448_v47 = vsel %vm9786_vm13, %v11447_v38, %v11421_v18  ;;  %v9965_v38 = vsel %vm9964_vm3, %v9963_v13, %v19273_v6 }
 0xf28   : > { %v11449_v36 = vsel %vm11397_vm7, %v11448_v47, 0.0  ;;  %v11395_v47 = vsel %vm21300_vm9, %v9965_v38, 0.0 }
 0xf36   : > { %v11425_v2 = vpop.permute.xlu0 %11424 }
 0xf37   : > { %v11450_v39 = vsel %vm20214_vm8, %v11449_v36, %v11425_v2  ;;  %vm21288_vm8 = vcmask 736256  }
 0xf38   : > { %v11451_v43 = vsel %vm20215_vm0, %v11450_v39, 0.0  ;;  %vm11414_vm0 = vcmask 1014784  }
 0xf3a   : > { %v11429_v63 = vpop.permute.xlu0 %11428  ;;  %v11433_v40 = vpop.permute.xlu1 %11432 }
 0xf3b   : > { %v11452_v20 = vsel %vm20216_vm12, %v11451_v43, %v11429_v63  ;;  %vm21289_vm12 = vcmask 883712  }
 0xf3c   : > { %v11453_v28 = vsel %vm11404_vm15, %v11452_v20, 0.0 }
 0xf3d   : > { %v11454_v60 = vsel %vm9721_vm11, %v11453_v28, %v11433_v40 }
 0xf3e   : > { %v11455_v32 = vsel %vm11407_vm2, %v11454_v60, 0.0  ;;  %v11437_v42 = vpop.permute.xlu0 %11436  ;;  %v11441_v33 = vpop.permute.xlu1 %11440 }
 0xf3f   : > { %v11456_v51 = vsel %vm21288_vm8, %v11455_v32, %v11437_v42  ;;  %vm21290_vm8 = vcmask 1031168  }
 0xf40   : > { %v11457_v23 = vsel %vm11411_vm5, %v11456_v51, 0.0  ;;  %vm21306_vm6 = vmmov %vm21290_vm8 }
 0xf41   : > { %v11458_v35 = vsel %vm21289_vm12, %v11457_v23, %v11441_v33 }
 0xf42   : > { %v11459_v11 = vsel %vm11414_vm0, %v11458_v35, 0.0  ;;  %v10614_v31 = vpop.permute.xlu0 %10613  ;;  %v11445_v37 = vpop.permute.xlu1 %11444 }
 0xf43   : > { %v10622_v19 = vsel %vm9964_vm3, %v19436_v5, %v10614_v31  ;;  %v11460_v62 = vsel %vm21290_vm8, %v11459_v11, %v11445_v37  ;;  %v11601_v5 = vunpack.c.h.bf16 %v11590_v22  ;;  %v21307_v31 = vld [vmem:[#allocation8_spill] sm:$0xff] }
 0xf44   : > { %11392 = vrot.lane.b32.xlu0 %v10622_v19, %s21190_s28  ;;  %11462 = vrot.lane.b32.xlu1 %v11460_v62, %s21291_s15 }
 0xf45   : > { %v12140_v49 = vpack.i.bf16 %v11601_v5, %v11600_v46 }
 0xf48   : > { %11464 = vrot.lane.b32.xlu0 %v11445_v37, %s21291_s15  ;;  %12126 = vrot.lane.b32.xlu1 %v12125_v55, %s21294_s26 }
 0xf4c   : > { %12131 = vrot.lane.b32.xlu0 %v12130_v27, %s21294_s26  ;;  %12136 = vrot.lane.b32.xlu1 %v12135_v24, %s21294_s26 }
 0xf4f   : > { %v11473_v17 = vpop.permute.xlu0 %11472  ;;  %v11478_v14 = vpop.permute.xlu1 %11477 }
 0xf50   : > { %12141 = vrot.lane.b32.xlu0 %v12140_v49, %s21294_s26  ;;  %12146 = vrot.lane.b32.xlu1 %v12145_v15, %s21294_s26 }
 0xf53   : > { %v11483_v10 = vpop.permute.xlu0 %11482  ;;  %v11488_v18 = vpop.permute.xlu1 %11487 }
 0xf54   : > { %12151 = vrot.lane.b32.xlu0 %v12150_v7, %s21294_s26 }
 0xf57   : > { %v11369_v36 = vpop.permute.xlu0 %11368  ;;  %v11373_v43 = vpop.permute.xlu1 %11372 }
 0xf58   : > { %v11396_v2 = vsel %vm9786_vm13, %v11395_v47, %v11369_v36  ;;  %vm21305_vm13 = vmmov %vm21289_vm12 }
 0xf59   : > { %v11398_v39 = vsel %vm11397_vm7, %v11396_v2, 0.0  ;;  %vm21309_vm7 = vmmov %vm21300_vm9 }
 0xf5a   : > { %v11399_v63 = vsel %vm21301_vm1, %v11398_v39, %v11373_v43  ;;  %vm11756_vm1 = vcmask 1047704  }
 0xf5b   : > { %v11401_v40 = vsel %vm21302_vm10, %v11399_v63, 0.0  ;;  %vm11759_vm10 = vcmask 400384  }
 0xf66   : > { %v11377_v20 = vpop.permute.xlu0 %11376 }
 0xf67   : > { %v11403_v28 = vsel %vm21303_vm14, %v11401_v40, %v11377_v20  ;;  %vm21333_vm14 = vcmask 154624  }
 0xf68   : > { %v11405_v60 = vsel %vm11404_vm15, %v11403_v28, 0.0 }
 0xf6a   : > { %v11381_v6 = vpop.permute.xlu1 %11380 }
 0xf6b   : > { %v11406_v3 = vsel %vm9721_vm11, %v11405_v60, %v11381_v6  ;;  %vm21308_vm11 = vmmov %vm21300_vm9 }
 0xf6c   : > { %v11408_v32 = vsel %vm11407_vm2, %v11406_v3, 0.0 }
 0xf6e   : > { %v11385_v42 = vpop.permute.xlu0 %11384 }
 0xf6f   : > { %v11410_v33 = vsel %vm21304_vm4, %v11408_v32, %v11385_v42  ;;  %vm21334_vm4 = vmmov %vm21333_vm14 }
 0xf70   : > { %v11412_v51 = vsel %vm11411_vm5, %v11410_v33, 0.0 }
 0xf72   : > { %v11389_v23 = vpop.permute.xlu1 %11388 }
 0xf73   : > { %v11413_v26 = vsel %vm21305_vm13, %v11412_v51, %v11389_v23  ;;  %vm21335_vm13 = vmmov %vm21334_vm4 }
 0xf74   : > { %v11415_v25 = vsel %vm11414_vm0, %v11413_v26, 0.0 }
 0xfb6   : > { %v11393_v50 = vpop.permute.xlu0 %11392  ;;  %v11463_v35 = vpop.permute.xlu1 %11462 }
 0xfb7   : > { %v11417_v8 = vsel %vm21306_vm6, %v11415_v25, %v11393_v50  ;;  %v11418_v11 = vsel %vm9964_vm3, %v11393_v50, 0.0  ;;  %vm21311_vm3 = vcmask 891904   ;;  %vm21336_vm6 = vmmov %vm21334_vm4 }
 0xfb8   : > { %v11493_v37 = vrot.slane %v11417_v8, %v21307_v31  ;;  %v11469_v19 = vsel %vm21308_vm11, %v11418_v11, %v11463_v35  ;;  %vm21312_vm0 = vmmov %vm21311_vm3 }
 0xfb9   : > { %v11497_v62 = vrot.slane %v11469_v19, %v21307_v31  ;;  %vm21315_vm12 = vmmov %vm21312_vm0 }
 0xfba   : > { %v11502_v4 = vadd.f32 %v11493_v37, %v11473_v17  ;;  %v11505_v55 = vadd.f32 %v11493_v37, %v11478_v14  ;;  %v11508_v34 = vadd.f32 %v11493_v37, %v11483_v10  ;;  %v11511_v57 = vadd.f32 %v11493_v37, %v11488_v18  ;;  %v11465_v44 = vpop.permute.xlu0 %11464  ;;  %v19537_v29 = vpop.permute.xlu1 %12126  ;;  %vm21316_vm15 = vmmov %vm21312_vm0 }
 0xfbb   : > { %v11503_v22 = vadd.f32 %v11497_v62, %v11473_v17  ;;  %v11506_v9 = vadd.f32 %v11497_v62, %v11478_v14  ;;  %v11509_v54 = vadd.f32 %v11497_v62, %v11483_v10  ;;  %v11466_v46 = vsel %vm21309_vm7, %v11463_v35, %v11465_v44  ;;  %vm21321_vm2 = vmmov %vm21312_vm0 }
 0xfbc   : > { %v11881_v59 = vmul.f32 -1.442695, %v11502_v4  ;;  %v11884_v58 = vmul.f32 -1.442695, %v11505_v55  ;;  %v11887_v48 = vmul.f32 -1.442695, %v11508_v34  ;;  %v11512_v27 = vadd.f32 %v11497_v62, %v11488_v18  ;;  %vm21324_vm5 = vmmov %vm21312_vm0 }
 0xfbd   : > { %v11890_v5 = vmul.f32 -1.442695, %v11511_v57  ;;  %v11501_v24 = vrot.slane %v11466_v46, %v21307_v31  ;;  %v11882_v12 = vmul.f32 -1.442695, %v11503_v22  ;;  %v11885_v56 = vmul.f32 -1.442695, %v11506_v9  ;;  %vm21327_vm8 = vmmov %vm21312_vm0 }
 0xfbe   : > { %12180 = vpow2.f32 %v11881_v59  ;;  %v11888_v21 = vmul.f32 -1.442695, %v11509_v54  ;;  %v11891_v49 = vmul.f32 -1.442695, %v11512_v27  ;;  %v19541_v40 = vpop.permute.xlu1 %12136  ;;  %v12129_v50 = vunpack.i.h.bf16 %v19537_v29  ;;  %v21310_v57 = vld [vmem:[#allocation19_spill] sm:$0xff]  ;;  %vm21331_vm9 = vmmov %vm21312_vm0 }
 0xfbf   : > { %12182 = vpow2.f32 %v11884_v58  ;;  %v11504_v61 = vadd.f32 %v11501_v24, %v11473_v17  ;;  %v11507_v41 = vadd.f32 %v11501_v24, %v11478_v14  ;;  %v11510_v30 = vadd.f32 %v11501_v24, %v11483_v10  ;;  %v19535_v14 = vpop.permute.xlu0 %12131  ;;  %v21313_v59 = vld [vmem:[#allocation23_spill] sm:$0xff]  ;;  %vm21337_vm11 = vmmov %vm21334_vm4 }
 0xfc0   : > { %12184 = vpow2.f32 %v11887_v48  ;;  %v11513_v15 = vadd.f32 %v11501_v24, %v11488_v18  ;;  %v12128_v35 = vunpack.i.l.bf16 %v19537_v29  ;;  %v12134_v37 = vunpack.i.h.bf16 %v19535_v14  ;;  %vm21338_vm7 = vmmov %vm21334_vm4 }
 0xfc1   : > { %12186 = vpow2.f32 %v11890_v5  ;;  %v11883_v53 = vmul.f32 -1.442695, %v11504_v61  ;;  %v11886_v45 = vmul.f32 -1.442695, %v11507_v41  ;;  %v11889_v52 = vmul.f32 -1.442695, %v11510_v30 }
 0xfc2   : > { %12188 = vpow2.f32 %v11882_v12  ;;  %v11892_v1 = vmul.f32 -1.442695, %v11513_v15  ;;  %v19545_v26 = vpop.permute.xlu1 %12146  ;;  %v12138_v19 = vunpack.i.l.bf16 %v19541_v40  ;;  %v11655_v9 = vsel %vm21311_vm3, %v12128_v35, %v12129_v50  ;;  %v21314_v5 = vld [vmem:[#allocation12_spill] sm:$0xff]  ;;  %v21317_v41 = vld [vmem:[#allocation15_spill] sm:$0xff]  ;;  %vm21339_vm3 = vmmov %vm21334_vm4 }
 0xfc3   : > { %12190 = vpow2.f32 %v11885_v56  ;;  %v19539_v63 = vpop.permute.xlu0 %12141  ;;  %v12149_v4 = vunpack.i.h.bf16 %v19545_v26  ;;  %v12133_v30 = vunpack.i.l.bf16 %v19535_v14  ;;  %v21322_v14 = vld [vmem:[#allocation22_spill] sm:$0xff] }
 0xfc4   : > { %12192 = vpow2.f32 %v11888_v21  ;;  %v12144_v11 = vunpack.i.h.bf16 %v19539_v63  ;;  %v12143_v31 = vunpack.i.l.bf16 %v19539_v63  ;;  %v11657_v24 = vsel %vm21315_vm12, %v12134_v37, %v12138_v19 }
 0xfc5   : > { %12194 = vpow2.f32 %v11891_v49 }
 0xfc6   : > { %12196 = vpow2.f32 %v11883_v53  ;;  %v11659_v54 = vsel %vm21312_vm0, %v12143_v31, %v12144_v11  ;;  %vm21340_vm0 = vmmov %vm21339_vm3 }
 0xfc7   : > { %12198 = vpow2.f32 %v11886_v45  ;;  %v19543_v23 = vpop.permute.xlu0 %12151  ;;  %v21318_v45 = vld [vmem:[#allocation21_spill] sm:$0xff] }
 0xfc8   : > { %12200 = vpow2.f32 %v11889_v52  ;;  %v12153_v62 = vunpack.i.l.bf16 %v19543_v23 }
 0xfc9   : > { %12202 = vpow2.f32 %v11892_v1  ;;  %v12139_v1 = vunpack.i.h.bf16 %v19541_v40 }
 0xfca   : > { %v11661_v12 = vsel %vm21316_vm15, %v12149_v4, %v12153_v62 }
 0xfcb   : > { %v12181_v17 = vpop.eup %12180 }
 0xfcc   : > { %v12183_v0 = vpop.eup %12182  ;;  %v11550_v7 = vadd.f32 1.0, %v12181_v17 }
 0xfcd   : > { %v12185_v16 = vpop.eup %12184  ;;  %v11553_v13 = vadd.f32 1.0, %v12183_v0 }
 0xfce   : > { %v12187_v10 = vpop.eup %12186  ;;  %v11556_v18 = vadd.f32 1.0, %v12185_v16  ;;  %12204 = vrcp.f32 %v11550_v7  ;;  %v21320_v16 = vld [vmem:[#allocation17_spill] sm:$0xff] }
 0xfcf   : > { %v12189_v38 = vpop.eup %12188  ;;  %v11559_v47 = vadd.f32 1.0, %v12187_v10  ;;  %12206 = vrcp.f32 %v11553_v13  ;;  %v11656_v10 = vsel %vm21321_vm2, %v12129_v50, %v12133_v30 }
 0xfd0   : > { %v12191_v36 = vpop.eup %12190  ;;  %12208 = vrcp.f32 %v11556_v18  ;;  %v11551_v2 = vadd.f32 1.0, %v12189_v38 }
 0xfd1   : > { %v12193_v39 = vpop.eup %12192  ;;  %12210 = vrcp.f32 %v11559_v47  ;;  %v11554_v43 = vadd.f32 1.0, %v12191_v36 }
 0xfd2   : > { %v12195_v20 = vpop.eup %12194  ;;  %12212 = vrcp.f32 %v11551_v2  ;;  %v11557_v32 = vadd.f32 1.0, %v12193_v39  ;;  %v21323_v2 = vld [vmem:[#allocation20_spill] sm:$0xff] }
 0xfd3   : > { %v12197_v28 = vpop.eup %12196  ;;  %12214 = vrcp.f32 %v11554_v43  ;;  %v11560_v25 = vadd.f32 1.0, %v12195_v20  ;;  %v11658_v43 = vsel %vm21324_vm5, %v12138_v19, %v12139_v1 }
 0xfd4   : > { %v12199_v60 = vpop.eup %12198  ;;  %v11552_v6 = vadd.f32 1.0, %v12197_v28  ;;  %v12148_v28 = vunpack.i.l.bf16 %v19545_v26  ;;  %v21328_v26 = vld [vmem:[#allocation16_spill] sm:$0xff] }
 0xfd5   : > { %v12201_v3 = vpop.eup %12200  ;;  %v11555_v42 = vadd.f32 1.0, %v12199_v60 }
 0xfd6   : > { %v12203_v33 = vpop.eup %12202  ;;  %v11558_v51 = vadd.f32 1.0, %v12201_v3  ;;  %12216 = vrcp.f32 %v11552_v6  ;;  %v21325_v3 = vld [vmem:[#allocation14_spill] sm:$0xff]  ;;  %v11660_v31 = vsel %vm21327_vm8, %v12144_v11, %v12148_v28 }
 0xfd7   : > { %12218 = vrcp.f32 %v11555_v42  ;;  %v11561_v8 = vadd.f32 1.0, %v12203_v33 }
 0xfd8   : > { %12220 = vrcp.f32 %v11558_v51  ;;  %v12154_v51 = vunpack.i.h.bf16 %v19543_v23 }
 0xfd9   : > { %12222 = vrcp.f32 %v11557_v32 }
 0xfda   : > { %12224 = vrcp.f32 %v11560_v25  ;;  %v21326_v25 = vld [vmem:[#allocation13_spill] sm:$0xff] }
 0xfdb   : > { %v12205_v55 = vpop.eup %12204  ;;  %12226 = vrcp.f32 %v11561_v8 }
 0xfdc   : > { %v12207_v34 = vpop.eup %12206  ;;  %v11606_v44 = vmul.f32 %v12205_v55, %v21310_v57 }
 0xfdd   : > { %v12209_v22 = vpop.eup %12208  ;;  %v11609_v58 = vmul.f32 %v12207_v34, %v21313_v59  ;;  %v21329_v34 = vld [vmem:[#allocation18_spill] sm:$0xff] }
 0xfde   : > { %v12211_v48 = vpop.eup %12210  ;;  %v11675_v46 = vadd.f32 %v11655_v9, %v11606_v44  ;;  %v11612_v27 = vmul.f32 %v12209_v22, %v21314_v5  ;;  %v11662_v44 = vsel %vm21331_vm9, %v12153_v62, %v12154_v51 }
 0xfdf   : > { %v12213_v56 = vpop.eup %12212  ;;  %v11678_v61 = vadd.f32 %v11657_v24, %v11609_v58  ;;  %v11615_v21 = vmul.f32 %v12211_v48, %v21317_v41 }
 0xfe0   : > { %v11681_v49 = vadd.f32 %v11659_v54, %v11612_v27  ;;  %v11687_v15 = vmax.f32 %v11675_v46, 0.0  ;;  %v12215_v53 = vpop.eup %12214  ;;  %v11607_v52 = vmul.f32 %v12213_v56, %v21318_v45 }
 0xfe1   : > { %v11684_v17 = vadd.f32 %v11661_v12, %v11615_v21  ;;  %v11690_v29 = vmax.f32 %v11678_v61, 0.0  ;;  %v11610_v18 = vmul.f32 %v12215_v53, %v21322_v14 }
 0xfe2   : > { %11711 = vrot.lane.b32.xlu1 %v11687_v15, %s21319_s20  ;;  %v11693_v38 = vmax.f32 %v11681_v49, 0.0  ;;  %v11676_v36 = vadd.f32 %v11656_v10, %v11607_v52 }
 0xfe3   : > { %v12217_v0 = vpop.eup %12216  ;;  %11717 = vrot.lane.b32.xlu0 %v11690_v29, %s21319_s20  ;;  %v11696_v63 = vmax.f32 %v11684_v17, 0.0  ;;  %v11679_v6 = vadd.f32 %v11658_v43, %v11610_v18 }
 0xfe4   : > { %v12219_v7 = vpop.eup %12218  ;;  %v11608_v13 = vmul.f32 %v12217_v0, %v21320_v16  ;;  %v11688_v35 = vmax.f32 %v11676_v36, 0.0 }
 0xfe5   : > { %v12221_v47 = vpop.eup %12220  ;;  %v11611_v39 = vmul.f32 %v12219_v7, %v21323_v2  ;;  %v11691_v4 = vmax.f32 %v11679_v6, 0.0 }
 0xfe6   : > { %v12223_v40 = vpop.eup %12222  ;;  %v11677_v20 = vadd.f32 %v12133_v30, %v11608_v13  ;;  %11723 = vrot.lane.b32.xlu1 %v11693_v38, %s21319_s20  ;;  %v11614_v32 = vmul.f32 %v12221_v47, %v21325_v3 }
 0xfe7   : > { %11729 = vrot.lane.b32.xlu0 %v11696_v63, %s21319_s20  ;;  %v12225_v42 = vpop.eup %12224  ;;  %v11680_v33 = vadd.f32 %v12139_v1, %v11611_v39  ;;  %v11613_v50 = vmul.f32 %v12223_v40, %v21326_v25 }
 0xfe8   : > { %v11689_v60 = vmax.f32 %v11677_v20, 0.0  ;;  %v12227_v8 = vpop.eup %12226  ;;  %v11616_v37 = vmul.f32 %v12225_v42, %v21328_v26  ;;  %v11683_v19 = vadd.f32 %v12148_v28, %v11614_v32 }
 0xfe9   : > { %v11692_v55 = vmax.f32 %v11680_v33, 0.0  ;;  %v11617_v57 = vmul.f32 %v12227_v8, %v21329_v34  ;;  %v11682_v22 = vadd.f32 %v11660_v31, %v11613_v50 }
 0xfea   : > { %11715 = vrot.lane.b32.xlu1 %v11689_v60, %s21319_s20  ;;  %v11685_v11 = vadd.f32 %v11662_v44, %v11616_v37  ;;  %v11695_v9 = vmax.f32 %v11683_v19, 0.0 }
 0xfeb   : > { %11713 = vrot.lane.b32.xlu0 %v11688_v35, %s21319_s20  ;;  %v11686_v54 = vadd.f32 %v12154_v51, %v11617_v57  ;;  %v11694_v59 = vmax.f32 %v11682_v22, 0.0 }
 0xfec   : > { %v11697_v58 = vmax.f32 %v11685_v11, 0.0 }
 0xfed   : > { %v11698_v48 = vmax.f32 %v11686_v54, 0.0 }
 0xfee   : > { %11719 = vrot.lane.b32.xlu1 %v11691_v4, %s21319_s20 }
 0xfef   : > { %11721 = vrot.lane.b32.xlu0 %v11692_v55, %s21319_s20 }
 0xff2   : > { %11727 = vrot.lane.b32.xlu1 %v11695_v9, %s21319_s20 }
 0xff3   : > { %11725 = vrot.lane.b32.xlu0 %v11694_v59, %s21319_s20 }
 0xff6   : > { %11731 = vrot.lane.b32.xlu1 %v11697_v58, %s21319_s20 }
 0xff7   : > { %11733 = vrot.lane.b32.xlu0 %v11698_v48, %s21319_s20 }
0x1054   : > { %v11712_v23 = vpop.permute.xlu1 %11711 }
0x1055   : > { %v11718_v62 = vpop.permute.xlu0 %11717  ;;  %11757 = vst.msk [vmem:[%s19599_s29] sm:$0xff] %vm11756_vm1, %v11712_v23 }
0x1056   : > { %11761 = vst.msk [vmem:[%s19599_s29 + $0x18] sm:$0xff] %vm11756_vm1, %v11718_v62 }
0x1058   : > { %v11724_v46 = vpop.permute.xlu1 %11723 }
0x1059   : > { %v11730_v5 = vpop.permute.xlu0 %11729  ;;  %11764 = vst.msk [vmem:[%s19599_s29 + $0x30] sm:$0xff] %vm11756_vm1, %v11724_v46 }
0x105a   : > { %11767 = vst.msk [vmem:[%s19599_s29 + $0x48] sm:$0xff] %vm11756_vm1, %v11730_v5 }
0x105c   : > { %v11716_v27 = vpop.permute.xlu1 %11715 }
0x105d   : > { %v11714_v24 = vpop.permute.xlu0 %11713 }
0x105e   : > { %v11736_v12 = vsel %vm21333_vm14, %v11712_v23, %v11714_v24  ;;  %v11737_v56 = vsel %vm21334_vm4, %v11714_v24, %v11716_v27 }
0x105f   : > { %11758 = vst [vmem:[%s19599_s29 + $0x8] sm:$0xff] %v11736_v12  ;;  %11760 = vst.msk [vmem:[%s19599_s29 + $0x10] sm:$0xff] %vm11759_vm10, %v11737_v56 }
0x1060   : > { %v11720_v61 = vpop.permute.xlu1 %11719 }
0x1061   : > { %v11722_v41 = vpop.permute.xlu0 %11721  ;;  %v11738_v21 = vsel %vm21335_vm13, %v11718_v62, %v11720_v61 }
0x1062   : > { %v11739_v30 = vsel %vm21336_vm6, %v11720_v61, %v11722_v41  ;;  %11762 = vst [vmem:[%s19599_s29 + $0x20] sm:$0xff] %v11738_v21 }
0x1063   : > { %11763 = vst.msk [vmem:[%s19599_s29 + $0x28] sm:$0xff] %vm11759_vm10, %v11739_v30 }
0x1064   : > { %v11728_v49 = vpop.permute.xlu1 %11727 }
0x1065   : > { %v11726_v15 = vpop.permute.xlu0 %11725 }
0x1066   : > { %v11740_v53 = vsel %vm21337_vm11, %v11724_v46, %v11726_v15  ;;  %v11741_v45 = vsel %vm21338_vm7, %v11726_v15, %v11728_v49 }
0x1067   : > { %11765 = vst [vmem:[%s19599_s29 + $0x38] sm:$0xff] %v11740_v53  ;;  %11766 = vst.msk [vmem:[%s19599_s29 + $0x40] sm:$0xff] %vm11759_vm10, %v11741_v45 }
0x1068   : > { %v11732_v52 = vpop.permute.xlu1 %11731 }
0x1069   : > { %v11734_v1 = vpop.permute.xlu0 %11733  ;;  %v11742_v17 = vsel %vm21339_vm3, %v11730_v5, %v11732_v52 }
0x106a   : > { %v11743_v29 = vsel %vm21340_vm0, %v11732_v52, %v11734_v1  ;;  %11768 = vst [vmem:[%s19599_s29 + $0x50] sm:$0xff] %v11742_v17 }
0x106b   : > { %11769 = vst.msk [vmem:[%s19599_s29 + $0x58] sm:$0xff] %vm11759_vm10, %v11743_v29 }
0x106c PF: > { %s21341_s10 = sld [smem:[#allocation3_spill]] }
0x1072   : > { %s24_s29 = sadd.s32 1, %s21341_s10  }
0x1073   : > { %p21_p4 = scmp.ge.s32.totalorder %s24_s29, 4  }
0x1075   :  { %23 = sbr.rel (!%p21_p4) target bundleno = 16 (0x10), region = 106 }

</bundles_post_ra>
